<compile_context>
chip_gen: v7x
topology: tpu7x:2x2x1
jax: 0.10.0
libtpu: 0.0.40
codegen_flags: <defaults>
</compile_context>

<pallas_src>
import functools

import numpy as np
import jax
import jax.numpy as jnp
from jax.experimental import pallas as pl
from jax.experimental.pallas import tpu as pltpu

# ---------------- fixed configuration --------------------------------------
# The reference module hard-codes `result.view(-1, 512, 2, 2)` in decode(), so
# hidden_dims[-1] must be 512.  We use hidden_dims=[32, 512] with 8x8 inputs
# (encoder 8 -> 4 -> 2 spatial, flatten = 512*2*2 = 2048).
BATCH = 2
IN_CH = 3
H = W = 8
HIDDEN_DIMS = (32, 512)
LATENT = 16

K = 3                        # module hard-codes kernel_size=3 everywhere
CP = 128                     # lane padding for every <=128-channel layer
LP = 128                     # padded latent width
C2 = HIDDEN_DIMS[1]          # 512
FLAT = C2 * 4                # 2048
BN_EPS = 1e-5
SLOPE = 0.01                 # nn.LeakyReLU() default negative_slope
TAPS = [(kh, kw) for kh in range(K) for kw in range(K)]


# ---------------- static tap-selection matrices (built once) ----------------

def _sel_stack_conv(b, hin, win, hout, wout, stride, pad):
    """Forward conv: S[t*R_out + r_out, r_in] = 1 iff input row feeds tap t."""
    r_in, r_out = b * hin * win, b * hout * wout
    s = np.zeros((9 * r_out, r_in), np.float32)
    for t, (kh, kw) in enumerate(TAPS):
        for n in range(b):
            for oh in range(hout):
                for ow in range(wout):
                    ih = oh * stride - pad + kh
                    iw = ow * stride - pad + kw
                    if 0 <= ih < hin and 0 <= iw < win:
                        s[t * r_out + n * hout * wout + oh * wout + ow,
                          n * hin * win + ih * win + iw] = 1.0
    return jnp.asarray(s, jnp.bfloat16)


def _sel_wide_convT(b, hin, win, hout, wout, stride, pad):
    """ConvTranspose: S[r_out, t*R_in + r_in] = 1 iff input row feeds tap t."""
    r_in, r_out = b * hin * win, b * hout * wout
    s = np.zeros((r_out, 9 * r_in), np.float32)
    for t, (kh, kw) in enumerate(TAPS):
        for n in range(b):
            for ih in range(hin):
                for iw in range(win):
                    oh = ih * stride - pad + kh
                    ow = iw * stride - pad + kw
                    if 0 <= oh < hout and 0 <= ow < wout:
                        s[n * hout * wout + oh * wout + ow,
                          t * r_in + n * hin * win + ih * win + iw] = 1.0
    return jnp.asarray(s, jnp.bfloat16)


# ---------------- weight packing (layout + pad + bf16) ----------------------

def _w_tall_conv(w_oihw, cin_pad, cout_pad):
    """Conv2d [Cout,Cin,kh,kw] -> [9*cin_pad, cout_pad] (tap-major rows)."""
    cout, cin, _, _ = w_oihw.shape
    wt = jnp.zeros((9 * cin_pad, cout_pad), jnp.float32)
    for t, (kh, kw) in enumerate(TAPS):
        wt = wt.at[t * cin_pad:t * cin_pad + cin, :cout].set(w_oihw[:, :, kh, kw].T)
    return wt.astype(jnp.bfloat16)


def _w_wide_convT(w_iohw, cin_pad, cout_pad):
    """ConvTranspose2d [Cin,Cout,kh,kw] -> [cin_pad, 9*cout_pad] (tap-major cols)."""
    cin, cout, _, _ = w_iohw.shape
    ww = jnp.zeros((cin_pad, 9 * cout_pad), jnp.float32)
    for t, (kh, kw) in enumerate(TAPS):
        ww = ww.at[:cin, t * cout_pad:t * cout_pad + cout].set(w_iohw[:, :, kh, kw])
    return ww.astype(jnp.bfloat16)


def _pack_bn(bn, cpad):
    c = bn["gamma"].shape[0]
    g = jnp.pad(bn["gamma"], (0, cpad - c), constant_values=1.0)
    bt = jnp.pad(bn["beta"], (0, cpad - c))            # beta pad = 0 keeps pad chans 0
    return jnp.stack([g, bt], axis=0).astype(jnp.float32)   # [2, cpad]


def _pack_latent(fc_mu, fc_var, dec_in):
    """fc_mu||fc_var and decoder_input with the NCHW flatten folded into them."""
    m = np.arange(FLAT)
    # my feature index m = s*512 + c  <->  torch flatten index perm[m] = c*4 + s
    perm = (m % C2) * 4 + (m // C2)
    wmv = jnp.zeros((FLAT, 2 * LP), jnp.float32)
    wmv = wmv.at[:, :LATENT].set(fc_mu["w"].T[perm, :])
    wmv = wmv.at[:, LP:LP + LATENT].set(fc_var["w"].T[perm, :])
    bmv = jnp.zeros((1, 2 * LP), jnp.float32)
    bmv = bmv.at[0, :LATENT].set(fc_mu["b"]).at[0, LP:LP + LATENT].set(fc_var["b"])
    wdec = jnp.zeros((LP, FLAT), jnp.float32)
    wdec = wdec.at[:LATENT, :].set(dec_in["w"][perm, :].T)
    bdec = dec_in["b"][perm].reshape(1, FLAT).astype(jnp.float32)
    return wmv.astype(jnp.bfloat16), bmv, wdec.astype(jnp.bfloat16), bdec


# ---------------- parameter init (PyTorch layouts) ---------------------------

def init_params(key):
    ks = jax.random.split(key, 8)

    def conv(k, cin, cout):
        kw, kb = jax.random.split(k)
        return {"w": jax.random.normal(kw, (cout, cin, K, K), jnp.float32) * 0.05,
                "b": jax.random.normal(kb, (cout,), jnp.float32) * 0.01}

    def convT(k, cin, cout):
        kw, kb = jax.random.split(k)
        return {"w": jax.random.normal(kw, (cin, cout, K, K), jnp.float32) * 0.05,
                "b": jax.random.normal(kb, (cout,), jnp.float32) * 0.01}

    def dense(k, fin, fout):
        kw, kb = jax.random.split(k)
        return {"w": jax.random.normal(kw, (fout, fin), jnp.float32) * 0.05,
                "b": jax.random.normal(kb, (fout,), jnp.float32) * 0.01}

    def bn(c):
        i = jnp.arange(c, dtype=jnp.float32)
        return {"gamma": 1.0 + 0.1 * jnp.cos(i), "beta": 0.05 * jnp.sin(i)}

    hd = HIDDEN_DIMS
    return {
        "encoder": [{"conv": conv(ks[0], IN_CH, hd[0]), "bn": bn(hd[0])},
                    {"conv": conv(ks[1], hd[0], hd[1]), "bn": bn(hd[1])}],
        "fc_mu": dense(ks[2], FLAT, LATENT),
        "fc_var": dense(ks[3], FLAT, LATENT),
        "decoder_input": dense(ks[4], LATENT, FLAT),
        "decoder": [{"convT": convT(ks[5], hd[1], hd[0]), "bn": bn(hd[0])}],
        "final": {"convT": convT(ks[6], hd[0], hd[0]), "bn": bn(hd[0]),
                  "conv": conv(ks[7], hd[0], IN_CH)},
    }


def pack_params(params):
    hd = HIDDEN_DIMS
    p = {}
    # static conv/convT geometry as 0/1 selection matrices (bf16, exact)
    p["sel1"] = _sel_stack_conv(BATCH, 8, 8, 4, 4, 2, 1)   # enc conv1
    p["sel2"] = _sel_stack_conv(BATCH, 4, 4, 2, 2, 2, 1)   # enc conv2
    p["sel3"] = _sel_wide_convT(BATCH, 2, 2, 4, 4, 2, 1)   # decoder convT
    p["sel4"] = _sel_wide_convT(BATCH, 4, 4, 8, 8, 2, 1)   # final convT
    p["sel5"] = _sel_stack_conv(BATCH, 8, 8, 8, 8, 1, 1)   # final 3x3 conv
    e0, e1 = params["encoder"]
    p["w1"] = _w_tall_conv(e0["conv"]["w"], CP, CP)
    p["bn1"] = _pack_bn(e0["bn"], CP)
    p["w2"] = _w_tall_conv(e1["conv"]["w"], CP, hd[1])
    p["bn2"] = _pack_bn(e1["bn"], hd[1])
    p["wmv"], p["bmv"], p["wdec"], p["bdec"] = _pack_latent(
        params["fc_mu"], params["fc_var"], params["decoder_input"])
    d0 = params["decoder"][0]
    p["w3"] = _w_wide_convT(d0["convT"]["w"], hd[1], CP)
    p["bn3"] = _pack_bn(d0["bn"], CP)
    fl = params["final"]
    p["w4"] = _w_wide_convT(fl["convT"]["w"], CP, CP)
    p["bn4"] = _pack_bn(fl["bn"], CP)
    p["w5"] = _w_tall_conv(fl["conv"]["w"], CP, CP)
    p["b5"] = jnp.pad(fl["conv"]["b"], (0, CP - IN_CH)).reshape(1, CP).astype(jnp.float32)
    return p


# ---------------- the single fused Pallas kernel -----------------------------

def _vae_kernel(
        # small VMEM inputs (auto-copied)
        x_ref, eps_ref,
        sel1_ref, w1_ref, bn1_ref,
        sel2_ref, bn2_ref,
        bmv_ref, bdec_ref,
        sel3_ref, bn3_ref,
        sel4_ref, bn4_ref,
        sel5_ref, b5_ref,
        # big weights kept in HBM (pl.ANY), manually prefetched
        w2_hbm, wmv_hbm, wdec_hbm, w3_hbm, w4_hbm, w5_hbm,
        # outputs
        recon_ref, mu_ref, lv_ref,
        # scratch
        w2_v, wmv_v, wdec_v, w3_v, w4_v, w5_v, sems,
        *, batch):

    # ---- kick off all big-weight DMAs up front so they overlap compute -----
    copies = []
    for i, (src, dst) in enumerate([(w2_hbm, w2_v), (wmv_hbm, wmv_v),
                                    (wdec_hbm, wdec_v), (w3_hbm, w3_v),
                                    (w4_hbm, w4_v), (w5_hbm, w5_v)]):
        cp = pltpu.make_async_copy(src, dst, sems.at[i])
        cp.start()
        copies.append(cp)

    def bn_lrelu(acc, bn_ref_):
        bn = bn_ref_[...]
        mean = jnp.mean(acc, axis=0, keepdims=True)
        var = jnp.mean((acc - mean) ** 2, axis=0, keepdims=True)       # biased (torch)
        y = (acc - mean) * jax.lax.rsqrt(var + BN_EPS) * bn[0:1, :] + bn[1:2, :]
        return jnp.where(y >= 0.0, y, SLOPE * y)

    def conv_gather_first(x_bf, sel_bf, w_bf, r_out):
        # in-kernel im2col: gather the 9 taps with a 0/1 matmul, then one big dot
        stacked = jnp.dot(sel_bf, x_bf, preferred_element_type=jnp.float32)
        col = jnp.concatenate(
            [stacked[t * r_out:(t + 1) * r_out, :] for t in range(9)], axis=1)
        return jnp.dot(col.astype(jnp.bfloat16), w_bf,
                       preferred_element_type=jnp.float32)

    def conv_weight_first(x_bf, sel_bf, w_bf, cout_p):
        # sub-pixel ConvTranspose: weights applied at the LOW resolution, then a
        # 0/1 scatter-add matmul places/accumulates taps into the output grid
        y = jnp.dot(x_bf, w_bf, preferred_element_type=jnp.float32)
        y_stack = jnp.concatenate(
            [y[:, t * cout_p:(t + 1) * cout_p] for t in range(9)], axis=0)
        return jnp.dot(sel_bf.astype(jnp.float32), y_stack,
                       preferred_element_type=jnp.float32)

    # ---- encoder 1: conv(3->32, s2, p1) + BN + LeakyReLU   (8x8 -> 4x4) ----
    h = conv_gather_first(x_ref[...], sel1_ref[...], w1_ref[...], 32)   # [32,128]
    h = bn_lrelu(h, bn1_ref)

    # ---- encoder 2: conv(32->512, s2, p1) + BN + LeakyReLU (4x4 -> 2x2) ----
    copies[0].wait()
    h = conv_gather_first(h.astype(jnp.bfloat16), sel2_ref[...], w2_v[...], 8)
    h = bn_lrelu(h, bn2_ref)                                            # [8, 512]

    # ---- flatten (NCHW order folded into packed fc weights) + fc_mu/fc_var -
    feat = jnp.concatenate(
        [jnp.concatenate([h[n * 4 + s:n * 4 + s + 1, :] for s in range(4)], axis=1)
         for n in range(batch)], axis=0)                                # [B, 2048]
    copies[1].wait()
    mulv = jnp.dot(feat.astype(jnp.bfloat16), wmv_v[...],
                   preferred_element_type=jnp.float32) + bmv_ref[...]   # [B, 2*LP]
    mu = mulv[:, :LP]
    log_var = mulv[:, LP:2 * LP]
    mu_ref[...] = mu
    lv_ref[...] = log_var

    # ---- reparameterize + decoder_input ------------------------------------
    z = eps_ref[...] * jnp.exp(0.5 * log_var) + mu                      # [B, LP]
    copies[2].wait()
    d = jnp.dot(z.astype(jnp.bfloat16), wdec_v[...],
                preferred_element_type=jnp.float32) + bdec_ref[...]     # [B, 2048]
    h = jnp.concatenate(
        [d[n:n + 1, s * C2:(s + 1) * C2] for n in range(batch) for s in range(4)],
        axis=0)                                                         # [8, 512]

    # ---- decoder: ConvT(512->32, s2, p1, op1) + BN + LReLU (2x2 -> 4x4) ----
    copies[3].wait()
    h = conv_weight_first(h.astype(jnp.bfloat16), sel3_ref[...], w3_v[...], CP)
    h = bn_lrelu(h, bn3_ref)                                            # [32, 128]

    # ---- final ConvT(32->32, s2, p1, op1) + BN + LReLU     (4x4 -> 8x8) ----
    copies[4].wait()
    h = conv_weight_first(h.astype(jnp.bfloat16), sel4_ref[...], w4_v[...], CP)
    h = bn_lrelu(h, bn4_ref)                                            # [128, 128]

    # ---- final conv(32->3, s1, p1) + bias + tanh ----------------------------
    copies[5].wait()
    h = conv_gather_first(h.astype(jnp.bfloat16), sel5_ref[...], w5_v[...], 128)
    recon_ref[...] = jnp.tanh(h + b5_ref[...])                          # [128, 128]


def _full_spec(arr):
    nd = arr.ndim
    return pl.BlockSpec(arr.shape, lambda i, n=nd: (0,) * n)


# ---------------- forward wrapper --------------------------------------------

def vae_forward(packed, x_nchw, eps):
    assert x_nchw.shape == (BATCH, IN_CH, H, W)
    # single NCHW -> (row = n*H*W + h*W + w, lane = channel) layout change
    x_rows = jnp.transpose(x_nchw, (0, 2, 3, 1)).reshape(BATCH * H * W, IN_CH)
    x_rows = jnp.pad(x_rows, ((0, 0), (0, CP - IN_CH))).astype(jnp.bfloat16)
    eps_p = jnp.pad(eps.astype(jnp.float32), ((0, 0), (0, LP - LATENT)))

    vmem_inputs = [x_rows, eps_p,
                   packed["sel1"], packed["w1"], packed["bn1"],
                   packed["sel2"], packed["bn2"],
                   packed["bmv"], packed["bdec"],
                   packed["sel3"], packed["bn3"],
                   packed["sel4"], packed["bn4"],
                   packed["sel5"], packed["b5"]]
    hbm_inputs = [packed["w2"], packed["wmv"], packed["wdec"],
                  packed["w3"], packed["w4"], packed["w5"]]

    in_specs = ([_full_spec(a) for a in vmem_inputs]
                + [pl.BlockSpec(memory_space=pl.ANY) for _ in hbm_inputs])
    out_shape = (jax.ShapeDtypeStruct((BATCH * H * W, CP), jnp.float32),
                 jax.ShapeDtypeStruct((BATCH, LP), jnp.float32),
                 jax.ShapeDtypeStruct((BATCH, LP), jnp.float32))
    out_specs = (pl.BlockSpec((BATCH * H * W, CP), lambda i: (0, 0)),
                 pl.BlockSpec((BATCH, LP), lambda i: (0, 0)),
                 pl.BlockSpec((BATCH, LP), lambda i: (0, 0)))
    scratch = [pltpu.VMEM(packed["w2"].shape, jnp.bfloat16),
               pltpu.VMEM(packed["wmv"].shape, jnp.bfloat16),
               pltpu.VMEM(packed["wdec"].shape, jnp.bfloat16),
               pltpu.VMEM(packed["w3"].shape, jnp.bfloat16),
               pltpu.VMEM(packed["w4"].shape, jnp.bfloat16),
               pltpu.VMEM(packed["w5"].shape, jnp.bfloat16),
               pltpu.SemaphoreType.DMA((6,))]

    recon_rows, mu_p, lv_p = pl.pallas_call(
        functools.partial(_vae_kernel, batch=BATCH),
        grid=(1,),
        in_specs=in_specs,
        out_specs=out_specs,
        out_shape=out_shape,
        scratch_shapes=scratch,
        compiler_params=pltpu.CompilerParams(
            dimension_semantics=("arbitrary",),
            vmem_limit_bytes=32 * 1024 * 1024),
    )(*(vmem_inputs + hbm_inputs))

    recon = recon_rows[:, :IN_CH].reshape(BATCH, H, W, IN_CH).transpose(0, 3, 1, 2)
    return recon, x_nchw, mu_p[:, :LATENT], lv_p[:, :LATENT]


# ---------------- pure-JAX f32 reference (correctness oracle) ----------------

def _lrelu(x):
    return jnp.where(x >= 0, x, SLOPE * x)


def _bn_ref(x, bn):
    mean = jnp.mean(x, axis=(0, 2, 3), keepdims=True)
    var = jnp.mean((x - mean) ** 2, axis=(0, 2, 3), keepdims=True)
    return ((x - mean) * jax.lax.rsqrt(var + BN_EPS)
            * bn["gamma"].reshape(1, -1, 1, 1) + bn["beta"].reshape(1, -1, 1, 1))


def _conv_ref(x, p, stride, pad):
    y = jax.lax.conv_general_dilated(
        x, p["w"], (stride, stride), ((pad, pad), (pad, pad)),
        dimension_numbers=("NCHW", "OIHW", "NCHW"),
        precision=jax.lax.Precision.HIGHEST)
    return y + p["b"].reshape(1, -1, 1, 1)


def _convT_ref(x, p):     # ConvTranspose2d(k3, s2, p1, op1)
    w = jnp.transpose(jnp.flip(p["w"], axis=(2, 3)), (1, 0, 2, 3))
    y = jax.lax.conv_general_dilated(
        x, w, (1, 1), ((1, 2), (1, 2)), lhs_dilation=(2, 2),
        dimension_numbers=("NCHW", "OIHW", "NCHW"),
        precision=jax.lax.Precision.HIGHEST)
    return y + p["b"].reshape(1, -1, 1, 1)


def vae_reference(params, x, eps):
    hi = jax.lax.Precision.HIGHEST
    h = x
    for blk in params["encoder"]:
        h = _lrelu(_bn_ref(_conv_ref(h, blk["conv"], 2, 1), blk["bn"]))
    feat = h.reshape(h.shape[0], -1)
    mu = jnp.dot(feat, params["fc_mu"]["w"].T, precision=hi) + params["fc_mu"]["b"]
    log_var = jnp.dot(feat, params["fc_var"]["w"].T, precision=hi) + params["fc_var"]["b"]
    z = eps * jnp.exp(0.5 * log_var) + mu
    d = (jnp.dot(z, params["decoder_input"]["w"].T, precision=hi)
         + params["decoder_input"]["b"])
    h = d.reshape(-1, C2, 2, 2)
    for blk in params["decoder"]:
        h = _lrelu(_bn_ref(_convT_ref(h, blk["convT"]), blk["bn"]))
    fl = params["final"]
    h = _lrelu(_bn_ref(_convT_ref(h, fl["convT"]), fl["bn"]))
    h = jnp.tanh(_conv_ref(h, fl["conv"], 1, 1))
    return h, x, mu, log_var


# ---------------- main --------------------------------------------------------

if __name__ == "__main__":
    key = jax.random.PRNGKey(0)
    kx, keps, kparams = jax.random.split(key, 3)

    x = jax.random.normal(kx, (BATCH, IN_CH, H, W), jnp.float32)
    eps = jax.random.normal(keps, (BATCH, LATENT), jnp.float32)
    params = init_params(kparams)
    packed = pack_params(params)

    fwd = jax.jit(vae_forward)
    recon, inp, mu, log_var = fwd(packed, x, eps)
    jax.block_until_ready((recon, inp, mu, log_var))

    assert recon.shape == (BATCH, IN_CH, H, W)
    assert inp.shape == x.shape
    assert mu.shape == (BATCH, LATENT) and log_var.shape == (BATCH, LATENT)
    assert bool(jnp.all(jnp.isfinite(recon)))
    assert bool(jnp.all(jnp.isfinite(mu))) and bool(jnp.all(jnp.isfinite(log_var)))

    # pure-JAX f32 reference; kernel uses bf16 weights/activations -> loose tol
    r_ref, _, mu_ref, lv_ref = vae_reference(params, x, eps)
    assert bool(jnp.allclose(recon, r_ref, rtol=0.1, atol=0.15)), \
        float(jnp.max(jnp.abs(recon - r_ref)))
    assert bool(jnp.allclose(mu, mu_ref, rtol=0.1, atol=0.15)), \
        float(jnp.max(jnp.abs(mu - mu_ref)))
    assert bool(jnp.allclose(log_var, lv_ref, rtol=0.1, atol=0.15)), \
        float(jnp.max(jnp.abs(log_var - lv_ref)))

    print("KERNEL_OK")
</pallas_src>

<mosaic_0001>
module attributes {stable_mosaic.version = 11 : i64} {
  func.func @_vae_kernel(%arg0: i32, %arg1: memref<128x128xbf16, #tpu.memory_space<vmem>>, %arg2: memref<2x128xf32, #tpu.memory_space<vmem>>, %arg3: memref<288x128xbf16, #tpu.memory_space<vmem>>, %arg4: memref<1152x128xbf16, #tpu.memory_space<vmem>>, %arg5: memref<2x128xf32, #tpu.memory_space<vmem>>, %arg6: memref<72x32xbf16, #tpu.memory_space<vmem>>, %arg7: memref<2x512xf32, #tpu.memory_space<vmem>>, %arg8: memref<1x256xf32, #tpu.memory_space<vmem>>, %arg9: memref<1x2048xf32, #tpu.memory_space<vmem>>, %arg10: memref<32x72xbf16, #tpu.memory_space<vmem>>, %arg11: memref<2x128xf32, #tpu.memory_space<vmem>>, %arg12: memref<128x288xbf16, #tpu.memory_space<vmem>>, %arg13: memref<2x128xf32, #tpu.memory_space<vmem>>, %arg14: memref<1152x128xbf16, #tpu.memory_space<vmem>>, %arg15: memref<1x128xf32, #tpu.memory_space<vmem>>, %arg16: memref<1152x512xbf16, #tpu.memory_space<any>>, %arg17: memref<2048x256xbf16, #tpu.memory_space<any>>, %arg18: memref<128x2048xbf16, #tpu.memory_space<any>>, %arg19: memref<512x1152xbf16, #tpu.memory_space<any>>, %arg20: memref<128x1152xbf16, #tpu.memory_space<any>>, %arg21: memref<1152x128xbf16, #tpu.memory_space<any>>, %arg22: memref<128x128xf32, #tpu.memory_space<vmem>>, %arg23: memref<2x128xf32, #tpu.memory_space<vmem>>, %arg24: memref<2x128xf32, #tpu.memory_space<vmem>>, %arg25: memref<1152x512xbf16, #tpu.memory_space<vmem>>, %arg26: memref<2048x256xbf16, #tpu.memory_space<vmem>>, %arg27: memref<128x2048xbf16, #tpu.memory_space<vmem>>, %arg28: memref<512x1152xbf16, #tpu.memory_space<vmem>>, %arg29: memref<128x1152xbf16, #tpu.memory_space<vmem>>, %arg30: memref<1152x128xbf16, #tpu.memory_space<vmem>>, %arg31: memref<6x!tpu.dma_semaphore, #tpu.memory_space<semaphore_mem>>) attributes {dimension_semantics = [#tpu.dimension_semantics<arbitrary>], iteration_bounds = array<i64: 1>, scalar_prefetch = 0 : i64, scratch_operands = 7 : i64, tpu.core_type = #tpu.core_type<tc>, window_params = [{pipeline_mode = #tpu.pipeline_mode<synchronous>, transform_indices = @transform_0, window_bounds = array<i64: 128, 128>}, {pipeline_mode = #tpu.pipeline_mode<synchronous>, transform_indices = @transform_1, window_bounds = array<i64: 2, 128>}, {pipeline_mode = #tpu.pipeline_mode<synchronous>, transform_indices = @transform_2, window_bounds = array<i64: 288, 128>}, {pipeline_mode = #tpu.pipeline_mode<synchronous>, transform_indices = @transform_3, window_bounds = array<i64: 1152, 128>}, {pipeline_mode = #tpu.pipeline_mode<synchronous>, transform_indices = @transform_4, window_bounds = array<i64: 2, 128>}, {pipeline_mode = #tpu.pipeline_mode<synchronous>, transform_indices = @transform_5, window_bounds = array<i64: 72, 32>}, {pipeline_mode = #tpu.pipeline_mode<synchronous>, transform_indices = @transform_6, window_bounds = array<i64: 2, 512>}, {pipeline_mode = #tpu.pipeline_mode<synchronous>, transform_indices = @transform_7, window_bounds = array<i64: 1, 256>}, {pipeline_mode = #tpu.pipeline_mode<synchronous>, transform_indices = @transform_8, window_bounds = array<i64: 1, 2048>}, {pipeline_mode = #tpu.pipeline_mode<synchronous>, transform_indices = @transform_9, window_bounds = array<i64: 32, 72>}, {pipeline_mode = #tpu.pipeline_mode<synchronous>, transform_indices = @transform_10, window_bounds = array<i64: 2, 128>}, {pipeline_mode = #tpu.pipeline_mode<synchronous>, transform_indices = @transform_11, window_bounds = array<i64: 128, 288>}, {pipeline_mode = #tpu.pipeline_mode<synchronous>, transform_indices = @transform_12, window_bounds = array<i64: 2, 128>}, {pipeline_mode = #tpu.pipeline_mode<synchronous>, transform_indices = @transform_13, window_bounds = array<i64: 1152, 128>}, {pipeline_mode = #tpu.pipeline_mode<synchronous>, transform_indices = @transform_14, window_bounds = array<i64: 1, 128>}, {}, {}, {}, {}, {}, {}, {pipeline_mode = #tpu.pipeline_mode<synchronous>, transform_indices = @transform_21, window_bounds = array<i64: 128, 128>}, {pipeline_mode = #tpu.pipeline_mode<synchronous>, transform_indices = @transform_22, window_bounds = array<i64: 2, 128>}, {pipeline_mode = #tpu.pipeline_mode<synchronous>, transform_indices = @transform_23, window_bounds = array<i64: 2, 128>}]} {
    %c0_i32 = arith.constant 0 : i32
    %0 = tpu.memref_slice %arg31[%c0_i32] : memref<6x!tpu.dma_semaphore, #tpu.memory_space<semaphore_mem>> -> memref<1x!tpu.dma_semaphore, #tpu.memory_space<semaphore_mem>>
    %1 = tpu.memref_squeeze %0 : memref<1x!tpu.dma_semaphore, #tpu.memory_space<semaphore_mem>> -> memref<!tpu.dma_semaphore, #tpu.memory_space<semaphore_mem>>
    tpu.enqueue_dma source(%arg16 : memref<1152x512xbf16, #tpu.memory_space<any>>) target(%arg25 : memref<1152x512xbf16, #tpu.memory_space<vmem>>) target_semaphore(%1 : memref<!tpu.dma_semaphore, #tpu.memory_space<semaphore_mem>>)
    %c1_i32 = arith.constant 1 : i32
    %2 = tpu.memref_slice %arg31[%c1_i32] : memref<6x!tpu.dma_semaphore, #tpu.memory_space<semaphore_mem>> -> memref<1x!tpu.dma_semaphore, #tpu.memory_space<semaphore_mem>>
    %3 = tpu.memref_squeeze %2 : memref<1x!tpu.dma_semaphore, #tpu.memory_space<semaphore_mem>> -> memref<!tpu.dma_semaphore, #tpu.memory_space<semaphore_mem>>
    tpu.enqueue_dma source(%arg17 : memref<2048x256xbf16, #tpu.memory_space<any>>) target(%arg26 : memref<2048x256xbf16, #tpu.memory_space<vmem>>) target_semaphore(%3 : memref<!tpu.dma_semaphore, #tpu.memory_space<semaphore_mem>>)
    %c2_i32 = arith.constant 2 : i32
    %4 = tpu.memref_slice %arg31[%c2_i32] : memref<6x!tpu.dma_semaphore, #tpu.memory_space<semaphore_mem>> -> memref<1x!tpu.dma_semaphore, #tpu.memory_space<semaphore_mem>>
    %5 = tpu.memref_squeeze %4 : memref<1x!tpu.dma_semaphore, #tpu.memory_space<semaphore_mem>> -> memref<!tpu.dma_semaphore, #tpu.memory_space<semaphore_mem>>
    tpu.enqueue_dma source(%arg18 : memref<128x2048xbf16, #tpu.memory_space<any>>) target(%arg27 : memref<128x2048xbf16, #tpu.memory_space<vmem>>) target_semaphore(%5 : memref<!tpu.dma_semaphore, #tpu.memory_space<semaphore_mem>>)
    %c3_i32 = arith.constant 3 : i32
    %6 = tpu.memref_slice %arg31[%c3_i32] : memref<6x!tpu.dma_semaphore, #tpu.memory_space<semaphore_mem>> -> memref<1x!tpu.dma_semaphore, #tpu.memory_space<semaphore_mem>>
    %7 = tpu.memref_squeeze %6 : memref<1x!tpu.dma_semaphore, #tpu.memory_space<semaphore_mem>> -> memref<!tpu.dma_semaphore, #tpu.memory_space<semaphore_mem>>
    tpu.enqueue_dma source(%arg19 : memref<512x1152xbf16, #tpu.memory_space<any>>) target(%arg28 : memref<512x1152xbf16, #tpu.memory_space<vmem>>) target_semaphore(%7 : memref<!tpu.dma_semaphore, #tpu.memory_space<semaphore_mem>>)
    %c4_i32 = arith.constant 4 : i32
    %8 = tpu.memref_slice %arg31[%c4_i32] : memref<6x!tpu.dma_semaphore, #tpu.memory_space<semaphore_mem>> -> memref<1x!tpu.dma_semaphore, #tpu.memory_space<semaphore_mem>>
    %9 = tpu.memref_squeeze %8 : memref<1x!tpu.dma_semaphore, #tpu.memory_space<semaphore_mem>> -> memref<!tpu.dma_semaphore, #tpu.memory_space<semaphore_mem>>
    tpu.enqueue_dma source(%arg20 : memref<128x1152xbf16, #tpu.memory_space<any>>) target(%arg29 : memref<128x1152xbf16, #tpu.memory_space<vmem>>) target_semaphore(%9 : memref<!tpu.dma_semaphore, #tpu.memory_space<semaphore_mem>>)
    %c5_i32 = arith.constant 5 : i32
    %10 = tpu.memref_slice %arg31[%c5_i32] : memref<6x!tpu.dma_semaphore, #tpu.memory_space<semaphore_mem>> -> memref<1x!tpu.dma_semaphore, #tpu.memory_space<semaphore_mem>>
    %11 = tpu.memref_squeeze %10 : memref<1x!tpu.dma_semaphore, #tpu.memory_space<semaphore_mem>> -> memref<!tpu.dma_semaphore, #tpu.memory_space<semaphore_mem>>
    tpu.enqueue_dma source(%arg21 : memref<1152x128xbf16, #tpu.memory_space<any>>) target(%arg30 : memref<1152x128xbf16, #tpu.memory_space<vmem>>) target_semaphore(%11 : memref<!tpu.dma_semaphore, #tpu.memory_space<semaphore_mem>>)
    %c0 = arith.constant 0 : index
    %c0_0 = arith.constant 0 : index
    %12 = vector.load %arg1[%c0, %c0_0] : memref<128x128xbf16, #tpu.memory_space<vmem>>, vector<128x128xbf16>
    %c0_1 = arith.constant 0 : index
    %c0_2 = arith.constant 0 : index
    %13 = vector.load %arg3[%c0_1, %c0_2] : memref<288x128xbf16, #tpu.memory_space<vmem>>, vector<288x128xbf16>
    %c0_3 = arith.constant 0 : index
    %c0_4 = arith.constant 0 : index
    %14 = vector.load %arg4[%c0_3, %c0_4] : memref<1152x128xbf16, #tpu.memory_space<vmem>>, vector<1152x128xbf16>
    %cst = arith.constant dense<0.000000e+00> : vector<288x128xf32>
    %15 = tpu.matmul %13, %12, %cst {dimension_numbers = #tpu.dot_dimension_numbers<[1], [0], [0], [1], [0, 0, 1, 1], [], []>} : vector<288x128xbf16>, vector<128x128xbf16>, vector<288x128xf32> -> vector<288x128xf32>
    %16 = vector.extract_strided_slice %15 {offsets = [0, 0], sizes = [32, 128], strides = [1, 1]} : vector<288x128xf32> to vector<32x128xf32>
    %17 = vector.extract_strided_slice %15 {offsets = [32, 0], sizes = [32, 128], strides = [1, 1]} : vector<288x128xf32> to vector<32x128xf32>
    %18 = vector.extract_strided_slice %15 {offsets = [64, 0], sizes = [32, 128], strides = [1, 1]} : vector<288x128xf32> to vector<32x128xf32>
    %19 = vector.extract_strided_slice %15 {offsets = [96, 0], sizes = [32, 128], strides = [1, 1]} : vector<288x128xf32> to vector<32x128xf32>
    %20 = vector.extract_strided_slice %15 {offsets = [128, 0], sizes = [32, 128], strides = [1, 1]} : vector<288x128xf32> to vector<32x128xf32>
    %21 = vector.extract_strided_slice %15 {offsets = [160, 0], sizes = [32, 128], strides = [1, 1]} : vector<288x128xf32> to vector<32x128xf32>
    %22 = vector.extract_strided_slice %15 {offsets = [192, 0], sizes = [32, 128], strides = [1, 1]} : vector<288x128xf32> to vector<32x128xf32>
    %23 = vector.extract_strided_slice %15 {offsets = [224, 0], sizes = [32, 128], strides = [1, 1]} : vector<288x128xf32> to vector<32x128xf32>
    %24 = vector.extract_strided_slice %15 {offsets = [256, 0], sizes = [32, 128], strides = [1, 1]} : vector<288x128xf32> to vector<32x128xf32>
    %25 = tpu.concatenate %16, %17, %18, %19, %20, %21, %22, %23, %24 in 1 : vector<32x128xf32>, vector<32x128xf32>, vector<32x128xf32>, vector<32x128xf32>, vector<32x128xf32>, vector<32x128xf32>, vector<32x128xf32>, vector<32x128xf32>, vector<32x128xf32> -> vector<32x1152xf32>
    %26 = arith.truncf %25 : vector<32x1152xf32> to vector<32x1152xbf16>
    %cst_5 = arith.constant dense<0.000000e+00> : vector<32x128xf32>
    %27 = tpu.matmul %26, %14, %cst_5 {dimension_numbers = #tpu.dot_dimension_numbers<[1], [0], [0], [1], [0, 0, 1, 1], [], []>} : vector<32x1152xbf16>, vector<1152x128xbf16>, vector<32x128xf32> -> vector<32x128xf32>
    %c0_6 = arith.constant 0 : index
    %c0_7 = arith.constant 0 : index
    %28 = vector.load %arg5[%c0_6, %c0_7] : memref<2x128xf32, #tpu.memory_space<vmem>>, vector<2x128xf32>
    %cst_8 = arith.constant dense<0.000000e+00> : vector<128xf32>
    %29 = vector.multi_reduction <add>, %27, %cst_8 [0] : vector<32x128xf32> to vector<128xf32>
    %30 = vector.shape_cast %29 : vector<128xf32> to vector<1x128xf32>
    %cst_9 = arith.constant 3.200000e+01 : f32
    %31 = vector.broadcast %cst_9 : f32 to vector<1x128xf32>
    %32 = arith.divf %30, %31 : vector<1x128xf32>
    %33 = vector.broadcast %32 : vector<1x128xf32> to vector<32x128xf32>
    %34 = arith.subf %27, %33 : vector<32x128xf32>
    %35 = arith.mulf %34, %34 : vector<32x128xf32>
    %cst_10 = arith.constant dense<0.000000e+00> : vector<128xf32>
    %36 = vector.multi_reduction <add>, %35, %cst_10 [0] : vector<32x128xf32> to vector<128xf32>
    %37 = vector.shape_cast %36 : vector<128xf32> to vector<1x128xf32>
    %cst_11 = arith.constant 3.200000e+01 : f32
    %38 = vector.broadcast %cst_11 : f32 to vector<1x128xf32>
    %39 = arith.divf %37, %38 : vector<1x128xf32>
    %40 = vector.broadcast %32 : vector<1x128xf32> to vector<32x128xf32>
    %41 = arith.subf %27, %40 : vector<32x128xf32>
    %cst_12 = arith.constant 9.99999974E-6 : f32
    %42 = vector.broadcast %cst_12 : f32 to vector<1x128xf32>
    %43 = arith.addf %39, %42 : vector<1x128xf32>
    %44 = math.rsqrt %43 : vector<1x128xf32>
    %45 = vector.broadcast %44 : vector<1x128xf32> to vector<32x128xf32>
    %46 = arith.mulf %41, %45 : vector<32x128xf32>
    %47 = vector.extract_strided_slice %28 {offsets = [0, 0], sizes = [1, 128], strides = [1, 1]} : vector<2x128xf32> to vector<1x128xf32>
    %48 = vector.broadcast %47 : vector<1x128xf32> to vector<32x128xf32>
    %49 = arith.mulf %46, %48 : vector<32x128xf32>
    %50 = vector.extract_strided_slice %28 {offsets = [1, 0], sizes = [1, 128], strides = [1, 1]} : vector<2x128xf32> to vector<1x128xf32>
    %51 = vector.broadcast %50 : vector<1x128xf32> to vector<32x128xf32>
    %52 = arith.addf %49, %51 : vector<32x128xf32>
    %cst_13 = arith.constant 0.000000e+00 : f32
    %53 = vector.broadcast %cst_13 : f32 to vector<32x128xf32>
    %54 = arith.cmpf oge, %52, %53 : vector<32x128xf32>
    %cst_14 = arith.constant 0.00999999977 : f32
    %55 = vector.broadcast %cst_14 : f32 to vector<32x128xf32>
    %56 = arith.mulf %55, %52 : vector<32x128xf32>
    %57 = arith.select %54, %52, %56 : vector<32x128xi1>, vector<32x128xf32>
    %c0_i32_15 = arith.constant 0 : i32
    %58 = tpu.memref_slice %arg31[%c0_i32_15] : memref<6x!tpu.dma_semaphore, #tpu.memory_space<semaphore_mem>> -> memref<1x!tpu.dma_semaphore, #tpu.memory_space<semaphore_mem>>
    %59 = tpu.memref_squeeze %58 : memref<1x!tpu.dma_semaphore, #tpu.memory_space<semaphore_mem>> -> memref<!tpu.dma_semaphore, #tpu.memory_space<semaphore_mem>>
    tpu.wait_dma2 semaphore(%59 : memref<!tpu.dma_semaphore, #tpu.memory_space<semaphore_mem>>) src(%arg16 : memref<1152x512xbf16, #tpu.memory_space<any>>) dst(%arg25 : memref<1152x512xbf16, #tpu.memory_space<vmem>>)
    %60 = arith.truncf %57 : vector<32x128xf32> to vector<32x128xbf16>
    %c0_16 = arith.constant 0 : index
    %c0_17 = arith.constant 0 : index
    %61 = vector.load %arg6[%c0_16, %c0_17] : memref<72x32xbf16, #tpu.memory_space<vmem>>, vector<72x32xbf16>
    %c0_18 = arith.constant 0 : index
    %c0_19 = arith.constant 0 : index
    %62 = vector.load %arg25[%c0_18, %c0_19] : memref<1152x512xbf16, #tpu.memory_space<vmem>>, vector<1152x512xbf16>
    %cst_20 = arith.constant dense<0.000000e+00> : vector<72x128xf32>
    %63 = tpu.matmul %61, %60, %cst_20 {dimension_numbers = #tpu.dot_dimension_numbers<[1], [0], [0], [1], [0, 0, 1, 1], [], []>} : vector<72x32xbf16>, vector<32x128xbf16>, vector<72x128xf32> -> vector<72x128xf32>
    %64 = vector.extract_strided_slice %63 {offsets = [0, 0], sizes = [8, 128], strides = [1, 1]} : vector<72x128xf32> to vector<8x128xf32>
    %65 = vector.extract_strided_slice %63 {offsets = [8, 0], sizes = [8, 128], strides = [1, 1]} : vector<72x128xf32> to vector<8x128xf32>
    %66 = vector.extract_strided_slice %63 {offsets = [16, 0], sizes = [8, 128], strides = [1, 1]} : vector<72x128xf32> to vector<8x128xf32>
    %67 = vector.extract_strided_slice %63 {offsets = [24, 0], sizes = [8, 128], strides = [1, 1]} : vector<72x128xf32> to vector<8x128xf32>
    %68 = vector.extract_strided_slice %63 {offsets = [32, 0], sizes = [8, 128], strides = [1, 1]} : vector<72x128xf32> to vector<8x128xf32>
    %69 = vector.extract_strided_slice %63 {offsets = [40, 0], sizes = [8, 128], strides = [1, 1]} : vector<72x128xf32> to vector<8x128xf32>
    %70 = vector.extract_strided_slice %63 {offsets = [48, 0], sizes = [8, 128], strides = [1, 1]} : vector<72x128xf32> to vector<8x128xf32>
    %71 = vector.extract_strided_slice %63 {offsets = [56, 0], sizes = [8, 128], strides = [1, 1]} : vector<72x128xf32> to vector<8x128xf32>
    %72 = vector.extract_strided_slice %63 {offsets = [64, 0], sizes = [8, 128], strides = [1, 1]} : vector<72x128xf32> to vector<8x128xf32>
    %73 = tpu.concatenate %64, %65, %66, %67, %68, %69, %70, %71, %72 in 1 : vector<8x128xf32>, vector<8x128xf32>, vector<8x128xf32>, vector<8x128xf32>, vector<8x128xf32>, vector<8x128xf32>, vector<8x128xf32>, vector<8x128xf32>, vector<8x128xf32> -> vector<8x1152xf32>
    %74 = arith.truncf %73 : vector<8x1152xf32> to vector<8x1152xbf16>
    %cst_21 = arith.constant dense<0.000000e+00> : vector<8x512xf32>
    %75 = tpu.matmul %74, %62, %cst_21 {dimension_numbers = #tpu.dot_dimension_numbers<[1], [0], [0], [1], [0, 0, 1, 1], [], []>} : vector<8x1152xbf16>, vector<1152x512xbf16>, vector<8x512xf32> -> vector<8x512xf32>
    %c0_22 = arith.constant 0 : index
    %c0_23 = arith.constant 0 : index
    %76 = vector.load %arg7[%c0_22, %c0_23] : memref<2x512xf32, #tpu.memory_space<vmem>>, vector<2x512xf32>
    %cst_24 = arith.constant dense<0.000000e+00> : vector<512xf32>
    %77 = vector.multi_reduction <add>, %75, %cst_24 [0] : vector<8x512xf32> to vector<512xf32>
    %78 = vector.shape_cast %77 : vector<512xf32> to vector<1x512xf32>
    %cst_25 = arith.constant 8.000000e+00 : f32
    %79 = vector.broadcast %cst_25 : f32 to vector<1x512xf32>
    %80 = arith.divf %78, %79 : vector<1x512xf32>
    %81 = vector.broadcast %80 : vector<1x512xf32> to vector<8x512xf32>
    %82 = arith.subf %75, %81 : vector<8x512xf32>
    %83 = arith.mulf %82, %82 : vector<8x512xf32>
    %cst_26 = arith.constant dense<0.000000e+00> : vector<512xf32>
    %84 = vector.multi_reduction <add>, %83, %cst_26 [0] : vector<8x512xf32> to vector<512xf32>
    %85 = vector.shape_cast %84 : vector<512xf32> to vector<1x512xf32>
    %cst_27 = arith.constant 8.000000e+00 : f32
    %86 = vector.broadcast %cst_27 : f32 to vector<1x512xf32>
    %87 = arith.divf %85, %86 : vector<1x512xf32>
    %88 = vector.broadcast %80 : vector<1x512xf32> to vector<8x512xf32>
    %89 = arith.subf %75, %88 : vector<8x512xf32>
    %cst_28 = arith.constant 9.99999974E-6 : f32
    %90 = vector.broadcast %cst_28 : f32 to vector<1x512xf32>
    %91 = arith.addf %87, %90 : vector<1x512xf32>
    %92 = math.rsqrt %91 : vector<1x512xf32>
    %93 = vector.broadcast %92 : vector<1x512xf32> to vector<8x512xf32>
    %94 = arith.mulf %89, %93 : vector<8x512xf32>
    %95 = vector.extract_strided_slice %76 {offsets = [0, 0], sizes = [1, 512], strides = [1, 1]} : vector<2x512xf32> to vector<1x512xf32>
    %96 = vector.broadcast %95 : vector<1x512xf32> to vector<8x512xf32>
    %97 = arith.mulf %94, %96 : vector<8x512xf32>
    %98 = vector.extract_strided_slice %76 {offsets = [1, 0], sizes = [1, 512], strides = [1, 1]} : vector<2x512xf32> to vector<1x512xf32>
    %99 = vector.broadcast %98 : vector<1x512xf32> to vector<8x512xf32>
    %100 = arith.addf %97, %99 : vector<8x512xf32>
    %cst_29 = arith.constant 0.000000e+00 : f32
    %101 = vector.broadcast %cst_29 : f32 to vector<8x512xf32>
    %102 = arith.cmpf oge, %100, %101 : vector<8x512xf32>
    %cst_30 = arith.constant 0.00999999977 : f32
    %103 = vector.broadcast %cst_30 : f32 to vector<8x512xf32>
    %104 = arith.mulf %103, %100 : vector<8x512xf32>
    %105 = arith.select %102, %100, %104 : vector<8x512xi1>, vector<8x512xf32>
    %106 = vector.extract_strided_slice %105 {offsets = [0, 0], sizes = [1, 512], strides = [1, 1]} : vector<8x512xf32> to vector<1x512xf32>
    %107 = vector.extract_strided_slice %105 {offsets = [1, 0], sizes = [1, 512], strides = [1, 1]} : vector<8x512xf32> to vector<1x512xf32>
    %108 = vector.extract_strided_slice %105 {offsets = [2, 0], sizes = [1, 512], strides = [1, 1]} : vector<8x512xf32> to vector<1x512xf32>
    %109 = vector.extract_strided_slice %105 {offsets = [3, 0], sizes = [1, 512], strides = [1, 1]} : vector<8x512xf32> to vector<1x512xf32>
    %110 = tpu.concatenate %106, %107, %108, %109 in 1 : vector<1x512xf32>, vector<1x512xf32>, vector<1x512xf32>, vector<1x512xf32> -> vector<1x2048xf32>
    %111 = vector.extract_strided_slice %105 {offsets = [4, 0], sizes = [1, 512], strides = [1, 1]} : vector<8x512xf32> to vector<1x512xf32>
    %112 = vector.extract_strided_slice %105 {offsets = [5, 0], sizes = [1, 512], strides = [1, 1]} : vector<8x512xf32> to vector<1x512xf32>
    %113 = vector.extract_strided_slice %105 {offsets = [6, 0], sizes = [1, 512], strides = [1, 1]} : vector<8x512xf32> to vector<1x512xf32>
    %114 = vector.extract_strided_slice %105 {offsets = [7, 0], sizes = [1, 512], strides = [1, 1]} : vector<8x512xf32> to vector<1x512xf32>
    %115 = tpu.concatenate %111, %112, %113, %114 in 1 : vector<1x512xf32>, vector<1x512xf32>, vector<1x512xf32>, vector<1x512xf32> -> vector<1x2048xf32>
    %116 = tpu.concatenate %110, %115 in 0 : vector<1x2048xf32>, vector<1x2048xf32> -> vector<2x2048xf32>
    %c1_i32_31 = arith.constant 1 : i32
    %117 = tpu.memref_slice %arg31[%c1_i32_31] : memref<6x!tpu.dma_semaphore, #tpu.memory_space<semaphore_mem>> -> memref<1x!tpu.dma_semaphore, #tpu.memory_space<semaphore_mem>>
    %118 = tpu.memref_squeeze %117 : memref<1x!tpu.dma_semaphore, #tpu.memory_space<semaphore_mem>> -> memref<!tpu.dma_semaphore, #tpu.memory_space<semaphore_mem>>
    tpu.wait_dma2 semaphore(%118 : memref<!tpu.dma_semaphore, #tpu.memory_space<semaphore_mem>>) src(%arg17 : memref<2048x256xbf16, #tpu.memory_space<any>>) dst(%arg26 : memref<2048x256xbf16, #tpu.memory_space<vmem>>)
    %119 = arith.truncf %116 : vector<2x2048xf32> to vector<2x2048xbf16>
    %c0_32 = arith.constant 0 : index
    %c0_33 = arith.constant 0 : index
    %120 = vector.load %arg26[%c0_32, %c0_33] : memref<2048x256xbf16, #tpu.memory_space<vmem>>, vector<2048x256xbf16>
    %cst_34 = arith.constant dense<0.000000e+00> : vector<2x256xf32>
    %121 = tpu.matmul %119, %120, %cst_34 {dimension_numbers = #tpu.dot_dimension_numbers<[1], [0], [0], [1], [0, 0, 1, 1], [], []>} : vector<2x2048xbf16>, vector<2048x256xbf16>, vector<2x256xf32> -> vector<2x256xf32>
    %c0_35 = arith.constant 0 : index
    %c0_36 = arith.constant 0 : index
    %122 = vector.load %arg8[%c0_35, %c0_36] : memref<1x256xf32, #tpu.memory_space<vmem>>, vector<1x256xf32>
    %123 = vector.broadcast %122 : vector<1x256xf32> to vector<2x256xf32>
    %124 = arith.addf %121, %123 : vector<2x256xf32>
    %125 = vector.extract_strided_slice %124 {offsets = [0, 0], sizes = [2, 128], strides = [1, 1]} : vector<2x256xf32> to vector<2x128xf32>
    %126 = vector.extract_strided_slice %124 {offsets = [0, 128], sizes = [2, 128], strides = [1, 1]} : vector<2x256xf32> to vector<2x128xf32>
    %c0_37 = arith.constant 0 : index
    %c0_38 = arith.constant 0 : index
    %127 = vector.load %arg23[%c0_37, %c0_38] : memref<2x128xf32, #tpu.memory_space<vmem>>, vector<2x128xf32>
    tpu.vector_store %arg23[%c0_37, %c0_38], %125 {strides = array<i32>} : memref<2x128xf32, #tpu.memory_space<vmem>>, vector<2x128xf32>,
    %c0_39 = arith.constant 0 : index
    %c0_40 = arith.constant 0 : index
    %128 = vector.load %arg24[%c0_39, %c0_40] : memref<2x128xf32, #tpu.memory_space<vmem>>, vector<2x128xf32>
    tpu.vector_store %arg24[%c0_39, %c0_40], %126 {strides = array<i32>} : memref<2x128xf32, #tpu.memory_space<vmem>>, vector<2x128xf32>,
    %c0_41 = arith.constant 0 : index
    %c0_42 = arith.constant 0 : index
    %129 = vector.load %arg2[%c0_41, %c0_42] : memref<2x128xf32, #tpu.memory_space<vmem>>, vector<2x128xf32>
    %cst_43 = arith.constant 5.000000e-01 : f32
    %130 = vector.broadcast %cst_43 : f32 to vector<2x128xf32>
    %131 = arith.mulf %130, %126 : vector<2x128xf32>
    %132 = math.exp %131 : vector<2x128xf32>
    %133 = arith.mulf %129, %132 : vector<2x128xf32>
    %134 = arith.addf %133, %125 : vector<2x128xf32>
    %c2_i32_44 = arith.constant 2 : i32
    %135 = tpu.memref_slice %arg31[%c2_i32_44] : memref<6x!tpu.dma_semaphore, #tpu.memory_space<semaphore_mem>> -> memref<1x!tpu.dma_semaphore, #tpu.memory_space<semaphore_mem>>
    %136 = tpu.memref_squeeze %135 : memref<1x!tpu.dma_semaphore, #tpu.memory_space<semaphore_mem>> -> memref<!tpu.dma_semaphore, #tpu.memory_space<semaphore_mem>>
    tpu.wait_dma2 semaphore(%136 : memref<!tpu.dma_semaphore, #tpu.memory_space<semaphore_mem>>) src(%arg18 : memref<128x2048xbf16, #tpu.memory_space<any>>) dst(%arg27 : memref<128x2048xbf16, #tpu.memory_space<vmem>>)
    %137 = arith.truncf %134 : vector<2x128xf32> to vector<2x128xbf16>
    %c0_45 = arith.constant 0 : index
    %c0_46 = arith.constant 0 : index
    %138 = vector.load %arg27[%c0_45, %c0_46] : memref<128x2048xbf16, #tpu.memory_space<vmem>>, vector<128x2048xbf16>
    %cst_47 = arith.constant dense<0.000000e+00> : vector<2x2048xf32>
    %139 = tpu.matmul %137, %138, %cst_47 {dimension_numbers = #tpu.dot_dimension_numbers<[1], [0], [0], [1], [0, 0, 1, 1], [], []>} : vector<2x128xbf16>, vector<128x2048xbf16>, vector<2x2048xf32> -> vector<2x2048xf32>
    %c0_48 = arith.constant 0 : index
    %c0_49 = arith.constant 0 : index
    %140 = vector.load %arg9[%c0_48, %c0_49] : memref<1x2048xf32, #tpu.memory_space<vmem>>, vector<1x2048xf32>
    %141 = vector.broadcast %140 : vector<1x2048xf32> to vector<2x2048xf32>
    %142 = arith.addf %139, %141 : vector<2x2048xf32>
    %143 = vector.extract_strided_slice %142 {offsets = [0, 0], sizes = [1, 512], strides = [1, 1]} : vector<2x2048xf32> to vector<1x512xf32>
    %144 = vector.extract_strided_slice %142 {offsets = [0, 512], sizes = [1, 512], strides = [1, 1]} : vector<2x2048xf32> to vector<1x512xf32>
    %145 = vector.extract_strided_slice %142 {offsets = [0, 1024], sizes = [1, 512], strides = [1, 1]} : vector<2x2048xf32> to vector<1x512xf32>
    %146 = vector.extract_strided_slice %142 {offsets = [0, 1536], sizes = [1, 512], strides = [1, 1]} : vector<2x2048xf32> to vector<1x512xf32>
    %147 = vector.extract_strided_slice %142 {offsets = [1, 0], sizes = [1, 512], strides = [1, 1]} : vector<2x2048xf32> to vector<1x512xf32>
    %148 = vector.extract_strided_slice %142 {offsets = [1, 512], sizes = [1, 512], strides = [1, 1]} : vector<2x2048xf32> to vector<1x512xf32>
    %149 = vector.extract_strided_slice %142 {offsets = [1, 1024], sizes = [1, 512], strides = [1, 1]} : vector<2x2048xf32> to vector<1x512xf32>
    %150 = vector.extract_strided_slice %142 {offsets = [1, 1536], sizes = [1, 512], strides = [1, 1]} : vector<2x2048xf32> to vector<1x512xf32>
    %151 = tpu.concatenate %143, %144, %145, %146, %147, %148, %149, %150 in 0 : vector<1x512xf32>, vector<1x512xf32>, vector<1x512xf32>, vector<1x512xf32>, vector<1x512xf32>, vector<1x512xf32>, vector<1x512xf32>, vector<1x512xf32> -> vector<8x512xf32>
    %c3_i32_50 = arith.constant 3 : i32
    %152 = tpu.memref_slice %arg31[%c3_i32_50] : memref<6x!tpu.dma_semaphore, #tpu.memory_space<semaphore_mem>> -> memref<1x!tpu.dma_semaphore, #tpu.memory_space<semaphore_mem>>
    %153 = tpu.memref_squeeze %152 : memref<1x!tpu.dma_semaphore, #tpu.memory_space<semaphore_mem>> -> memref<!tpu.dma_semaphore, #tpu.memory_space<semaphore_mem>>
    tpu.wait_dma2 semaphore(%153 : memref<!tpu.dma_semaphore, #tpu.memory_space<semaphore_mem>>) src(%arg19 : memref<512x1152xbf16, #tpu.memory_space<any>>) dst(%arg28 : memref<512x1152xbf16, #tpu.memory_space<vmem>>)
    %154 = arith.truncf %151 : vector<8x512xf32> to vector<8x512xbf16>
    %c0_51 = arith.constant 0 : index
    %c0_52 = arith.constant 0 : index
    %155 = vector.load %arg10[%c0_51, %c0_52] : memref<32x72xbf16, #tpu.memory_space<vmem>>, vector<32x72xbf16>
    %c0_53 = arith.constant 0 : index
    %c0_54 = arith.constant 0 : index
    %156 = vector.load %arg28[%c0_53, %c0_54] : memref<512x1152xbf16, #tpu.memory_space<vmem>>, vector<512x1152xbf16>
    %cst_55 = arith.constant dense<0.000000e+00> : vector<8x1152xf32>
    %157 = tpu.matmul %154, %156, %cst_55 {dimension_numbers = #tpu.dot_dimension_numbers<[1], [0], [0], [1], [0, 0, 1, 1], [], []>} : vector<8x512xbf16>, vector<512x1152xbf16>, vector<8x1152xf32> -> vector<8x1152xf32>
    %158 = vector.extract_strided_slice %157 {offsets = [0, 0], sizes = [8, 128], strides = [1, 1]} : vector<8x1152xf32> to vector<8x128xf32>
    %159 = vector.extract_strided_slice %157 {offsets = [0, 128], sizes = [8, 128], strides = [1, 1]} : vector<8x1152xf32> to vector<8x128xf32>
    %160 = vector.extract_strided_slice %157 {offsets = [0, 256], sizes = [8, 128], strides = [1, 1]} : vector<8x1152xf32> to vector<8x128xf32>
    %161 = vector.extract_strided_slice %157 {offsets = [0, 384], sizes = [8, 128], strides = [1, 1]} : vector<8x1152xf32> to vector<8x128xf32>
    %162 = vector.extract_strided_slice %157 {offsets = [0, 512], sizes = [8, 128], strides = [1, 1]} : vector<8x1152xf32> to vector<8x128xf32>
    %163 = vector.extract_strided_slice %157 {offsets = [0, 640], sizes = [8, 128], strides = [1, 1]} : vector<8x1152xf32> to vector<8x128xf32>
    %164 = vector.extract_strided_slice %157 {offsets = [0, 768], sizes = [8, 128], strides = [1, 1]} : vector<8x1152xf32> to vector<8x128xf32>
    %165 = vector.extract_strided_slice %157 {offsets = [0, 896], sizes = [8, 128], strides = [1, 1]} : vector<8x1152xf32> to vector<8x128xf32>
    %166 = vector.extract_strided_slice %157 {offsets = [0, 1024], sizes = [8, 128], strides = [1, 1]} : vector<8x1152xf32> to vector<8x128xf32>
    %167 = tpu.concatenate %158, %159, %160, %161, %162, %163, %164, %165, %166 in 0 : vector<8x128xf32>, vector<8x128xf32>, vector<8x128xf32>, vector<8x128xf32>, vector<8x128xf32>, vector<8x128xf32>, vector<8x128xf32>, vector<8x128xf32>, vector<8x128xf32> -> vector<72x128xf32>
    %168 = arith.extf %155 : vector<32x72xbf16> to vector<32x72xf32>
    %cst_56 = arith.constant dense<0.000000e+00> : vector<32x128xf32>
    %169 = tpu.matmul %168, %167, %cst_56 {dimension_numbers = #tpu.dot_dimension_numbers<[1], [0], [0], [1], [0, 0, 1, 1], [], []>} : vector<32x72xf32>, vector<72x128xf32>, vector<32x128xf32> -> vector<32x128xf32>
    %c0_57 = arith.constant 0 : index
    %c0_58 = arith.constant 0 : index
    %170 = vector.load %arg11[%c0_57, %c0_58] : memref<2x128xf32, #tpu.memory_space<vmem>>, vector<2x128xf32>
    %cst_59 = arith.constant dense<0.000000e+00> : vector<128xf32>
    %171 = vector.multi_reduction <add>, %169, %cst_59 [0] : vector<32x128xf32> to vector<128xf32>
    %172 = vector.shape_cast %171 : vector<128xf32> to vector<1x128xf32>
    %cst_60 = arith.constant 3.200000e+01 : f32
    %173 = vector.broadcast %cst_60 : f32 to vector<1x128xf32>
    %174 = arith.divf %172, %173 : vector<1x128xf32>
    %175 = vector.broadcast %174 : vector<1x128xf32> to vector<32x128xf32>
    %176 = arith.subf %169, %175 : vector<32x128xf32>
    %177 = arith.mulf %176, %176 : vector<32x128xf32>
    %cst_61 = arith.constant dense<0.000000e+00> : vector<128xf32>
    %178 = vector.multi_reduction <add>, %177, %cst_61 [0] : vector<32x128xf32> to vector<128xf32>
    %179 = vector.shape_cast %178 : vector<128xf32> to vector<1x128xf32>
    %cst_62 = arith.constant 3.200000e+01 : f32
    %180 = vector.broadcast %cst_62 : f32 to vector<1x128xf32>
    %181 = arith.divf %179, %180 : vector<1x128xf32>
    %182 = vector.broadcast %174 : vector<1x128xf32> to vector<32x128xf32>
    %183 = arith.subf %169, %182 : vector<32x128xf32>
    %cst_63 = arith.constant 9.99999974E-6 : f32
    %184 = vector.broadcast %cst_63 : f32 to vector<1x128xf32>
    %185 = arith.addf %181, %184 : vector<1x128xf32>
    %186 = math.rsqrt %185 : vector<1x128xf32>
    %187 = vector.broadcast %186 : vector<1x128xf32> to vector<32x128xf32>
    %188 = arith.mulf %183, %187 : vector<32x128xf32>
    %189 = vector.extract_strided_slice %170 {offsets = [0, 0], sizes = [1, 128], strides = [1, 1]} : vector<2x128xf32> to vector<1x128xf32>
    %190 = vector.broadcast %189 : vector<1x128xf32> to vector<32x128xf32>
    %191 = arith.mulf %188, %190 : vector<32x128xf32>
    %192 = vector.extract_strided_slice %170 {offsets = [1, 0], sizes = [1, 128], strides = [1, 1]} : vector<2x128xf32> to vector<1x128xf32>
    %193 = vector.broadcast %192 : vector<1x128xf32> to vector<32x128xf32>
    %194 = arith.addf %191, %193 : vector<32x128xf32>
    %cst_64 = arith.constant 0.000000e+00 : f32
    %195 = vector.broadcast %cst_64 : f32 to vector<32x128xf32>
    %196 = arith.cmpf oge, %194, %195 : vector<32x128xf32>
    %cst_65 = arith.constant 0.00999999977 : f32
    %197 = vector.broadcast %cst_65 : f32 to vector<32x128xf32>
    %198 = arith.mulf %197, %194 : vector<32x128xf32>
    %199 = arith.select %196, %194, %198 : vector<32x128xi1>, vector<32x128xf32>
    %c4_i32_66 = arith.constant 4 : i32
    %200 = tpu.memref_slice %arg31[%c4_i32_66] : memref<6x!tpu.dma_semaphore, #tpu.memory_space<semaphore_mem>> -> memref<1x!tpu.dma_semaphore, #tpu.memory_space<semaphore_mem>>
    %201 = tpu.memref_squeeze %200 : memref<1x!tpu.dma_semaphore, #tpu.memory_space<semaphore_mem>> -> memref<!tpu.dma_semaphore, #tpu.memory_space<semaphore_mem>>
    tpu.wait_dma2 semaphore(%201 : memref<!tpu.dma_semaphore, #tpu.memory_space<semaphore_mem>>) src(%arg20 : memref<128x1152xbf16, #tpu.memory_space<any>>) dst(%arg29 : memref<128x1152xbf16, #tpu.memory_space<vmem>>)
    %202 = arith.truncf %199 : vector<32x128xf32> to vector<32x128xbf16>
    %c0_67 = arith.constant 0 : index
    %c0_68 = arith.constant 0 : index
    %203 = vector.load %arg12[%c0_67, %c0_68] : memref<128x288xbf16, #tpu.memory_space<vmem>>, vector<128x288xbf16>
    %c0_69 = arith.constant 0 : index
    %c0_70 = arith.constant 0 : index
    %204 = vector.load %arg29[%c0_69, %c0_70] : memref<128x1152xbf16, #tpu.memory_space<vmem>>, vector<128x1152xbf16>
    %cst_71 = arith.constant dense<0.000000e+00> : vector<32x1152xf32>
    %205 = tpu.matmul %202, %204, %cst_71 {dimension_numbers = #tpu.dot_dimension_numbers<[1], [0], [0], [1], [0, 0, 1, 1], [], []>} : vector<32x128xbf16>, vector<128x1152xbf16>, vector<32x1152xf32> -> vector<32x1152xf32>
    %206 = vector.extract_strided_slice %205 {offsets = [0, 0], sizes = [32, 128], strides = [1, 1]} : vector<32x1152xf32> to vector<32x128xf32>
    %207 = vector.extract_strided_slice %205 {offsets = [0, 128], sizes = [32, 128], strides = [1, 1]} : vector<32x1152xf32> to vector<32x128xf32>
    %208 = vector.extract_strided_slice %205 {offsets = [0, 256], sizes = [32, 128], strides = [1, 1]} : vector<32x1152xf32> to vector<32x128xf32>
    %209 = vector.extract_strided_slice %205 {offsets = [0, 384], sizes = [32, 128], strides = [1, 1]} : vector<32x1152xf32> to vector<32x128xf32>
    %210 = vector.extract_strided_slice %205 {offsets = [0, 512], sizes = [32, 128], strides = [1, 1]} : vector<32x1152xf32> to vector<32x128xf32>
    %211 = vector.extract_strided_slice %205 {offsets = [0, 640], sizes = [32, 128], strides = [1, 1]} : vector<32x1152xf32> to vector<32x128xf32>
    %212 = vector.extract_strided_slice %205 {offsets = [0, 768], sizes = [32, 128], strides = [1, 1]} : vector<32x1152xf32> to vector<32x128xf32>
    %213 = vector.extract_strided_slice %205 {offsets = [0, 896], sizes = [32, 128], strides = [1, 1]} : vector<32x1152xf32> to vector<32x128xf32>
    %214 = vector.extract_strided_slice %205 {offsets = [0, 1024], sizes = [32, 128], strides = [1, 1]} : vector<32x1152xf32> to vector<32x128xf32>
    %215 = tpu.concatenate %206, %207, %208, %209, %210, %211, %212, %213, %214 in 0 : vector<32x128xf32>, vector<32x128xf32>, vector<32x128xf32>, vector<32x128xf32>, vector<32x128xf32>, vector<32x128xf32>, vector<32x128xf32>, vector<32x128xf32>, vector<32x128xf32> -> vector<288x128xf32>
    %216 = arith.extf %203 : vector<128x288xbf16> to vector<128x288xf32>
    %cst_72 = arith.constant dense<0.000000e+00> : vector<128x128xf32>
    %217 = tpu.matmul %216, %215, %cst_72 {dimension_numbers = #tpu.dot_dimension_numbers<[1], [0], [0], [1], [0, 0, 1, 1], [], []>} : vector<128x288xf32>, vector<288x128xf32>, vector<128x128xf32> -> vector<128x128xf32>
    %c0_73 = arith.constant 0 : index
    %c0_74 = arith.constant 0 : index
    %218 = vector.load %arg13[%c0_73, %c0_74] : memref<2x128xf32, #tpu.memory_space<vmem>>, vector<2x128xf32>
    %cst_75 = arith.constant dense<0.000000e+00> : vector<128xf32>
    %219 = vector.multi_reduction <add>, %217, %cst_75 [0] : vector<128x128xf32> to vector<128xf32>
    %220 = vector.shape_cast %219 : vector<128xf32> to vector<1x128xf32>
    %cst_76 = arith.constant 1.280000e+02 : f32
    %221 = vector.broadcast %cst_76 : f32 to vector<1x128xf32>
    %222 = arith.divf %220, %221 : vector<1x128xf32>
    %223 = vector.broadcast %222 : vector<1x128xf32> to vector<128x128xf32>
    %224 = arith.subf %217, %223 : vector<128x128xf32>
    %225 = arith.mulf %224, %224 : vector<128x128xf32>
    %cst_77 = arith.constant dense<0.000000e+00> : vector<128xf32>
    %226 = vector.multi_reduction <add>, %225, %cst_77 [0] : vector<128x128xf32> to vector<128xf32>
    %227 = vector.shape_cast %226 : vector<128xf32> to vector<1x128xf32>
    %cst_78 = arith.constant 1.280000e+02 : f32
    %228 = vector.broadcast %cst_78 : f32 to vector<1x128xf32>
    %229 = arith.divf %227, %228 : vector<1x128xf32>
    %230 = vector.broadcast %222 : vector<1x128xf32> to vector<128x128xf32>
    %231 = arith.subf %217, %230 : vector<128x128xf32>
    %cst_79 = arith.constant 9.99999974E-6 : f32
    %232 = vector.broadcast %cst_79 : f32 to vector<1x128xf32>
    %233 = arith.addf %229, %232 : vector<1x128xf32>
    %234 = math.rsqrt %233 : vector<1x128xf32>
    %235 = vector.broadcast %234 : vector<1x128xf32> to vector<128x128xf32>
    %236 = arith.mulf %231, %235 : vector<128x128xf32>
    %237 = vector.extract_strided_slice %218 {offsets = [0, 0], sizes = [1, 128], strides = [1, 1]} : vector<2x128xf32> to vector<1x128xf32>
    %238 = vector.broadcast %237 : vector<1x128xf32> to vector<128x128xf32>
    %239 = arith.mulf %236, %238 : vector<128x128xf32>
    %240 = vector.extract_strided_slice %218 {offsets = [1, 0], sizes = [1, 128], strides = [1, 1]} : vector<2x128xf32> to vector<1x128xf32>
    %241 = vector.broadcast %240 : vector<1x128xf32> to vector<128x128xf32>
    %242 = arith.addf %239, %241 : vector<128x128xf32>
    %cst_80 = arith.constant 0.000000e+00 : f32
    %243 = vector.broadcast %cst_80 : f32 to vector<128x128xf32>
    %244 = arith.cmpf oge, %242, %243 : vector<128x128xf32>
    %cst_81 = arith.constant 0.00999999977 : f32
    %245 = vector.broadcast %cst_81 : f32 to vector<128x128xf32>
    %246 = arith.mulf %245, %242 : vector<128x128xf32>
    %247 = arith.select %244, %242, %246 : vector<128x128xi1>, vector<128x128xf32>
    %c5_i32_82 = arith.constant 5 : i32
    %248 = tpu.memref_slice %arg31[%c5_i32_82] : memref<6x!tpu.dma_semaphore, #tpu.memory_space<semaphore_mem>> -> memref<1x!tpu.dma_semaphore, #tpu.memory_space<semaphore_mem>>
    %249 = tpu.memref_squeeze %248 : memref<1x!tpu.dma_semaphore, #tpu.memory_space<semaphore_mem>> -> memref<!tpu.dma_semaphore, #tpu.memory_space<semaphore_mem>>
    tpu.wait_dma2 semaphore(%249 : memref<!tpu.dma_semaphore, #tpu.memory_space<semaphore_mem>>) src(%arg21 : memref<1152x128xbf16, #tpu.memory_space<any>>) dst(%arg30 : memref<1152x128xbf16, #tpu.memory_space<vmem>>)
    %250 = arith.truncf %247 : vector<128x128xf32> to vector<128x128xbf16>
    %c0_83 = arith.constant 0 : index
    %c0_84 = arith.constant 0 : index
    %251 = vector.load %arg14[%c0_83, %c0_84] : memref<1152x128xbf16, #tpu.memory_space<vmem>>, vector<1152x128xbf16>
    %c0_85 = arith.constant 0 : index
    %c0_86 = arith.constant 0 : index
    %252 = vector.load %arg30[%c0_85, %c0_86] : memref<1152x128xbf16, #tpu.memory_space<vmem>>, vector<1152x128xbf16>
    %cst_87 = arith.constant dense<0.000000e+00> : vector<1152x128xf32>
    %253 = tpu.matmul %251, %250, %cst_87 {dimension_numbers = #tpu.dot_dimension_numbers<[1], [0], [0], [1], [0, 0, 1, 1], [], []>} : vector<1152x128xbf16>, vector<128x128xbf16>, vector<1152x128xf32> -> vector<1152x128xf32>
    %254 = vector.extract_strided_slice %253 {offsets = [0, 0], sizes = [128, 128], strides = [1, 1]} : vector<1152x128xf32> to vector<128x128xf32>
    %255 = vector.extract_strided_slice %253 {offsets = [128, 0], sizes = [128, 128], strides = [1, 1]} : vector<1152x128xf32> to vector<128x128xf32>
    %256 = vector.extract_strided_slice %253 {offsets = [256, 0], sizes = [128, 128], strides = [1, 1]} : vector<1152x128xf32> to vector<128x128xf32>
    %257 = vector.extract_strided_slice %253 {offsets = [384, 0], sizes = [128, 128], strides = [1, 1]} : vector<1152x128xf32> to vector<128x128xf32>
    %258 = vector.extract_strided_slice %253 {offsets = [512, 0], sizes = [128, 128], strides = [1, 1]} : vector<1152x128xf32> to vector<128x128xf32>
    %259 = vector.extract_strided_slice %253 {offsets = [640, 0], sizes = [128, 128], strides = [1, 1]} : vector<1152x128xf32> to vector<128x128xf32>
    %260 = vector.extract_strided_slice %253 {offsets = [768, 0], sizes = [128, 128], strides = [1, 1]} : vector<1152x128xf32> to vector<128x128xf32>
    %261 = vector.extract_strided_slice %253 {offsets = [896, 0], sizes = [128, 128], strides = [1, 1]} : vector<1152x128xf32> to vector<128x128xf32>
    %262 = vector.extract_strided_slice %253 {offsets = [1024, 0], sizes = [128, 128], strides = [1, 1]} : vector<1152x128xf32> to vector<128x128xf32>
    %263 = tpu.concatenate %254, %255, %256, %257, %258, %259, %260, %261, %262 in 1 : vector<128x128xf32>, vector<128x128xf32>, vector<128x128xf32>, vector<128x128xf32>, vector<128x128xf32>, vector<128x128xf32>, vector<128x128xf32>, vector<128x128xf32>, vector<128x128xf32> -> vector<128x1152xf32>
    %264 = arith.truncf %263 : vector<128x1152xf32> to vector<128x1152xbf16>
    %cst_88 = arith.constant dense<0.000000e+00> : vector<128x128xf32>
    %265 = tpu.matmul %264, %252, %cst_88 {dimension_numbers = #tpu.dot_dimension_numbers<[1], [0], [0], [1], [0, 0, 1, 1], [], []>} : vector<128x1152xbf16>, vector<1152x128xbf16>, vector<128x128xf32> -> vector<128x128xf32>
    %c0_89 = arith.constant 0 : index
    %c0_90 = arith.constant 0 : index
    %266 = vector.load %arg15[%c0_89, %c0_90] : memref<1x128xf32, #tpu.memory_space<vmem>>, vector<1x128xf32>
    %267 = vector.broadcast %266 : vector<1x128xf32> to vector<128x128xf32>
    %268 = arith.addf %265, %267 : vector<128x128xf32>
    %269 = math.tanh %268 : vector<128x128xf32>
    %c0_91 = arith.constant 0 : index
    %c0_92 = arith.constant 0 : index
    %270 = vector.load %arg22[%c0_91, %c0_92] : memref<128x128xf32, #tpu.memory_space<vmem>>, vector<128x128xf32>
    tpu.vector_store %arg22[%c0_91, %c0_92], %269 {strides = array<i32>} : memref<128x128xf32, #tpu.memory_space<vmem>>, vector<128x128xf32>,
    return
  }
  func.func @transform_0(%arg0: i32) -> (i32, i32) {
    %c0_i32 = arith.constant 0 : i32
    %c0_i32_0 = arith.constant 0 : i32
    %c0_i32_1 = arith.constant 0 : i32
    return %c0_i32, %c0_i32_0 : i32, i32
  }
  func.func @transform_1(%arg0: i32) -> (i32, i32) {
    %c0_i32 = arith.constant 0 : i32
    %c0_i32_0 = arith.constant 0 : i32
    %c0_i32_1 = arith.constant 0 : i32
    return %c0_i32, %c0_i32_0 : i32, i32
  }
  func.func @transform_2(%arg0: i32) -> (i32, i32) {
    %c0_i32 = arith.constant 0 : i32
    %c0_i32_0 = arith.constant 0 : i32
    %c0_i32_1 = arith.constant 0 : i32
    return %c0_i32, %c0_i32_0 : i32, i32
  }
  func.func @transform_3(%arg0: i32) -> (i32, i32) {
    %c0_i32 = arith.constant 0 : i32
    %c0_i32_0 = arith.constant 0 : i32
    %c0_i32_1 = arith.constant 0 : i32
    return %c0_i32, %c0_i32_0 : i32, i32
  }
  func.func @transform_4(%arg0: i32) -> (i32, i32) {
    %c0_i32 = arith.constant 0 : i32
    %c0_i32_0 = arith.constant 0 : i32
    %c0_i32_1 = arith.constant 0 : i32
    return %c0_i32, %c0_i32_0 : i32, i32
  }
  func.func @transform_5(%arg0: i32) -> (i32, i32) {
    %c0_i32 = arith.constant 0 : i32
    %c0_i32_0 = arith.constant 0 : i32
    %c0_i32_1 = arith.constant 0 : i32
    return %c0_i32, %c0_i32_0 : i32, i32
  }
  func.func @transform_6(%arg0: i32) -> (i32, i32) {
    %c0_i32 = arith.constant 0 : i32
    %c0_i32_0 = arith.constant 0 : i32
    %c0_i32_1 = arith.constant 0 : i32
    return %c0_i32, %c0_i32_0 : i32, i32
  }
  func.func @transform_7(%arg0: i32) -> (i32, i32) {
    %c0_i32 = arith.constant 0 : i32
    %c0_i32_0 = arith.constant 0 : i32
    %c0_i32_1 = arith.constant 0 : i32
    return %c0_i32, %c0_i32_0 : i32, i32
  }
  func.func @transform_8(%arg0: i32) -> (i32, i32) {
    %c0_i32 = arith.constant 0 : i32
    %c0_i32_0 = arith.constant 0 : i32
    %c0_i32_1 = arith.constant 0 : i32
    return %c0_i32, %c0_i32_0 : i32, i32
  }
  func.func @transform_9(%arg0: i32) -> (i32, i32) {
    %c0_i32 = arith.constant 0 : i32
    %c0_i32_0 = arith.constant 0 : i32
    %c0_i32_1 = arith.constant 0 : i32
    return %c0_i32, %c0_i32_0 : i32, i32
  }
  func.func @transform_10(%arg0: i32) -> (i32, i32) {
    %c0_i32 = arith.constant 0 : i32
    %c0_i32_0 = arith.constant 0 : i32
    %c0_i32_1 = arith.constant 0 : i32
    return %c0_i32, %c0_i32_0 : i32, i32
  }
  func.func @transform_11(%arg0: i32) -> (i32, i32) {
    %c0_i32 = arith.constant 0 : i32
    %c0_i32_0 = arith.constant 0 : i32
    %c0_i32_1 = arith.constant 0 : i32
    return %c0_i32, %c0_i32_0 : i32, i32
  }
  func.func @transform_12(%arg0: i32) -> (i32, i32) {
    %c0_i32 = arith.constant 0 : i32
    %c0_i32_0 = arith.constant 0 : i32
    %c0_i32_1 = arith.constant 0 : i32
    return %c0_i32, %c0_i32_0 : i32, i32
  }
  func.func @transform_13(%arg0: i32) -> (i32, i32) {
    %c0_i32 = arith.constant 0 : i32
    %c0_i32_0 = arith.constant 0 : i32
    %c0_i32_1 = arith.constant 0 : i32
    return %c0_i32, %c0_i32_0 : i32, i32
  }
  func.func @transform_14(%arg0: i32) -> (i32, i32) {
    %c0_i32 = arith.constant 0 : i32
    %c0_i32_0 = arith.constant 0 : i32
    %c0_i32_1 = arith.constant 0 : i32
    return %c0_i32, %c0_i32_0 : i32, i32
  }
  func.func @transform_21(%arg0: i32) -> (i32, i32) {
    %c0_i32 = arith.constant 0 : i32
    %c0_i32_0 = arith.constant 0 : i32
    %c0_i32_1 = arith.constant 0 : i32
    return %c0_i32, %c0_i32_0 : i32, i32
  }
  func.func @transform_22(%arg0: i32) -> (i32, i32) {
    %c0_i32 = arith.constant 0 : i32
    %c0_i32_0 = arith.constant 0 : i32
    %c0_i32_1 = arith.constant 0 : i32
    return %c0_i32, %c0_i32_0 : i32, i32
  }
  func.func @transform_23(%arg0: i32) -> (i32, i32) {
    %c0_i32 = arith.constant 0 : i32
    %c0_i32_0 = arith.constant 0 : i32
    %c0_i32_1 = arith.constant 0 : i32
    return %c0_i32, %c0_i32_0 : i32, i32
  }
}

</mosaic_0001>

<bundles_post_ra>
// kernel: vae_forward.1
= control target key start
LH: loop header
LB: loop body
LE: loop exit
PB: predicated region body
PF: predicated region fallthrough
CT: control target
= control target key end

     0   :  { %s11291_s0 = inlined_call_operand.vmem [shape: bf16[128,128], index: 0, kind: input, shape index: {}]   ;;  %s11292_s1 = inlined_call_operand.vmem [shape: f32[2,128], index: 1, kind: input, shape index: {}]   ;;  %s11293_s2 = inlined_call_operand.hbm [shape: bf16[288,128], index: 2, kind: input, shape index: {}]   ;;  %s11294_s3 = inlined_call_operand.hbm [shape: bf16[1152,128], index: 3, kind: input, shape index: {}]   ;;  %s11295_s4 = inlined_call_operand.hbm [shape: f32[2,128], index: 4, kind: input, shape index: {}]   ;;  %s11296_s5 = inlined_call_operand.vmem [shape: bf16[72,32], index: 5, kind: input, shape index: {}]   ;;  %s11297_s6 = inlined_call_operand.hbm [shape: f32[2,512], index: 6, kind: input, shape index: {}]   ;;  %s11298_s7 = inlined_call_operand.hbm [shape: f32[1,256], index: 7, kind: input, shape index: {}]   ;;  %s11299_s8 = inlined_call_operand.hbm [shape: f32[1,2048], index: 8, kind: input, shape index: {}]   ;;  %s11300_s9 = inlined_call_operand.hbm [shape: bf16[32,72], index: 9, kind: input, shape index: {}]   ;;  %s11301_s10 = inlined_call_operand.hbm [shape: f32[2,128], index: 10, kind: input, shape index: {}]   ;;  %s11302_s11 = inlined_call_operand.vmem [shape: bf16[128,288], index: 11, kind: input, shape index: {}]   ;;  %s11303_s12 = inlined_call_operand.hbm [shape: f32[2,128], index: 12, kind: input, shape index: {}]   ;;  %s11304_s13 = inlined_call_operand.hbm [shape: bf16[1152,128], index: 13, kind: input, shape index: {}]   ;;  %s11305_s14 = inlined_call_operand.hbm [shape: f32[1,128], index: 14, kind: input, shape index: {}]   ;;  %s11306_s15 = inlined_call_operand.hbm [shape: bf16[1152,512], index: 15, kind: input, shape index: {}]   ;;  %s11307_s16 = inlined_call_operand.hbm [shape: bf16[2048,256], index: 16, kind: input, shape index: {}]   ;;  %s11308_s17 = inlined_call_operand.hbm [shape: bf16[128,2048], index: 17, kind: input, shape index: {}]   ;;  %s11309_s18 = inlined_call_operand.hbm [shape: bf16[512,1152], index: 18, kind: input, shape index: {}]   ;;  %s11310_s19 = inlined_call_operand.hbm [shape: bf16[128,1152], index: 19, kind: input, shape index: {}]   ;;  %s11311_s20 = inlined_call_operand.hbm [shape: bf16[1152,128], index: 20, kind: input, shape index: {}]   ;;  %s11312_s21 = inlined_call_operand.vmem [shape: f32[128,128], index: 21, kind: output, shape index: {0}]   ;;  %s11313_s22 = inlined_call_operand.hbm [shape: f32[2,128], index: 22, kind: output, shape index: {1}]   ;;  %s11314_s23 = inlined_call_operand.hbm [shape: f32[2,128], index: 23, kind: output, shape index: {2}]  }
   0x1   :  { %11325 = sst [smem:[#allocation58_spill]] %s11291_s0 }
   0x2   :  { %11326 = sst [smem:[#allocation59_spill]] %s11292_s1 }
   0x3   :  { %11327 = sst [smem:[#allocation60_spill]] %s11293_s2 }
   0x4   :  { %11328 = sst [smem:[#allocation61_spill]] %s11294_s3 }
   0x5   :  { %11329 = sst [smem:[#allocation62_spill]] %s11295_s4 }
   0x6   :  { %11330 = sst [smem:[#allocation63_spill]] %s11296_s5 }
   0x7   :  { %11331 = sst [smem:[#allocation64_spill]] %s11297_s6 }
   0x8   :  { %11332 = sst [smem:[#allocation65_spill]] %s11298_s7 }
   0x9   :  { %11333 = sst [smem:[#allocation66_spill]] %s11312_s21 }
   0xa   :  { %29 = vsyncpa [#allocation10], 0 }
   0xb   :  { %30 = vsyncpa [#allocation13], 0 }
   0xc   :  { %31 = vsyncpa [#allocation16], 0 }
   0xd   :  { %32 = vsyncpa [#allocation19], 0 }
   0xe   :  { %33 = vsyncpa [#allocation22], 0 }
   0xf   :  { %34 = vsyncpa [#allocation25], 0 }
  0x10   :  { %35 = vsyncpa [#allocation11], 0 }
  0x11   :  { %36 = vsyncpa [#allocation29], 0  ;;  %s9793_s4 = smov [#allocation12]   ;;  %s9794_s24 = smov [#allocation15]  }
  0x12   :  { %s58_s30 = sshll.u32 %s9793_s4, 4  ;;  %s83_s25 = sshll.u32 %s9794_s24, 4  ;;  %s59_s30 = int_to_ptr.vmem [resolvable:$true] %s58_s30  ;;  %s84_s25 = int_to_ptr.vmem [resolvable:$true] %s83_s25 }
  0x13   :  { %s11334_s26 = sld [smem:[#allocation61_spill]] }
  0x19   :  { %s9457_s2 = scalar_lea.hbm %s11334_s26, 9216 }
  0x1a   :  { %p9458_p0 = scmp.ne.s32.totalorder %s11334_s26, %s9457_s2  ;;  %p9461_p1 = scmp.lt.u32.totalorder %s9457_s2, %s11334_s26 }
  0x1c   :  { %p9463_p2 = pnand %p9461_p1, %p9458_p0 }
  0x1e   :  { %9466 = shalt.err (!%p9463_p2)
}
  0x1f   :  { %s9467_s29 = scalar_lea.vmem %s59_s30, 9216  ;;  %p9472_p4 = scmp.lt.s32.totalorder %s59_s30, %s59_s30 }
  0x20   :  { %p9468_p3 = scmp.ne.s32.totalorder %s59_s30, %s9467_s29  ;;  %p9473_p5 = scmp.lt.s32.totalorder %s9467_s29, %s9467_s29 }
  0x22   :  { %p9474_p6 = por %p9473_p5, %p9472_p4 }
  0x24   :  { %p9475_p7 = pnand %p9474_p6, %p9468_p3 }
  0x26   :  { %9478 = shalt.err (!%p9475_p7)
}
  0x27   :  { %s11323_s3 = smov 64   ;;  %s9796_s0 = smov 4  }
  0x28   :  { %64 = dma.hbm_to_vmem [thread:$0]  %s11334_s26, 9216, %s59_s30, [#allocation13], %s11323_s3, %s11323_s3, %s9796_s0  }
  0x29   :  { %s11335_s2 = sld [smem:[#allocation64_spill]] }
  0x2f   :  { %s9479_s6 = scalar_lea.hbm %s11335_s2, 128 }
  0x30   :  { %p9480_p8 = scmp.ne.s32.totalorder %s11335_s2, %s9479_s6  ;;  %p9483_p9 = scmp.lt.u32.totalorder %s9479_s6, %s11335_s2 }
  0x32   :  { %p9485_p10 = pnand %p9483_p9, %p9480_p8 }
  0x34   :  { %9488 = shalt.err (!%p9485_p10)
}
  0x35   :  { %s9489_s21 = scalar_lea.vmem %s84_s25, 128  ;;  %p9494_p12 = scmp.lt.s32.totalorder %s84_s25, %s84_s25 }
  0x36   :  { %p9490_p11 = scmp.ne.s32.totalorder %s84_s25, %s9489_s21  ;;  %p9495_p13 = scmp.lt.s32.totalorder %s9489_s21, %s9489_s21 }
  0x38   :  { %p9496_p0 = por %p9495_p13, %p9494_p12 }
  0x3a   :  { %p9497_p1 = pnand %p9496_p0, %p9490_p11 }
  0x3c   :  { %9500 = shalt.err (!%p9497_p1)
}
  0x3d   :  { %86 = dma.hbm_to_vmem [thread:$0]  %s11335_s2, 128, %s84_s25, [#allocation16]  }
  0x3e   :  { %s9797_s4 = smov [#allocation18]   ;;  %s9798_s5 = smov [#allocation21]  }
  0x3f   :  { %s103_s24 = sshll.u32 %s9797_s4, 4  ;;  %s125_s1 = sshll.u32 %s9798_s5, 4  ;;  %s104_s24 = int_to_ptr.vmem [resolvable:$true] %s103_s24  ;;  %s126_s1 = int_to_ptr.vmem [resolvable:$true] %s125_s1 }
  0x40   :  { %s9501_s7 = scalar_lea.hbm %s11299_s8, 256 }
  0x41   :  { %p9502_p2 = scmp.ne.s32.totalorder %s11299_s8, %s9501_s7  ;;  %p9505_p3 = scmp.lt.u32.totalorder %s9501_s7, %s11299_s8 }
  0x43   :  { %p9507_p4 = pnand %p9505_p3, %p9502_p2 }
  0x45   :  { %9510 = shalt.err (!%p9507_p4)
}
  0x46   :  { %s9511_s25 = scalar_lea.vmem %s104_s24, 256  ;;  %p9516_p6 = scmp.lt.s32.totalorder %s104_s24, %s104_s24 }
  0x47   :  { %p9512_p5 = scmp.ne.s32.totalorder %s104_s24, %s9511_s25  ;;  %p9517_p7 = scmp.lt.s32.totalorder %s9511_s25, %s9511_s25 }
  0x49   :  { %p9518_p8 = por %p9517_p7, %p9516_p6 }
  0x4b   :  { %p9519_p9 = pnand %p9518_p8, %p9512_p5 }
  0x4d   :  { %9522 = shalt.err (!%p9519_p9)
}
  0x4e   :  { %106 = dma.hbm_to_vmem [thread:$0]  %s11299_s8, 256, %s104_s24, [#allocation19]  }
  0x4f   :  { %s9523_s5 = scalar_lea.hbm %s11301_s10, 32 }
  0x50   :  { %p9524_p10 = scmp.ne.s32.totalorder %s11301_s10, %s9523_s5  ;;  %p9527_p11 = scmp.lt.u32.totalorder %s9523_s5, %s11301_s10 }
  0x52   :  { %p9529_p12 = pnand %p9527_p11, %p9524_p10 }
  0x54   :  { %9532 = shalt.err (!%p9529_p12)
}
  0x55   :  { %s9533_s28 = scalar_lea.vmem %s126_s1, 32  ;;  %p9538_p0 = scmp.lt.s32.totalorder %s126_s1, %s126_s1 }
  0x56   :  { %p9534_p13 = scmp.ne.s32.totalorder %s126_s1, %s9533_s28  ;;  %p9539_p1 = scmp.lt.s32.totalorder %s9533_s28, %s9533_s28 }
  0x58   :  { %p9540_p2 = por %p9539_p1, %p9538_p0 }
  0x5a   :  { %p9541_p3 = pnand %p9540_p2, %p9534_p13 }
  0x5c   :  { %9544 = shalt.err (!%p9541_p3)
}
  0x5d   :  { %128 = dma.hbm_to_vmem [thread:$0]  %s11301_s10, 32, %s126_s1, [#allocation22]  }
  0x5e   :  { %s9799_s29 = smov [#allocation24]   ;;  %s9800_s25 = smov [#allocation9]  }
  0x5f   :  { %s146_s21 = sshll.u32 %s9799_s29, 4  ;;  %s46_s2 = sshll.u32 %s9800_s25, 4  ;;  %s147_s21 = int_to_ptr.vmem [resolvable:$true] %s146_s21  ;;  %s10008_s2 = int_to_ptr.vmem [resolvable:$true] %s46_s2 }
  0x60   :  { %s9545_s4 = scalar_lea.hbm %s11304_s13, 9216 }
  0x61   :  { %p9546_p4 = scmp.ne.s32.totalorder %s11304_s13, %s9545_s4  ;;  %p9549_p5 = scmp.lt.u32.totalorder %s9545_s4, %s11304_s13 }
  0x63   :  { %p9551_p6 = pnand %p9549_p5, %p9546_p4 }
  0x65   :  { %9554 = shalt.err (!%p9551_p6)
}
  0x66   :  { %s9555_s10 = scalar_lea.vmem %s147_s21, 9216  ;;  %p9560_p8 = scmp.lt.s32.totalorder %s147_s21, %s147_s21 }
  0x67   :  { %p9556_p7 = scmp.ne.s32.totalorder %s147_s21, %s9555_s10  ;;  %p9561_p9 = scmp.lt.s32.totalorder %s9555_s10, %s9555_s10 }
  0x69   :  { %p9562_p10 = por %p9561_p9, %p9560_p8 }
  0x6b   :  { %p9563_p11 = pnand %p9562_p10, %p9556_p7 }
  0x6d   :  { %9566 = shalt.err (!%p9563_p11)
}
  0x6e   :  { %s11336_s1 = smov 64   ;;  %s11337_s29 = sld [smem:[#allocation60_spill]] }
  0x6f   :  { %152 = dma.hbm_to_vmem [thread:$0]  %s11304_s13, 9216, %s147_s21, [#allocation25], %s11336_s1, %s11336_s1, %s9796_s0  }
  0x74   :  { %s9567_s25 = scalar_lea.hbm %s11337_s29, 2304 }
  0x75   :  { %p9568_p12 = scmp.ne.s32.totalorder %s11337_s29, %s9567_s25  ;;  %p9571_p13 = scmp.lt.u32.totalorder %s9567_s25, %s11337_s29 }
  0x77   :  { %p9573_p0 = pnand %p9571_p13, %p9568_p12 }
  0x79   :  { %9576 = shalt.err (!%p9573_p0)
}
  0x7a   :  { %s9577_s6 = scalar_lea.vmem %s10008_s2, 2304  ;;  %p9582_p2 = scmp.lt.s32.totalorder %s10008_s2, %s10008_s2 }
  0x7b   :  { %p9578_p1 = scmp.ne.s32.totalorder %s10008_s2, %s9577_s6  ;;  %p9583_p3 = scmp.lt.s32.totalorder %s9577_s6, %s9577_s6 }
  0x7d   :  { %p9584_p4 = por %p9583_p3, %p9582_p2 }
  0x7f   :  { %p9585_p5 = pnand %p9584_p4, %p9578_p1 }
  0x81   :  { %9588 = shalt.err (!%p9585_p5)
}
  0x82   :  { %52 = dma.hbm_to_vmem [thread:$0]  %s11337_s29, 2304, %s10008_s2, [#allocation10], %s11336_s1, %s11336_s1, %s9796_s0  }
  0x83   :  { %s9801_s3 = smov [#allocation14]   ;;  %s9802_s10 = smov [#allocation17]  }
  0x84   :  { %s71_s27 = sshll.u32 %s9801_s3, 4  ;;  %s93_s7 = sshll.u32 %s9802_s10, 4  ;;  %s72_s27 = int_to_ptr.vmem [resolvable:$true] %s71_s27  ;;  %s94_s7 = int_to_ptr.vmem [resolvable:$true] %s93_s7 }
  0x85   :  { %s11338_s24 = sld [smem:[#allocation62_spill]] }
  0x8b   :  { %s9589_s25 = scalar_lea.hbm %s11338_s24, 32 }
  0x8c   :  { %p9590_p6 = scmp.ne.s32.totalorder %s11338_s24, %s9589_s25  ;;  %p9593_p7 = scmp.lt.u32.totalorder %s9589_s25, %s11338_s24 }
  0x8e   :  { %p9595_p8 = pnand %p9593_p7, %p9590_p6 }
  0x90   :  { %9598 = shalt.err (!%p9595_p8)
}
  0x91   :  { %s9599_s2 = scalar_lea.vmem %s72_s27, 32  ;;  %p9604_p10 = scmp.lt.s32.totalorder %s72_s27, %s72_s27 }
  0x92   :  { %p9600_p9 = scmp.ne.s32.totalorder %s72_s27, %s9599_s2  ;;  %p9605_p11 = scmp.lt.s32.totalorder %s9599_s2, %s9599_s2 }
  0x94   :  { %p9606_p12 = por %p9605_p11, %p9604_p10 }
  0x96   :  { %p9607_p13 = pnand %p9606_p12, %p9600_p9 }
  0x98   :  { %9610 = shalt.err (!%p9607_p13)
}
  0x99   :  { %74 = dma.hbm_to_vmem [thread:$0]  %s11338_s24, 32, %s72_s27, [#allocation13]  }
  0x9a   :  { %s11339_s3 = sld [smem:[#allocation65_spill]] }
  0xa0   :  { %s9611_s10 = scalar_lea.hbm %s11339_s3, 32 }
  0xa1   :  { %p9612_p0 = scmp.ne.s32.totalorder %s11339_s3, %s9611_s10  ;;  %p9615_p1 = scmp.lt.u32.totalorder %s9611_s10, %s11339_s3 }
  0xa3   :  { %p9617_p2 = pnand %p9615_p1, %p9612_p0 }
  0xa5   :  { %9620 = shalt.err (!%p9617_p2)
}
  0xa6   :  { %s9621_s26 = scalar_lea.vmem %s94_s7, 32  ;;  %p9626_p4 = scmp.lt.s32.totalorder %s94_s7, %s94_s7 }
  0xa7   :  { %p9622_p3 = scmp.ne.s32.totalorder %s94_s7, %s9621_s26  ;;  %p9627_p5 = scmp.lt.s32.totalorder %s9621_s26, %s9621_s26 }
  0xa9   :  { %p9628_p6 = por %p9627_p5, %p9626_p4 }
  0xab   :  { %p9629_p7 = pnand %p9628_p6, %p9622_p3 }
  0xad   :  { %9632 = shalt.err (!%p9629_p7)
}
  0xae   :  { %96 = dma.hbm_to_vmem [thread:$0]  %s11339_s3, 32, %s94_s7, [#allocation16]  }
  0xaf   :  { %s9803_s4 = smov [#allocation20]   ;;  %s9804_s2 = smov [#allocation23]  }
  0xb0   :  { %s112_s5 = sshll.u32 %s9803_s4, 4  ;;  %s137_s29 = sshll.u32 %s9804_s2, 4  ;;  %s113_s5 = int_to_ptr.vmem [resolvable:$true] %s112_s5  ;;  %s138_s29 = int_to_ptr.vmem [resolvable:$true] %s137_s29 }
  0xb1   :  { %s9633_s21 = scalar_lea.hbm %s11300_s9, 256 }
  0xb2   :  { %p9634_p8 = scmp.ne.s32.totalorder %s11300_s9, %s9633_s21  ;;  %p9637_p9 = scmp.lt.u32.totalorder %s9633_s21, %s11300_s9 }
  0xb4   :  { %p9639_p10 = pnand %p9637_p9, %p9634_p8 }
  0xb6   :  { %9642 = shalt.err (!%p9639_p10)
}
  0xb7   :  { %s9643_s7 = scalar_lea.vmem %s113_s5, 256  ;;  %p9648_p12 = scmp.lt.s32.totalorder %s113_s5, %s113_s5 }
  0xb8   :  { %p9644_p11 = scmp.ne.s32.totalorder %s113_s5, %s9643_s7  ;;  %p9649_p13 = scmp.lt.s32.totalorder %s9643_s7, %s9643_s7 }
  0xba   :  { %p9650_p0 = por %p9649_p13, %p9648_p12 }
  0xbc   :  { %p9651_p1 = pnand %p9650_p0, %p9644_p11 }
  0xbe   :  { %9654 = shalt.err (!%p9651_p1)
}
  0xbf   :  { %118 = dma.hbm_to_vmem [thread:$0]  %s11300_s9, 256, %s113_s5, [#allocation19], %s11336_s1, %s11336_s1, %s9796_s0  }
  0xc0   :  { %s9655_s24 = scalar_lea.hbm %s11303_s12, 32 }
  0xc1   :  { %p9656_p2 = scmp.ne.s32.totalorder %s11303_s12, %s9655_s24  ;;  %p9659_p3 = scmp.lt.u32.totalorder %s9655_s24, %s11303_s12 }
  0xc3   :  { %p9661_p4 = pnand %p9659_p3, %p9656_p2 }
  0xc5   :  { %9664 = shalt.err (!%p9661_p4)
}
  0xc6   :  { %s9665_s21 = scalar_lea.vmem %s138_s29, 32  ;;  %p9670_p6 = scmp.lt.s32.totalorder %s138_s29, %s138_s29 }
  0xc7   :  { %p9666_p5 = scmp.ne.s32.totalorder %s138_s29, %s9665_s21  ;;  %p9671_p7 = scmp.lt.s32.totalorder %s9665_s21, %s9665_s21 }
  0xc9   :  { %p9672_p8 = por %p9671_p7, %p9670_p6 }
  0xcb   :  { %p9673_p9 = pnand %p9672_p8, %p9666_p5 }
  0xcd   :  { %9676 = shalt.err (!%p9673_p9)
}
  0xce   :  { %140 = dma.hbm_to_vmem [thread:$0]  %s11303_s12, 32, %s138_s29, [#allocation22]  }
  0xcf   :  { %s9805_s10 = smov [#allocation26]   ;;  %s9677_s7 = scalar_lea.hbm %s11305_s14, 16 }
  0xd0   :  { %s159_s28 = sshll.u32 %s9805_s10, 4  ;;  %p9678_p10 = scmp.ne.s32.totalorder %s11305_s14, %s9677_s7  ;;  %s160_s28 = int_to_ptr.vmem [resolvable:$true] %s159_s28 }
  0xd1   :  { %p9681_p11 = scmp.lt.u32.totalorder %s9677_s7, %s11305_s14 }
  0xd3   :  { %p9683_p12 = pnand %p9681_p11, %p9678_p10 }
  0xd5   :  { %9686 = shalt.err (!%p9683_p12)
}
  0xd6   :  { %s9687_s24 = scalar_lea.vmem %s160_s28, 16  ;;  %s9691_s12 = scalar_lea.vmem %s160_s28, 32 }
  0xd7   :  { %p9688_p13 = scmp.ne.s32.totalorder %s160_s28, %s9687_s24  ;;  %p9692_p0 = scmp.lt.s32.totalorder %s160_s28, %s160_s28 }
  0xd8   :  { %p9693_p1 = scmp.lt.s32.totalorder %s9691_s12, %s9687_s24 }
  0xda   :  { %p9694_p2 = por %p9693_p1, %p9692_p0 }
  0xdc   :  { %p9695_p3 = pnand %p9694_p2, %p9688_p13 }
  0xde   :  { %9698 = shalt.err (!%p9695_p3)
}
  0xdf   :  { %162 = dma.hbm_to_vmem [thread:$0]  %s11305_s14, 16, %s160_s28, [#allocation25]  }
  0xe0   :  { %9765 = dma.done.wait [#allocation10], 2304  }
  0xe1   :  { %9766 = vsyncadd [#allocation10], 4294964992 }
  0xe2   :  { %9767 = dma.done.wait [#allocation13], 9248  }
  0xe3   :  { %9768 = vsyncadd [#allocation13], 4294958048 }
  0xe4   :  { %9769 = dma.done.wait [#allocation16], 160  }
  0xe5   :  { %9770 = vsyncadd [#allocation16], 4294967136 }
  0xe6   :  { %9771 = dma.done.wait [#allocation19], 512  }
  0xe7   :  { %9772 = vsyncadd [#allocation19], 4294966784 }
  0xe8   :  { %9773 = dma.done.wait [#allocation22], 64  }
  0xe9   :  { %9774 = vsyncadd [#allocation22], 4294967232 }
  0xea   :  { %9775 = dma.done.wait [#allocation25], 9232  }
  0xeb   :  { %9776 = vsyncadd [#allocation25], 4294958064  ;;  %s201_s2 = sld [smem:[#allocation0]]   ;;  %s9806_s6 = smov 512  }
  0xec   :  { %213 = sst [smem:[#allocation31]] %s9806_s6  ;;  %s9807_s14 = smov [#allocation2]  }
  0xed   :  { %215 = sst [smem:[#allocation31 + $0x1]] %s9806_s6  ;;  %s209_s13 = sshll.u32 %s9807_s14, 4  ;;  %s210_s13 = int_to_ptr.vmem [resolvable:$true] %s209_s13 }
  0xee   :  { %217 = sst [smem:[#allocation31 + $0x2]] %s9796_s0  ;;  %s9808_s21 = smov 128  }
  0xef   :  { %219 = sst [smem:[#allocation31 + $0x3]] %s11336_s1  ;;  %s9809_s9 = smov 2  }
  0xf0   :  { %221 = sst [smem:[#allocation31 + $0x4]] %s9808_s21  ;;  %s9810_s28 = smov 256  }
  0xf1   :  { %223 = sst [smem:[#allocation31 + $0x5]] %s9809_s9  ;;  %s7776_s5 = sshll.u32 %s201_s2, 26 }
  0xf2   :  { %227 = sst [smem:[#allocation31 + $0x7]] %s11336_s1  ;;  %s10113_s10 = sadd.s32 134217728, %s7776_s5 }
  0xf3   :  { %229 = sst [smem:[#allocation31 + $0x8]] %s9796_s0  ;;  %s9811_s8 = smov [#allocation8]  }
  0xf4   :  { %225 = sst [smem:[#allocation31 + $0x6]] %s9810_s28  ;;  %s9812_s25 = smov [#allocation30]  }
  0xf5   :  { %231 = dma.general %s11306_s15, 36864, %s210_s13, %s9811_s8, %s9812_s25, [#allocation31], %s10113_s10, 0  }
  0xf6   :  { %248 = sst [smem:[#allocation33]] %s9810_s28  ;;  %s9813_s30 = smov [#allocation3]  }
  0xf7   :  { %s244_s26 = sshll.u32 %s9813_s30, 4  ;;  %250 = sst [smem:[#allocation33 + $0x1]] %s9810_s28  ;;  %s245_s26 = int_to_ptr.vmem [resolvable:$true] %s244_s26 }
  0xf8   :  { %252 = sst [smem:[#allocation33 + $0x2]] %s9809_s9  ;;  %s9814_s15 = smov [#allocation8 + $0x1]  }
  0xf9   :  { %254 = sst [smem:[#allocation33 + $0x3]] %s11336_s1  ;;  %s9815_s27 = smov [#allocation32]  }
  0xfa   :  { %256 = sst [smem:[#allocation33 + $0x4]] %s9808_s21  ;;  %s9816_s29 = smov 2048  }
  0xfb   :  { %258 = sst [smem:[#allocation33 + $0x5]] %s9809_s9  ;;  %s9817_s4 = smov [#allocation4]  }
  0xfc   :  { %260 = sst [smem:[#allocation33 + $0x6]] %s9808_s21  ;;  %s279_s2 = sshll.u32 %s9817_s4, 4  ;;  %s280_s2 = int_to_ptr.vmem [resolvable:$true] %s279_s2 }
  0xfd   :  { %262 = sst [smem:[#allocation33 + $0x7]] %s11336_s1  ;;  %s9818_s6 = smov 16  }
  0xfe   :  { %264 = sst [smem:[#allocation33 + $0x8]] %s9796_s0  ;;  %s9819_s14 = smov 1024  }
  0xff   :  { %266 = dma.general %s11307_s16, 32768, %s245_s26, %s9814_s15, %s9815_s27, [#allocation33], %s10113_s10, 0  }
 0x100   :  { %283 = sst [smem:[#allocation35]] %s9816_s29  ;;  %s9820_s16 = smov [#allocation8 + $0x2]  }
 0x101   :  { %285 = sst [smem:[#allocation35 + $0x1]] %s9816_s29  ;;  %s9821_s13 = smov [#allocation34]  }
 0x102   :  { %287 = sst [smem:[#allocation35 + $0x2]] %s9818_s6  ;;  %s9822_s8 = smov 1152  }
 0x103   :  { %289 = sst [smem:[#allocation35 + $0x3]] %s11336_s1  ;;  %s9823_s25 = smov [#allocation5]  }
 0x104   :  { %291 = sst [smem:[#allocation35 + $0x4]] %s9808_s21  ;;  %s314_s7 = sshll.u32 %s9823_s25, 4  ;;  %s315_s7 = int_to_ptr.vmem [resolvable:$true] %s314_s7 }
 0x105   :  { %293 = sst [smem:[#allocation35 + $0x5]] %s9809_s9  ;;  %s9824_s3 = smov 9  }
 0x106   :  { %295 = sst [smem:[#allocation35 + $0x6]] %s9819_s14  ;;  %s9825_s30 = smov 576  }
 0x107   :  { %297 = sst [smem:[#allocation35 + $0x7]] %s11336_s1  ;;  %s9827_s26 = smov [#allocation36]  }
 0x108   :  { %299 = sst [smem:[#allocation35 + $0x8]] %s9796_s0  ;;  %s9828_s24 = smov [#allocation6]  }
 0x109   :  { %301 = dma.general %s11308_s17, 16384, %s280_s2, %s9820_s16, %s9821_s13, [#allocation35], %s10113_s10, 0  }
 0x10a   :  { %318 = sst [smem:[#allocation37]] %s9822_s8  ;;  %s9826_s17 = smov [#allocation8 + $0x3]  }
 0x10b   :  { %320 = sst [smem:[#allocation37 + $0x1]] %s9822_s8  ;;  %s349_s12 = sshll.u32 %s9828_s24, 4  ;;  %s350_s12 = int_to_ptr.vmem [resolvable:$true] %s349_s12 }
 0x10c   :  { %322 = sst [smem:[#allocation37 + $0x2]] %s9824_s3  ;;  %s9829_s29 = smov [#allocation8 + $0x4]  }
 0x10d   :  { %324 = sst [smem:[#allocation37 + $0x3]] %s11336_s1  ;;  %s9830_s4 = smov [#allocation38]  }
 0x10e   :  { %326 = sst [smem:[#allocation37 + $0x4]] %s9808_s21  ;;  %s9699_s24 = scalar_lea.hbm %s11311_s20, 9216 }
 0x10f   :  { %328 = sst [smem:[#allocation37 + $0x5]] %s9809_s9  ;;  %p9700_p4 = scmp.ne.s32.totalorder %s11311_s20, %s9699_s24 }
 0x110   :  { %330 = sst [smem:[#allocation37 + $0x6]] %s9825_s30  ;;  %p9703_p5 = scmp.lt.u32.totalorder %s9699_s24, %s11311_s20 }
 0x111   :  { %332 = sst [smem:[#allocation37 + $0x7]] %s11336_s1 }
 0x112   :  { %334 = sst [smem:[#allocation37 + $0x8]] %s9796_s0  ;;  %p9705_p6 = pnand %p9703_p5, %p9700_p4 }
 0x113   :  { %336 = dma.general %s11309_s18, 36864, %s315_s7, %s9826_s17, %s9827_s26, [#allocation37], %s10113_s10, 0  }
 0x114   :  { %353 = sst [smem:[#allocation39]] %s9822_s8  ;;  %s9831_s17 = smov [#allocation7]  }
 0x115   :  { %355 = sst [smem:[#allocation39 + $0x1]] %s9822_s8  ;;  %s380_s26 = sshll.u32 %s9831_s17, 4  ;;  %s381_s26 = int_to_ptr.vmem [resolvable:$true] %s380_s26 }
 0x116   :  { %357 = sst [smem:[#allocation39 + $0x2]] %s9824_s3 }
 0x117   :  { %359 = sst [smem:[#allocation39 + $0x3]] %s11336_s1 }
 0x118   :  { %361 = sst [smem:[#allocation39 + $0x4]] %s9808_s21 }
 0x119   :  { %363 = sst [smem:[#allocation39 + $0x5]] %s9809_s9 }
 0x11a   :  { %365 = sst [smem:[#allocation39 + $0x6]] %s9825_s30 }
 0x11b   :  { %367 = sst [smem:[#allocation39 + $0x7]] %s11336_s1 }
 0x11c   :  { %369 = sst [smem:[#allocation39 + $0x8]] %s9796_s0 }
 0x11d   :  { %371 = dma.general %s11310_s19, 9216, %s350_s12, %s9829_s29, %s9830_s4, [#allocation39], %s10113_s10, 0  }
 0x11e   :  { %s11340_s16 = sld [smem:[#allocation58_spill]]  ;;  %v9242_v4 = vld [vmem:[#allocation9] sm:$0xff]   ;;  %v9260_v9 = vld [vmem:[#allocation12 + $0x40] sm:$0xff]   ;;  %v9243_v11 = vld [vmem:[#allocation9 + $0x8] sm:$0xff]  }
 0x11f   :  { %8692 = vmatprep.mubr.bf16.mxu0 %v9242_v4  ;;  %v9261_v10 = vld [vmem:[#allocation12] sm:$0xff]   ;;  %8028 = vmatprep.subr.bf16.mxu1 %v9260_v9  ;;  %v9262_v12 = vld [vmem:[#allocation12 + $0x48] sm:$0xff]   ;;  %v9264_v14 = vld [vmem:[#allocation12 + $0x50] sm:$0xff]  }
 0x120   :  { %8029 = vmatpush3.bf16.msra.mxu1 %v9261_v10  ;;  %v9263_v13 = vld [vmem:[#allocation12 + $0x8] sm:$0xff]   ;;  %v9244_v15 = vld [vmem:[#allocation9 + $0x10] sm:$0xff]   ;;  %v9265_v16 = vld [vmem:[#allocation12 + $0x10] sm:$0xff]  }
 0x121   :  { %8030 = vmatprep.subr.bf16.mxu1 %v9262_v12  ;;  %v9266_v17 = vld [vmem:[#allocation12 + $0x58] sm:$0xff]   ;;  %v9245_v19 = vld [vmem:[#allocation9 + $0x18] sm:$0xff]   ;;  %v9268_v20 = vld [vmem:[#allocation12 + $0x60] sm:$0xff]  }
 0x122   :  { %v9267_v18 = vld [vmem:[#allocation12 + $0x18] sm:$0xff]   ;;  %v9246_v21 = vld [vmem:[#allocation9 + $0x20] sm:$0xff]   ;;  %v9269_v22 = vld [vmem:[#allocation12 + $0x20] sm:$0xff]  }
 0x123   :  { %v9247_v23 = vld [vmem:[#allocation9 + $0x28] sm:$0xff]   ;;  %v9248_v24 = vld [vmem:[#allocation9 + $0x30] sm:$0xff]   ;;  %v9249_v25 = vld [vmem:[#allocation9 + $0x38] sm:$0xff]  }
 0x124   :  { %v9234_v0 = vld [vmem:[%s11340_s16] sm:$0xff]   ;;  %v9235_v1 = vld [vmem:[%s11340_s16 + $0x8] sm:$0xff]   ;;  %v9236_v2 = vld [vmem:[%s11340_s16 + $0x10] sm:$0xff]   ;;  %8031 = vmatpush3.bf16.msra.mxu1 %v9263_v13 }
 0x125   :  { %8676 = vmatprep.subr.bf16.mxu0 %v9234_v0  ;;  %v9237_v3 = vld [vmem:[%s11340_s16 + $0x18] sm:$0xff]   ;;  %v9238_v5 = vld [vmem:[%s11340_s16 + $0x20] sm:$0xff]   ;;  %v9239_v6 = vld [vmem:[%s11340_s16 + $0x28] sm:$0xff]   ;;  %8032 = vmatprep.subr.bf16.mxu1 %v9264_v14 }
 0x126   :  { %8677 = vmatpush3.bf16.msra.mxu0 %v9234_v0  ;;  %v9240_v7 = vld [vmem:[%s11340_s16 + $0x30] sm:$0xff]   ;;  %v9241_v8 = vld [vmem:[%s11340_s16 + $0x38] sm:$0xff]   ;;  %v9250_v26 = vld [vmem:[#allocation9 + $0x40] sm:$0xff]  }
 0x127   :  { %8678 = vmatprep.subr.bf16.mxu0 %v9235_v1  ;;  %v9251_v27 = vld [vmem:[#allocation9 + $0x48] sm:$0xff]   ;;  %v9252_v28 = vld [vmem:[#allocation9 + $0x50] sm:$0xff]   ;;  %v9253_v29 = vld [vmem:[#allocation9 + $0x58] sm:$0xff]  }
 0x128   :  { %8033 = vmatpush3.bf16.msra.mxu1 %v9265_v16  ;;  %v9254_v30 = vld [vmem:[#allocation9 + $0x60] sm:$0xff]   ;;  %v9255_v31 = vld [vmem:[#allocation9 + $0x68] sm:$0xff]   ;;  %v9256_v32 = vld [vmem:[#allocation9 + $0x70] sm:$0xff]  }
 0x129   :  { %8034 = vmatprep.subr.bf16.mxu1 %v9266_v17  ;;  %v9257_v33 = vld [vmem:[#allocation9 + $0x78] sm:$0xff]   ;;  %v9258_v34 = vld [vmem:[#allocation9 + $0x80] sm:$0xff]   ;;  %v9259_v35 = vld [vmem:[#allocation9 + $0x88] sm:$0xff]  }
 0x12a   :  { %8679 = vmatpush3.bf16.msra.mxu0 %v9235_v1  ;;  %v9270_v36 = vld [vmem:[#allocation12 + $0x68] sm:$0xff]   ;;  %v9272_v38 = vld [vmem:[#allocation12 + $0x70] sm:$0xff]   ;;  %v9274_v40 = vld [vmem:[#allocation12 + $0x78] sm:$0xff]  }
 0x12b   :  { %8680 = vmatprep.subr.bf16.mxu0 %v9236_v2  ;;  %v9271_v37 = vld [vmem:[#allocation12 + $0x28] sm:$0xff]   ;;  %v9273_v39 = vld [vmem:[#allocation12 + $0x30] sm:$0xff]   ;;  %v9275_v41 = vld [vmem:[#allocation12 + $0x38] sm:$0xff]  }
 0x12c   :  { %8035 = vmatpush3.bf16.msra.mxu1 %v9267_v18  ;;  %v9276_v42 = vld [vmem:[#allocation12 + $0xc0] sm:$0xff]   ;;  %v9291_v45 = vld [vmem:[#allocation12 + $0x1c8] sm:$0xff]   ;;  %v9298_v47 = vld [vmem:[#allocation12 + $0x1d0] sm:$0xff]  }
 0x12d   :  { %8036 = vmatprep.subr.bf16.mxu1 %v9268_v20  ;;  %v9284_v43 = vld [vmem:[#allocation12 + $0x1c0] sm:$0xff]   ;;  %v9293_v46 = vld [vmem:[#allocation12 + $0x188] sm:$0xff]   ;;  %v9299_v48 = vld [vmem:[#allocation12 + $0x190] sm:$0xff]  }
 0x12e   :  { %8681 = vmatpush3.bf16.msra.mxu0 %v9236_v2  ;;  %v9286_v44 = vld [vmem:[#allocation12 + $0x180] sm:$0xff]   ;;  %v9304_v49 = vld [vmem:[#allocation12 + $0x1d8] sm:$0xff]   ;;  %v9314_v53 = vld [vmem:[#allocation12 + $0x1e8] sm:$0xff]  }
 0x12f   :  { %8682 = vmatprep.subr.bf16.mxu0 %v9237_v3  ;;  %v9305_v50 = vld [vmem:[#allocation12 + $0x198] sm:$0xff]   ;;  %v9310_v51 = vld [vmem:[#allocation12 + $0x1e0] sm:$0xff]   ;;  %v9315_v54 = vld [vmem:[#allocation12 + $0x1a8] sm:$0xff]  }
 0x130   :  { %8037 = vmatpush3.bf16.msra.mxu1 %v9269_v22  ;;  %v9311_v52 = vld [vmem:[#allocation12 + $0x1a0] sm:$0xff]   ;;  %v9318_v55 = vld [vmem:[#allocation12 + $0x1f0] sm:$0xff]   ;;  %v9322_v57 = vld [vmem:[#allocation12 + $0x1f8] sm:$0xff]  }
 0x131   :  { %8038 = vmatprep.subr.bf16.mxu1 %v9270_v36  ;;  %v9319_v56 = vld [vmem:[#allocation12 + $0x1b0] sm:$0xff]   ;;  %v9323_v58 = vld [vmem:[#allocation12 + $0x1b8] sm:$0xff]   ;;  %v9279_v9 = vld [vmem:[#allocation12 + $0x88] sm:$0xff]  }
 0x132   :  { %8683 = vmatpush3.bf16.msra.mxu0 %v9237_v3  ;;  %v9281_v16 = vld [vmem:[#allocation12 + $0x90] sm:$0xff]   ;;  %v9282_v18 = vld [vmem:[#allocation12 + $0xd8] sm:$0xff]  }
 0x133   :  { %8684 = vmatprep.subr.bf16.mxu0 %v9238_v5  ;;  %v9292_v36 = vld [vmem:[#allocation12 + $0xb0] sm:$0xff]  }
 0x134   :  { %8039 = vmatpush3.bf16.msra.mxu1 %v9271_v37 }
 0x135   :  { %8040 = vmatprep.subr.bf16.mxu1 %v9272_v38  ;;  %v9294_v38 = vld [vmem:[#allocation12 + $0xf8] sm:$0xff]  }
 0x136   :  { %8685 = vmatpush3.bf16.msra.mxu0 %v9238_v5 }
 0x137   :  { %8686 = vmatprep.subr.bf16.mxu0 %v9239_v6 }
 0x138   :  { %8041 = vmatpush3.bf16.msra.mxu1 %v9273_v39  ;;  %v9295_v39 = vld [vmem:[#allocation12 + $0xb8] sm:$0xff]  }
 0x139   :  { %8042 = vmatprep.subr.bf16.mxu1 %v9274_v40 }
 0x13a   :  { %8687 = vmatpush3.bf16.msra.mxu0 %v9239_v6 }
 0x13b   :  { %8688 = vmatprep.subr.bf16.mxu0 %v9240_v7 }
 0x13c   :  { %8043 = vmatpush3.bf16.msra.mxu1 %v9275_v41  ;;  %v9296_v41 = vld [vmem:[#allocation12 + $0x140] sm:$0xff]  }
 0x13d   :  { %8056 = vmatprep.subr.bf16.mxu1 %v9276_v42 }
 0x13e   :  { %8689 = vmatpush3.bf16.msra.mxu0 %v9240_v7  ;;  %v9277_v7 = vld [vmem:[#allocation12 + $0x80] sm:$0xff]  }
 0x13f   :  { %8690 = vmatprep.subr.bf16.mxu0 %v9241_v8 }
 0x142   :  { %8691 = vmatpush3.bf16.msra.mxu0 %v9241_v8  ;;  %v9278_v8 = vld [vmem:[#allocation12 + $0xc8] sm:$0xff]  }
 0x143   :  { %8112 = vmatprep.subr.bf16.mxu0 %v9284_v43 }
 0x145   :  { %8693 = vmatmul.mubr.bf16.vlgmr.msra.gmra.mrb[0].mxu0 %v9243_v11  ;;  %v9280_v11 = vld [vmem:[#allocation12 + $0xd0] sm:$0xff]  }
 0x146   :  { %8696 = vmatprep.mubr.bf16.mxu0 %v9244_v15  ;;  %8113 = vmatpush3.bf16.msra.mxu0 %v9286_v44 }
 0x147   :  { %8114 = vmatprep.subr.bf16.mxu0 %v9291_v45 }
 0x14a   :  { %8115 = vmatpush3.bf16.msra.mxu0 %v9293_v46  ;;  %v9297_v46 = vld [vmem:[#allocation12 + $0x100] sm:$0xff]  }
 0x14b   :  { %8116 = vmatprep.subr.bf16.mxu0 %v9298_v47 }
 0x14d   :  { %8697 = vmatmul.mubr.bf16.gmra.mrb[4].mxu0 %v9245_v19  ;;  %v9283_v19 = vld [vmem:[#allocation12 + $0x98] sm:$0xff]  }
 0x14e   :  { %8700 = vmatprep.mubr.bf16.mxu0 %v9246_v21  ;;  %8117 = vmatpush3.bf16.msra.mxu0 %v9299_v48  ;;  %v9285_v21 = vld [vmem:[#allocation12 + $0xe0] sm:$0xff]   ;;  %v9300_v48 = vld [vmem:[#allocation12 + $0x148] sm:$0xff]  }
 0x14f   :  { %8118 = vmatprep.subr.bf16.mxu0 %v9304_v49  ;;  %v9301_v49 = vld [vmem:[#allocation12 + $0x108] sm:$0xff]  }
 0x152   :  { %8119 = vmatpush3.bf16.msra.mxu0 %v9305_v50 }
 0x153   :  { %8120 = vmatprep.subr.bf16.mxu0 %v9310_v51  ;;  %v9302_v51 = vld [vmem:[#allocation12 + $0x150] sm:$0xff]  }
 0x155   :  { %8701 = vmatmul.mubr.bf16.gmra.mrb[8].mxu0 %v9247_v23 }
 0x156   :  { %8704 = vmatprep.mubr.bf16.mxu0 %v9248_v24  ;;  %8121 = vmatpush3.bf16.msra.mxu0 %v9311_v52 }
 0x157   :  { %8122 = vmatprep.subr.bf16.mxu0 %v9314_v53 }
 0x15a   :  { %8123 = vmatpush3.bf16.msra.mxu0 %v9315_v54 }
 0x15b   :  { %8124 = vmatprep.subr.bf16.mxu0 %v9318_v55 }
 0x15d   :  { %8705 = vmatmul.mubr.bf16.gmra.mrb[12].mxu0 %v9249_v25 }
 0x15e   :  { %8708 = vmatprep.mubr.bf16.mxu0 %v9250_v26  ;;  %8125 = vmatpush3.bf16.msra.mxu0 %v9319_v56  ;;  %v9287_v26 = vld [vmem:[#allocation12 + $0xa0] sm:$0xff]   ;;  %v9303_v56 = vld [vmem:[#allocation12 + $0x110] sm:$0xff]  }
 0x15f   :  { %8126 = vmatprep.subr.bf16.mxu0 %v9322_v57 }
 0x162   :  { %8127 = vmatpush3.bf16.msra.mxu0 %v9323_v58  ;;  %v9306_v58 = vld [vmem:[#allocation12 + $0x158] sm:$0xff]  }
 0x165   :  { %8709 = vmatmul.mubr.bf16.gmra.mrb[16].mxu0 %v9251_v27 }
 0x166   :  { %8712 = vmatprep.mubr.bf16.mxu0 %v9252_v28  ;;  %v9288_v28 = vld [vmem:[#allocation12 + $0xe8] sm:$0xff]  }
 0x16d   :  { %8713 = vmatmul.mubr.bf16.gmra.mrb[20].mxu0 %v9253_v29  ;;  %v9289_v29 = vld [vmem:[#allocation12 + $0xa8] sm:$0xff]  }
 0x16e   :  { %8716 = vmatprep.mubr.bf16.mxu0 %v9254_v30 }
 0x175   :  { %8717 = vmatmul.mubr.bf16.gmra.mrb[24].mxu0 %v9255_v31  ;;  %v9290_v31 = vld [vmem:[#allocation12 + $0xf0] sm:$0xff]  }
 0x176   :  { %8720 = vmatprep.mubr.bf16.mxu0 %v9256_v32 }
 0x17d   :  { %8721 = vmatmul.mubr.bf16.gmra.mrb[28].mxu0 %v9257_v33 }
 0x17e   :  { %8724 = vmatprep.mubr.bf16.mxu0 %v9258_v34 }
 0x185   :  { %8725 = vmatmul.mubr.bf16.gmra.mrb[32].mxu0 %v9259_v35 }
 0x218   :  { %v8694_v59 = vpop.f32.mrb[0].mxu0 }
 0x219   :  { %v770_v60 = vpop.f32.mrb[1].mxu0 }
 0x21a   :  { %v8695_v61 = vpop.f32.mrb[2].mxu0 }
 0x21b   :  { %v922_v62 = vpack.c.bf16 %v8695_v61, %v8694_v59  ;;  %v773_v63 = vpop.f32.mrb[3].mxu0  ;;  %v9307_v59 = vld [vmem:[#allocation12 + $0x118] sm:$0xff]   ;;  %v9308_v61 = vld [vmem:[#allocation12 + $0x160] sm:$0xff]  }
 0x21c   :  { %v913_v0 = vpack.c.bf16 %v773_v63, %v770_v60 }
 0x220   :  { %v8698_v1 = vpop.f32.mrb[4].mxu0 }
 0x221   :  { %v786_v2 = vpop.f32.mrb[5].mxu0 }
 0x222   :  { %v8699_v3 = vpop.f32.mrb[6].mxu0 }
 0x223   :  { %v923_v4 = vpack.c.bf16 %v8699_v3, %v8698_v1  ;;  %v789_v5 = vpop.f32.mrb[7].mxu0 }
 0x224   :  { %v914_v6 = vpack.c.bf16 %v789_v5, %v786_v2  ;;  %v9309_v2 = vld [vmem:[#allocation12 + $0x120] sm:$0xff]   ;;  %v9313_v5 = vld [vmem:[#allocation12 + $0x128] sm:$0xff]  }
 0x226   :  { %1395 = vmatprep.mubr.bf16.mxu1 %v914_v6 }
 0x227   :  { %1396 = vmatmul.mubr.bf16.vlgmr.msra.gmra.mrb[0].mxu1 %v913_v0 }
 0x228   :  { %8057 = vmatpush3.bf16.msra.mxu1 %v9277_v7  ;;  %1403 = vmatprep.mubr.bf16.mxu1 %v923_v4  ;;  %v10182_v10 = vpop.f32.mrb[8].mxu0  ;;  %v9312_v4 = vld [vmem:[#allocation12 + $0x168] sm:$0xff]   ;;  %v9316_v7 = vld [vmem:[#allocation12 + $0x170] sm:$0xff]  }
 0x229   :  { %8058 = vmatprep.subr.bf16.mxu1 %v9278_v8  ;;  %v802_v12 = vpop.f32.mrb[9].mxu0 }
 0x22a   :  { %v10184_v13 = vpop.f32.mrb[10].mxu0 }
 0x22b   :  { %v924_v14 = vpack.c.bf16 %v10184_v13, %v10182_v10  ;;  %v805_v15 = vpop.f32.mrb[11].mxu0 }
 0x22c   :  { %8059 = vmatpush3.bf16.msra.mxu1 %v9279_v9  ;;  %v915_v17 = vpack.c.bf16 %v805_v15, %v802_v12  ;;  %v9317_v12 = vld [vmem:[#allocation12 + $0x130] sm:$0xff]   ;;  %v9321_v15 = vld [vmem:[#allocation12 + $0x138] sm:$0xff]  }
 0x22d   :  { %8060 = vmatprep.subr.bf16.mxu1 %v9280_v11 }
 0x22f   :  { %1404 = vmatmul.mubr.bf16.gmra.mrb[4].mxu1 %v922_v62 }
 0x230   :  { %8061 = vmatpush3.bf16.msra.mxu1 %v9281_v16  ;;  %v8706_v20 = vpop.f32.mrb[12].mxu0  ;;  %v9324_v16 = vld [vmem:[#allocation12 + $0x200] sm:$0xff]  }
 0x231   :  { %8062 = vmatprep.subr.bf16.mxu1 %v9282_v18  ;;  %v818_v22 = vpop.f32.mrb[13].mxu0  ;;  %v9326_v18 = vld [vmem:[#allocation12 + $0x210] sm:$0xff]  }
 0x232   :  { %v8707_v23 = vpop.f32.mrb[14].mxu0 }
 0x233   :  { %v925_v24 = vpack.c.bf16 %v8707_v23, %v8706_v20  ;;  %v821_v25 = vpop.f32.mrb[15].mxu0  ;;  %v9328_v20 = vld [vmem:[#allocation12 + $0x220] sm:$0xff]   ;;  %v9331_v23 = vld [vmem:[#allocation12 + $0x238] sm:$0xff]  }
 0x234   :  { %8063 = vmatpush3.bf16.msra.mxu1 %v9283_v19  ;;  %v916_v27 = vpack.c.bf16 %v821_v25, %v818_v22  ;;  %v9327_v19 = vld [vmem:[#allocation12 + $0x218] sm:$0xff]   ;;  %v9330_v22 = vld [vmem:[#allocation12 + $0x230] sm:$0xff]  }
 0x235   :  { %8064 = vmatprep.subr.bf16.mxu1 %v9285_v21  ;;  %v9329_v21 = vld [vmem:[#allocation12 + $0x228] sm:$0xff]  }
 0x236   :  { %1444 = vmatprep.mubr.bf16.mxu1 %v916_v27 }
 0x238   :  { %8065 = vmatpush3.bf16.msra.mxu1 %v9287_v26  ;;  %v10188_v30 = vpop.f32.mrb[16].mxu0 }
 0x239   :  { %8066 = vmatprep.subr.bf16.mxu1 %v9288_v28  ;;  %v10190_v32 = vpop.f32.mrb[17].mxu0 }
 0x23a   :  { %v10192_v33 = vpop.f32.mrb[18].mxu0 }
 0x23b   :  { %v926_v34 = vpack.c.bf16 %v10192_v33, %v10188_v30  ;;  %v10196_v35 = vpop.f32.mrb[19].mxu0 }
 0x23c   :  { %8067 = vmatpush3.bf16.msra.mxu1 %v9289_v29  ;;  %v917_v37 = vpack.c.bf16 %v10196_v35, %v10190_v32 }
 0x23d   :  { %8068 = vmatprep.subr.bf16.mxu1 %v9290_v31 }
 0x240   :  { %8069 = vmatpush3.bf16.msra.mxu1 %v9292_v36  ;;  %v10200_v40 = vpop.f32.mrb[20].mxu0 }
 0x241   :  { %8070 = vmatprep.subr.bf16.mxu1 %v9294_v38  ;;  %v850_v42 = vpop.f32.mrb[21].mxu0 }
 0x242   :  { %v10202_v43 = vpop.f32.mrb[22].mxu0 }
 0x243   :  { %v927_v44 = vpack.c.bf16 %v10202_v43, %v10200_v40  ;;  %v853_v45 = vpop.f32.mrb[23].mxu0 }
 0x244   :  { %8071 = vmatpush3.bf16.msra.mxu1 %v9295_v39  ;;  %v918_v47 = vpack.c.bf16 %v853_v45, %v850_v42 }
 0x245   :  { %8084 = vmatprep.subr.bf16.mxu1 %v9296_v41 }
 0x247   :  { %1445 = vmatmul.mubr.bf16.vlgmr.msra.gmra.mrb[8].mxu1 %v915_v17  ;;  %v9325_v17 = vld [vmem:[#allocation12 + $0x208] sm:$0xff]  }
 0x248   :  { %1452 = vmatprep.mubr.bf16.mxu1 %v925_v24  ;;  %8085 = vmatpush3.bf16.msra.mxu1 %v9297_v46  ;;  %v8718_v50 = vpop.f32.mrb[24].mxu0 }
 0x249   :  { %8086 = vmatprep.subr.bf16.mxu1 %v9300_v48  ;;  %v866_v52 = vpop.f32.mrb[25].mxu0 }
 0x24a   :  { %v8719_v53 = vpop.f32.mrb[26].mxu0 }
 0x24b   :  { %v928_v54 = vpack.c.bf16 %v8719_v53, %v8718_v50  ;;  %v869_v55 = vpop.f32.mrb[27].mxu0 }
 0x24c   :  { %8087 = vmatpush3.bf16.msra.mxu1 %v9301_v49  ;;  %v919_v57 = vpack.c.bf16 %v869_v55, %v866_v52 }
 0x24d   :  { %8088 = vmatprep.subr.bf16.mxu1 %v9302_v51 }
 0x24f   :  { %1453 = vmatmul.mubr.bf16.gmra.mrb[12].mxu1 %v924_v14  ;;  %v9320_v14 = vld [vmem:[#allocation12 + $0x178] sm:$0xff]  }
 0x250   :  { %8089 = vmatpush3.bf16.msra.mxu1 %v9303_v56  ;;  %v8722_v60 = vpop.f32.mrb[28].mxu0  ;;  %1493 = vmatprep.mubr.bf16.mxu1 %v918_v47 }
 0x251   :  { %8090 = vmatprep.subr.bf16.mxu1 %v9306_v58  ;;  %v882_v62 = vpop.f32.mrb[29].mxu0 }
 0x252   :  { %v8723_v63 = vpop.f32.mrb[30].mxu0 }
 0x253   :  { %v929_v0 = vpack.c.bf16 %v8723_v63, %v8722_v60  ;;  %v885_v1 = vpop.f32.mrb[31].mxu0 }
 0x254   :  { %8091 = vmatpush3.bf16.msra.mxu1 %v9307_v59  ;;  %v920_v3 = vpack.c.bf16 %v885_v1, %v882_v62 }
 0x255   :  { %8092 = vmatprep.subr.bf16.mxu1 %v9308_v61 }
 0x256   :  { %1542 = vmatprep.mubr.bf16.mxu0 %v920_v3 }
 0x257   :  { %1543 = vmatmul.mubr.bf16.vlgmr.msra.gmra.mrb[36].mxu0 %v919_v57 }
 0x258   :  { %8093 = vmatpush3.bf16.msra.mxu1 %v9309_v2  ;;  %1550 = vmatprep.mubr.bf16.mxu0 %v929_v0  ;;  %v8726_v6 = vpop.f32.mrb[32].mxu0 }
 0x259   :  { %8094 = vmatprep.subr.bf16.mxu1 %v9312_v4  ;;  %v898_v8 = vpop.f32.mrb[33].mxu0 }
 0x25a   :  { %v8727_v9 = vpop.f32.mrb[34].mxu0 }
 0x25b   :  { %v930_v10 = vpack.c.bf16 %v8727_v9, %v8726_v6  ;;  %v901_v11 = vpop.f32.mrb[35].mxu0 }
 0x25c   :  { %8095 = vmatpush3.bf16.msra.mxu1 %v9313_v5  ;;  %v921_v13 = vpack.c.bf16 %v901_v11, %v898_v8 }
 0x25d   :  { %8096 = vmatprep.subr.bf16.mxu1 %v9316_v7 }
 0x25f   :  { %1551 = vmatmul.mubr.bf16.gmra.mrb[40].mxu0 %v928_v54 }
 0x260   :  { %8097 = vmatpush3.bf16.msra.mxu1 %v9317_v12 }
 0x261   :  { %8098 = vmatprep.subr.bf16.mxu1 %v9320_v14 }
 0x264   :  { %8099 = vmatpush3.bf16.msra.mxu1 %v9321_v15 }
 0x265   :  { %8728 = vmatprep.subr.bf16.mxu1 %v9324_v16 }
 0x267   :  { %1494 = vmatmul.mubr.bf16.vlgmr.msra.gmra.mrb[16].mxu1 %v917_v37 }
 0x268   :  { %1501 = vmatprep.mubr.bf16.mxu1 %v927_v44  ;;  %8729 = vmatpush3.bf16.msra.mxu1 %v9324_v16 }
 0x269   :  { %8730 = vmatprep.subr.bf16.mxu1 %v9325_v17 }
 0x26c   :  { %8731 = vmatpush3.bf16.msra.mxu1 %v9325_v17 }
 0x26d   :  { %8732 = vmatprep.subr.bf16.mxu1 %v9326_v18 }
 0x26f   :  { %1502 = vmatmul.mubr.bf16.gmra.mrb[20].mxu1 %v926_v34 }
 0x270   :  { %8733 = vmatpush3.bf16.msra.mxu1 %v9326_v18  ;;  %8744 = vmatprep.mubr.bf16.mxu1 %v921_v13 }
 0x271   :  { %8734 = vmatprep.subr.bf16.mxu1 %v9327_v19 }
 0x274   :  { %8735 = vmatpush3.bf16.msra.mxu1 %v9327_v19 }
 0x275   :  { %8736 = vmatprep.subr.bf16.mxu1 %v9328_v20 }
 0x278   :  { %8737 = vmatpush3.bf16.msra.mxu1 %v9328_v20 }
 0x279   :  { %8738 = vmatprep.subr.bf16.mxu1 %v9329_v21 }
 0x27c   :  { %8739 = vmatpush3.bf16.msra.mxu1 %v9329_v21 }
 0x27d   :  { %8740 = vmatprep.subr.bf16.mxu1 %v9330_v22 }
 0x280   :  { %8741 = vmatpush3.bf16.msra.mxu1 %v9330_v22 }
 0x281   :  { %8742 = vmatprep.subr.bf16.mxu1 %v9331_v23 }
 0x284   :  { %8743 = vmatpush3.bf16.msra.mxu1 %v9331_v23 }
 0x287   :  { %8745 = vmatmul.mubr.bf16.vlgmr.msra.gmra.mrb[24].mxu1 %v930_v10 }
 0x2fa   :  { %v8044_v24 = vpop.f32.mrb[0].mxu1 }
 0x2fb   :  { %v8045_v25 = vpop.f32.mrb[1].mxu1 }
 0x2fc   :  { %v8046_v26 = vadd.f32 %v8045_v25, %v8044_v24  ;;  %v8047_v27 = vpop.f32.mrb[2].mxu1 }
 0x2fd   :  { %v8048_v28 = vpop.f32.mrb[3].mxu1 }
 0x2fe   :  { %v8049_v29 = vadd.f32 %v8048_v28, %v8047_v27 }
 0x302   :  { %v8050_v30 = vpop.f32.mrb[4].mxu1 }
 0x303   :  { %v8051_v31 = vpop.f32.mrb[5].mxu1 }
 0x304   :  { %v8052_v32 = vadd.f32 %v8051_v31, %v8050_v30  ;;  %v8053_v33 = vpop.f32.mrb[6].mxu1 }
 0x305   :  { %v8054_v34 = vpop.f32.mrb[7].mxu1 }
 0x306   :  { %v8055_v35 = vadd.f32 %v8054_v34, %v8053_v33 }
 0x31a   :  { %v8072_v36 = vpop.f32.mrb[8].mxu1 }
 0x31b   :  { %v8073_v37 = vpop.f32.mrb[9].mxu1 }
 0x31c   :  { %v8074_v38 = vadd.f32 %v8073_v37, %v8072_v36  ;;  %v8075_v39 = vpop.f32.mrb[10].mxu1 }
 0x31d   :  { %v8076_v40 = vpop.f32.mrb[11].mxu1 }
 0x31e   :  { %v1447_v41 = vadd.f32 %v8074_v38, %v8046_v26  ;;  %v8077_v42 = vadd.f32 %v8076_v40, %v8075_v39 }
 0x320   :  { %v1450_v43 = vadd.f32 %v8077_v42, %v8049_v29 }
 0x322   :  { %v8078_v44 = vpop.f32.mrb[12].mxu1 }
 0x323   :  { %v8079_v45 = vpop.f32.mrb[13].mxu1 }
 0x324   :  { %9708 = shalt.err (!%p9705_p6)  }
 0x325   :  { %s9709_s2 = scalar_lea.vmem %s381_s26, 9216  ;;  %p9714_p8 = scmp.lt.s32.totalorder %s381_s26, %s381_s26 }
 0x326   :  { %p9710_p7 = scmp.ne.s32.totalorder %s381_s26, %s9709_s2  ;;  %p9715_p9 = scmp.lt.s32.totalorder %s9709_s2, %s9709_s2 }
 0x328   :  { %p9716_p10 = por %p9715_p9, %p9714_p8 }
 0x32a   :  { %p9717_p11 = pnand %p9716_p10, %p9710_p7 }
 0x32c   :  { %9720 = shalt.err (!%p9717_p11)  }
 0x32d   :  { %383 = dma.hbm_to_vmem [thread:$0]  %s11311_s20, 9216, %s381_s26, [#allocation8 + $0x5]  ;;  %v8080_v46 = vadd.f32 %v8079_v45, %v8078_v44  ;;  %v8081_v47 = vpop.f32.mrb[14].mxu1  ;;  %v8128_v52 = vpop.f32.mrb[36].mxu0 }
 0x32e   :  { %v8082_v48 = vpop.f32.mrb[15].mxu1  ;;  %v8129_v53 = vpop.f32.mrb[37].mxu0 }
 0x32f   :  { %v1455_v49 = vadd.f32 %v8080_v46, %v8052_v32  ;;  %v8083_v50 = vadd.f32 %v8082_v48, %v8081_v47  ;;  %v8130_v54 = vadd.f32 %v8129_v53, %v8128_v52  ;;  %v8131_v55 = vpop.f32.mrb[38].mxu0 }
 0x330   :  { %v8132_v56 = vpop.f32.mrb[39].mxu0 }
 0x331   :  { %v1458_v51 = vadd.f32 %v8083_v50, %v8055_v35  ;;  %v8133_v57 = vadd.f32 %v8132_v56, %v8131_v55  ;;  %v1644_v56 = vlaneseq }
 0x332   :  { %v8134_v58 = vpop.f32.mrb[40].mxu0 }
 0x333   :  { %v8135_v59 = vpop.f32.mrb[41].mxu0 }
 0x334   :  { %v8136_v60 = vadd.f32 %v8135_v59, %v8134_v58  ;;  %v8137_v61 = vpop.f32.mrb[42].mxu0  ;;  %v10230_v58 = vshrl.u32 %v1644_v56, 7 }
 0x335   :  { %v8138_v62 = vpop.f32.mrb[43].mxu0 }
 0x336   :  { %v8139_v63 = vadd.f32 %v8138_v62, %v8137_v61  ;;  %v10233_v59 = vsub.s32 0, %v10230_v58  ;;  %v10236_v61 = vsub.s32 1, %v10230_v58 }
 0x33a   :  { %v8100_v0 = vpop.f32.mrb[16].mxu1 }
 0x33b   :  { %v8101_v1 = vpop.f32.mrb[17].mxu1 }
 0x33c   :  { %v8102_v2 = vadd.f32 %v8101_v1, %v8100_v0  ;;  %v8103_v3 = vpop.f32.mrb[18].mxu1 }
 0x33d   :  { %v8104_v4 = vpop.f32.mrb[19].mxu1 }
 0x33e   :  { %v1496_v5 = vadd.f32 %v8102_v2, %v1447_v41  ;;  %v8105_v6 = vadd.f32 %v8104_v4, %v8103_v3 }
 0x340   :  { %v1499_v7 = vadd.f32 %v8105_v6, %v1450_v43  ;;  %v1545_v8 = vadd.f32 %v8130_v54, %v1496_v5 }
 0x342   :  { %v8106_v9 = vpop.f32.mrb[20].mxu1  ;;  %v1548_v10 = vadd.f32 %v8133_v57, %v1499_v7 }
 0x343   :  { %v8107_v11 = vpop.f32.mrb[21].mxu1 }
 0x344   :  { %v8108_v12 = vadd.f32 %v8107_v11, %v8106_v9  ;;  %v8109_v13 = vpop.f32.mrb[22].mxu1 }
 0x345   :  { %v8110_v14 = vpop.f32.mrb[23].mxu1 }
 0x346   :  { %v1504_v15 = vadd.f32 %v8108_v12, %v1455_v49  ;;  %v8111_v16 = vadd.f32 %v8110_v14, %v8109_v13 }
 0x348   :  { %v1507_v17 = vadd.f32 %v8111_v16, %v1458_v51  ;;  %v1553_v18 = vadd.f32 %v8136_v60, %v1504_v15  ;;  %v1608_v60 = vld [vmem:[#allocation14] sm:$0x3] }
 0x349   :  { %v1647_v62 = vrot.slane %v1608_v60, %v10233_v59  ;;  %v1655_v0 = vrot.slane %v1608_v60, %v10236_v61 }
 0x34a   :  { %v1556_v19 = vadd.f32 %v8139_v63, %v1507_v17 }
 0x35a   :  { %v8746_v20 = vpop.f32.mrb[24].mxu1 }
 0x35b   :  { %v1602_v21 = vadd.f32 %v8746_v20, %v1553_v18  ;;  %v1593_v22 = vpop.f32.mrb[25].mxu1 }
 0x35c   :  { %v1594_v23 = vadd.f32 %v1593_v22, %v1545_v8  ;;  %v8747_v24 = vpop.f32.mrb[26].mxu1 }
 0x35d   :  { %v1605_v25 = vadd.f32 %v8747_v24, %v1556_v19  ;;  %v1596_v26 = vpop.f32.mrb[27].mxu1 }
 0x35e   :  { %v1597_v27 = vadd.f32 %v1596_v26, %v1548_v10 }
 0x360   :  { %v1609_v28 = vadd.f32 %v1597_v27, %v1594_v23 }
 0x362   :  { %v1610_v29 = vadd.f32 %v1609_v28, %v1602_v21 }
 0x364   :  { %v1611_v30 = vadd.f32 %v1610_v29, %v1605_v25 }
 0x366   :  { %v1612_v31 = vrot.slane %v1611_v30, 4 }
 0x368   :  { %v1613_v32 = vadd.f32 %v1612_v31, %v1611_v30 }
 0x36a   :  { %v1614_v33 = vrot.slane %v1613_v32, 2 }
 0x36c   :  { %v1615_v34 = vadd.f32 %v1614_v33, %v1613_v32 }
 0x36e   :  { %v1616_v35 = vrot.slane %v1615_v34, 1 }
 0x370   :  { %v1617_v36 = vadd.f32 %v1616_v35, %v1615_v34 }
 0x372   :  { %v1619_v37 = vmul.f32 0.03125, %v1617_v36 }
 0x374   :  { %v1620_v38 = vsub.f32 %v1594_v23, %v1619_v37  ;;  %v1621_v39 = vsub.f32 %v1597_v27, %v1619_v37  ;;  %v1622_v40 = vsub.f32 %v1602_v21, %v1619_v37  ;;  %v1623_v41 = vsub.f32 %v1605_v25, %v1619_v37 }
 0x376   :  { %v1624_v42 = vmul.f32 %v1620_v38, %v1620_v38  ;;  %v1625_v43 = vmul.f32 %v1621_v39, %v1621_v39  ;;  %v1626_v44 = vmul.f32 %v1622_v40, %v1622_v40  ;;  %v1627_v46 = vmul.f32 %v1623_v41, %v1623_v41 }
 0x378   :  { %v1628_v45 = vadd.f32 %v1625_v43, %v1624_v42 }
 0x37a   :  { %v1629_v47 = vadd.f32 %v1628_v45, %v1626_v44 }
 0x37c   :  { %v1630_v48 = vadd.f32 %v1629_v47, %v1627_v46 }
 0x37e   :  { %v1631_v49 = vrot.slane %v1630_v48, 4 }
 0x380   :  { %v1632_v50 = vadd.f32 %v1631_v49, %v1630_v48 }
 0x382   :  { %v1633_v51 = vrot.slane %v1632_v50, 2 }
 0x384   :  { %v1634_v52 = vadd.f32 %v1633_v51, %v1632_v50 }
 0x386   :  { %v1635_v53 = vrot.slane %v1634_v52, 1 }
 0x388   :  { %v1636_v54 = vadd.f32 %v1635_v53, %v1634_v52 }
 0x38a   :  { %v1637_v55 = vmul.f32 0.03125, %v1636_v54 }
 0x38c   :  { %v1638_v57 = vadd.f32 1e-05, %v1637_v55 }
 0x38e   :  { %9332 = vrsqrt.f32 %v1638_v57 }
 0x398   :  { %v9333_v63 = vpop.eup %9332 }
 0x399   :  { %v1640_v1 = vmul.f32 %v9333_v63, %v1620_v38  ;;  %v1641_v2 = vmul.f32 %v9333_v63, %v1621_v39  ;;  %v1642_v3 = vmul.f32 %v9333_v63, %v1622_v40  ;;  %v1643_v4 = vmul.f32 %v9333_v63, %v1623_v41 }
 0x39b   :  { %v1648_v5 = vmul.f32 %v1647_v62, %v1640_v1  ;;  %v1649_v6 = vmul.f32 %v1647_v62, %v1641_v2  ;;  %v1650_v7 = vmul.f32 %v1647_v62, %v1642_v3  ;;  %v1651_v8 = vmul.f32 %v1647_v62, %v1643_v4 }
 0x39d   :  { %v1656_v9 = vadd.f32 %v1655_v0, %v1648_v5  ;;  %v1657_v10 = vadd.f32 %v1655_v0, %v1649_v6  ;;  %v1658_v11 = vadd.f32 %v1655_v0, %v1650_v7  ;;  %v1659_v12 = vadd.f32 %v1655_v0, %v1651_v8 }
 0x39f   :  { %vm1660_vm0 = vcmp.ge.f32.partialorder %v1656_v9, 0.0  ;;  %vm1661_vm1 = vcmp.ge.f32.partialorder %v1657_v10, 0.0  ;;  %vm1662_vm2 = vcmp.ge.f32.partialorder %v1658_v11, 0.0  ;;  %vm1663_vm3 = vcmp.ge.f32.partialorder %v1659_v12, 0.0 }
 0x3a0   :  { %v1664_v13 = vmul.f32 0.01, %v1656_v9  ;;  %v1665_v14 = vmul.f32 0.01, %v1657_v10  ;;  %v1666_v15 = vmul.f32 0.01, %v1658_v11 }
 0x3a1   :  { %v1667_v16 = vmul.f32 0.01, %v1659_v12 }
 0x3a2   :  { %v1668_v17 = vsel %vm1660_vm0, %v1656_v9, %v1664_v13  ;;  %v1669_v18 = vsel %vm1661_vm1, %v1657_v10, %v1665_v14  ;;  %v1670_v19 = vsel %vm1662_vm2, %v1658_v11, %v1666_v15 }
 0x3a3   :  { %v1671_v20 = vsel %vm1663_vm3, %v1659_v12, %v1667_v16 }
 0x3a4   :  { %9777 = dma.done.wait [#allocation8], 36864 }
 0x3a5   :  { %9778 = vsyncadd [#allocation8], 4294930432  ;;  %v1676_v21 = vpack.c.bf16 %v1669_v18, %v1668_v17  ;;  %v9832_v22 = vmov 0.0   ;;  %vm9833_vm4 = vmmov 0   ;;  %v1677_v23 = vpack.c.bf16 %v1671_v20, %v1670_v19  ;;  %s11341_s13 = sld [smem:[#allocation63_spill]]  ;;  %v1688_v25 = vld [vmem:[#allocation2 + $0x8] sm:$0xff] }
 0x3a6   :  { %8748 = vmatprep.subr.bf16.mxu0 %v9832_v22  ;;  %8752 = vmatprep.mubr.msk.bf16.mxu0 %vm9833_vm4, %v9832_v22  ;;  %vm1998_vm5 = vcmask 261120   ;;  %v1690_v26 = vld [vmem:[#allocation2 + $0x18] sm:$0xff]  ;;  %v1687_v27 = vld [vmem:[#allocation2] sm:$0xff]  ;;  %v1689_v28 = vld [vmem:[#allocation2 + $0x10] sm:$0xff]  ;;  %vm2728_vm7 = vcmask 1040384  }
 0x3a7   :  { %8749 = vmatpush3.bf16.msra.mxu0 %v1676_v21  ;;  %2300 = vmatprep.subr.bf16.mxu1 %v1690_v26  ;;  %v1692_v29 = vld [vmem:[#allocation2 + $0x28] sm:$0xff]  ;;  %v1694_v30 = vld [vmem:[#allocation2 + $0x38] sm:$0xff]  ;;  %v1691_v32 = vld [vmem:[#allocation2 + $0x20] sm:$0xff] }
 0x3a8   :  { %8750 = vmatprep.subr.bf16.mxu0 %v9832_v22  ;;  %2301 = vmatpush1.bf16.msra.mxu1 %v1689_v28  ;;  %v1693_v33 = vld [vmem:[#allocation2 + $0x30] sm:$0xff]  ;;  %v1696_v34 = vld [vmem:[#allocation2 + $0x48] sm:$0xff]  ;;  %v1698_v35 = vld [vmem:[#allocation2 + $0x58] sm:$0xff] }
 0x3a9   :  { %2302 = vmatprep.subr.bf16.mxu1 %v1694_v30  ;;  %v1695_v36 = vld [vmem:[#allocation2 + $0x40] sm:$0xff]  ;;  %v1697_v37 = vld [vmem:[#allocation2 + $0x50] sm:$0xff]  ;;  %v1700_v38 = vld [vmem:[#allocation2 + $0x68] sm:$0xff] }
 0x3aa   :  { %v1702_v39 = vld [vmem:[#allocation2 + $0x78] sm:$0xff]  ;;  %v1699_v41 = vld [vmem:[#allocation2 + $0x60] sm:$0xff]  ;;  %v1701_v42 = vld [vmem:[#allocation2 + $0x70] sm:$0xff] }
 0x3ab   :  { %8751 = vmatpush3.bf16.msra.mxu0 %v1677_v23  ;;  %v9334_v24 = vld [vmem:[%s11341_s13] sm:$0xff]   ;;  %v9335_v31 = vld [vmem:[%s11341_s13 + $0x8] sm:$0xff]   ;;  %v9336_v40 = vld [vmem:[%s11341_s13 + $0x10] sm:$0xff]  }
 0x3ac   :  { %2095 = vmatprep.subr.bf16.mxu0 %v1688_v25  ;;  %2303 = vmatpush1.bf16.msra.mxu1 %v1693_v33  ;;  %v1704_v43 = vld [vmem:[#allocation2 + $0x88] sm:$0xff]  ;;  %v1706_v44 = vld [vmem:[#allocation2 + $0x98] sm:$0xff]  ;;  %v1703_v45 = vld [vmem:[#allocation2 + $0x80] sm:$0xff] }
 0x3ad   :  { %2304 = vmatprep.subr.bf16.mxu1 %v1698_v35  ;;  %v1705_v46 = vld [vmem:[#allocation2 + $0x90] sm:$0xff]  ;;  %v1708_v47 = vld [vmem:[#allocation2 + $0xa8] sm:$0xff]  ;;  %v1710_v48 = vld [vmem:[#allocation2 + $0xb8] sm:$0xff] }
 0x3ae   :  { %8753 = vmatmul.mubr.msk.bf16.vlgmr.msra.gmra.mrb[44].mxu0 %vm1998_vm5, %v9334_v24  ;;  %v1707_v49 = vld [vmem:[#allocation2 + $0xa0] sm:$0xff]  ;;  %v1709_v50 = vld [vmem:[#allocation2 + $0xb0] sm:$0xff]  ;;  %v1712_v51 = vld [vmem:[#allocation2 + $0xc8] sm:$0xff] }
 0x3af   :  { %8756 = vmatprep.mubr.msk.bf16.mxu0 %vm9833_vm4, %v9832_v22  ;;  %2096 = vmatpush1.bf16.msra.mxu0 %v1687_v27  ;;  %v1714_v52 = vld [vmem:[#allocation2 + $0xd8] sm:$0xff]  ;;  %v1711_v54 = vld [vmem:[#allocation2 + $0xc0] sm:$0xff]  ;;  %v1713_v55 = vld [vmem:[#allocation2 + $0xd0] sm:$0xff] }
 0x3b0   :  { %2097 = vmatprep.subr.bf16.mxu0 %v1692_v29  ;;  %2305 = vmatpush1.bf16.msra.mxu1 %v1697_v37  ;;  %v9337_v53 = vld [vmem:[%s11341_s13 + $0x18] sm:$0xff]   ;;  %v1716_v56 = vld [vmem:[#allocation2 + $0xe8] sm:$0xff]  ;;  %v1715_v60 = vld [vmem:[#allocation2 + $0xe0] sm:$0xff] }
 0x3b1   :  { %2306 = vmatprep.subr.bf16.mxu1 %v1702_v39  ;;  %v1718_v57 = vld [vmem:[#allocation2 + $0xf8] sm:$0xff]  ;;  %v1717_v62 = vld [vmem:[#allocation2 + $0xf0] sm:$0xff]  ;;  %v1720_v63 = vld [vmem:[#allocation2 + $0x108] sm:$0xff] }
 0x3b2   :  { %v1722_v0 = vld [vmem:[#allocation2 + $0x118] sm:$0xff]  ;;  %v9338_v1 = vld [vmem:[%s11341_s13 + $0x20] ss:$0 sps:$4 sm:$0xff]   ;;  %v1721_v3 = vld [vmem:[#allocation2 + $0x110] sm:$0xff] }
 0x3b3   :  { %2098 = vmatpush1.bf16.msra.mxu0 %v1691_v32  ;;  %v1719_v2 = vld [vmem:[#allocation2 + $0x100] sm:$0xff]  ;;  %v1724_v4 = vld [vmem:[#allocation2 + $0x128] sm:$0xff]  ;;  %v1726_v5 = vld [vmem:[#allocation2 + $0x138] sm:$0xff] }
 0x3b4   :  { %2099 = vmatprep.subr.bf16.mxu0 %v1696_v34  ;;  %2307 = vmatpush1.bf16.msra.mxu1 %v1701_v42  ;;  %v1723_v6 = vld [vmem:[#allocation2 + $0x120] sm:$0xff]  ;;  %v1725_v7 = vld [vmem:[#allocation2 + $0x130] sm:$0xff]  ;;  %v1728_v8 = vld [vmem:[#allocation2 + $0x148] sm:$0xff] }
 0x3b5   :  { %2308 = vmatprep.subr.bf16.mxu1 %v1706_v44  ;;  %v1730_v9 = vld [vmem:[#allocation2 + $0x158] sm:$0xff]  ;;  %v1727_v10 = vld [vmem:[#allocation2 + $0x140] sm:$0xff]  ;;  %v1729_v11 = vld [vmem:[#allocation2 + $0x150] sm:$0xff] }
 0x3b6   :  { %8757 = vmatmul.mubr.msk.bf16.gmra.mrb[48].mxu0 %vm1998_vm5, %v9335_v31  ;;  %v1732_v12 = vld [vmem:[#allocation2 + $0x168] sm:$0xff]  ;;  %v1734_v13 = vld [vmem:[#allocation2 + $0x178] sm:$0xff]  ;;  %v1731_v14 = vld [vmem:[#allocation2 + $0x160] sm:$0xff] }
 0x3b7   :  { %8760 = vmatprep.mubr.msk.bf16.mxu0 %vm9833_vm4, %v9832_v22  ;;  %2100 = vmatpush1.bf16.msra.mxu0 %v1695_v36  ;;  %v1733_v15 = vld [vmem:[#allocation2 + $0x170] sm:$0xff]  ;;  %v1736_v16 = vld [vmem:[#allocation2 + $0x188] sm:$0xff]  ;;  %v1738_v17 = vld [vmem:[#allocation2 + $0x198] sm:$0xff] }
 0x3b8   :  { %2101 = vmatprep.subr.bf16.mxu0 %v1700_v38  ;;  %2309 = vmatpush1.bf16.msra.mxu1 %v1705_v46  ;;  %v1735_v18 = vld [vmem:[#allocation2 + $0x180] sm:$0xff]  ;;  %v1737_v19 = vld [vmem:[#allocation2 + $0x190] sm:$0xff]  ;;  %v1740_v20 = vld [vmem:[#allocation2 + $0x1a8] sm:$0xff] }
 0x3b9   :  { %2310 = vmatprep.subr.bf16.mxu1 %v1710_v48  ;;  %v1742_v21 = vld [vmem:[#allocation2 + $0x1b8] sm:$0xff]  ;;  %v1741_v23 = vld [vmem:[#allocation2 + $0x1b0] sm:$0xff]  ;;  %v1744_v24 = vld [vmem:[#allocation2 + $0x1c8] sm:$0xff] }
 0x3ba   :  { %v1746_v25 = vld [vmem:[#allocation2 + $0x1d8] sm:$0xff]  ;;  %v1743_v26 = vld [vmem:[#allocation2 + $0x1c0] sm:$0xff]  ;;  %v1745_v27 = vld [vmem:[#allocation2 + $0x1d0] sm:$0xff] }
 0x3bb   :  { %2102 = vmatpush1.bf16.msra.mxu0 %v1699_v41  ;;  %v1748_v28 = vld [vmem:[#allocation2 + $0x1e8] sm:$0xff]  ;;  %v1750_v29 = vld [vmem:[#allocation2 + $0x1f8] sm:$0xff]  ;;  %v1747_v30 = vld [vmem:[#allocation2 + $0x1e0] sm:$0xff] }
 0x3bc   :  { %2103 = vmatprep.subr.bf16.mxu0 %v1704_v43  ;;  %2311 = vmatpush1.bf16.msra.mxu1 %v1709_v50  ;;  %v1749_v31 = vld [vmem:[#allocation2 + $0x1f0] sm:$0xff]  ;;  %v1752_v32 = vld [vmem:[#allocation2 + $0x208] sm:$0xff]  ;;  %v1754_v33 = vld [vmem:[#allocation2 + $0x218] sm:$0xff] }
 0x3bd   :  { %2312 = vmatprep.subr.bf16.mxu1 %v1714_v52  ;;  %v1753_v41 = vld [vmem:[#allocation2 + $0x210] sm:$0xff]  ;;  %v1756_v42 = vld [vmem:[#allocation2 + $0x228] sm:$0xff]  ;;  %v1758_v43 = vld [vmem:[#allocation2 + $0x238] sm:$0xff] }
 0x3be   :  { %8761 = vmatmul.mubr.msk.bf16.gmra.mrb[52].mxu0 %vm1998_vm5, %v9336_v40  ;;  %v1751_v40 = vld [vmem:[#allocation2 + $0x200] sm:$0xff]  ;;  %v1762_v48 = vld [vmem:[#allocation2 + $0x258] sm:$0xff] }
 0x3bf   :  { %8764 = vmatprep.mubr.msk.bf16.mxu0 %vm9833_vm4, %v9832_v22  ;;  %2104 = vmatpush1.bf16.msra.mxu0 %v1703_v45  ;;  %v1755_v44 = vld [vmem:[#allocation2 + $0x220] sm:$0xff]  ;;  %v1757_v45 = vld [vmem:[#allocation2 + $0x230] sm:$0xff] }
 0x3c0   :  { %2105 = vmatprep.subr.bf16.mxu0 %v1708_v47  ;;  %2313 = vmatpush1.bf16.msra.mxu1 %v1713_v55  ;;  %v1760_v47 = vld [vmem:[#allocation2 + $0x248] sm:$0xff] }
 0x3c1   :  { %2314 = vmatprep.subr.bf16.mxu1 %v1718_v57  ;;  %v1764_v55 = vld [vmem:[#allocation2 + $0x268] sm:$0xff]  ;;  %v1763_v57 = vld [vmem:[#allocation2 + $0x260] sm:$0xff] }
 0x3c3   :  { %2106 = vmatpush1.bf16.msra.mxu0 %v1707_v49 }
 0x3c4   :  { %2107 = vmatprep.subr.bf16.mxu0 %v1712_v51  ;;  %2315 = vmatpush1.bf16.msra.mxu1 %v1717_v62 }
 0x3c5   :  { %2316 = vmatprep.subr.bf16.mxu1 %v1722_v0  ;;  %v1770_v0 = vld [vmem:[#allocation2 + $0x298] sm:$0xff] }
 0x3c6   :  { %8765 = vmatmul.mubr.msk.bf16.gmra.mrb[56].mxu0 %vm1998_vm5, %v9337_v53  ;;  %v1759_v53 = vld [vmem:[#allocation2 + $0x240] sm:$0xff] }
 0x3c7   :  { %8768 = vmatprep.mubr.msk.bf16.mxu0 %vm9833_vm4, %v9832_v22  ;;  %2108 = vmatpush1.bf16.msra.mxu0 %v1711_v54  ;;  %v1739_v22 = vld [vmem:[#allocation2 + $0x1a0] sm:$0xff]  ;;  %v1761_v54 = vld [vmem:[#allocation2 + $0x250] sm:$0xff] }
 0x3c8   :  { %2109 = vmatprep.subr.bf16.mxu0 %v1716_v56  ;;  %2317 = vmatpush1.bf16.msra.mxu1 %v1721_v3  ;;  %v1766_v56 = vld [vmem:[#allocation2 + $0x278] sm:$0xff] }
 0x3c9   :  { %2318 = vmatprep.subr.bf16.mxu1 %v1726_v5  ;;  %v1769_v5 = vld [vmem:[#allocation2 + $0x290] sm:$0xff] }
 0x3cb   :  { %2110 = vmatpush1.bf16.msra.mxu0 %v1715_v60  ;;  %v1765_v60 = vld [vmem:[#allocation2 + $0x270] sm:$0xff] }
 0x3cc   :  { %2111 = vmatprep.subr.bf16.mxu0 %v1720_v63  ;;  %2319 = vmatpush1.bf16.msra.mxu1 %v1725_v7  ;;  %v1768_v63 = vld [vmem:[#allocation2 + $0x288] sm:$0xff]  ;;  %v1774_v7 = vld [vmem:[#allocation2 + $0x2b8] sm:$0xff] }
 0x3cd   :  { %2320 = vmatprep.subr.bf16.mxu1 %v1730_v9  ;;  %v1773_v9 = vld [vmem:[#allocation2 + $0x2b0] sm:$0xff] }
 0x3ce   :  { %8769 = vmatmul.mubr.msk.bf16.gmra.mrb[60].mxu0 %vm1998_vm5, %v9338_v1 }
 0x3cf   :  { %2112 = vmatpush1.bf16.msra.mxu0 %v1719_v2 }
 0x3d0   :  { %2113 = vmatprep.subr.bf16.mxu0 %v1724_v4  ;;  %2321 = vmatpush1.bf16.msra.mxu1 %v1729_v11  ;;  %v1767_v4 = vld [vmem:[#allocation2 + $0x280] sm:$0xff]  ;;  %v1778_v11 = vld [vmem:[#allocation2 + $0x2d8] sm:$0xff] }
 0x3d1   :  { %2322 = vmatprep.subr.bf16.mxu1 %v1734_v13  ;;  %v1777_v13 = vld [vmem:[#allocation2 + $0x2d0] sm:$0xff] }
 0x3d3   :  { %2114 = vmatpush1.bf16.msra.mxu0 %v1723_v6  ;;  %v1772_v6 = vld [vmem:[#allocation2 + $0x2a8] sm:$0xff] }
 0x3d4   :  { %2115 = vmatprep.subr.bf16.mxu0 %v1728_v8  ;;  %2323 = vmatpush1.bf16.msra.mxu1 %v1733_v15  ;;  %v1771_v8 = vld [vmem:[#allocation2 + $0x2a0] sm:$0xff]  ;;  %v1782_v15 = vld [vmem:[#allocation2 + $0x2f8] sm:$0xff] }
 0x3d5   :  { %2324 = vmatprep.subr.bf16.mxu1 %v1738_v17  ;;  %v1781_v17 = vld [vmem:[#allocation2 + $0x2f0] sm:$0xff] }
 0x3d7   :  { %2116 = vmatpush1.bf16.msra.mxu0 %v1727_v10  ;;  %v1776_v10 = vld [vmem:[#allocation2 + $0x2c8] sm:$0xff] }
 0x3d8   :  { %2117 = vmatprep.subr.bf16.mxu0 %v1732_v12  ;;  %2325 = vmatpush1.bf16.msra.mxu1 %v1737_v19  ;;  %v1775_v12 = vld [vmem:[#allocation2 + $0x2c0] sm:$0xff]  ;;  %v1786_v19 = vld [vmem:[#allocation2 + $0x318] sm:$0xff] }
 0x3d9   :  { %2326 = vmatprep.subr.bf16.mxu1 %v1742_v21  ;;  %v1785_v21 = vld [vmem:[#allocation2 + $0x310] sm:$0xff] }
 0x3db   :  { %2118 = vmatpush1.bf16.msra.mxu0 %v1731_v14  ;;  %v1780_v14 = vld [vmem:[#allocation2 + $0x2e8] sm:$0xff] }
 0x3dc   :  { %2119 = vmatprep.subr.bf16.mxu0 %v1736_v16  ;;  %2327 = vmatpush1.bf16.msra.mxu1 %v1741_v23  ;;  %v1779_v16 = vld [vmem:[#allocation2 + $0x2e0] sm:$0xff]  ;;  %v1790_v23 = vld [vmem:[#allocation2 + $0x338] sm:$0xff] }
 0x3dd   :  { %2328 = vmatprep.subr.bf16.mxu1 %v1746_v25  ;;  %v1789_v25 = vld [vmem:[#allocation2 + $0x330] sm:$0xff] }
 0x3df   :  { %2120 = vmatpush1.bf16.msra.mxu0 %v1735_v18  ;;  %v1784_v18 = vld [vmem:[#allocation2 + $0x308] sm:$0xff] }
 0x3e0   :  { %2121 = vmatprep.subr.bf16.mxu0 %v1740_v20  ;;  %2329 = vmatpush1.bf16.msra.mxu1 %v1745_v27  ;;  %v1783_v20 = vld [vmem:[#allocation2 + $0x300] sm:$0xff]  ;;  %v1794_v27 = vld [vmem:[#allocation2 + $0x358] sm:$0xff] }
 0x3e1   :  { %2330 = vmatprep.subr.bf16.mxu1 %v1750_v29  ;;  %v1793_v29 = vld [vmem:[#allocation2 + $0x350] sm:$0xff] }
 0x3e3   :  { %2122 = vmatpush1.bf16.msra.mxu0 %v1739_v22  ;;  %v1788_v22 = vld [vmem:[#allocation2 + $0x328] sm:$0xff] }
 0x3e4   :  { %2123 = vmatprep.subr.bf16.mxu0 %v1744_v24  ;;  %2331 = vmatpush1.bf16.msra.mxu1 %v1749_v31  ;;  %v1787_v24 = vld [vmem:[#allocation2 + $0x320] sm:$0xff]  ;;  %v1798_v31 = vld [vmem:[#allocation2 + $0x378] sm:$0xff] }
 0x3e5   :  { %2341 = vmatprep.subr.bf16.mxu1 %v1754_v33  ;;  %v1797_v33 = vld [vmem:[#allocation2 + $0x370] sm:$0xff] }
 0x3e7   :  { %2124 = vmatpush1.bf16.msra.mxu0 %v1743_v26  ;;  %v1792_v26 = vld [vmem:[#allocation2 + $0x348] sm:$0xff] }
 0x3e8   :  { %2125 = vmatprep.subr.bf16.mxu0 %v1748_v28  ;;  %v1791_v28 = vld [vmem:[#allocation2 + $0x340] sm:$0xff] }
 0x3eb   :  { %2126 = vmatpush1.bf16.msra.mxu0 %v1747_v30  ;;  %v1796_v30 = vld [vmem:[#allocation2 + $0x368] sm:$0xff] }
 0x3ec   :  { %2136 = vmatprep.subr.bf16.mxu0 %v1752_v32  ;;  %v1795_v32 = vld [vmem:[#allocation2 + $0x360] sm:$0xff] }
 0x481   :  { %v2048_v34 = vpop.f32.mrb[44].mxu0 }
 0x482   :  { %v8754_v35 = vpop.f32.mrb[45].mxu0  ;;  %v2086_v39 = vpack.c.bf16 %v2048_v34, %v2048_v34  ;;  %v1800_v34 = vld [vmem:[#allocation2 + $0x388] sm:$0xff] }
 0x483   :  { %v2051_v36 = vpop.f32.mrb[46].mxu0  ;;  %v1802_v35 = vld [vmem:[#allocation2 + $0x398] sm:$0xff] }
 0x484   :  { %v2087_v37 = vpack.c.bf16 %v2051_v36, %v2051_v36  ;;  %v8755_v38 = vpop.f32.mrb[47].mxu0  ;;  %v1799_v36 = vld [vmem:[#allocation2 + $0x380] sm:$0xff] }
 0x485   :  { %v1804_v38 = vld [vmem:[#allocation2 + $0x3a8] sm:$0xff] }
 0x486   :  { %2127 = vmatprep.mubr.bf16.mxu0 %v2087_v37  ;;  %2332 = vmatprep.mubr.bf16.mxu1 %v2087_v37  ;;  %v1801_v37 = vld [vmem:[#allocation2 + $0x390] sm:$0xff] }
 0x487   :  { %2128 = vmatmul.mubr.bf16.vlgmr.msra.gmra.mrb[64].mxu0 %v2086_v39  ;;  %2333 = vmatmul.mubr.bf16.vlgmr.msra.gmra.mrb[28].mxu1 %v2086_v39  ;;  %v1806_v39 = vld [vmem:[#allocation2 + $0x3b8] sm:$0xff] }
 0x488   :  { %2137 = vmatpush1.bf16.msra.mxu0 %v1751_v40  ;;  %2342 = vmatpush1.bf16.msra.mxu1 %v1753_v41  ;;  %v1803_v40 = vld [vmem:[#allocation2 + $0x3a0] sm:$0xff]  ;;  %v1805_v41 = vld [vmem:[#allocation2 + $0x3b0] sm:$0xff] }
 0x489   :  { %2138 = vmatprep.subr.bf16.mxu0 %v1756_v42  ;;  %2343 = vmatprep.subr.bf16.mxu1 %v1758_v43  ;;  %v10272_v46 = vpop.f32.mrb[48].mxu0  ;;  %v1808_v42 = vld [vmem:[#allocation2 + $0x3c8] sm:$0xff]  ;;  %v1810_v43 = vld [vmem:[#allocation2 + $0x3d8] sm:$0xff] }
 0x48a   :  { %v8758_v49 = vpop.f32.mrb[49].mxu0 }
 0x48b   :  { %v2059_v50 = vpop.f32.mrb[50].mxu0  ;;  %v1812_v49 = vld [vmem:[#allocation2 + $0x3e8] sm:$0xff] }
 0x48c   :  { %2139 = vmatpush1.bf16.msra.mxu0 %v1755_v44  ;;  %2344 = vmatpush1.bf16.msra.mxu1 %v1757_v45  ;;  %v2089_v51 = vpack.c.bf16 %v2059_v50, %v2059_v50  ;;  %v8759_v52 = vpop.f32.mrb[51].mxu0  ;;  %v1807_v45 = vld [vmem:[#allocation2 + $0x3c0] sm:$0xff]  ;;  %v1814_v50 = vld [vmem:[#allocation2 + $0x3f8] sm:$0xff] }
 0x48d   :  { %2140 = vmatprep.subr.bf16.mxu0 %v1760_v47  ;;  %2345 = vmatprep.subr.bf16.mxu1 %v1762_v48  ;;  %v1809_v47 = vld [vmem:[#allocation2 + $0x3d0] sm:$0xff]  ;;  %v1811_v52 = vld [vmem:[#allocation2 + $0x3e0] sm:$0xff] }
 0x48e   :  { %2168 = vmatprep.mubr.bf16.mxu0 %v2089_v51  ;;  %2373 = vmatprep.mubr.bf16.mxu1 %v2089_v51 }
 0x490   :  { %2141 = vmatpush1.bf16.msra.mxu0 %v1759_v53  ;;  %2346 = vmatpush1.bf16.msra.mxu1 %v1761_v54  ;;  %v1813_v53 = vld [vmem:[#allocation2 + $0x3f0] sm:$0xff] }
 0x491   :  { %2142 = vmatprep.subr.bf16.mxu0 %v1764_v55  ;;  %2347 = vmatprep.subr.bf16.mxu1 %v1766_v56  ;;  %v10274_v62 = vpop.f32.mrb[52].mxu0  ;;  %v1816_v55 = vld [vmem:[#allocation2 + $0x408] sm:$0xff]  ;;  %v1818_v56 = vld [vmem:[#allocation2 + $0x418] sm:$0xff] }
 0x492   :  { %v8762_v1 = vpop.f32.mrb[53].mxu0 }
 0x493   :  { %v10276_v2 = vpop.f32.mrb[54].mxu0  ;;  %v1822_v1 = vld [vmem:[#allocation2 + $0x438] sm:$0xff] }
 0x494   :  { %2143 = vmatpush1.bf16.msra.mxu0 %v1763_v57  ;;  %2348 = vmatpush1.bf16.msra.mxu1 %v1765_v60  ;;  %v8763_v3 = vpop.f32.mrb[55].mxu0  ;;  %v2088_v57 = vpack.c.bf16 %v10272_v46, %v10272_v46  ;;  %v1815_v60 = vld [vmem:[#allocation2 + $0x400] sm:$0xff] }
 0x495   :  { %2144 = vmatprep.subr.bf16.mxu0 %v1768_v63  ;;  %2349 = vmatprep.subr.bf16.mxu1 %v1770_v0  ;;  %v1817_v63 = vld [vmem:[#allocation2 + $0x410] sm:$0xff]  ;;  %v1820_v0 = vld [vmem:[#allocation2 + $0x428] sm:$0xff]  ;;  %v2091_v3 = vpack.c.bf16 %v10276_v2, %v10276_v2  ;;  %v1823_v46 = vld [vmem:[#allocation2 + $0x440] sm:$0xff] }
 0x496   :  { %v1828_v2 = vld [vmem:[#allocation2 + $0x468] sm:$0xff] }
 0x498   :  { %2145 = vmatpush1.bf16.msra.mxu0 %v1767_v4  ;;  %2350 = vmatpush1.bf16.msra.mxu1 %v1769_v5  ;;  %v1819_v4 = vld [vmem:[#allocation2 + $0x420] sm:$0xff]  ;;  %v1821_v5 = vld [vmem:[#allocation2 + $0x430] sm:$0xff] }
 0x499   :  { %2146 = vmatprep.subr.bf16.mxu0 %v1772_v6  ;;  %2351 = vmatprep.subr.bf16.mxu1 %v1774_v7  ;;  %v10278_v44 = vpop.f32.mrb[56].mxu0  ;;  %v1824_v6 = vld [vmem:[#allocation2 + $0x448] sm:$0xff]  ;;  %v1826_v7 = vld [vmem:[#allocation2 + $0x458] sm:$0xff] }
 0x49a   :  { %v8766_v48 = vpop.f32.mrb[57].mxu0 }
 0x49b   :  { %v10280_v51 = vpop.f32.mrb[58].mxu0  ;;  %v1859_v48 = vld [vmem:[#allocation2 + $0x560] sm:$0xff] }
 0x49c   :  { %2147 = vmatpush1.bf16.msra.mxu0 %v1771_v8  ;;  %2352 = vmatpush1.bf16.msra.mxu1 %v1773_v9  ;;  %v8767_v54 = vpop.f32.mrb[59].mxu0  ;;  %v1825_v8 = vld [vmem:[#allocation2 + $0x450] sm:$0xff] }
 0x49d   :  { %2148 = vmatprep.subr.bf16.mxu0 %v1776_v10  ;;  %2353 = vmatprep.subr.bf16.mxu1 %v1778_v11  ;;  %v1830_v10 = vld [vmem:[#allocation2 + $0x478] sm:$0xff]  ;;  %v1865_v54 = vld [vmem:[#allocation2 + $0x590] sm:$0xff] }
 0x4a0   :  { %2149 = vmatpush1.bf16.msra.mxu0 %v1775_v12  ;;  %2354 = vmatpush1.bf16.msra.mxu1 %v1777_v13 }
 0x4a1   :  { %2150 = vmatprep.subr.bf16.mxu0 %v1780_v14  ;;  %2355 = vmatprep.subr.bf16.mxu1 %v1782_v15  ;;  %v10286_v9 = vpop.f32.mrb[60].mxu0  ;;  %v1827_v14 = vld [vmem:[#allocation2 + $0x460] sm:$0xff]  ;;  %v1829_v15 = vld [vmem:[#allocation2 + $0x470] sm:$0xff] }
 0x4a2   :  { %v8770_v11 = vpop.f32.mrb[61].mxu0 }
 0x4a3   :  { %v2083_v12 = vpop.f32.mrb[62].mxu0  ;;  %v1881_v11 = vld [vmem:[#allocation2 + $0x610] sm:$0xff] }
 0x4a4   :  { %2151 = vmatpush1.bf16.msra.mxu0 %v1779_v16  ;;  %2356 = vmatpush1.bf16.msra.mxu1 %v1781_v17  ;;  %v8771_v13 = vpop.f32.mrb[63].mxu0  ;;  %v1832_v16 = vld [vmem:[#allocation2 + $0x488] sm:$0xff]  ;;  %v1834_v17 = vld [vmem:[#allocation2 + $0x498] sm:$0xff] }
 0x4a5   :  { %2152 = vmatprep.subr.bf16.mxu0 %v1784_v18  ;;  %2357 = vmatprep.subr.bf16.mxu1 %v1786_v19  ;;  %v1831_v18 = vld [vmem:[#allocation2 + $0x480] sm:$0xff]  ;;  %v1833_v19 = vld [vmem:[#allocation2 + $0x490] sm:$0xff]  ;;  %v1884_v12 = vld [vmem:[#allocation2 + $0x628] sm:$0xff] }
 0x4a6   :  { %v1886_v13 = vld [vmem:[#allocation2 + $0x638] sm:$0xff] }
 0x4a8   :  { %2153 = vmatpush1.bf16.msra.mxu0 %v1783_v20  ;;  %2358 = vmatpush1.bf16.msra.mxu1 %v1785_v21  ;;  %v1836_v20 = vld [vmem:[#allocation2 + $0x4a8] sm:$0xff]  ;;  %v1838_v21 = vld [vmem:[#allocation2 + $0x4b8] sm:$0xff] }
 0x4a9   :  { %2154 = vmatprep.subr.bf16.mxu0 %v1788_v22  ;;  %2359 = vmatprep.subr.bf16.mxu1 %v1790_v23  ;;  %v1835_v22 = vld [vmem:[#allocation2 + $0x4a0] sm:$0xff]  ;;  %v1837_v23 = vld [vmem:[#allocation2 + $0x4b0] sm:$0xff] }
 0x4ac   :  { %2155 = vmatpush1.bf16.msra.mxu0 %v1787_v24  ;;  %2360 = vmatpush1.bf16.msra.mxu1 %v1789_v25  ;;  %v1840_v24 = vld [vmem:[#allocation2 + $0x4c8] sm:$0xff]  ;;  %v1842_v25 = vld [vmem:[#allocation2 + $0x4d8] sm:$0xff] }
 0x4ad   :  { %2156 = vmatprep.subr.bf16.mxu0 %v1792_v26  ;;  %2361 = vmatprep.subr.bf16.mxu1 %v1794_v27  ;;  %v1839_v26 = vld [vmem:[#allocation2 + $0x4c0] sm:$0xff]  ;;  %v1841_v27 = vld [vmem:[#allocation2 + $0x4d0] sm:$0xff] }
 0x4b0   :  { %2157 = vmatpush1.bf16.msra.mxu0 %v1791_v28  ;;  %2362 = vmatpush1.bf16.msra.mxu1 %v1793_v29  ;;  %v1844_v28 = vld [vmem:[#allocation2 + $0x4e8] sm:$0xff]  ;;  %v1846_v29 = vld [vmem:[#allocation2 + $0x4f8] sm:$0xff] }
 0x4b1   :  { %2158 = vmatprep.subr.bf16.mxu0 %v1796_v30  ;;  %2363 = vmatprep.subr.bf16.mxu1 %v1798_v31  ;;  %v1843_v30 = vld [vmem:[#allocation2 + $0x4e0] sm:$0xff]  ;;  %v1845_v31 = vld [vmem:[#allocation2 + $0x4f0] sm:$0xff] }
 0x4b4   :  { %2159 = vmatpush1.bf16.msra.mxu0 %v1795_v32  ;;  %2364 = vmatpush1.bf16.msra.mxu1 %v1797_v33  ;;  %v1848_v32 = vld [vmem:[#allocation2 + $0x508] sm:$0xff]  ;;  %v1850_v33 = vld [vmem:[#allocation2 + $0x518] sm:$0xff] }
 0x4b5   :  { %2160 = vmatprep.subr.bf16.mxu0 %v1800_v34  ;;  %2365 = vmatprep.subr.bf16.mxu1 %v1802_v35  ;;  %v1847_v34 = vld [vmem:[#allocation2 + $0x500] sm:$0xff]  ;;  %v1849_v35 = vld [vmem:[#allocation2 + $0x510] sm:$0xff] }
 0x4b8   :  { %2161 = vmatpush1.bf16.msra.mxu0 %v1799_v36  ;;  %2366 = vmatpush1.bf16.msra.mxu1 %v1801_v37  ;;  %v1852_v36 = vld [vmem:[#allocation2 + $0x528] sm:$0xff]  ;;  %v1854_v37 = vld [vmem:[#allocation2 + $0x538] sm:$0xff] }
 0x4b9   :  { %2162 = vmatprep.subr.bf16.mxu0 %v1804_v38  ;;  %2367 = vmatprep.subr.bf16.mxu1 %v1806_v39  ;;  %v1851_v38 = vld [vmem:[#allocation2 + $0x520] sm:$0xff]  ;;  %v1853_v39 = vld [vmem:[#allocation2 + $0x530] sm:$0xff] }
 0x4bc   :  { %2163 = vmatpush1.bf16.msra.mxu0 %v1803_v40  ;;  %2368 = vmatpush1.bf16.msra.mxu1 %v1805_v41  ;;  %v1856_v40 = vld [vmem:[#allocation2 + $0x548] sm:$0xff]  ;;  %v1858_v41 = vld [vmem:[#allocation2 + $0x558] sm:$0xff] }
 0x4bd   :  { %2164 = vmatprep.subr.bf16.mxu0 %v1808_v42  ;;  %2369 = vmatprep.subr.bf16.mxu1 %v1810_v43  ;;  %v1855_v42 = vld [vmem:[#allocation2 + $0x540] sm:$0xff]  ;;  %v1857_v43 = vld [vmem:[#allocation2 + $0x550] sm:$0xff] }
 0x4c0   :  { %2165 = vmatpush1.bf16.msra.mxu0 %v1807_v45  ;;  %2370 = vmatpush1.bf16.msra.mxu1 %v1809_v47  ;;  %v1860_v45 = vld [vmem:[#allocation2 + $0x568] sm:$0xff]  ;;  %v1862_v47 = vld [vmem:[#allocation2 + $0x578] sm:$0xff] }
 0x4c1   :  { %2166 = vmatprep.subr.bf16.mxu0 %v1812_v49  ;;  %2371 = vmatprep.subr.bf16.mxu1 %v1814_v50  ;;  %v1861_v49 = vld [vmem:[#allocation2 + $0x570] sm:$0xff]  ;;  %v1864_v50 = vld [vmem:[#allocation2 + $0x588] sm:$0xff] }
 0x4c4   :  { %2167 = vmatpush1.bf16.msra.mxu0 %v1811_v52  ;;  %2372 = vmatpush1.bf16.msra.mxu1 %v1813_v53  ;;  %v1866_v52 = vld [vmem:[#allocation2 + $0x598] sm:$0xff]  ;;  %v1863_v53 = vld [vmem:[#allocation2 + $0x580] sm:$0xff] }
 0x4c5   :  { %2177 = vmatprep.subr.bf16.mxu0 %v1816_v55  ;;  %2382 = vmatprep.subr.bf16.mxu1 %v1818_v56  ;;  %v1868_v55 = vld [vmem:[#allocation2 + $0x5a8] sm:$0xff]  ;;  %v1870_v56 = vld [vmem:[#allocation2 + $0x5b8] sm:$0xff] }
 0x4c7   :  { %2169 = vmatmul.mubr.bf16.vlgmr.msra.gmra.mrb[64].mxu0 %v2088_v57  ;;  %2374 = vmatmul.mubr.bf16.vlgmr.msra.gmra.mrb[28].mxu1 %v2088_v57  ;;  %v1867_v57 = vld [vmem:[#allocation2 + $0x5a0] sm:$0xff] }
 0x4c8   :  { %2178 = vmatpush1.bf16.msra.mxu0 %v1815_v60  ;;  %2383 = vmatpush1.bf16.msra.mxu1 %v1817_v63  ;;  %v1869_v60 = vld [vmem:[#allocation2 + $0x5b0] sm:$0xff]  ;;  %v1872_v63 = vld [vmem:[#allocation2 + $0x5c8] sm:$0xff] }
 0x4c9   :  { %2179 = vmatprep.subr.bf16.mxu0 %v1820_v0  ;;  %2384 = vmatprep.subr.bf16.mxu1 %v1822_v1  ;;  %v1874_v0 = vld [vmem:[#allocation2 + $0x5d8] sm:$0xff]  ;;  %v1871_v1 = vld [vmem:[#allocation2 + $0x5c0] sm:$0xff] }
 0x4ca   :  { %2209 = vmatprep.mubr.bf16.mxu0 %v2091_v3  ;;  %2414 = vmatprep.mubr.bf16.mxu1 %v2091_v3  ;;  %v1873_v3 = vld [vmem:[#allocation2 + $0x5d0] sm:$0xff] }
 0x4cc   :  { %2180 = vmatpush1.bf16.msra.mxu0 %v1819_v4  ;;  %2385 = vmatpush1.bf16.msra.mxu1 %v1821_v5  ;;  %v1876_v4 = vld [vmem:[#allocation2 + $0x5e8] sm:$0xff]  ;;  %v1878_v5 = vld [vmem:[#allocation2 + $0x5f8] sm:$0xff] }
 0x4cd   :  { %2181 = vmatprep.subr.bf16.mxu0 %v1824_v6  ;;  %2386 = vmatprep.subr.bf16.mxu1 %v1826_v7  ;;  %v1875_v6 = vld [vmem:[#allocation2 + $0x5e0] sm:$0xff]  ;;  %v1877_v7 = vld [vmem:[#allocation2 + $0x5f0] sm:$0xff] }
 0x4d0   :  { %2182 = vmatpush1.bf16.msra.mxu0 %v1823_v46  ;;  %2387 = vmatpush1.bf16.msra.mxu1 %v1825_v8  ;;  %v1880_v46 = vld [vmem:[#allocation2 + $0x608] sm:$0xff]  ;;  %v1882_v8 = vld [vmem:[#allocation2 + $0x618] sm:$0xff] }
 0x4d1   :  { %2183 = vmatprep.subr.bf16.mxu0 %v1828_v2  ;;  %2388 = vmatprep.subr.bf16.mxu1 %v1830_v10  ;;  %v2090_v2 = vpack.c.bf16 %v10274_v62, %v10274_v62  ;;  %v1879_v10 = vld [vmem:[#allocation2 + $0x600] sm:$0xff] }
 0x4d2   :  { %v1887_v62 = vld [vmem:[#allocation2 + $0x640] sm:$0xff] }
 0x4d4   :  { %2184 = vmatpush1.bf16.msra.mxu0 %v1827_v14  ;;  %2389 = vmatpush1.bf16.msra.mxu1 %v1829_v15  ;;  %v2093_v14 = vpack.c.bf16 %v10280_v51, %v10280_v51  ;;  %v1883_v15 = vld [vmem:[#allocation2 + $0x620] sm:$0xff]  ;;  %v1894_v51 = vld [vmem:[#allocation2 + $0x678] sm:$0xff] }
 0x4d5   :  { %2185 = vmatprep.subr.bf16.mxu0 %v1832_v16  ;;  %2390 = vmatprep.subr.bf16.mxu1 %v1834_v17  ;;  %v1885_v16 = vld [vmem:[#allocation2 + $0x630] sm:$0xff]  ;;  %v1888_v17 = vld [vmem:[#allocation2 + $0x648] sm:$0xff] }
 0x4d8   :  { %2186 = vmatpush1.bf16.msra.mxu0 %v1831_v18  ;;  %2391 = vmatpush1.bf16.msra.mxu1 %v1833_v19  ;;  %v1890_v18 = vld [vmem:[#allocation2 + $0x658] sm:$0xff]  ;;  %v1889_v19 = vld [vmem:[#allocation2 + $0x650] sm:$0xff] }
 0x4d9   :  { %2187 = vmatprep.subr.bf16.mxu0 %v1836_v20  ;;  %2392 = vmatprep.subr.bf16.mxu1 %v1838_v21  ;;  %v1892_v20 = vld [vmem:[#allocation2 + $0x668] sm:$0xff]  ;;  %v1891_v21 = vld [vmem:[#allocation2 + $0x660] sm:$0xff] }
 0x4dc   :  { %2188 = vmatpush1.bf16.msra.mxu0 %v1835_v22  ;;  %2393 = vmatpush1.bf16.msra.mxu1 %v1837_v23  ;;  %v1893_v22 = vld [vmem:[#allocation2 + $0x670] sm:$0xff]  ;;  %v1896_v23 = vld [vmem:[#allocation2 + $0x688] sm:$0xff] }
 0x4dd   :  { %2189 = vmatprep.subr.bf16.mxu0 %v1840_v24  ;;  %2394 = vmatprep.subr.bf16.mxu1 %v1842_v25  ;;  %v1898_v24 = vld [vmem:[#allocation2 + $0x698] sm:$0xff]  ;;  %v1895_v25 = vld [vmem:[#allocation2 + $0x680] sm:$0xff] }
 0x4e0   :  { %2190 = vmatpush1.bf16.msra.mxu0 %v1839_v26  ;;  %2395 = vmatpush1.bf16.msra.mxu1 %v1841_v27  ;;  %v1897_v26 = vld [vmem:[#allocation2 + $0x690] sm:$0xff]  ;;  %v1900_v27 = vld [vmem:[#allocation2 + $0x6a8] sm:$0xff] }
 0x4e1   :  { %2191 = vmatprep.subr.bf16.mxu0 %v1844_v28  ;;  %2396 = vmatprep.subr.bf16.mxu1 %v1846_v29  ;;  %v1902_v28 = vld [vmem:[#allocation2 + $0x6b8] sm:$0xff]  ;;  %v1899_v29 = vld [vmem:[#allocation2 + $0x6a0] sm:$0xff] }
 0x4e4   :  { %2192 = vmatpush1.bf16.msra.mxu0 %v1843_v30  ;;  %2397 = vmatpush1.bf16.msra.mxu1 %v1845_v31  ;;  %v1901_v30 = vld [vmem:[#allocation2 + $0x6b0] sm:$0xff]  ;;  %v1904_v31 = vld [vmem:[#allocation2 + $0x6c8] sm:$0xff] }
 0x4e5   :  { %2193 = vmatprep.subr.bf16.mxu0 %v1848_v32  ;;  %2398 = vmatprep.subr.bf16.mxu1 %v1850_v33  ;;  %v1906_v32 = vld [vmem:[#allocation2 + $0x6d8] sm:$0xff]  ;;  %v1903_v33 = vld [vmem:[#allocation2 + $0x6c0] sm:$0xff] }
 0x4e8   :  { %2194 = vmatpush1.bf16.msra.mxu0 %v1847_v34  ;;  %2399 = vmatpush1.bf16.msra.mxu1 %v1849_v35  ;;  %v1905_v34 = vld [vmem:[#allocation2 + $0x6d0] sm:$0xff]  ;;  %v1908_v35 = vld [vmem:[#allocation2 + $0x6e8] sm:$0xff] }
 0x4e9   :  { %2195 = vmatprep.subr.bf16.mxu0 %v1852_v36  ;;  %2400 = vmatprep.subr.bf16.mxu1 %v1854_v37  ;;  %v1910_v36 = vld [vmem:[#allocation2 + $0x6f8] sm:$0xff]  ;;  %v1907_v37 = vld [vmem:[#allocation2 + $0x6e0] sm:$0xff] }
 0x4ec   :  { %2196 = vmatpush1.bf16.msra.mxu0 %v1851_v38  ;;  %2401 = vmatpush1.bf16.msra.mxu1 %v1853_v39  ;;  %v1909_v38 = vld [vmem:[#allocation2 + $0x6f0] sm:$0xff]  ;;  %v1912_v39 = vld [vmem:[#allocation2 + $0x708] sm:$0xff] }
 0x4ed   :  { %2197 = vmatprep.subr.bf16.mxu0 %v1856_v40  ;;  %2402 = vmatprep.subr.bf16.mxu1 %v1858_v41  ;;  %v1914_v40 = vld [vmem:[#allocation2 + $0x718] sm:$0xff]  ;;  %v1911_v41 = vld [vmem:[#allocation2 + $0x700] sm:$0xff] }
 0x4f0   :  { %2198 = vmatpush1.bf16.msra.mxu0 %v1855_v42  ;;  %2403 = vmatpush1.bf16.msra.mxu1 %v1857_v43  ;;  %v1913_v42 = vld [vmem:[#allocation2 + $0x710] sm:$0xff]  ;;  %v1916_v43 = vld [vmem:[#allocation2 + $0x728] sm:$0xff] }
 0x4f1   :  { %2199 = vmatprep.subr.bf16.mxu0 %v1860_v45  ;;  %2404 = vmatprep.subr.bf16.mxu1 %v1862_v47  ;;  %v1918_v45 = vld [vmem:[#allocation2 + $0x738] sm:$0xff]  ;;  %v1915_v47 = vld [vmem:[#allocation2 + $0x720] sm:$0xff] }
 0x4f4   :  { %2200 = vmatpush1.bf16.msra.mxu0 %v1859_v48  ;;  %2405 = vmatpush1.bf16.msra.mxu1 %v1861_v49  ;;  %v1917_v48 = vld [vmem:[#allocation2 + $0x730] sm:$0xff]  ;;  %v1920_v49 = vld [vmem:[#allocation2 + $0x748] sm:$0xff] }
 0x4f5   :  { %2201 = vmatprep.subr.bf16.mxu0 %v1864_v50  ;;  %2406 = vmatprep.subr.bf16.mxu1 %v1866_v52  ;;  %v1922_v50 = vld [vmem:[#allocation2 + $0x758] sm:$0xff]  ;;  %v1919_v52 = vld [vmem:[#allocation2 + $0x740] sm:$0xff] }
 0x4f8   :  { %2202 = vmatpush1.bf16.msra.mxu0 %v1863_v53  ;;  %2407 = vmatpush1.bf16.msra.mxu1 %v1865_v54  ;;  %v1921_v53 = vld [vmem:[#allocation2 + $0x750] sm:$0xff]  ;;  %v1924_v54 = vld [vmem:[#allocation2 + $0x768] sm:$0xff] }
 0x4f9   :  { %2203 = vmatprep.subr.bf16.mxu0 %v1868_v55  ;;  %2408 = vmatprep.subr.bf16.mxu1 %v1870_v56  ;;  %v1926_v55 = vld [vmem:[#allocation2 + $0x778] sm:$0xff]  ;;  %v1923_v56 = vld [vmem:[#allocation2 + $0x760] sm:$0xff] }
 0x4fc   :  { %2204 = vmatpush1.bf16.msra.mxu0 %v1867_v57  ;;  %2409 = vmatpush1.bf16.msra.mxu1 %v1869_v60  ;;  %v1925_v57 = vld [vmem:[#allocation2 + $0x770] sm:$0xff]  ;;  %v1928_v60 = vld [vmem:[#allocation2 + $0x788] sm:$0xff] }
 0x4fd   :  { %2205 = vmatprep.subr.bf16.mxu0 %v1872_v63  ;;  %2410 = vmatprep.subr.bf16.mxu1 %v1874_v0  ;;  %v1930_v63 = vld [vmem:[#allocation2 + $0x798] sm:$0xff]  ;;  %v1927_v0 = vld [vmem:[#allocation2 + $0x780] sm:$0xff] }
 0x500   :  { %2206 = vmatpush1.bf16.msra.mxu0 %v1871_v1  ;;  %2411 = vmatpush1.bf16.msra.mxu1 %v1873_v3  ;;  %v1929_v1 = vld [vmem:[#allocation2 + $0x790] sm:$0xff]  ;;  %v1932_v3 = vld [vmem:[#allocation2 + $0x7a8] sm:$0xff] }
 0x501   :  { %2207 = vmatprep.subr.bf16.mxu0 %v1876_v4  ;;  %2412 = vmatprep.subr.bf16.mxu1 %v1878_v5  ;;  %v1934_v4 = vld [vmem:[#allocation2 + $0x7b8] sm:$0xff]  ;;  %v1931_v5 = vld [vmem:[#allocation2 + $0x7a0] sm:$0xff] }
 0x504   :  { %2208 = vmatpush1.bf16.msra.mxu0 %v1875_v6  ;;  %2413 = vmatpush1.bf16.msra.mxu1 %v1877_v7  ;;  %v1933_v6 = vld [vmem:[#allocation2 + $0x7b0] sm:$0xff]  ;;  %v1936_v7 = vld [vmem:[#allocation2 + $0x7c8] sm:$0xff] }
 0x505   :  { %2218 = vmatprep.subr.bf16.mxu0 %v1880_v46  ;;  %2423 = vmatprep.subr.bf16.mxu1 %v1882_v8  ;;  %v1938_v46 = vld [vmem:[#allocation2 + $0x7d8] sm:$0xff]  ;;  %v1935_v8 = vld [vmem:[#allocation2 + $0x7c0] sm:$0xff] }
 0x507   :  { %2210 = vmatmul.mubr.bf16.vlgmr.msra.gmra.mrb[64].mxu0 %v2090_v2  ;;  %2415 = vmatmul.mubr.bf16.vlgmr.msra.gmra.mrb[28].mxu1 %v2090_v2  ;;  %v1937_v2 = vld [vmem:[#allocation2 + $0x7d0] sm:$0xff] }
 0x508   :  { %2219 = vmatpush1.bf16.msra.mxu0 %v1879_v10  ;;  %2424 = vmatpush1.bf16.msra.mxu1 %v1881_v11  ;;  %v1940_v10 = vld [vmem:[#allocation2 + $0x7e8] sm:$0xff]  ;;  %v1942_v11 = vld [vmem:[#allocation2 + $0x7f8] sm:$0xff] }
 0x509   :  { %2220 = vmatprep.subr.bf16.mxu0 %v1884_v12  ;;  %2425 = vmatprep.subr.bf16.mxu1 %v1886_v13  ;;  %v1939_v12 = vld [vmem:[#allocation2 + $0x7e0] sm:$0xff]  ;;  %v1941_v13 = vld [vmem:[#allocation2 + $0x7f0] sm:$0xff] }
 0x50a   :  { %2250 = vmatprep.mubr.bf16.mxu0 %v2093_v14  ;;  %2455 = vmatprep.mubr.bf16.mxu1 %v2093_v14  ;;  %v1944_v14 = vld [vmem:[#allocation2 + $0x808] sm:$0xff] }
 0x50c   :  { %2221 = vmatpush1.bf16.msra.mxu0 %v1883_v15  ;;  %2426 = vmatpush1.bf16.msra.mxu1 %v1885_v16  ;;  %v1946_v15 = vld [vmem:[#allocation2 + $0x818] sm:$0xff]  ;;  %v2092_v16 = vpack.c.bf16 %v10278_v44, %v10278_v44  ;;  %v1951_v44 = vld [vmem:[#allocation2 + $0x840] sm:$0xff] }
 0x50d   :  { %2222 = vmatprep.subr.bf16.mxu0 %v1888_v17  ;;  %2427 = vmatprep.subr.bf16.mxu1 %v1890_v18  ;;  %v1943_v17 = vld [vmem:[#allocation2 + $0x800] sm:$0xff]  ;;  %v1945_v18 = vld [vmem:[#allocation2 + $0x810] sm:$0xff] }
 0x510   :  { %2223 = vmatpush1.bf16.msra.mxu0 %v1887_v62  ;;  %2428 = vmatpush1.bf16.msra.mxu1 %v1889_v19  ;;  %v1948_v62 = vld [vmem:[#allocation2 + $0x828] sm:$0xff]  ;;  %v1950_v19 = vld [vmem:[#allocation2 + $0x838] sm:$0xff] }
 0x511   :  { %2224 = vmatprep.subr.bf16.mxu0 %v1892_v20  ;;  %2429 = vmatprep.subr.bf16.mxu1 %v1894_v51  ;;  %v1947_v20 = vld [vmem:[#allocation2 + $0x820] sm:$0xff]  ;;  %v1949_v51 = vld [vmem:[#allocation2 + $0x830] sm:$0xff] }
 0x514   :  { %2225 = vmatpush1.bf16.msra.mxu0 %v1891_v21  ;;  %2430 = vmatpush1.bf16.msra.mxu1 %v1893_v22  ;;  %v1952_v21 = vld [vmem:[#allocation2 + $0x848] sm:$0xff]  ;;  %v1954_v22 = vld [vmem:[#allocation2 + $0x858] sm:$0xff] }
 0x515   :  { %2226 = vmatprep.subr.bf16.mxu0 %v1896_v23  ;;  %2431 = vmatprep.subr.bf16.mxu1 %v1898_v24  ;;  %v9834_v23 = vmov 0   ;;  %v1953_v24 = vld [vmem:[#allocation2 + $0x850] sm:$0xff] }
 0x518   :  { %2227 = vmatpush1.bf16.msra.mxu0 %v1895_v25  ;;  %2432 = vmatpush1.bf16.msra.mxu1 %v1897_v26  ;;  %v1956_v25 = vld [vmem:[#allocation2 + $0x868] sm:$0xff]  ;;  %v1958_v26 = vld [vmem:[#allocation2 + $0x878] sm:$0xff] }
 0x519   :  { %2228 = vmatprep.subr.bf16.mxu0 %v1900_v27  ;;  %2433 = vmatprep.subr.bf16.mxu1 %v1902_v28  ;;  %v1955_v27 = vld [vmem:[#allocation2 + $0x860] sm:$0xff]  ;;  %v1957_v28 = vld [vmem:[#allocation2 + $0x870] sm:$0xff] }
 0x51c   :  { %2229 = vmatpush1.bf16.msra.mxu0 %v1899_v29  ;;  %2434 = vmatpush1.bf16.msra.mxu1 %v1901_v30  ;;  %v1960_v29 = vld [vmem:[#allocation2 + $0x888] sm:$0xff]  ;;  %v1962_v30 = vld [vmem:[#allocation2 + $0x898] sm:$0xff] }
 0x51d   :  { %2230 = vmatprep.subr.bf16.mxu0 %v1904_v31  ;;  %2435 = vmatprep.subr.bf16.mxu1 %v1906_v32  ;;  %v1959_v31 = vld [vmem:[#allocation2 + $0x880] sm:$0xff]  ;;  %v1961_v32 = vld [vmem:[#allocation2 + $0x890] sm:$0xff] }
 0x520   :  { %2231 = vmatpush1.bf16.msra.mxu0 %v1903_v33  ;;  %2436 = vmatpush1.bf16.msra.mxu1 %v1905_v34  ;;  %v1964_v33 = vld [vmem:[#allocation2 + $0x8a8] sm:$0xff]  ;;  %v1966_v34 = vld [vmem:[#allocation2 + $0x8b8] sm:$0xff] }
 0x521   :  { %2232 = vmatprep.subr.bf16.mxu0 %v1908_v35  ;;  %2437 = vmatprep.subr.bf16.mxu1 %v1910_v36  ;;  %v1963_v35 = vld [vmem:[#allocation2 + $0x8a0] sm:$0xff]  ;;  %v1965_v36 = vld [vmem:[#allocation2 + $0x8b0] sm:$0xff] }
 0x524   :  { %2233 = vmatpush1.bf16.msra.mxu0 %v1907_v37  ;;  %2438 = vmatpush1.bf16.msra.mxu1 %v1909_v38  ;;  %v1968_v37 = vld [vmem:[#allocation2 + $0x8c8] sm:$0xff]  ;;  %v1970_v38 = vld [vmem:[#allocation2 + $0x8d8] sm:$0xff] }
 0x525   :  { %2234 = vmatprep.subr.bf16.mxu0 %v1912_v39  ;;  %2439 = vmatprep.subr.bf16.mxu1 %v1914_v40  ;;  %v1967_v39 = vld [vmem:[#allocation2 + $0x8c0] sm:$0xff]  ;;  %v1969_v40 = vld [vmem:[#allocation2 + $0x8d0] sm:$0xff] }
 0x528   :  { %2235 = vmatpush1.bf16.msra.mxu0 %v1911_v41  ;;  %2440 = vmatpush1.bf16.msra.mxu1 %v1913_v42  ;;  %v1972_v41 = vld [vmem:[#allocation2 + $0x8e8] sm:$0xff]  ;;  %v1974_v42 = vld [vmem:[#allocation2 + $0x8f8] sm:$0xff] }
 0x529   :  { %2236 = vmatprep.subr.bf16.mxu0 %v1916_v43  ;;  %2441 = vmatprep.subr.bf16.mxu1 %v1918_v45  ;;  %v1971_v43 = vld [vmem:[#allocation2 + $0x8e0] sm:$0xff]  ;;  %v1973_v45 = vld [vmem:[#allocation2 + $0x8f0] sm:$0xff] }
 0x52c   :  { %2237 = vmatpush1.bf16.msra.mxu0 %v1915_v47  ;;  %2442 = vmatpush1.bf16.msra.mxu1 %v1917_v48  ;;  %v2094_v47 = vpack.c.bf16 %v10286_v9, %v10286_v9 }
 0x52d   :  { %2238 = vmatprep.subr.bf16.mxu0 %v1920_v49  ;;  %2443 = vmatprep.subr.bf16.mxu1 %v1922_v50 }
 0x530   :  { %2239 = vmatpush1.bf16.msra.mxu0 %v1919_v52  ;;  %2444 = vmatpush1.bf16.msra.mxu1 %v1921_v53 }
 0x531   :  { %2240 = vmatprep.subr.bf16.mxu0 %v1924_v54  ;;  %2445 = vmatprep.subr.bf16.mxu1 %v1926_v55 }
 0x534   :  { %2241 = vmatpush1.bf16.msra.mxu0 %v1923_v56  ;;  %2446 = vmatpush1.bf16.msra.mxu1 %v1925_v57 }
 0x535   :  { %2242 = vmatprep.subr.bf16.mxu0 %v1928_v60  ;;  %2447 = vmatprep.subr.bf16.mxu1 %v1930_v63 }
 0x538   :  { %2243 = vmatpush1.bf16.msra.mxu0 %v1927_v0  ;;  %2448 = vmatpush1.bf16.msra.mxu1 %v1929_v1 }
 0x539   :  { %2244 = vmatprep.subr.bf16.mxu0 %v1932_v3  ;;  %2449 = vmatprep.subr.bf16.mxu1 %v1934_v4 }
 0x53c   :  { %2245 = vmatpush1.bf16.msra.mxu0 %v1931_v5  ;;  %2450 = vmatpush1.bf16.msra.mxu1 %v1933_v6 }
 0x53d   :  { %2246 = vmatprep.subr.bf16.mxu0 %v1936_v7  ;;  %2451 = vmatprep.subr.bf16.mxu1 %v1938_v46 }
 0x540   :  { %2247 = vmatpush1.bf16.msra.mxu0 %v1935_v8  ;;  %2452 = vmatpush1.bf16.msra.mxu1 %v1937_v2 }
 0x541   :  { %2248 = vmatprep.subr.bf16.mxu0 %v1940_v10  ;;  %2453 = vmatprep.subr.bf16.mxu1 %v1942_v11 }
 0x544   :  { %2249 = vmatpush1.bf16.msra.mxu0 %v1939_v12  ;;  %2454 = vmatpush1.bf16.msra.mxu1 %v1941_v13 }
 0x545   :  { %2259 = vmatprep.subr.bf16.mxu0 %v1944_v14  ;;  %2464 = vmatprep.subr.bf16.mxu1 %v1946_v15 }
 0x547   :  { %2251 = vmatmul.mubr.bf16.vlgmr.msra.gmra.mrb[64].mxu0 %v2092_v16  ;;  %2456 = vmatmul.mubr.bf16.vlgmr.msra.gmra.mrb[28].mxu1 %v2092_v16 }
 0x548   :  { %2260 = vmatpush1.bf16.msra.mxu0 %v1943_v17  ;;  %2465 = vmatpush1.bf16.msra.mxu1 %v1945_v18 }
 0x549   :  { %2261 = vmatprep.subr.bf16.mxu0 %v1948_v62  ;;  %2466 = vmatprep.subr.bf16.mxu1 %v1950_v19 }
 0x54a   :  { %2291 = vmatprep.mubr.bf16.mxu0 %v9834_v23  ;;  %2496 = vmatprep.mubr.bf16.mxu1 %v9834_v23 }
 0x54c   :  { %2262 = vmatpush1.bf16.msra.mxu0 %v1947_v20  ;;  %2467 = vmatpush1.bf16.msra.mxu1 %v1949_v51 }
 0x54d   :  { %2263 = vmatprep.subr.bf16.mxu0 %v1952_v21  ;;  %2468 = vmatprep.subr.bf16.mxu1 %v1954_v22 }
 0x550   :  { %2264 = vmatpush1.bf16.msra.mxu0 %v1951_v44  ;;  %2469 = vmatpush1.bf16.msra.mxu1 %v1953_v24 }
 0x551   :  { %2265 = vmatprep.subr.bf16.mxu0 %v1956_v25  ;;  %2470 = vmatprep.subr.bf16.mxu1 %v1958_v26 }
 0x554   :  { %2266 = vmatpush1.bf16.msra.mxu0 %v1955_v27  ;;  %2471 = vmatpush1.bf16.msra.mxu1 %v1957_v28 }
 0x555   :  { %2267 = vmatprep.subr.bf16.mxu0 %v1960_v29  ;;  %2472 = vmatprep.subr.bf16.mxu1 %v1962_v30 }
 0x558   :  { %2268 = vmatpush1.bf16.msra.mxu0 %v1959_v31  ;;  %2473 = vmatpush1.bf16.msra.mxu1 %v1961_v32 }
 0x559   :  { %2269 = vmatprep.subr.bf16.mxu0 %v1964_v33  ;;  %2474 = vmatprep.subr.bf16.mxu1 %v1966_v34 }
 0x55c   :  { %2270 = vmatpush1.bf16.msra.mxu0 %v1963_v35  ;;  %2475 = vmatpush1.bf16.msra.mxu1 %v1965_v36 }
 0x55d   :  { %2271 = vmatprep.subr.bf16.mxu0 %v1968_v37  ;;  %2476 = vmatprep.subr.bf16.mxu1 %v1970_v38 }
 0x560   :  { %2272 = vmatpush1.bf16.msra.mxu0 %v1967_v39  ;;  %2477 = vmatpush1.bf16.msra.mxu1 %v1969_v40 }
 0x561   :  { %2273 = vmatprep.subr.bf16.mxu0 %v1972_v41  ;;  %2478 = vmatprep.subr.bf16.mxu1 %v1974_v42 }
 0x564   :  { %2274 = vmatpush1.bf16.msra.mxu0 %v1971_v43  ;;  %2479 = vmatpush1.bf16.msra.mxu1 %v1973_v45 }
 0x567   :  { %2292 = vmatmul.mubr.bf16.vlgmr.msra.gmra.mrb[64].mxu0 %v2094_v47  ;;  %2497 = vmatmul.mubr.bf16.vlgmr.msra.gmra.mrb[28].mxu1 %v2094_v47 }
 0x63a   :  { %v2293_v48 = vpop.f32.mrb[64].mxu0  ;;  %v2498_v49 = vpop.f32.mrb[28].mxu1 }
 0x63b   :  { %v2506_v50 = vrot.slane %v2293_v48, 4  ;;  %v2518_v52 = vrot.slane %v2498_v49, 4  ;;  %v2295_v53 = vpop.f32.mrb[65].mxu0  ;;  %v2500_v54 = vpop.f32.mrb[29].mxu1 }
 0x63c   :  { %v2512_v55 = vrot.slane %v2295_v53, 4  ;;  %v2524_v56 = vrot.slane %v2500_v54, 4  ;;  %v2297_v57 = vpop.f32.mrb[66].mxu0  ;;  %v2502_v60 = vpop.f32.mrb[30].mxu1 }
 0x63d   :  { %v2507_v63 = vadd.f32 %v2506_v50, %v2293_v48  ;;  %v2519_v0 = vadd.f32 %v2518_v52, %v2498_v49  ;;  %v2298_v1 = vpop.f32.mrb[67].mxu0  ;;  %v2503_v3 = vpop.f32.mrb[31].mxu1 }
 0x63e   :  { %v2513_v4 = vadd.f32 %v2512_v55, %v2295_v53  ;;  %v2525_v5 = vadd.f32 %v2524_v56, %v2500_v54 }
 0x63f   :  { %v2508_v6 = vrot.slane %v2507_v63, 2  ;;  %v2520_v9 = vrot.slane %v2519_v0, 2 }
 0x640   :  { %v2514_v7 = vrot.slane %v2513_v4, 2  ;;  %v2526_v46 = vrot.slane %v2525_v5, 2 }
 0x641   :  { %v2509_v8 = vadd.f32 %v2508_v6, %v2507_v63  ;;  %v2521_v2 = vadd.f32 %v2520_v9, %v2519_v0  ;;  %v2505_v6 = vld [vmem:[#allocation15] sm:$0xff]  ;;  %v10311_v9 = vsub.s32 4, %v10230_v58 }
 0x642   :  { %v2515_v10 = vadd.f32 %v2514_v7, %v2513_v4  ;;  %v2527_v11 = vadd.f32 %v2526_v46, %v2525_v5  ;;  %v10314_v7 = vsub.s32 2, %v10230_v58  ;;  %v10317_v46 = vsub.s32 5, %v10230_v58 }
 0x643   :  { %v2510_v12 = vrot.slane %v2509_v8, 1  ;;  %v2522_v13 = vrot.slane %v2521_v2, 1 }
 0x644   :  { %v2516_v14 = vrot.slane %v2515_v10, 1  ;;  %v2528_v15 = vrot.slane %v2527_v11, 1 }
 0x645   :  { %v2511_v16 = vadd.f32 %v2510_v12, %v2509_v8  ;;  %v2523_v17 = vadd.f32 %v2522_v13, %v2521_v2  ;;  %v10320_v8 = vsub.s32 6, %v10230_v58  ;;  %v2587_v2 = vrot.slane %v2505_v6, %v10233_v59 }
 0x646   :  { %v2517_v18 = vadd.f32 %v2516_v14, %v2515_v10  ;;  %v2529_v62 = vadd.f32 %v2528_v15, %v2527_v11  ;;  %v10324_v10 = vsub.s32 3, %v10230_v58  ;;  %v2595_v11 = vrot.slane %v2505_v6, %v10311_v9 }
 0x647   :  { %v2531_v19 = vmul.f32 0.125, %v2511_v16  ;;  %v2533_v20 = vmul.f32 0.125, %v2523_v17  ;;  %v2627_v12 = vrot.slane %v2505_v6, %v10236_v61  ;;  %v2591_v13 = vrot.slane %v2505_v6, %v10314_v7 }
 0x648   :  { %v2532_v51 = vmul.f32 0.125, %v2517_v18  ;;  %v2534_v21 = vmul.f32 0.125, %v2529_v62  ;;  %v10330_v14 = vsub.s32 7, %v10230_v58  ;;  %v2635_v15 = vrot.slane %v2505_v6, %v10317_v46 }
 0x649   :  { %v2535_v22 = vsub.f32 %v2293_v48, %v2531_v19  ;;  %v10298_v44 = vsub.f32 %v2498_v49, %v2533_v20  ;;  %v2599_v16 = vrot.slane %v2505_v6, %v10320_v8  ;;  %v2607_v17 = vrot.slane %v2587_v2, %v10233_v59 }
 0x64a   :  { %v10300_v24 = vsub.f32 %v2295_v53, %v2532_v51  ;;  %v10302_v25 = vsub.f32 %v2500_v54, %v2534_v21  ;;  %v2631_v18 = vrot.slane %v2505_v6, %v10324_v10  ;;  %v2615_v19 = vrot.slane %v2595_v11, %v10233_v59 }
 0x64b   :  { %v2539_v26 = vmul.f32 %v2535_v22, %v2535_v22  ;;  %v2541_v27 = vmul.f32 %v10298_v44, %v10298_v44  ;;  %v2647_v21 = vrot.slane %v2627_v12, %v10236_v61  ;;  %v2639_v58 = vrot.slane %v2505_v6, %v10330_v14 }
 0x64c   :  { %v2540_v28 = vmul.f32 %v10300_v24, %v10300_v24  ;;  %v2542_v29 = vmul.f32 %v10302_v25, %v10302_v25 }
 0x64d   :  { %v2543_v30 = vrot.slane %v2539_v26, 4  ;;  %v2555_v31 = vrot.slane %v2541_v27, 4 }
 0x64e   :  { %v2549_v32 = vrot.slane %v2540_v28, 4  ;;  %v2561_v33 = vrot.slane %v2542_v29, 4 }
 0x64f   :  { %v2544_v34 = vadd.f32 %v2543_v30, %v2539_v26  ;;  %v2556_v35 = vadd.f32 %v2555_v31, %v2541_v27  ;;  %v2611_v26 = vrot.slane %v2591_v13, %v10233_v59  ;;  %v2619_v30 = vrot.slane %v2599_v16, %v10233_v59 }
 0x650   :  { %v2550_v36 = vadd.f32 %v2549_v32, %v2540_v28  ;;  %v2562_v37 = vadd.f32 %v2561_v33, %v2542_v29  ;;  %v2655_v29 = vrot.slane %v2635_v15, %v10236_v61 }
 0x651   :  { %v2545_v38 = vrot.slane %v2544_v34, 2  ;;  %v2557_v39 = vrot.slane %v2556_v35, 2 }
 0x652   :  { %v2551_v40 = vrot.slane %v2550_v36, 2  ;;  %v2563_v41 = vrot.slane %v2562_v37, 2 }
 0x653   :  { %v2546_v42 = vadd.f32 %v2545_v38, %v2544_v34  ;;  %v2558_v43 = vadd.f32 %v2557_v39, %v2556_v35  ;;  %v2651_v34 = vrot.slane %v2631_v18, %v10236_v61  ;;  %v2659_v38 = vrot.slane %v2639_v58, %v10236_v61 }
 0x654   :  { %v2552_v45 = vadd.f32 %v2551_v40, %v2550_v36  ;;  %v2564_v47 = vadd.f32 %v2563_v41, %v2562_v37 }
 0x655   :  { %v2547_v48 = vrot.slane %v2546_v42, 1  ;;  %v2559_v49 = vrot.slane %v2558_v43, 1 }
 0x656   :  { %v2553_v50 = vrot.slane %v2552_v45, 1  ;;  %v2565_v52 = vrot.slane %v2564_v47, 1 }
 0x657   :  { %v2548_v53 = vadd.f32 %v2547_v48, %v2546_v42  ;;  %v2560_v54 = vadd.f32 %v2559_v49, %v2558_v43 }
 0x658   :  { %v2554_v55 = vadd.f32 %v2553_v50, %v2552_v45  ;;  %v2566_v56 = vadd.f32 %v2565_v52, %v2564_v47 }
 0x659   :  { %v2567_v57 = vmul.f32 0.125, %v2548_v53  ;;  %v2569_v60 = vmul.f32 0.125, %v2560_v54 }
 0x65a   :  { %v2568_v63 = vmul.f32 0.125, %v2554_v55  ;;  %v2570_v0 = vmul.f32 0.125, %v2566_v56 }
 0x65b   :  { %v2571_v1 = vadd.f32 1e-05, %v2567_v57  ;;  %v2573_v3 = vadd.f32 1e-05, %v2569_v60 }
 0x65c   :  { %v2572_v4 = vadd.f32 1e-05, %v2568_v63  ;;  %v2574_v5 = vadd.f32 1e-05, %v2570_v0 }
 0x65d   :  { %9339 = vrsqrt.f32 %v2571_v1 }
 0x65e   :  { %9341 = vrsqrt.f32 %v2573_v3 }
 0x65f   :  { %9343 = vrsqrt.f32 %v2572_v4 }
 0x660   :  { %9345 = vrsqrt.f32 %v2574_v5 }
 0x667   :  { %v9340_v62 = vpop.eup %9339 }
 0x668   :  { %v9342_v20 = vpop.eup %9341  ;;  %v2579_v51 = vmul.f32 %v9340_v62, %v2535_v22 }
 0x669   :  { %v9344_v27 = vpop.eup %9343  ;;  %v2581_v28 = vmul.f32 %v9342_v20, %v10298_v44 }
 0x66a   :  { %v9346_v31 = vpop.eup %9345  ;;  %v2620_v32 = vmul.f32 %v2607_v17, %v2579_v51  ;;  %v2580_v33 = vmul.f32 %v9344_v27, %v10300_v24 }
 0x66b   :  { %v2622_v22 = vmul.f32 %v2615_v19, %v2581_v28  ;;  %v2582_v35 = vmul.f32 %v9346_v31, %v10302_v25 }
 0x66c   :  { %v2660_v36 = vadd.f32 %v2647_v21, %v2620_v32  ;;  %v2621_v37 = vmul.f32 %v2611_v26, %v2580_v33 }
 0x66d   :  { %v2662_v39 = vadd.f32 %v2655_v29, %v2622_v22  ;;  %v2623_v40 = vmul.f32 %v2619_v30, %v2582_v35 }
 0x66e   :  { %vm2664_vm6 = vcmp.ge.f32.partialorder %v2660_v36, 0.0  ;;  %v2668_v44 = vmul.f32 0.01, %v2660_v36  ;;  %v2661_v41 = vadd.f32 %v2651_v34, %v2621_v37 }
 0x66f   :  { %vm2666_vm8 = vcmp.ge.f32.partialorder %v2662_v39, 0.0  ;;  %v2670_v42 = vmul.f32 0.01, %v2662_v39  ;;  %v2663_v45 = vadd.f32 %v2659_v38, %v2623_v40 }
 0x670   :  { %v2672_v43 = vsel %vm2664_vm6, %v2660_v36, %v2668_v44  ;;  %vm2665_vm9 = vcmp.ge.f32.partialorder %v2661_v41, 0.0  ;;  %v2669_v24 = vmul.f32 0.01, %v2661_v41 }
 0x671   :  { %v2680_v47 = vrot.slane %v2672_v43, 1  ;;  %v2688_v48 = vrot.slane %v2672_v43, 2  ;;  %v2696_v49 = vrot.slane %v2672_v43, 3  ;;  %v2674_v25 = vsel %vm2666_vm8, %v2662_v39, %v2670_v42 }
 0x672   :  { %v2682_v50 = vrot.slane %v2674_v25, 1  ;;  %v2690_v52 = vrot.slane %v2674_v25, 2  ;;  %v2698_v53 = vrot.slane %v2674_v25, 3  ;;  %v2673_v54 = vsel %vm2665_vm9, %v2661_v41, %v2669_v24 }
 0x673   :  { %v2704_v55 = vrot.slane %v2680_v47, 3  ;;  %v2708_v56 = vrot.slane %v2688_v48, 3  ;;  %v2712_v57 = vrot.slane %v2696_v49, 3  ;;  %v10348_v60 = vsel %vm2728_vm7, %v2672_v43, %v2696_v49 }
 0x674   :  { %v2706_v63 = vrot.slane %v2682_v50, 3  ;;  %v2710_v0 = vrot.slane %v2690_v52, 3  ;;  %v2714_v1 = vrot.slane %v2698_v53, 3  ;;  %v10351_v3 = vsel %vm2728_vm7, %v2674_v25, %v2698_v53 }
 0x675   :  { %v10354_v4 = vsel %vm2728_vm7, %v2680_v47, %v2704_v55  ;;  %v10357_v5 = vsel %vm2728_vm7, %v2688_v48, %v2708_v56  ;;  %v10360_v6 = vsel %vm2728_vm7, %v2696_v49, %v2712_v57  ;;  %v2681_v2 = vrot.slane %v2673_v54, 1 }
 0x676   :  { %v10363_v11 = vsel %vm2728_vm7, %v2682_v50, %v2706_v63  ;;  %v10366_v12 = vsel %vm2728_vm7, %v2690_v52, %v2710_v0  ;;  %v10369_v13 = vsel %vm2728_vm7, %v2698_v53, %v2714_v1  ;;  %v2689_v15 = vrot.slane %v2673_v54, 2 }
 0x677   :  { %v2697_v16 = vrot.slane %v2673_v54, 3  ;;  %v2705_v17 = vrot.slane %v2681_v2, 3  ;;  %vm2667_vm10 = vcmp.ge.f32.partialorder %v2663_v45, 0.0  ;;  %v2671_v18 = vmul.f32 0.01, %v2663_v45 }
 0x678   :  { %v2709_v62 = vrot.slane %v2689_v15, 3 }
 0x679   :  { %v2713_v19 = vrot.slane %v2697_v16, 3  ;;  %v2730_v20 = vsel %vm2728_vm7, %v2673_v54, %v2697_v16  ;;  %v10373_v51 = vsel %vm2728_vm7, %v2681_v2, %v2705_v17  ;;  %v2675_v21 = vsel %vm2667_vm10, %v2663_v45, %v2671_v18 }
 0x67a   :  { %v10376_v26 = vsel %vm2728_vm7, %v2689_v15, %v2709_v62  ;;  %v2683_v58 = vrot.slane %v2675_v21, 1  ;;  %v2691_v27 = vrot.slane %v2675_v21, 2  ;;  %v2699_v28 = vrot.slane %v2675_v21, 3 }
 0x67b   :  { %v10379_v29 = vsel %vm2728_vm7, %v2697_v16, %v2713_v19 }
 0x67c   :  { %v2707_v30 = vrot.slane %v2683_v58, 3  ;;  %v2711_v31 = vrot.slane %v2691_v27, 3  ;;  %v2715_v32 = vrot.slane %v2699_v28, 3  ;;  %v10382_v33 = vsel %vm2728_vm7, %v2675_v21, %v2699_v28 }
 0x67e   :  { %v10385_v34 = vsel %vm2728_vm7, %v2683_v58, %v2707_v30  ;;  %v10388_v22 = vsel %vm2728_vm7, %v2691_v27, %v2711_v31  ;;  %v10391_v35 = vsel %vm2728_vm7, %v2699_v28, %v2715_v32 }
 0x67f   :  { %9779 = dma.done.wait [#allocation8 + $0x1], 32768 }
 0x680   :  { %9780 = vsyncadd [#allocation8 + $0x1], 4294934528  ;;  %v2750_v36 = vpack.c.bf16 %v2730_v20, %v2730_v20  ;;  %v2766_v37 = vld [vmem:[#allocation3 + $0x8] sm:$0xff]  ;;  %v2765_v38 = vld [vmem:[#allocation3] sm:$0xff]  ;;  %v2749_v58 = vpack.c.bf16 %v10348_v60, %v10348_v60  ;;  %v2752_v27 = vpack.c.bf16 %v10382_v33, %v10382_v33  ;;  %s11342_s7 = sld [smem:[#allocation59_spill]] }
 0x681   :  { %v2768_v39 = vld [vmem:[#allocation3 + $0x18] sm:$0xff]  ;;  %3033 = vmatprep.subr.bf16.mxu0 %v2766_v37  ;;  %v2767_v40 = vld [vmem:[#allocation3 + $0x10] sm:$0xff]  ;;  %v2770_v44 = vld [vmem:[#allocation3 + $0x28] sm:$0xff] }
 0x682   :  { %3065 = vmatprep.mubr.bf16.mxu0 %v2750_v36  ;;  %3034 = vmatpush1.bf16.msra.mxu0 %v2765_v38  ;;  %v2769_v41 = vld [vmem:[#allocation3 + $0x20] sm:$0xff]  ;;  %v2772_v42 = vld [vmem:[#allocation3 + $0x38] sm:$0xff]  ;;  %v2771_v43 = vld [vmem:[#allocation3 + $0x30] sm:$0xff] }
 0x683   :  { %3035 = vmatprep.subr.bf16.mxu0 %v2768_v39  ;;  %v2774_v24 = vld [vmem:[#allocation3 + $0x48] sm:$0xff]  ;;  %v2773_v45 = vld [vmem:[#allocation3 + $0x40] sm:$0xff]  ;;  %v2776_v47 = vld [vmem:[#allocation3 + $0x58] sm:$0xff] }
 0x684   :  { %v2775_v48 = vld [vmem:[#allocation3 + $0x50] sm:$0xff]  ;;  %v2778_v49 = vld [vmem:[#allocation3 + $0x68] sm:$0xff]  ;;  %v2777_v25 = vld [vmem:[#allocation3 + $0x60] sm:$0xff] }
 0x685   :  { %v2780_v50 = vld [vmem:[#allocation3 + $0x78] sm:$0xff]  ;;  %v2779_v52 = vld [vmem:[#allocation3 + $0x70] sm:$0xff]  ;;  %v2782_v53 = vld [vmem:[#allocation3 + $0x88] sm:$0xff] }
 0x686   :  { %3036 = vmatpush1.bf16.msra.mxu0 %v2767_v40  ;;  %v2781_v54 = vld [vmem:[#allocation3 + $0x80] sm:$0xff]  ;;  %v2784_v55 = vld [vmem:[#allocation3 + $0x98] sm:$0xff]  ;;  %v2783_v56 = vld [vmem:[#allocation3 + $0x90] sm:$0xff] }
 0x687   :  { %3037 = vmatprep.subr.bf16.mxu0 %v2770_v44  ;;  %v2786_v57 = vld [vmem:[#allocation3 + $0xa8] sm:$0xff]  ;;  %v2785_v63 = vld [vmem:[#allocation3 + $0xa0] sm:$0xff]  ;;  %v2788_v0 = vld [vmem:[#allocation3 + $0xb8] sm:$0xff] }
 0x688   :  { %v2787_v1 = vld [vmem:[#allocation3 + $0xb0] sm:$0xff]  ;;  %v2790_v2 = vld [vmem:[#allocation3 + $0xc8] sm:$0xff]  ;;  %v2789_v15 = vld [vmem:[#allocation3 + $0xc0] sm:$0xff] }
 0x689   :  { %v2792_v16 = vld [vmem:[#allocation3 + $0xd8] sm:$0xff]  ;;  %v2791_v17 = vld [vmem:[#allocation3 + $0xd0] sm:$0xff]  ;;  %v2794_v18 = vld [vmem:[#allocation3 + $0xe8] sm:$0xff] }
 0x68a   :  { %3038 = vmatpush1.bf16.msra.mxu0 %v2769_v41  ;;  %v2793_v62 = vld [vmem:[#allocation3 + $0xe0] sm:$0xff]  ;;  %v2796_v19 = vld [vmem:[#allocation3 + $0xf8] sm:$0xff]  ;;  %v2795_v20 = vld [vmem:[#allocation3 + $0xf0] sm:$0xff] }
 0x68b   :  { %3039 = vmatprep.subr.bf16.mxu0 %v2772_v42  ;;  %v2798_v21 = vld [vmem:[#allocation3 + $0x108] sm:$0xff]  ;;  %v2797_v28 = vld [vmem:[#allocation3 + $0x100] sm:$0xff]  ;;  %v2800_v30 = vld [vmem:[#allocation3 + $0x118] sm:$0xff] }
 0x68c   :  { %v2799_v31 = vld [vmem:[#allocation3 + $0x110] sm:$0xff]  ;;  %v2802_v32 = vld [vmem:[#allocation3 + $0x128] sm:$0xff]  ;;  %v2801_v36 = vld [vmem:[#allocation3 + $0x120] sm:$0xff] }
 0x68d   :  { %v2804_v37 = vld [vmem:[#allocation3 + $0x138] sm:$0xff]  ;;  %v2803_v60 = vld [vmem:[#allocation3 + $0x130] sm:$0xff]  ;;  %v2806_v38 = vld [vmem:[#allocation3 + $0x148] sm:$0xff] }
 0x68e   :  { %3040 = vmatpush1.bf16.msra.mxu0 %v2771_v43  ;;  %v2805_v33 = vld [vmem:[#allocation3 + $0x140] sm:$0xff]  ;;  %v2808_v39 = vld [vmem:[#allocation3 + $0x158] sm:$0xff]  ;;  %v2807_v40 = vld [vmem:[#allocation3 + $0x150] sm:$0xff] }
 0x68f   :  { %3041 = vmatprep.subr.bf16.mxu0 %v2774_v24  ;;  %v2810_v44 = vld [vmem:[#allocation3 + $0x168] sm:$0xff]  ;;  %v2809_v41 = vld [vmem:[#allocation3 + $0x160] sm:$0xff]  ;;  %v2812_v42 = vld [vmem:[#allocation3 + $0x178] sm:$0xff] }
 0x690   :  { %v2811_v43 = vld [vmem:[#allocation3 + $0x170] sm:$0xff]  ;;  %v2814_v24 = vld [vmem:[#allocation3 + $0x188] sm:$0xff] }
 0x692   :  { %3042 = vmatpush1.bf16.msra.mxu0 %v2773_v45  ;;  %v2813_v45 = vld [vmem:[#allocation3 + $0x180] sm:$0xff] }
 0x693   :  { %3043 = vmatprep.subr.bf16.mxu0 %v2776_v47  ;;  %v2816_v47 = vld [vmem:[#allocation3 + $0x198] sm:$0xff] }
 0x696   :  { %3044 = vmatpush1.bf16.msra.mxu0 %v2775_v48  ;;  %v2815_v48 = vld [vmem:[#allocation3 + $0x190] sm:$0xff] }
 0x697   :  { %3045 = vmatprep.subr.bf16.mxu0 %v2778_v49  ;;  %v2818_v49 = vld [vmem:[#allocation3 + $0x1a8] sm:$0xff] }
 0x69a   :  { %3046 = vmatpush1.bf16.msra.mxu0 %v2777_v25  ;;  %v2817_v25 = vld [vmem:[#allocation3 + $0x1a0] sm:$0xff] }
 0x69b   :  { %3047 = vmatprep.subr.bf16.mxu0 %v2780_v50  ;;  %v2820_v50 = vld [vmem:[#allocation3 + $0x1b8] sm:$0xff] }
 0x69e   :  { %3048 = vmatpush1.bf16.msra.mxu0 %v2779_v52  ;;  %v2819_v52 = vld [vmem:[#allocation3 + $0x1b0] sm:$0xff] }
 0x69f   :  { %3049 = vmatprep.subr.bf16.mxu0 %v2782_v53  ;;  %v2822_v53 = vld [vmem:[#allocation3 + $0x1c8] sm:$0xff] }
 0x6a2   :  { %3050 = vmatpush1.bf16.msra.mxu0 %v2781_v54  ;;  %v2821_v54 = vld [vmem:[#allocation3 + $0x1c0] sm:$0xff] }
 0x6a3   :  { %3051 = vmatprep.subr.bf16.mxu0 %v2784_v55  ;;  %v2824_v55 = vld [vmem:[#allocation3 + $0x1d8] sm:$0xff] }
 0x6a6   :  { %3052 = vmatpush1.bf16.msra.mxu0 %v2783_v56  ;;  %v2823_v56 = vld [vmem:[#allocation3 + $0x1d0] sm:$0xff] }
 0x6a7   :  { %3053 = vmatprep.subr.bf16.mxu0 %v2786_v57  ;;  %v2826_v57 = vld [vmem:[#allocation3 + $0x1e8] sm:$0xff] }
 0x6aa   :  { %3054 = vmatpush1.bf16.msra.mxu0 %v2785_v63  ;;  %v2825_v63 = vld [vmem:[#allocation3 + $0x1e0] sm:$0xff] }
 0x6ab   :  { %3055 = vmatprep.subr.bf16.mxu0 %v2788_v0  ;;  %v2828_v0 = vld [vmem:[#allocation3 + $0x1f8] sm:$0xff] }
 0x6ae   :  { %3056 = vmatpush1.bf16.msra.mxu0 %v2787_v1  ;;  %v2827_v1 = vld [vmem:[#allocation3 + $0x1f0] sm:$0xff] }
 0x6af   :  { %3057 = vmatprep.subr.bf16.mxu0 %v2790_v2  ;;  %v2830_v2 = vld [vmem:[#allocation3 + $0x208] sm:$0xff] }
 0x6b2   :  { %3058 = vmatpush1.bf16.msra.mxu0 %v2789_v15  ;;  %v2751_v15 = vpack.c.bf16 %v10351_v3, %v10351_v3  ;;  %v2835_v3 = vld [vmem:[#allocation3 + $0x230] sm:$0xff] }
 0x6b3   :  { %3059 = vmatprep.subr.bf16.mxu0 %v2792_v16  ;;  %v2754_v16 = vpack.c.bf16 %v10373_v51, %v10373_v51  ;;  %v2837_v51 = vld [vmem:[#allocation3 + $0x240] sm:$0xff] }
 0x6b6   :  { %3060 = vmatpush1.bf16.msra.mxu0 %v2791_v17  ;;  %v2829_v17 = vld [vmem:[#allocation3 + $0x200] sm:$0xff] }
 0x6b7   :  { %3061 = vmatprep.subr.bf16.mxu0 %v2794_v18  ;;  %v2832_v18 = vld [vmem:[#allocation3 + $0x218] sm:$0xff] }
 0x6ba   :  { %3062 = vmatpush1.bf16.msra.mxu0 %v2793_v62  ;;  %v2831_v62 = vld [vmem:[#allocation3 + $0x210] sm:$0xff] }
 0x6bb   :  { %3063 = vmatprep.subr.bf16.mxu0 %v2796_v19  ;;  %v2834_v19 = vld [vmem:[#allocation3 + $0x228] sm:$0xff] }
 0x6be   :  { %3064 = vmatpush1.bf16.msra.mxu0 %v2795_v20  ;;  %v2833_v20 = vld [vmem:[#allocation3 + $0x220] sm:$0xff] }
 0x6bf   :  { %3074 = vmatprep.subr.bf16.mxu0 %v2798_v21  ;;  %v2836_v21 = vld [vmem:[#allocation3 + $0x238] sm:$0xff] }
 0x6c1   :  { %3066 = vmatmul.mubr.bf16.vlgmr.msra.gmra.mrb[68].mxu0 %v2749_v58  ;;  %v2838_v58 = vld [vmem:[#allocation3 + $0x248] sm:$0xff] }
 0x6c2   :  { %3075 = vmatpush1.bf16.msra.mxu0 %v2797_v28  ;;  %3106 = vmatprep.mubr.bf16.mxu0 %v2752_v27  ;;  %v2840_v27 = vld [vmem:[#allocation3 + $0x258] sm:$0xff]  ;;  %v2839_v28 = vld [vmem:[#allocation3 + $0x250] sm:$0xff] }
 0x6c3   :  { %3076 = vmatprep.subr.bf16.mxu0 %v2800_v30  ;;  %v2842_v30 = vld [vmem:[#allocation3 + $0x268] sm:$0xff] }
 0x6c6   :  { %3077 = vmatpush1.bf16.msra.mxu0 %v2799_v31  ;;  %v2841_v31 = vld [vmem:[#allocation3 + $0x260] sm:$0xff] }
 0x6c7   :  { %3078 = vmatprep.subr.bf16.mxu0 %v2802_v32  ;;  %v2844_v32 = vld [vmem:[#allocation3 + $0x278] sm:$0xff] }
 0x6ca   :  { %3079 = vmatpush1.bf16.msra.mxu0 %v2801_v36  ;;  %v2843_v36 = vld [vmem:[#allocation3 + $0x270] sm:$0xff] }
 0x6cb   :  { %3080 = vmatprep.subr.bf16.mxu0 %v2804_v37  ;;  %v2846_v37 = vld [vmem:[#allocation3 + $0x288] sm:$0xff] }
 0x6ce   :  { %3081 = vmatpush1.bf16.msra.mxu0 %v2803_v60  ;;  %v2845_v60 = vld [vmem:[#allocation3 + $0x280] sm:$0xff] }
 0x6cf   :  { %3082 = vmatprep.subr.bf16.mxu0 %v2806_v38  ;;  %v2848_v38 = vld [vmem:[#allocation3 + $0x298] sm:$0xff] }
 0x6d2   :  { %3083 = vmatpush1.bf16.msra.mxu0 %v2805_v33  ;;  %v2847_v33 = vld [vmem:[#allocation3 + $0x290] sm:$0xff] }
 0x6d3   :  { %3084 = vmatprep.subr.bf16.mxu0 %v2808_v39  ;;  %v2850_v39 = vld [vmem:[#allocation3 + $0x2a8] sm:$0xff] }
 0x6d6   :  { %3085 = vmatpush1.bf16.msra.mxu0 %v2807_v40  ;;  %v2849_v40 = vld [vmem:[#allocation3 + $0x2a0] sm:$0xff] }
 0x6d7   :  { %3086 = vmatprep.subr.bf16.mxu0 %v2810_v44  ;;  %v2852_v44 = vld [vmem:[#allocation3 + $0x2b8] sm:$0xff] }
 0x6da   :  { %3087 = vmatpush1.bf16.msra.mxu0 %v2809_v41  ;;  %v2851_v41 = vld [vmem:[#allocation3 + $0x2b0] sm:$0xff] }
 0x6db   :  { %3088 = vmatprep.subr.bf16.mxu0 %v2812_v42  ;;  %v2854_v42 = vld [vmem:[#allocation3 + $0x2c8] sm:$0xff] }
 0x6de   :  { %3089 = vmatpush1.bf16.msra.mxu0 %v2811_v43  ;;  %v2853_v43 = vld [vmem:[#allocation3 + $0x2c0] sm:$0xff] }
 0x6df   :  { %3090 = vmatprep.subr.bf16.mxu0 %v2814_v24  ;;  %v2856_v24 = vld [vmem:[#allocation3 + $0x2d8] sm:$0xff] }
 0x6e2   :  { %3091 = vmatpush1.bf16.msra.mxu0 %v2813_v45  ;;  %v2855_v45 = vld [vmem:[#allocation3 + $0x2d0] sm:$0xff] }
 0x6e3   :  { %3092 = vmatprep.subr.bf16.mxu0 %v2816_v47  ;;  %v2858_v47 = vld [vmem:[#allocation3 + $0x2e8] sm:$0xff] }
 0x6e6   :  { %3093 = vmatpush1.bf16.msra.mxu0 %v2815_v48  ;;  %v2857_v48 = vld [vmem:[#allocation3 + $0x2e0] sm:$0xff] }
 0x6e7   :  { %3094 = vmatprep.subr.bf16.mxu0 %v2818_v49  ;;  %v2860_v49 = vld [vmem:[#allocation3 + $0x2f8] sm:$0xff] }
 0x6ea   :  { %3095 = vmatpush1.bf16.msra.mxu0 %v2817_v25  ;;  %v2859_v25 = vld [vmem:[#allocation3 + $0x2f0] sm:$0xff] }
 0x6eb   :  { %3096 = vmatprep.subr.bf16.mxu0 %v2820_v50  ;;  %v2862_v50 = vld [vmem:[#allocation3 + $0x308] sm:$0xff] }
 0x6ee   :  { %3097 = vmatpush1.bf16.msra.mxu0 %v2819_v52  ;;  %v2753_v52 = vpack.c.bf16 %v10354_v4, %v10354_v4  ;;  %v2867_v4 = vld [vmem:[#allocation3 + $0x330] sm:$0xff] }
 0x6ef   :  { %3098 = vmatprep.subr.bf16.mxu0 %v2822_v53  ;;  %v2756_v53 = vpack.c.bf16 %v10385_v34, %v10385_v34  ;;  %v2869_v34 = vld [vmem:[#allocation3 + $0x340] sm:$0xff] }
 0x6f2   :  { %3099 = vmatpush1.bf16.msra.mxu0 %v2821_v54  ;;  %v2861_v54 = vld [vmem:[#allocation3 + $0x300] sm:$0xff] }
 0x6f3   :  { %3100 = vmatprep.subr.bf16.mxu0 %v2824_v55  ;;  %v2864_v55 = vld [vmem:[#allocation3 + $0x318] sm:$0xff] }
 0x6f6   :  { %3101 = vmatpush1.bf16.msra.mxu0 %v2823_v56  ;;  %v2863_v56 = vld [vmem:[#allocation3 + $0x310] sm:$0xff] }
 0x6f7   :  { %3102 = vmatprep.subr.bf16.mxu0 %v2826_v57  ;;  %v2866_v57 = vld [vmem:[#allocation3 + $0x328] sm:$0xff] }
 0x6fa   :  { %3103 = vmatpush1.bf16.msra.mxu0 %v2825_v63  ;;  %v2865_v63 = vld [vmem:[#allocation3 + $0x320] sm:$0xff] }
 0x6fb   :  { %3104 = vmatprep.subr.bf16.mxu0 %v2828_v0  ;;  %v2868_v0 = vld [vmem:[#allocation3 + $0x338] sm:$0xff] }
 0x6fe   :  { %3105 = vmatpush1.bf16.msra.mxu0 %v2827_v1  ;;  %v2870_v1 = vld [vmem:[#allocation3 + $0x348] sm:$0xff] }
 0x6ff   :  { %3115 = vmatprep.subr.bf16.mxu0 %v2830_v2  ;;  %v2872_v2 = vld [vmem:[#allocation3 + $0x358] sm:$0xff] }
 0x701   :  { %3107 = vmatmul.mubr.bf16.vlgmr.msra.gmra.mrb[68].mxu0 %v2751_v15  ;;  %v2871_v15 = vld [vmem:[#allocation3 + $0x350] sm:$0xff] }
 0x702   :  { %3116 = vmatpush1.bf16.msra.mxu0 %v2829_v17  ;;  %3147 = vmatprep.mubr.bf16.mxu0 %v2754_v16  ;;  %v2874_v16 = vld [vmem:[#allocation3 + $0x368] sm:$0xff]  ;;  %v2873_v17 = vld [vmem:[#allocation3 + $0x360] sm:$0xff] }
 0x703   :  { %3117 = vmatprep.subr.bf16.mxu0 %v2832_v18  ;;  %v2876_v18 = vld [vmem:[#allocation3 + $0x378] sm:$0xff] }
 0x706   :  { %3118 = vmatpush1.bf16.msra.mxu0 %v2831_v62  ;;  %v2875_v62 = vld [vmem:[#allocation3 + $0x370] sm:$0xff] }
 0x707   :  { %3119 = vmatprep.subr.bf16.mxu0 %v2834_v19  ;;  %v2878_v19 = vld [vmem:[#allocation3 + $0x388] sm:$0xff] }
 0x70a   :  { %3120 = vmatpush1.bf16.msra.mxu0 %v2833_v20  ;;  %v2877_v20 = vld [vmem:[#allocation3 + $0x380] sm:$0xff] }
 0x70b   :  { %3121 = vmatprep.subr.bf16.mxu0 %v2836_v21  ;;  %v2880_v21 = vld [vmem:[#allocation3 + $0x398] sm:$0xff] }
 0x70e   :  { %3122 = vmatpush1.bf16.msra.mxu0 %v2835_v3  ;;  %v2879_v3 = vld [vmem:[#allocation3 + $0x390] sm:$0xff] }
 0x70f   :  { %3123 = vmatprep.subr.bf16.mxu0 %v2838_v58  ;;  %v2882_v58 = vld [vmem:[#allocation3 + $0x3a8] sm:$0xff] }
 0x712   :  { %3124 = vmatpush1.bf16.msra.mxu0 %v2837_v51  ;;  %v2881_v51 = vld [vmem:[#allocation3 + $0x3a0] sm:$0xff] }
 0x713   :  { %3125 = vmatprep.subr.bf16.mxu0 %v2840_v27  ;;  %v2884_v27 = vld [vmem:[#allocation3 + $0x3b8] sm:$0xff] }
 0x716   :  { %3126 = vmatpush1.bf16.msra.mxu0 %v2839_v28  ;;  %v2883_v28 = vld [vmem:[#allocation3 + $0x3b0] sm:$0xff] }
 0x717   :  { %3127 = vmatprep.subr.bf16.mxu0 %v2842_v30  ;;  %v2886_v30 = vld [vmem:[#allocation3 + $0x3c8] sm:$0xff] }
 0x71a   :  { %3128 = vmatpush1.bf16.msra.mxu0 %v2841_v31  ;;  %v2885_v31 = vld [vmem:[#allocation3 + $0x3c0] sm:$0xff] }
 0x71b   :  { %3129 = vmatprep.subr.bf16.mxu0 %v2844_v32  ;;  %v2888_v32 = vld [vmem:[#allocation3 + $0x3d8] sm:$0xff] }
 0x71e   :  { %3130 = vmatpush1.bf16.msra.mxu0 %v2843_v36  ;;  %v2887_v36 = vld [vmem:[#allocation3 + $0x3d0] sm:$0xff] }
 0x71f   :  { %3131 = vmatprep.subr.bf16.mxu0 %v2846_v37  ;;  %v2890_v37 = vld [vmem:[#allocation3 + $0x3e8] sm:$0xff] }
 0x722   :  { %3132 = vmatpush1.bf16.msra.mxu0 %v2845_v60  ;;  %v2889_v60 = vld [vmem:[#allocation3 + $0x3e0] sm:$0xff] }
 0x723   :  { %3133 = vmatprep.subr.bf16.mxu0 %v2848_v38  ;;  %v2892_v38 = vld [vmem:[#allocation3 + $0x3f8] sm:$0xff] }
 0x726   :  { %3134 = vmatpush1.bf16.msra.mxu0 %v2847_v33  ;;  %v2891_v33 = vld [vmem:[#allocation3 + $0x3f0] sm:$0xff] }
 0x727   :  { %3135 = vmatprep.subr.bf16.mxu0 %v2850_v39  ;;  %v2894_v39 = vld [vmem:[#allocation3 + $0x408] sm:$0xff] }
 0x72a   :  { %3136 = vmatpush1.bf16.msra.mxu0 %v2849_v40  ;;  %v2755_v40 = vpack.c.bf16 %v10363_v11, %v10363_v11  ;;  %v2899_v11 = vld [vmem:[#allocation3 + $0x430] sm:$0xff] }
 0x72b   :  { %3137 = vmatprep.subr.bf16.mxu0 %v2852_v44  ;;  %v2758_v44 = vpack.c.bf16 %v10376_v26, %v10376_v26  ;;  %v2901_v26 = vld [vmem:[#allocation3 + $0x440] sm:$0xff] }
 0x72e   :  { %3138 = vmatpush1.bf16.msra.mxu0 %v2851_v41  ;;  %v2893_v41 = vld [vmem:[#allocation3 + $0x400] sm:$0xff] }
 0x72f   :  { %3139 = vmatprep.subr.bf16.mxu0 %v2854_v42  ;;  %v2896_v42 = vld [vmem:[#allocation3 + $0x418] sm:$0xff] }
 0x732   :  { %3140 = vmatpush1.bf16.msra.mxu0 %v2853_v43  ;;  %v2895_v43 = vld [vmem:[#allocation3 + $0x410] sm:$0xff] }
 0x733   :  { %3141 = vmatprep.subr.bf16.mxu0 %v2856_v24  ;;  %v2898_v24 = vld [vmem:[#allocation3 + $0x428] sm:$0xff] }
 0x736   :  { %3142 = vmatpush1.bf16.msra.mxu0 %v2855_v45  ;;  %v2897_v45 = vld [vmem:[#allocation3 + $0x420] sm:$0xff] }
 0x737   :  { %3143 = vmatprep.subr.bf16.mxu0 %v2858_v47  ;;  %v2900_v47 = vld [vmem:[#allocation3 + $0x438] sm:$0xff] }
 0x73a   :  { %3144 = vmatpush1.bf16.msra.mxu0 %v2857_v48  ;;  %v2902_v48 = vld [vmem:[#allocation3 + $0x448] sm:$0xff] }
 0x73b   :  { %3145 = vmatprep.subr.bf16.mxu0 %v2860_v49  ;;  %v2904_v49 = vld [vmem:[#allocation3 + $0x458] sm:$0xff] }
 0x73e   :  { %3146 = vmatpush1.bf16.msra.mxu0 %v2859_v25  ;;  %v2903_v25 = vld [vmem:[#allocation3 + $0x450] sm:$0xff] }
 0x73f   :  { %3156 = vmatprep.subr.bf16.mxu0 %v2862_v50  ;;  %v2906_v50 = vld [vmem:[#allocation3 + $0x468] sm:$0xff] }
 0x741   :  { %3148 = vmatmul.mubr.bf16.vlgmr.msra.gmra.mrb[68].mxu0 %v2753_v52  ;;  %v2905_v52 = vld [vmem:[#allocation3 + $0x460] sm:$0xff] }
 0x742   :  { %3157 = vmatpush1.bf16.msra.mxu0 %v2861_v54  ;;  %3188 = vmatprep.mubr.bf16.mxu0 %v2756_v53  ;;  %v2908_v53 = vld [vmem:[#allocation3 + $0x478] sm:$0xff]  ;;  %v2907_v54 = vld [vmem:[#allocation3 + $0x470] sm:$0xff] }
 0x743   :  { %3158 = vmatprep.subr.bf16.mxu0 %v2864_v55  ;;  %v2910_v55 = vld [vmem:[#allocation3 + $0x488] sm:$0xff] }
 0x746   :  { %3159 = vmatpush1.bf16.msra.mxu0 %v2863_v56  ;;  %v2909_v56 = vld [vmem:[#allocation3 + $0x480] sm:$0xff] }
 0x747   :  { %3160 = vmatprep.subr.bf16.mxu0 %v2866_v57  ;;  %v2912_v57 = vld [vmem:[#allocation3 + $0x498] sm:$0xff] }
 0x74a   :  { %3161 = vmatpush1.bf16.msra.mxu0 %v2865_v63  ;;  %v2911_v63 = vld [vmem:[#allocation3 + $0x490] sm:$0xff] }
 0x74b   :  { %3162 = vmatprep.subr.bf16.mxu0 %v2868_v0  ;;  %v2914_v0 = vld [vmem:[#allocation3 + $0x4a8] sm:$0xff] }
 0x74e   :  { %3163 = vmatpush1.bf16.msra.mxu0 %v2867_v4  ;;  %v2913_v4 = vld [vmem:[#allocation3 + $0x4a0] sm:$0xff] }
 0x74f   :  { %3164 = vmatprep.subr.bf16.mxu0 %v2870_v1  ;;  %v2916_v1 = vld [vmem:[#allocation3 + $0x4b8] sm:$0xff] }
 0x752   :  { %3165 = vmatpush1.bf16.msra.mxu0 %v2869_v34  ;;  %v2915_v34 = vld [vmem:[#allocation3 + $0x4b0] sm:$0xff] }
 0x753   :  { %3166 = vmatprep.subr.bf16.mxu0 %v2872_v2  ;;  %v2918_v2 = vld [vmem:[#allocation3 + $0x4c8] sm:$0xff] }
 0x756   :  { %3167 = vmatpush1.bf16.msra.mxu0 %v2871_v15  ;;  %v2917_v15 = vld [vmem:[#allocation3 + $0x4c0] sm:$0xff] }
 0x757   :  { %3168 = vmatprep.subr.bf16.mxu0 %v2874_v16  ;;  %v2920_v16 = vld [vmem:[#allocation3 + $0x4d8] sm:$0xff] }
 0x75a   :  { %3169 = vmatpush1.bf16.msra.mxu0 %v2873_v17  ;;  %v2919_v17 = vld [vmem:[#allocation3 + $0x4d0] sm:$0xff] }
 0x75b   :  { %3170 = vmatprep.subr.bf16.mxu0 %v2876_v18  ;;  %v2922_v18 = vld [vmem:[#allocation3 + $0x4e8] sm:$0xff] }
 0x75e   :  { %3171 = vmatpush1.bf16.msra.mxu0 %v2875_v62  ;;  %v2921_v62 = vld [vmem:[#allocation3 + $0x4e0] sm:$0xff] }
 0x75f   :  { %3172 = vmatprep.subr.bf16.mxu0 %v2878_v19  ;;  %v2924_v19 = vld [vmem:[#allocation3 + $0x4f8] sm:$0xff] }
 0x762   :  { %3173 = vmatpush1.bf16.msra.mxu0 %v2877_v20  ;;  %v2923_v20 = vld [vmem:[#allocation3 + $0x4f0] sm:$0xff] }
 0x763   :  { %3174 = vmatprep.subr.bf16.mxu0 %v2880_v21  ;;  %v2926_v21 = vld [vmem:[#allocation3 + $0x508] sm:$0xff] }
 0x766   :  { %3175 = vmatpush1.bf16.msra.mxu0 %v2879_v3  ;;  %v2757_v3 = vpack.c.bf16 %v10357_v5, %v10357_v5  ;;  %v2931_v5 = vld [vmem:[#allocation3 + $0x530] sm:$0xff] }
 0x767   :  { %3176 = vmatprep.subr.bf16.mxu0 %v2882_v58  ;;  %v2760_v58 = vpack.c.bf16 %v10388_v22, %v10388_v22  ;;  %v2933_v22 = vld [vmem:[#allocation3 + $0x540] sm:$0xff] }
 0x76a   :  { %3177 = vmatpush1.bf16.msra.mxu0 %v2881_v51  ;;  %v2925_v51 = vld [vmem:[#allocation3 + $0x500] sm:$0xff] }
 0x76b   :  { %3178 = vmatprep.subr.bf16.mxu0 %v2884_v27  ;;  %v2928_v27 = vld [vmem:[#allocation3 + $0x518] sm:$0xff] }
 0x76e   :  { %3179 = vmatpush1.bf16.msra.mxu0 %v2883_v28  ;;  %v2927_v28 = vld [vmem:[#allocation3 + $0x510] sm:$0xff] }
 0x76f   :  { %3180 = vmatprep.subr.bf16.mxu0 %v2886_v30  ;;  %v2930_v30 = vld [vmem:[#allocation3 + $0x528] sm:$0xff] }
 0x772   :  { %3181 = vmatpush1.bf16.msra.mxu0 %v2885_v31  ;;  %v2929_v31 = vld [vmem:[#allocation3 + $0x520] sm:$0xff] }
 0x773   :  { %3182 = vmatprep.subr.bf16.mxu0 %v2888_v32  ;;  %v2932_v32 = vld [vmem:[#allocation3 + $0x538] sm:$0xff] }
 0x776   :  { %3183 = vmatpush1.bf16.msra.mxu0 %v2887_v36  ;;  %v2934_v36 = vld [vmem:[#allocation3 + $0x548] sm:$0xff] }
 0x777   :  { %3184 = vmatprep.subr.bf16.mxu0 %v2890_v37  ;;  %v2936_v37 = vld [vmem:[#allocation3 + $0x558] sm:$0xff] }
 0x77a   :  { %3185 = vmatpush1.bf16.msra.mxu0 %v2889_v60  ;;  %v2935_v60 = vld [vmem:[#allocation3 + $0x550] sm:$0xff] }
 0x77b   :  { %3186 = vmatprep.subr.bf16.mxu0 %v2892_v38  ;;  %v2938_v38 = vld [vmem:[#allocation3 + $0x568] sm:$0xff] }
 0x77e   :  { %3187 = vmatpush1.bf16.msra.mxu0 %v2891_v33  ;;  %v2937_v33 = vld [vmem:[#allocation3 + $0x560] sm:$0xff] }
 0x77f   :  { %3197 = vmatprep.subr.bf16.mxu0 %v2894_v39  ;;  %v2940_v39 = vld [vmem:[#allocation3 + $0x578] sm:$0xff] }
 0x781   :  { %3189 = vmatmul.mubr.bf16.vlgmr.msra.gmra.mrb[68].mxu0 %v2755_v40  ;;  %v2939_v40 = vld [vmem:[#allocation3 + $0x570] sm:$0xff] }
 0x782   :  { %3198 = vmatpush1.bf16.msra.mxu0 %v2893_v41  ;;  %3229 = vmatprep.mubr.bf16.mxu0 %v2758_v44  ;;  %v2942_v44 = vld [vmem:[#allocation3 + $0x588] sm:$0xff]  ;;  %v2941_v41 = vld [vmem:[#allocation3 + $0x580] sm:$0xff] }
 0x783   :  { %3199 = vmatprep.subr.bf16.mxu0 %v2896_v42  ;;  %v2944_v42 = vld [vmem:[#allocation3 + $0x598] sm:$0xff] }
 0x786   :  { %3200 = vmatpush1.bf16.msra.mxu0 %v2895_v43  ;;  %v2943_v43 = vld [vmem:[#allocation3 + $0x590] sm:$0xff] }
 0x787   :  { %3201 = vmatprep.subr.bf16.mxu0 %v2898_v24  ;;  %v2946_v24 = vld [vmem:[#allocation3 + $0x5a8] sm:$0xff] }
 0x78a   :  { %3202 = vmatpush1.bf16.msra.mxu0 %v2897_v45  ;;  %v2945_v45 = vld [vmem:[#allocation3 + $0x5a0] sm:$0xff] }
 0x78b   :  { %3203 = vmatprep.subr.bf16.mxu0 %v2900_v47  ;;  %v2948_v47 = vld [vmem:[#allocation3 + $0x5b8] sm:$0xff] }
 0x78e   :  { %3204 = vmatpush1.bf16.msra.mxu0 %v2899_v11  ;;  %v2947_v11 = vld [vmem:[#allocation3 + $0x5b0] sm:$0xff] }
 0x78f   :  { %3205 = vmatprep.subr.bf16.mxu0 %v2902_v48  ;;  %v2950_v48 = vld [vmem:[#allocation3 + $0x5c8] sm:$0xff] }
 0x792   :  { %3206 = vmatpush1.bf16.msra.mxu0 %v2901_v26  ;;  %v2949_v26 = vld [vmem:[#allocation3 + $0x5c0] sm:$0xff] }
 0x793   :  { %3207 = vmatprep.subr.bf16.mxu0 %v2904_v49  ;;  %v2952_v49 = vld [vmem:[#allocation3 + $0x5d8] sm:$0xff] }
 0x796   :  { %3208 = vmatpush1.bf16.msra.mxu0 %v2903_v25  ;;  %v2951_v25 = vld [vmem:[#allocation3 + $0x5d0] sm:$0xff] }
 0x797   :  { %3209 = vmatprep.subr.bf16.mxu0 %v2906_v50  ;;  %v2954_v50 = vld [vmem:[#allocation3 + $0x5e8] sm:$0xff] }
 0x79a   :  { %3210 = vmatpush1.bf16.msra.mxu0 %v2905_v52  ;;  %v2953_v52 = vld [vmem:[#allocation3 + $0x5e0] sm:$0xff] }
 0x79b   :  { %3211 = vmatprep.subr.bf16.mxu0 %v2908_v53  ;;  %v2956_v53 = vld [vmem:[#allocation3 + $0x5f8] sm:$0xff] }
 0x79e   :  { %3212 = vmatpush1.bf16.msra.mxu0 %v2907_v54  ;;  %v2955_v54 = vld [vmem:[#allocation3 + $0x5f0] sm:$0xff] }
 0x79f   :  { %3213 = vmatprep.subr.bf16.mxu0 %v2910_v55  ;;  %v2958_v55 = vld [vmem:[#allocation3 + $0x608] sm:$0xff] }
 0x7a2   :  { %3214 = vmatpush1.bf16.msra.mxu0 %v2909_v56  ;;  %v2759_v56 = vpack.c.bf16 %v10366_v12, %v10366_v12  ;;  %v2963_v12 = vld [vmem:[#allocation3 + $0x630] sm:$0xff] }
 0x7a3   :  { %3215 = vmatprep.subr.bf16.mxu0 %v2912_v57  ;;  %v2762_v57 = vpack.c.bf16 %v10379_v29, %v10379_v29  ;;  %v2965_v29 = vld [vmem:[#allocation3 + $0x640] sm:$0xff] }
 0x7a6   :  { %3216 = vmatpush1.bf16.msra.mxu0 %v2911_v63  ;;  %v2957_v63 = vld [vmem:[#allocation3 + $0x600] sm:$0xff] }
 0x7a7   :  { %3217 = vmatprep.subr.bf16.mxu0 %v2914_v0  ;;  %v2960_v0 = vld [vmem:[#allocation3 + $0x618] sm:$0xff] }
 0x7aa   :  { %3218 = vmatpush1.bf16.msra.mxu0 %v2913_v4  ;;  %v2959_v4 = vld [vmem:[#allocation3 + $0x610] sm:$0xff] }
 0x7ab   :  { %3219 = vmatprep.subr.bf16.mxu0 %v2916_v1  ;;  %v2962_v1 = vld [vmem:[#allocation3 + $0x628] sm:$0xff] }
 0x7ae   :  { %3220 = vmatpush1.bf16.msra.mxu0 %v2915_v34  ;;  %v2961_v34 = vld [vmem:[#allocation3 + $0x620] sm:$0xff] }
 0x7af   :  { %3221 = vmatprep.subr.bf16.mxu0 %v2918_v2  ;;  %v2964_v2 = vld [vmem:[#allocation3 + $0x638] sm:$0xff] }
 0x7b2   :  { %3222 = vmatpush1.bf16.msra.mxu0 %v2917_v15  ;;  %v2966_v15 = vld [vmem:[#allocation3 + $0x648] sm:$0xff] }
 0x7b3   :  { %3223 = vmatprep.subr.bf16.mxu0 %v2920_v16  ;;  %v2968_v16 = vld [vmem:[#allocation3 + $0x658] sm:$0xff] }
 0x7b6   :  { %3224 = vmatpush1.bf16.msra.mxu0 %v2919_v17  ;;  %v2967_v17 = vld [vmem:[#allocation3 + $0x650] sm:$0xff] }
 0x7b7   :  { %3225 = vmatprep.subr.bf16.mxu0 %v2922_v18  ;;  %v2970_v18 = vld [vmem:[#allocation3 + $0x668] sm:$0xff] }
 0x7ba   :  { %3226 = vmatpush1.bf16.msra.mxu0 %v2921_v62  ;;  %v2969_v62 = vld [vmem:[#allocation3 + $0x660] sm:$0xff] }
 0x7bb   :  { %3227 = vmatprep.subr.bf16.mxu0 %v2924_v19  ;;  %v2972_v19 = vld [vmem:[#allocation3 + $0x678] sm:$0xff] }
 0x7be   :  { %3228 = vmatpush1.bf16.msra.mxu0 %v2923_v20  ;;  %v2971_v20 = vld [vmem:[#allocation3 + $0x670] sm:$0xff] }
 0x7bf   :  { %3238 = vmatprep.subr.bf16.mxu0 %v2926_v21  ;;  %v2974_v21 = vld [vmem:[#allocation3 + $0x688] sm:$0xff] }
 0x7c1   :  { %3230 = vmatmul.mubr.bf16.vlgmr.msra.gmra.mrb[68].mxu0 %v2757_v3  ;;  %v2973_v3 = vld [vmem:[#allocation3 + $0x680] sm:$0xff] }
 0x7c2   :  { %3239 = vmatpush1.bf16.msra.mxu0 %v2925_v51  ;;  %3270 = vmatprep.mubr.bf16.mxu0 %v2760_v58  ;;  %v2976_v58 = vld [vmem:[#allocation3 + $0x698] sm:$0xff]  ;;  %v2975_v51 = vld [vmem:[#allocation3 + $0x690] sm:$0xff] }
 0x7c3   :  { %3240 = vmatprep.subr.bf16.mxu0 %v2928_v27  ;;  %v2978_v27 = vld [vmem:[#allocation3 + $0x6a8] sm:$0xff] }
 0x7c6   :  { %3241 = vmatpush1.bf16.msra.mxu0 %v2927_v28  ;;  %v2977_v28 = vld [vmem:[#allocation3 + $0x6a0] sm:$0xff] }
 0x7c7   :  { %3242 = vmatprep.subr.bf16.mxu0 %v2930_v30  ;;  %v2980_v30 = vld [vmem:[#allocation3 + $0x6b8] sm:$0xff] }
 0x7ca   :  { %3243 = vmatpush1.bf16.msra.mxu0 %v2929_v31  ;;  %v2979_v31 = vld [vmem:[#allocation3 + $0x6b0] sm:$0xff] }
 0x7cb   :  { %3244 = vmatprep.subr.bf16.mxu0 %v2932_v32  ;;  %v2982_v32 = vld [vmem:[#allocation3 + $0x6c8] sm:$0xff] }
 0x7ce   :  { %3245 = vmatpush1.bf16.msra.mxu0 %v2931_v5  ;;  %v2981_v5 = vld [vmem:[#allocation3 + $0x6c0] sm:$0xff] }
 0x7cf   :  { %3246 = vmatprep.subr.bf16.mxu0 %v2934_v36  ;;  %v2984_v36 = vld [vmem:[#allocation3 + $0x6d8] sm:$0xff] }
 0x7d2   :  { %3247 = vmatpush1.bf16.msra.mxu0 %v2933_v22  ;;  %v2983_v22 = vld [vmem:[#allocation3 + $0x6d0] sm:$0xff] }
 0x7d3   :  { %3248 = vmatprep.subr.bf16.mxu0 %v2936_v37  ;;  %v2986_v37 = vld [vmem:[#allocation3 + $0x6e8] sm:$0xff] }
 0x7d6   :  { %3249 = vmatpush1.bf16.msra.mxu0 %v2935_v60  ;;  %v2985_v60 = vld [vmem:[#allocation3 + $0x6e0] sm:$0xff] }
 0x7d7   :  { %3250 = vmatprep.subr.bf16.mxu0 %v2938_v38  ;;  %v2988_v38 = vld [vmem:[#allocation3 + $0x6f8] sm:$0xff] }
 0x7da   :  { %3251 = vmatpush1.bf16.msra.mxu0 %v2937_v33  ;;  %v2987_v33 = vld [vmem:[#allocation3 + $0x6f0] sm:$0xff] }
 0x7db   :  { %3252 = vmatprep.subr.bf16.mxu0 %v2940_v39  ;;  %v2990_v39 = vld [vmem:[#allocation3 + $0x708] sm:$0xff] }
 0x7de   :  { %3253 = vmatpush1.bf16.msra.mxu0 %v2939_v40  ;;  %v2761_v40 = vpack.c.bf16 %v10360_v6, %v10360_v6  ;;  %v2995_v6 = vld [vmem:[#allocation3 + $0x730] sm:$0xff] }
 0x7df   :  { %3254 = vmatprep.subr.bf16.mxu0 %v2942_v44  ;;  %v2764_v44 = vpack.c.bf16 %v10391_v35, %v10391_v35  ;;  %v2997_v35 = vld [vmem:[#allocation3 + $0x740] sm:$0xff] }
 0x7e2   :  { %3255 = vmatpush1.bf16.msra.mxu0 %v2941_v41  ;;  %v2989_v41 = vld [vmem:[#allocation3 + $0x700] sm:$0xff] }
 0x7e3   :  { %3256 = vmatprep.subr.bf16.mxu0 %v2944_v42  ;;  %v2992_v42 = vld [vmem:[#allocation3 + $0x718] sm:$0xff] }
 0x7e6   :  { %3257 = vmatpush1.bf16.msra.mxu0 %v2943_v43  ;;  %v2991_v43 = vld [vmem:[#allocation3 + $0x710] sm:$0xff] }
 0x7e7   :  { %3258 = vmatprep.subr.bf16.mxu0 %v2946_v24  ;;  %v2994_v24 = vld [vmem:[#allocation3 + $0x728] sm:$0xff] }
 0x7ea   :  { %3259 = vmatpush1.bf16.msra.mxu0 %v2945_v45  ;;  %v2993_v45 = vld [vmem:[#allocation3 + $0x720] sm:$0xff] }
 0x7eb   :  { %3260 = vmatprep.subr.bf16.mxu0 %v2948_v47  ;;  %v2996_v47 = vld [vmem:[#allocation3 + $0x738] sm:$0xff] }
 0x7ee   :  { %3261 = vmatpush1.bf16.msra.mxu0 %v2947_v11  ;;  %v2998_v11 = vld [vmem:[#allocation3 + $0x748] sm:$0xff] }
 0x7ef   :  { %3262 = vmatprep.subr.bf16.mxu0 %v2950_v48  ;;  %v3000_v48 = vld [vmem:[#allocation3 + $0x758] sm:$0xff] }
 0x7f2   :  { %3263 = vmatpush1.bf16.msra.mxu0 %v2949_v26  ;;  %v2999_v26 = vld [vmem:[#allocation3 + $0x750] sm:$0xff] }
 0x7f3   :  { %3264 = vmatprep.subr.bf16.mxu0 %v2952_v49  ;;  %v3002_v49 = vld [vmem:[#allocation3 + $0x768] sm:$0xff] }
 0x7f6   :  { %3265 = vmatpush1.bf16.msra.mxu0 %v2951_v25  ;;  %v3001_v25 = vld [vmem:[#allocation3 + $0x760] sm:$0xff] }
 0x7f7   :  { %3266 = vmatprep.subr.bf16.mxu0 %v2954_v50  ;;  %v3004_v50 = vld [vmem:[#allocation3 + $0x778] sm:$0xff] }
 0x7fa   :  { %3267 = vmatpush1.bf16.msra.mxu0 %v2953_v52  ;;  %v3003_v52 = vld [vmem:[#allocation3 + $0x770] sm:$0xff] }
 0x7fb   :  { %3268 = vmatprep.subr.bf16.mxu0 %v2956_v53  ;;  %v3006_v53 = vld [vmem:[#allocation3 + $0x788] sm:$0xff] }
 0x7fe   :  { %3269 = vmatpush1.bf16.msra.mxu0 %v2955_v54  ;;  %v3005_v54 = vld [vmem:[#allocation3 + $0x780] sm:$0xff] }
 0x7ff   :  { %3279 = vmatprep.subr.bf16.mxu0 %v2958_v55  ;;  %v3008_v55 = vld [vmem:[#allocation3 + $0x798] sm:$0xff] }
 0x801   :  { %3271 = vmatmul.mubr.bf16.vlgmr.msra.gmra.mrb[68].mxu0 %v2759_v56  ;;  %v3007_v56 = vld [vmem:[#allocation3 + $0x790] sm:$0xff] }
 0x802   :  { %3280 = vmatpush1.bf16.msra.mxu0 %v2957_v63  ;;  %3311 = vmatprep.mubr.bf16.mxu0 %v2762_v57  ;;  %v3010_v57 = vld [vmem:[#allocation3 + $0x7a8] sm:$0xff]  ;;  %v3009_v63 = vld [vmem:[#allocation3 + $0x7a0] sm:$0xff] }
 0x803   :  { %3281 = vmatprep.subr.bf16.mxu0 %v2960_v0  ;;  %v3012_v0 = vld [vmem:[#allocation3 + $0x7b8] sm:$0xff] }
 0x806   :  { %3282 = vmatpush1.bf16.msra.mxu0 %v2959_v4  ;;  %v3011_v4 = vld [vmem:[#allocation3 + $0x7b0] sm:$0xff] }
 0x807   :  { %3283 = vmatprep.subr.bf16.mxu0 %v2962_v1  ;;  %v3014_v1 = vld [vmem:[#allocation3 + $0x7c8] sm:$0xff] }
 0x80a   :  { %3284 = vmatpush1.bf16.msra.mxu0 %v2961_v34  ;;  %v3013_v34 = vld [vmem:[#allocation3 + $0x7c0] sm:$0xff] }
 0x80b   :  { %3285 = vmatprep.subr.bf16.mxu0 %v2964_v2  ;;  %v3016_v2 = vld [vmem:[#allocation3 + $0x7d8] sm:$0xff] }
 0x80e   :  { %3286 = vmatpush1.bf16.msra.mxu0 %v2963_v12  ;;  %v3015_v12 = vld [vmem:[#allocation3 + $0x7d0] sm:$0xff] }
 0x80f   :  { %3287 = vmatprep.subr.bf16.mxu0 %v2966_v15  ;;  %v3018_v15 = vld [vmem:[#allocation3 + $0x7e8] sm:$0xff] }
 0x812   :  { %3288 = vmatpush1.bf16.msra.mxu0 %v2965_v29  ;;  %v3017_v29 = vld [vmem:[#allocation3 + $0x7e0] sm:$0xff] }
 0x813   :  { %3289 = vmatprep.subr.bf16.mxu0 %v2968_v16  ;;  %v3020_v16 = vld [vmem:[#allocation3 + $0x7f8] sm:$0xff] }
 0x816   :  { %3290 = vmatpush1.bf16.msra.mxu0 %v2967_v17  ;;  %v3019_v17 = vld [vmem:[#allocation3 + $0x7f0] sm:$0xff] }
 0x817   :  { %3291 = vmatprep.subr.bf16.mxu0 %v2970_v18  ;;  %v2763_v18 = vpack.c.bf16 %v10369_v13, %v10369_v13  ;;  %v3363_v13 = vld [vmem:[%s11342_s7] sm:$0x3] }
 0x81a   :  { %3292 = vmatpush1.bf16.msra.mxu0 %v2969_v62  ;;  %v3021_v62 = vld [vmem:[#allocation17] sm:$0x3] }
 0x81b   :  { %3293 = vmatprep.subr.bf16.mxu0 %v2972_v19  ;;  %v3026_v19 = vrot.slane %v3021_v62, %v10233_v59 }
 0x81e   :  { %3294 = vmatpush1.bf16.msra.mxu0 %v2971_v20  ;;  %v3030_v20 = vrot.slane %v3021_v62, %v10236_v61 }
 0x81f   :  { %3295 = vmatprep.subr.bf16.mxu0 %v2974_v21 }
 0x822   :  { %3296 = vmatpush1.bf16.msra.mxu0 %v2973_v3 }
 0x823   :  { %3297 = vmatprep.subr.bf16.mxu0 %v2976_v58 }
 0x826   :  { %3298 = vmatpush1.bf16.msra.mxu0 %v2975_v51 }
 0x827   :  { %3299 = vmatprep.subr.bf16.mxu0 %v2978_v27 }
 0x82a   :  { %3300 = vmatpush1.bf16.msra.mxu0 %v2977_v28 }
 0x82b   :  { %3301 = vmatprep.subr.bf16.mxu0 %v2980_v30 }
 0x82e   :  { %3302 = vmatpush1.bf16.msra.mxu0 %v2979_v31 }
 0x82f   :  { %3303 = vmatprep.subr.bf16.mxu0 %v2982_v32 }
 0x832   :  { %3304 = vmatpush1.bf16.msra.mxu0 %v2981_v5 }
 0x833   :  { %3305 = vmatprep.subr.bf16.mxu0 %v2984_v36 }
 0x836   :  { %3306 = vmatpush1.bf16.msra.mxu0 %v2983_v22 }
 0x837   :  { %3307 = vmatprep.subr.bf16.mxu0 %v2986_v37 }
 0x83a   :  { %3308 = vmatpush1.bf16.msra.mxu0 %v2985_v60 }
 0x83b   :  { %3309 = vmatprep.subr.bf16.mxu0 %v2988_v38 }
 0x83e   :  { %3310 = vmatpush1.bf16.msra.mxu0 %v2987_v33 }
 0x83f   :  { %3320 = vmatprep.subr.bf16.mxu0 %v2990_v39 }
 0x841   :  { %3312 = vmatmul.mubr.bf16.vlgmr.msra.gmra.mrb[68].mxu0 %v2761_v40 }
 0x842   :  { %3321 = vmatpush1.bf16.msra.mxu0 %v2989_v41  ;;  %3352 = vmatprep.mubr.bf16.mxu0 %v2764_v44 }
 0x843   :  { %3322 = vmatprep.subr.bf16.mxu0 %v2992_v42 }
 0x846   :  { %3323 = vmatpush1.bf16.msra.mxu0 %v2991_v43 }
 0x847   :  { %3324 = vmatprep.subr.bf16.mxu0 %v2994_v24 }
 0x84a   :  { %3325 = vmatpush1.bf16.msra.mxu0 %v2993_v45 }
 0x84b   :  { %3326 = vmatprep.subr.bf16.mxu0 %v2996_v47 }
 0x84e   :  { %3327 = vmatpush1.bf16.msra.mxu0 %v2995_v6 }
 0x84f   :  { %3328 = vmatprep.subr.bf16.mxu0 %v2998_v11 }
 0x852   :  { %3329 = vmatpush1.bf16.msra.mxu0 %v2997_v35 }
 0x853   :  { %3330 = vmatprep.subr.bf16.mxu0 %v3000_v48 }
 0x856   :  { %3331 = vmatpush1.bf16.msra.mxu0 %v2999_v26 }
 0x857   :  { %3332 = vmatprep.subr.bf16.mxu0 %v3002_v49 }
 0x85a   :  { %3333 = vmatpush1.bf16.msra.mxu0 %v3001_v25 }
 0x85b   :  { %3334 = vmatprep.subr.bf16.mxu0 %v3004_v50 }
 0x85e   :  { %3335 = vmatpush1.bf16.msra.mxu0 %v3003_v52 }
 0x85f   :  { %3336 = vmatprep.subr.bf16.mxu0 %v3006_v53 }
 0x862   :  { %3337 = vmatpush1.bf16.msra.mxu0 %v3005_v54 }
 0x863   :  { %3338 = vmatprep.subr.bf16.mxu0 %v3008_v55 }
 0x866   :  { %3339 = vmatpush1.bf16.msra.mxu0 %v3007_v56 }
 0x867   :  { %3340 = vmatprep.subr.bf16.mxu0 %v3010_v57 }
 0x86a   :  { %3341 = vmatpush1.bf16.msra.mxu0 %v3009_v63 }
 0x86b   :  { %3342 = vmatprep.subr.bf16.mxu0 %v3012_v0 }
 0x86e   :  { %3343 = vmatpush1.bf16.msra.mxu0 %v3011_v4 }
 0x86f   :  { %3344 = vmatprep.subr.bf16.mxu0 %v3014_v1 }
 0x872   :  { %3345 = vmatpush1.bf16.msra.mxu0 %v3013_v34 }
 0x873   :  { %3346 = vmatprep.subr.bf16.mxu0 %v3016_v2 }
 0x876   :  { %3347 = vmatpush1.bf16.msra.mxu0 %v3015_v12 }
 0x877   :  { %3348 = vmatprep.subr.bf16.mxu0 %v3018_v15 }
 0x87a   :  { %3349 = vmatpush1.bf16.msra.mxu0 %v3017_v29 }
 0x87b   :  { %3350 = vmatprep.subr.bf16.mxu0 %v3020_v16 }
 0x87e   :  { %3351 = vmatpush1.bf16.msra.mxu0 %v3019_v17 }
 0x881   :  { %3353 = vmatmul.mubr.bf16.vlgmr.msra.gmra.mrb[68].mxu0 %v2763_v18 }
 0x954   :  { %v3354_v21 = vpop.f32.mrb[68].mxu0 }
 0x955   :  { %v9112_v3 = vadd.f32 %v3354_v21, %v3026_v19  ;;  %v3356_v58 = vpop.f32.mrb[69].mxu0 }
 0x956   :  { %v9113_v51 = vadd.f32 %v3356_v58, %v3030_v20  ;;  %v3358_v27 = vpop.f32.mrb[70].mxu0 }
 0x957   :  { %3361 = vst [vmem:[#allocation27] sm:$0x3] %v9112_v3  ;;  %v3359_v28 = vpop.f32.mrb[71].mxu0 }
 0x958   :  { %3362 = vst [vmem:[#allocation28] sm:$0x3] %v9113_v51  ;;  %v3364_v30 = vmul.f32 0.5, %v9113_v51 }
 0x95a   :  { %v3365_v31 = vmul.f32 1.442695, %v3364_v30 }
 0x95c   :  { %9347 = vpow2.f32 %v3365_v31 }
 0x966   :  { %v9348_v32 = vpop.eup %9347 }
 0x967   :  { %v3367_v5 = vmul.f32 %v9348_v32, %v3363_v13 }
 0x969   :  { %v3368_v36 = vadd.f32 %v9112_v3, %v3367_v5 }
 0x96a   :  { %9781 = dma.done.wait [#allocation8 + $0x2], 16384 }
 0x96b   :  { %9782 = vsyncadd [#allocation8 + $0x2], 4294950912  ;;  %3618 = vmatprep.mubr.bf16.mxu1 %v9834_v23  ;;  %v3375_v22 = vld [vmem:[#allocation4 + $0x8] sm:$0xff]  ;;  %v3374_v37 = vld [vmem:[#allocation4] sm:$0xff]  ;;  %v10429_v48 = vpack.c.bf16 %v3368_v36, %v3368_v36  ;;  %vm3990_vm11 = vcmask 1041408   ;;  %vm3995_vm12 = vcmask 1042432  }
 0x96c   :  { %v3391_v60 = vld [vmem:[#allocation4 + $0x88] sm:$0xff]  ;;  %3586 = vmatprep.subr.bf16.mxu1 %v3375_v22  ;;  %v3390_v38 = vld [vmem:[#allocation4 + $0x80] sm:$0xff]  ;;  %v3377_v35 = vld [vmem:[#allocation4 + $0x18] sm:$0xff]  ;;  %vm4000_vm13 = vcmask 1043456   ;;  %vm4005_vm14 = vcmask 1044480   ;;  %vm4010_vm15 = vcmask 1045504  }
 0x96d   :  { %3587 = vmatpush1.bf16.msra.mxu1 %v3374_v37  ;;  %v3407_v33 = vld [vmem:[#allocation4 + $0x108] sm:$0xff]  ;;  %v3406_v39 = vld [vmem:[#allocation4 + $0x100] sm:$0xff]  ;;  %v3376_v26 = vld [vmem:[#allocation4 + $0x10] sm:$0xff]  ;;  %vm4015_vm0 = vcmask 1046528  }
 0x96e   :  { %3588 = vmatprep.subr.bf16.mxu1 %v3391_v60  ;;  %v3423_v40 = vld [vmem:[#allocation4 + $0x188] sm:$0xff]  ;;  %v3422_v44 = vld [vmem:[#allocation4 + $0x180] sm:$0xff]  ;;  %v3393_v49 = vld [vmem:[#allocation4 + $0x98] sm:$0xff] }
 0x96f   :  { %v3439_v41 = vld [vmem:[#allocation4 + $0x208] sm:$0xff]  ;;  %v3438_v42 = vld [vmem:[#allocation4 + $0x200] sm:$0xff]  ;;  %v3392_v25 = vld [vmem:[#allocation4 + $0x90] sm:$0xff] }
 0x970   :  { %v3455_v43 = vld [vmem:[#allocation4 + $0x288] sm:$0xff]  ;;  %v3454_v24 = vld [vmem:[#allocation4 + $0x280] sm:$0xff]  ;;  %v3409_v50 = vld [vmem:[#allocation4 + $0x118] sm:$0xff] }
 0x971   :  { %3589 = vmatpush1.bf16.msra.mxu1 %v3390_v38  ;;  %v3471_v45 = vld [vmem:[#allocation4 + $0x308] sm:$0xff]  ;;  %v3470_v47 = vld [vmem:[#allocation4 + $0x300] sm:$0xff]  ;;  %v3408_v52 = vld [vmem:[#allocation4 + $0x110] sm:$0xff] }
 0x972   :  { %3590 = vmatprep.subr.bf16.mxu1 %v3407_v33  ;;  %v3487_v6 = vld [vmem:[#allocation4 + $0x388] sm:$0xff]  ;;  %v3486_v11 = vld [vmem:[#allocation4 + $0x380] sm:$0xff]  ;;  %v3425_v53 = vld [vmem:[#allocation4 + $0x198] sm:$0xff] }
 0x973   :  { %v3424_v54 = vld [vmem:[#allocation4 + $0x190] sm:$0xff]  ;;  %v3441_v55 = vld [vmem:[#allocation4 + $0x218] sm:$0xff]  ;;  %v3379_v2 = vld [vmem:[#allocation4 + $0x28] sm:$0xff] }
 0x974   :  { %v3440_v56 = vld [vmem:[#allocation4 + $0x210] sm:$0xff]  ;;  %v3457_v57 = vld [vmem:[#allocation4 + $0x298] sm:$0xff]  ;;  %v3378_v12 = vld [vmem:[#allocation4 + $0x20] sm:$0xff] }
 0x975   :  { %3591 = vmatpush1.bf16.msra.mxu1 %v3406_v39  ;;  %v3456_v63 = vld [vmem:[#allocation4 + $0x290] sm:$0xff]  ;;  %v3473_v0 = vld [vmem:[#allocation4 + $0x318] sm:$0xff]  ;;  %v3395_v15 = vld [vmem:[#allocation4 + $0xa8] sm:$0xff] }
 0x976   :  { %3592 = vmatprep.subr.bf16.mxu1 %v3423_v40  ;;  %v3472_v4 = vld [vmem:[#allocation4 + $0x310] sm:$0xff]  ;;  %v3489_v1 = vld [vmem:[#allocation4 + $0x398] sm:$0xff]  ;;  %v3394_v29 = vld [vmem:[#allocation4 + $0xa0] sm:$0xff] }
 0x977   :  { %v3488_v34 = vld [vmem:[#allocation4 + $0x390] sm:$0xff]  ;;  %v3411_v16 = vld [vmem:[#allocation4 + $0x128] sm:$0xff]  ;;  %v3410_v17 = vld [vmem:[#allocation4 + $0x120] sm:$0xff] }
 0x978   :  { %v3427_v18 = vld [vmem:[#allocation4 + $0x1a8] sm:$0xff]  ;;  %v3426_v62 = vld [vmem:[#allocation4 + $0x1a0] sm:$0xff]  ;;  %v3381_v30 = vld [vmem:[#allocation4 + $0x38] sm:$0xff] }
 0x979   :  { %3593 = vmatpush1.bf16.msra.mxu1 %v3422_v44  ;;  %v3443_v19 = vld [vmem:[#allocation4 + $0x228] sm:$0xff]  ;;  %v3442_v20 = vld [vmem:[#allocation4 + $0x220] sm:$0xff]  ;;  %v3380_v31 = vld [vmem:[#allocation4 + $0x30] sm:$0xff] }
 0x97a   :  { %3594 = vmatprep.subr.bf16.mxu1 %v3439_v41  ;;  %v3459_v21 = vld [vmem:[#allocation4 + $0x2a8] sm:$0xff]  ;;  %v3458_v3 = vld [vmem:[#allocation4 + $0x2a0] sm:$0xff]  ;;  %v3397_v13 = vld [vmem:[#allocation4 + $0xb8] sm:$0xff] }
 0x97b   :  { %v3475_v58 = vld [vmem:[#allocation4 + $0x328] sm:$0xff]  ;;  %v3474_v51 = vld [vmem:[#allocation4 + $0x320] sm:$0xff]  ;;  %v3396_v32 = vld [vmem:[#allocation4 + $0xb0] sm:$0xff] }
 0x97c   :  { %v3491_v27 = vld [vmem:[#allocation4 + $0x3a8] sm:$0xff]  ;;  %v3490_v28 = vld [vmem:[#allocation4 + $0x3a0] sm:$0xff]  ;;  %v3413_v5 = vld [vmem:[#allocation4 + $0x138] sm:$0xff] }
 0x97d   :  { %3595 = vmatpush1.bf16.msra.mxu1 %v3438_v42  ;;  %v3412_v36 = vld [vmem:[#allocation4 + $0x130] sm:$0xff]  ;;  %v3429_v22 = vld [vmem:[#allocation4 + $0x1b8] sm:$0xff] }
 0x97e   :  { %3596 = vmatprep.subr.bf16.mxu1 %v3455_v43  ;;  %v3428_v37 = vld [vmem:[#allocation4 + $0x1b0] sm:$0xff]  ;;  %v3445_v60 = vld [vmem:[#allocation4 + $0x238] sm:$0xff]  ;;  %v3383_v43 = vld [vmem:[#allocation4 + $0x48] sm:$0xff] }
 0x97f   :  { %v3444_v38 = vld [vmem:[#allocation4 + $0x230] sm:$0xff]  ;;  %v3461_v33 = vld [vmem:[#allocation4 + $0x2b8] sm:$0xff] }
 0x980   :  { %v3460_v39 = vld [vmem:[#allocation4 + $0x2b0] sm:$0xff]  ;;  %v3477_v40 = vld [vmem:[#allocation4 + $0x338] sm:$0xff] }
 0x981   :  { %3597 = vmatpush1.bf16.msra.mxu1 %v3454_v24  ;;  %v3476_v44 = vld [vmem:[#allocation4 + $0x330] sm:$0xff]  ;;  %v3493_v41 = vld [vmem:[#allocation4 + $0x3b8] sm:$0xff]  ;;  %v3382_v24 = vld [vmem:[#allocation4 + $0x40] sm:$0xff] }
 0x982   :  { %3598 = vmatprep.subr.bf16.mxu1 %v3471_v45  ;;  %v3492_v42 = vld [vmem:[#allocation4 + $0x3b0] sm:$0xff]  ;;  %v3399_v45 = vld [vmem:[#allocation4 + $0xc8] sm:$0xff] }
 0x985   :  { %3599 = vmatpush1.bf16.msra.mxu1 %v3470_v47  ;;  %v3398_v47 = vld [vmem:[#allocation4 + $0xc0] sm:$0xff] }
 0x986   :  { %3600 = vmatprep.subr.bf16.mxu1 %v3487_v6  ;;  %v3415_v6 = vld [vmem:[#allocation4 + $0x148] sm:$0xff] }
 0x989   :  { %3601 = vmatpush1.bf16.msra.mxu1 %v3486_v11  ;;  %v3414_v11 = vld [vmem:[#allocation4 + $0x140] sm:$0xff] }
 0x98a   :  { %3627 = vmatprep.subr.bf16.mxu1 %v3377_v35  ;;  %v3431_v35 = vld [vmem:[#allocation4 + $0x1c8] sm:$0xff] }
 0x98c   :  { %3619 = vmatmul.mubr.bf16.vlgmr.msra.gmra.mrb[32].mxu1 %v10429_v48 }
 0x98d   :  { %3628 = vmatpush1.bf16.msra.mxu1 %v3376_v26  ;;  %3659 = vmatprep.mubr.bf16.mxu1 %v9834_v23  ;;  %v3430_v26 = vld [vmem:[#allocation4 + $0x1c0] sm:$0xff] }
 0x98e   :  { %3629 = vmatprep.subr.bf16.mxu1 %v3393_v49  ;;  %v3447_v49 = vld [vmem:[#allocation4 + $0x248] sm:$0xff] }
 0x991   :  { %3630 = vmatpush1.bf16.msra.mxu1 %v3392_v25  ;;  %v3446_v25 = vld [vmem:[#allocation4 + $0x240] sm:$0xff] }
 0x992   :  { %3631 = vmatprep.subr.bf16.mxu1 %v3409_v50  ;;  %v3463_v50 = vld [vmem:[#allocation4 + $0x2c8] sm:$0xff] }
 0x995   :  { %3632 = vmatpush1.bf16.msra.mxu1 %v3408_v52  ;;  %v3462_v52 = vld [vmem:[#allocation4 + $0x2c0] sm:$0xff] }
 0x996   :  { %3633 = vmatprep.subr.bf16.mxu1 %v3425_v53  ;;  %v3479_v53 = vld [vmem:[#allocation4 + $0x348] sm:$0xff] }
 0x999   :  { %3634 = vmatpush1.bf16.msra.mxu1 %v3424_v54  ;;  %v3478_v54 = vld [vmem:[#allocation4 + $0x340] sm:$0xff] }
 0x99a   :  { %3635 = vmatprep.subr.bf16.mxu1 %v3441_v55  ;;  %v3495_v55 = vld [vmem:[#allocation4 + $0x3c8] sm:$0xff] }
 0x99d   :  { %3636 = vmatpush1.bf16.msra.mxu1 %v3440_v56  ;;  %v3494_v56 = vld [vmem:[#allocation4 + $0x3c0] sm:$0xff] }
 0x99e   :  { %3637 = vmatprep.subr.bf16.mxu1 %v3457_v57  ;;  %v3385_v57 = vld [vmem:[#allocation4 + $0x58] sm:$0xff] }
 0x9a1   :  { %3638 = vmatpush1.bf16.msra.mxu1 %v3456_v63  ;;  %v3384_v63 = vld [vmem:[#allocation4 + $0x50] sm:$0xff] }
 0x9a2   :  { %3639 = vmatprep.subr.bf16.mxu1 %v3473_v0  ;;  %v3401_v0 = vld [vmem:[#allocation4 + $0xd8] sm:$0xff] }
 0x9a5   :  { %3640 = vmatpush1.bf16.msra.mxu1 %v3472_v4  ;;  %v3400_v4 = vld [vmem:[#allocation4 + $0xd0] sm:$0xff] }
 0x9a6   :  { %3641 = vmatprep.subr.bf16.mxu1 %v3489_v1  ;;  %v3417_v1 = vld [vmem:[#allocation4 + $0x158] sm:$0xff] }
 0x9a9   :  { %3642 = vmatpush1.bf16.msra.mxu1 %v3488_v34  ;;  %v3416_v34 = vld [vmem:[#allocation4 + $0x150] sm:$0xff] }
 0x9aa   :  { %3668 = vmatprep.subr.bf16.mxu1 %v3379_v2  ;;  %v3433_v2 = vld [vmem:[#allocation4 + $0x1d8] sm:$0xff] }
 0x9ac   :  { %3660 = vmatmul.mubr.bf16.vlgmr.msra.gmra.mrb[36].mxu1 %v10429_v48 }
 0x9ad   :  { %3669 = vmatpush1.bf16.msra.mxu1 %v3378_v12  ;;  %3700 = vmatprep.mubr.bf16.mxu1 %v9834_v23  ;;  %v3432_v12 = vld [vmem:[#allocation4 + $0x1d0] sm:$0xff] }
 0x9ae   :  { %3670 = vmatprep.subr.bf16.mxu1 %v3395_v15  ;;  %v3449_v15 = vld [vmem:[#allocation4 + $0x258] sm:$0xff] }
 0x9b1   :  { %3671 = vmatpush1.bf16.msra.mxu1 %v3394_v29  ;;  %v3448_v29 = vld [vmem:[#allocation4 + $0x250] sm:$0xff] }
 0x9b2   :  { %3672 = vmatprep.subr.bf16.mxu1 %v3411_v16  ;;  %v3465_v16 = vld [vmem:[#allocation4 + $0x2d8] sm:$0xff] }
 0x9b5   :  { %3673 = vmatpush1.bf16.msra.mxu1 %v3410_v17  ;;  %v3464_v17 = vld [vmem:[#allocation4 + $0x2d0] sm:$0xff] }
 0x9b6   :  { %3674 = vmatprep.subr.bf16.mxu1 %v3427_v18  ;;  %v3481_v18 = vld [vmem:[#allocation4 + $0x358] sm:$0xff] }
 0x9b9   :  { %3675 = vmatpush1.bf16.msra.mxu1 %v3426_v62  ;;  %v3480_v62 = vld [vmem:[#allocation4 + $0x350] sm:$0xff] }
 0x9ba   :  { %3676 = vmatprep.subr.bf16.mxu1 %v3443_v19  ;;  %v3497_v19 = vld [vmem:[#allocation4 + $0x3d8] sm:$0xff] }
 0x9bd   :  { %3677 = vmatpush1.bf16.msra.mxu1 %v3442_v20  ;;  %v3496_v20 = vld [vmem:[#allocation4 + $0x3d0] sm:$0xff] }
 0x9be   :  { %3678 = vmatprep.subr.bf16.mxu1 %v3459_v21  ;;  %v3387_v21 = vld [vmem:[#allocation4 + $0x68] sm:$0xff] }
 0x9c1   :  { %3679 = vmatpush1.bf16.msra.mxu1 %v3458_v3  ;;  %v3386_v3 = vld [vmem:[#allocation4 + $0x60] sm:$0xff] }
 0x9c2   :  { %3680 = vmatprep.subr.bf16.mxu1 %v3475_v58  ;;  %v3403_v58 = vld [vmem:[#allocation4 + $0xe8] sm:$0xff] }
 0x9c5   :  { %3681 = vmatpush1.bf16.msra.mxu1 %v3474_v51  ;;  %v3402_v51 = vld [vmem:[#allocation4 + $0xe0] sm:$0xff] }
 0x9c6   :  { %3682 = vmatprep.subr.bf16.mxu1 %v3491_v27  ;;  %v3419_v27 = vld [vmem:[#allocation4 + $0x168] sm:$0xff] }
 0x9c9   :  { %3683 = vmatpush1.bf16.msra.mxu1 %v3490_v28  ;;  %v3418_v28 = vld [vmem:[#allocation4 + $0x160] sm:$0xff] }
 0x9ca   :  { %3709 = vmatprep.subr.bf16.mxu1 %v3381_v30  ;;  %v3435_v30 = vld [vmem:[#allocation4 + $0x1e8] sm:$0xff] }
 0x9cc   :  { %3701 = vmatmul.mubr.bf16.vlgmr.msra.gmra.mrb[40].mxu1 %v10429_v48 }
 0x9cd   :  { %3710 = vmatpush1.bf16.msra.mxu1 %v3380_v31  ;;  %3741 = vmatprep.mubr.bf16.mxu1 %v9834_v23  ;;  %v3434_v31 = vld [vmem:[#allocation4 + $0x1e0] sm:$0xff] }
 0x9ce   :  { %3711 = vmatprep.subr.bf16.mxu1 %v3397_v13  ;;  %v3451_v13 = vld [vmem:[#allocation4 + $0x268] sm:$0xff] }
 0x9d1   :  { %3712 = vmatpush1.bf16.msra.mxu1 %v3396_v32  ;;  %v3450_v32 = vld [vmem:[#allocation4 + $0x260] sm:$0xff] }
 0x9d2   :  { %3713 = vmatprep.subr.bf16.mxu1 %v3413_v5  ;;  %v3467_v5 = vld [vmem:[#allocation4 + $0x2e8] sm:$0xff] }
 0x9d5   :  { %3714 = vmatpush1.bf16.msra.mxu1 %v3412_v36  ;;  %v3466_v36 = vld [vmem:[#allocation4 + $0x2e0] sm:$0xff] }
 0x9d6   :  { %3715 = vmatprep.subr.bf16.mxu1 %v3429_v22  ;;  %v3483_v22 = vld [vmem:[#allocation4 + $0x368] sm:$0xff] }
 0x9d9   :  { %3716 = vmatpush1.bf16.msra.mxu1 %v3428_v37  ;;  %v3482_v37 = vld [vmem:[#allocation4 + $0x360] sm:$0xff] }
 0x9da   :  { %3717 = vmatprep.subr.bf16.mxu1 %v3445_v60  ;;  %v3499_v60 = vld [vmem:[#allocation4 + $0x3e8] sm:$0xff] }
 0x9dd   :  { %3718 = vmatpush1.bf16.msra.mxu1 %v3444_v38  ;;  %v3498_v38 = vld [vmem:[#allocation4 + $0x3e0] sm:$0xff] }
 0x9de   :  { %3719 = vmatprep.subr.bf16.mxu1 %v3461_v33  ;;  %v3389_v33 = vld [vmem:[#allocation4 + $0x78] sm:$0xff] }
 0x9e1   :  { %3720 = vmatpush1.bf16.msra.mxu1 %v3460_v39  ;;  %v3388_v39 = vld [vmem:[#allocation4 + $0x70] sm:$0xff] }
 0x9e2   :  { %3721 = vmatprep.subr.bf16.mxu1 %v3477_v40  ;;  %v3405_v40 = vld [vmem:[#allocation4 + $0xf8] sm:$0xff] }
 0x9e5   :  { %3722 = vmatpush1.bf16.msra.mxu1 %v3476_v44  ;;  %v3404_v44 = vld [vmem:[#allocation4 + $0xf0] sm:$0xff] }
 0x9e6   :  { %3723 = vmatprep.subr.bf16.mxu1 %v3493_v41  ;;  %v3421_v41 = vld [vmem:[#allocation4 + $0x178] sm:$0xff] }
 0x9e9   :  { %3724 = vmatpush1.bf16.msra.mxu1 %v3492_v42  ;;  %v3420_v42 = vld [vmem:[#allocation4 + $0x170] sm:$0xff] }
 0x9ea   :  { %3750 = vmatprep.subr.bf16.mxu1 %v3383_v43  ;;  %v3437_v43 = vld [vmem:[#allocation4 + $0x1f8] sm:$0xff] }
 0x9ec   :  { %3742 = vmatmul.mubr.bf16.vlgmr.msra.gmra.mrb[44].mxu1 %v10429_v48 }
 0x9ed   :  { %3751 = vmatpush1.bf16.msra.mxu1 %v3382_v24  ;;  %3782 = vmatprep.mubr.bf16.mxu1 %v9834_v23  ;;  %v3436_v24 = vld [vmem:[#allocation4 + $0x1f0] sm:$0xff] }
 0x9ee   :  { %3752 = vmatprep.subr.bf16.mxu1 %v3399_v45  ;;  %v3453_v45 = vld [vmem:[#allocation4 + $0x278] sm:$0xff] }
 0x9f1   :  { %3753 = vmatpush1.bf16.msra.mxu1 %v3398_v47  ;;  %v3452_v47 = vld [vmem:[#allocation4 + $0x270] sm:$0xff] }
 0x9f2   :  { %3754 = vmatprep.subr.bf16.mxu1 %v3415_v6  ;;  %v3469_v6 = vld [vmem:[#allocation4 + $0x2f8] sm:$0xff] }
 0x9f5   :  { %3755 = vmatpush1.bf16.msra.mxu1 %v3414_v11  ;;  %v3468_v11 = vld [vmem:[#allocation4 + $0x2f0] sm:$0xff] }
 0x9f6   :  { %3756 = vmatprep.subr.bf16.mxu1 %v3431_v35 }
 0x9f9   :  { %3757 = vmatpush1.bf16.msra.mxu1 %v3430_v26  ;;  %v3485_v26 = vld [vmem:[#allocation4 + $0x378] sm:$0xff] }
 0x9fa   :  { %3758 = vmatprep.subr.bf16.mxu1 %v3447_v49 }
 0x9fd   :  { %3759 = vmatpush1.bf16.msra.mxu1 %v3446_v25 }
 0x9fe   :  { %3760 = vmatprep.subr.bf16.mxu1 %v3463_v50 }
 0xa01   :  { %3761 = vmatpush1.bf16.msra.mxu1 %v3462_v52  ;;  %v3484_v52 = vld [vmem:[#allocation4 + $0x370] sm:$0xff] }
 0xa02   :  { %3762 = vmatprep.subr.bf16.mxu1 %v3479_v53  ;;  %v3501_v53 = vld [vmem:[#allocation4 + $0x3f8] sm:$0xff] }
 0xa05   :  { %3763 = vmatpush1.bf16.msra.mxu1 %v3478_v54  ;;  %v3500_v54 = vld [vmem:[#allocation4 + $0x3f0] sm:$0xff] }
 0xa06   :  { %3764 = vmatprep.subr.bf16.mxu1 %v3495_v55 }
 0xa09   :  { %3765 = vmatpush1.bf16.msra.mxu1 %v3494_v56 }
 0xa0a   :  { %3791 = vmatprep.subr.bf16.mxu1 %v3385_v57 }
 0xa0c   :  { %3783 = vmatmul.mubr.bf16.vlgmr.msra.gmra.mrb[48].mxu1 %v10429_v48 }
 0xa0d   :  { %3792 = vmatpush1.bf16.msra.mxu1 %v3384_v63  ;;  %3823 = vmatprep.mubr.bf16.mxu1 %v9834_v23 }
 0xa0e   :  { %3793 = vmatprep.subr.bf16.mxu1 %v3401_v0  ;;  %v3502_v0 = vld [vmem:[#allocation18] sm:$0xff] }
 0xa11   :  { %3794 = vmatpush1.bf16.msra.mxu1 %v3400_v4  ;;  %v3525_v4 = vrot.slane %v3502_v0, %v10311_v9 }
 0xa12   :  { %3795 = vmatprep.subr.bf16.mxu1 %v3417_v1  ;;  %v3529_v1 = vrot.slane %v3502_v0, %v10317_v46 }
 0xa15   :  { %3796 = vmatpush1.bf16.msra.mxu1 %v3416_v34  ;;  %v3509_v34 = vrot.slane %v3502_v0, %v10233_v59 }
 0xa16   :  { %3797 = vmatprep.subr.bf16.mxu1 %v3433_v2  ;;  %v3513_v2 = vrot.slane %v3502_v0, %v10236_v61 }
 0xa19   :  { %3798 = vmatpush1.bf16.msra.mxu1 %v3432_v12 }
 0xa1a   :  { %3799 = vmatprep.subr.bf16.mxu1 %v3449_v15 }
 0xa1d   :  { %3800 = vmatpush1.bf16.msra.mxu1 %v3448_v29 }
 0xa1e   :  { %3801 = vmatprep.subr.bf16.mxu1 %v3465_v16 }
 0xa21   :  { %3802 = vmatpush1.bf16.msra.mxu1 %v3464_v17 }
 0xa22   :  { %3803 = vmatprep.subr.bf16.mxu1 %v3481_v18 }
 0xa25   :  { %3804 = vmatpush1.bf16.msra.mxu1 %v3480_v62 }
 0xa26   :  { %3805 = vmatprep.subr.bf16.mxu1 %v3497_v19 }
 0xa29   :  { %3806 = vmatpush1.bf16.msra.mxu1 %v3496_v20 }
 0xa2a   :  { %3832 = vmatprep.subr.bf16.mxu1 %v3387_v21 }
 0xa2c   :  { %3824 = vmatmul.mubr.bf16.vlgmr.msra.gmra.mrb[52].mxu1 %v10429_v48 }
 0xa2d   :  { %3833 = vmatpush1.bf16.msra.mxu1 %v3386_v3  ;;  %3864 = vmatprep.mubr.bf16.mxu1 %v9834_v23 }
 0xa2e   :  { %3834 = vmatprep.subr.bf16.mxu1 %v3403_v58  ;;  %v3533_v58 = vrot.slane %v3502_v0, %v10320_v8 }
 0xa31   :  { %3835 = vmatpush1.bf16.msra.mxu1 %v3402_v51  ;;  %v3537_v51 = vrot.slane %v3502_v0, %v10330_v14 }
 0xa32   :  { %3836 = vmatprep.subr.bf16.mxu1 %v3419_v27  ;;  %v3517_v27 = vrot.slane %v3502_v0, %v10314_v7 }
 0xa35   :  { %3837 = vmatpush1.bf16.msra.mxu1 %v3418_v28  ;;  %v3521_v28 = vrot.slane %v3502_v0, %v10324_v10 }
 0xa36   :  { %3838 = vmatprep.subr.bf16.mxu1 %v3435_v30 }
 0xa39   :  { %3839 = vmatpush1.bf16.msra.mxu1 %v3434_v31 }
 0xa3a   :  { %3840 = vmatprep.subr.bf16.mxu1 %v3451_v13 }
 0xa3d   :  { %3841 = vmatpush1.bf16.msra.mxu1 %v3450_v32 }
 0xa3e   :  { %3842 = vmatprep.subr.bf16.mxu1 %v3467_v5 }
 0xa41   :  { %3843 = vmatpush1.bf16.msra.mxu1 %v3466_v36 }
 0xa42   :  { %3844 = vmatprep.subr.bf16.mxu1 %v3483_v22 }
 0xa45   :  { %3845 = vmatpush1.bf16.msra.mxu1 %v3482_v37 }
 0xa46   :  { %3846 = vmatprep.subr.bf16.mxu1 %v3499_v60 }
 0xa49   :  { %3847 = vmatpush1.bf16.msra.mxu1 %v3498_v38 }
 0xa4a   :  { %3873 = vmatprep.subr.bf16.mxu1 %v3389_v33 }
 0xa4c   :  { %3865 = vmatmul.mubr.bf16.vlgmr.msra.gmra.mrb[56].mxu1 %v10429_v48 }
 0xa4d   :  { %3874 = vmatpush1.bf16.msra.mxu1 %v3388_v39  ;;  %3905 = vmatprep.mubr.bf16.mxu1 %v9834_v23 }
 0xa4e   :  { %3875 = vmatprep.subr.bf16.mxu1 %v3405_v40  ;;  %v10482_v40 = vld [vmem:[#allocation18 + $0x8] sm:$0xff] }
 0xa51   :  { %3876 = vmatpush1.bf16.msra.mxu1 %v3404_v44  ;;  %v3541_v44 = vrot.slane %v10482_v40, %v10233_v59 }
 0xa52   :  { %3877 = vmatprep.subr.bf16.mxu1 %v3421_v41  ;;  %v3545_v41 = vrot.slane %v10482_v40, %v10236_v61 }
 0xa55   :  { %3878 = vmatpush1.bf16.msra.mxu1 %v3420_v42 }
 0xa56   :  { %3879 = vmatprep.subr.bf16.mxu1 %v3437_v43 }
 0xa59   :  { %3880 = vmatpush1.bf16.msra.mxu1 %v3436_v24 }
 0xa5a   :  { %3881 = vmatprep.subr.bf16.mxu1 %v3453_v45 }
 0xa5d   :  { %3882 = vmatpush1.bf16.msra.mxu1 %v3452_v47 }
 0xa5e   :  { %3883 = vmatprep.subr.bf16.mxu1 %v3469_v6 }
 0xa5f   :  { %v3620_v35 = vpop.f32.mrb[32].mxu1 }
 0xa60   :  { %v3622_v49 = vpop.f32.mrb[33].mxu1  ;;  %v10454_v17 = vadd.f32 %v3620_v35, %v3509_v34 }
 0xa61   :  { %v3624_v25 = vpop.f32.mrb[34].mxu1  ;;  %3884 = vmatpush1.bf16.msra.mxu1 %v3468_v11  ;;  %v10457_v19 = vadd.f32 %v3622_v49, %v3513_v2 }
 0xa62   :  { %v3625_v50 = vpop.f32.mrb[35].mxu1  ;;  %3885 = vmatprep.subr.bf16.mxu1 %v3485_v26  ;;  %v3549_v25 = vrot.slane %v10482_v40, %v10314_v7  ;;  %v3557_v7 = vrot.slane %v10482_v40, %v10311_v9 }
 0xa63   :  { %v3553_v50 = vrot.slane %v10482_v40, %v10324_v10  ;;  %v3561_v10 = vrot.slane %v10482_v40, %v10317_v46 }
 0xa65   :  { %3886 = vmatpush1.bf16.msra.mxu1 %v3484_v52 }
 0xa66   :  { %3887 = vmatprep.subr.bf16.mxu1 %v3501_v53 }
 0xa69   :  { %3888 = vmatpush1.bf16.msra.mxu1 %v3500_v54 }
 0xa6c   :  { %3906 = vmatmul.mubr.bf16.vlgmr.msra.gmra.mrb[60].mxu1 %v10429_v48 }
 0xa7f   :  { %v3661_v55 = vpop.f32.mrb[36].mxu1 }
 0xa80   :  { %v3663_v56 = vpop.f32.mrb[37].mxu1  ;;  %v10472_v36 = vadd.f32 %v3661_v55, %v3517_v27 }
 0xa81   :  { %v3665_v57 = vpop.f32.mrb[38].mxu1  ;;  %v10475_v60 = vadd.f32 %v3663_v56, %v3521_v28 }
 0xa82   :  { %v3666_v63 = vpop.f32.mrb[39].mxu1 }
 0xa9f   :  { %v3702_v12 = vpop.f32.mrb[40].mxu1 }
 0xaa0   :  { %v10450_v15 = vadd.f32 %v3702_v12, %v3525_v4  ;;  %v3704_v29 = vpop.f32.mrb[41].mxu1 }
 0xaa1   :  { %v10452_v16 = vadd.f32 %v3704_v29, %v3529_v1  ;;  %v3706_v48 = vpop.f32.mrb[42].mxu1 }
 0xaa2   :  { %v3918_v18 = vrot.slane %v10450_v15, 7  ;;  %v3707_v62 = vpop.f32.mrb[43].mxu1  ;;  %v3962_v9 = vrot.slane %v10450_v15, 4 }
 0xaa3   :  { %v3919_v20 = vrot.slane %v10452_v16, 7 }
 0xaa4   :  { %v3986_v21 = vsel %vm2728_vm7, %v10454_v17, %v3918_v18 }
 0xaa5   :  { %v3987_v3 = vsel %vm2728_vm7, %v10457_v19, %v3919_v20  ;;  %v3954_v20 = vrot.slane %v10454_v17, 5 }
 0xabf   :  { %v3743_v30 = vpop.f32.mrb[44].mxu1 }
 0xac0   :  { %v10468_v31 = vadd.f32 %v3743_v30, %v3533_v58  ;;  %v3745_v13 = vpop.f32.mrb[45].mxu1  ;;  %v3963_v58 = vrot.slane %v10452_v16, 4 }
 0xac1   :  { %v10470_v32 = vadd.f32 %v3745_v13, %v3537_v51  ;;  %v3747_v5 = vpop.f32.mrb[46].mxu1 }
 0xac2   :  { %v3920_v22 = vrot.slane %v10468_v31, 7  ;;  %v3748_v37 = vpop.f32.mrb[47].mxu1 }
 0xac3   :  { %v3921_v38 = vrot.slane %v10470_v32, 7 }
 0xac4   :  { %v3988_v33 = vsel %vm2728_vm7, %v10472_v36, %v3920_v22 }
 0xac5   :  { %v3989_v39 = vsel %vm2728_vm7, %v10475_v60, %v3921_v38 }
 0xadf   :  { %v3784_v42 = vpop.f32.mrb[48].mxu1 }
 0xae0   :  { %v3785_v43 = vadd.f32 %v3784_v42, %v3541_v44  ;;  %v3786_v24 = vpop.f32.mrb[49].mxu1 }
 0xae1   :  { %v3787_v45 = vadd.f32 %v3786_v24, %v3545_v41  ;;  %v3788_v47 = vpop.f32.mrb[50].mxu1 }
 0xae2   :  { %v3930_v6 = vrot.slane %v3785_v43, 6  ;;  %v3789_v11 = vpop.f32.mrb[51].mxu1  ;;  %v3970_v51 = vrot.slane %v3785_v43, 3 }
 0xae3   :  { %v3931_v35 = vrot.slane %v3787_v45, 6  ;;  %v3971_v30 = vrot.slane %v3787_v45, 3 }
 0xae4   :  { %v3991_v26 = vsel %vm3990_vm11, %v3986_v21, %v3930_v6  ;;  %v3955_v21 = vrot.slane %v10457_v19, 5  ;;  %v3956_v6 = vrot.slane %v10472_v36, 5 }
 0xae5   :  { %v3992_v49 = vsel %vm3990_vm11, %v3987_v3, %v3931_v35  ;;  %v3957_v35 = vrot.slane %v10475_v60, 5 }
 0xaff   :  { %v3825_v52 = vpop.f32.mrb[52].mxu1 }
 0xb00   :  { %v10494_v53 = vadd.f32 %v3825_v52, %v3549_v25  ;;  %v3827_v54 = vpop.f32.mrb[53].mxu1 }
 0xb01   :  { %v10496_v55 = vadd.f32 %v3827_v54, %v3553_v50  ;;  %v3829_v56 = vpop.f32.mrb[54].mxu1 }
 0xb02   :  { %v3932_v57 = vrot.slane %v10494_v53, 6  ;;  %v3830_v63 = vpop.f32.mrb[55].mxu1 }
 0xb03   :  { %v3933_v0 = vrot.slane %v10496_v55, 6  ;;  %v3973_v50 = vrot.slane %v10496_v55, 3 }
 0xb04   :  { %v3993_v4 = vsel %vm3990_vm11, %v3988_v33, %v3932_v57  ;;  %v3565_v33 = vrot.slane %v10482_v40, %v10320_v8  ;;  %v3965_v8 = vrot.slane %v10470_v32, 4 }
 0xb05   :  { %v3994_v1 = vsel %vm3990_vm11, %v3989_v39, %v3933_v0  ;;  %v3569_v39 = vrot.slane %v10482_v40, %v10330_v14  ;;  %v3972_v14 = vrot.slane %v10494_v53, 3 }
 0xb1f   :  { %v3866_v34 = vpop.f32.mrb[56].mxu1 }
 0xb20   :  { %v3867_v2 = vadd.f32 %v3866_v34, %v3557_v7  ;;  %v3868_v12 = vpop.f32.mrb[57].mxu1 }
 0xb21   :  { %v3869_v29 = vadd.f32 %v3868_v12, %v3561_v10  ;;  %v3870_v48 = vpop.f32.mrb[58].mxu1 }
 0xb22   :  { %v3942_v18 = vrot.slane %v3867_v2, 5  ;;  %v3871_v62 = vpop.f32.mrb[59].mxu1  ;;  %v3978_v13 = vrot.slane %v3867_v2, 2 }
 0xb23   :  { %v3943_v3 = vrot.slane %v3869_v29, 5  ;;  %v3979_v15 = vrot.slane %v3869_v29, 2 }
 0xb24   :  { %v3996_v46 = vsel %vm3995_vm12, %v3991_v26, %v3942_v18  ;;  %v3964_v26 = vrot.slane %v10468_v31, 4 }
 0xb25   :  { %v4001_v27 = vsel %vm4000_vm13, %v3996_v46, %v3954_v20  ;;  %v3997_v28 = vsel %vm3995_vm12, %v3992_v49, %v3943_v3 }
 0xb26   :  { %v4006_v17 = vsel %vm4005_vm14, %v4001_v27, %v3962_v9  ;;  %v4002_v19 = vsel %vm4000_vm13, %v3997_v28, %v3955_v21 }
 0xb27   :  { %v4011_v5 = vsel %vm4010_vm15, %v4006_v17, %v3970_v51  ;;  %v4007_v16 = vsel %vm4005_vm14, %v4002_v19, %v3963_v58 }
 0xb28   :  { %v10518_v22 = vsel %vm4015_vm0, %v4011_v5, %v3978_v13  ;;  %v4012_v37 = vsel %vm4010_vm15, %v4007_v16, %v3971_v30 }
 0xb29   :  { %v4017_v38 = vsel %vm4015_vm0, %v4012_v37, %v3979_v15 }
 0xb3f   :  { %v3907_v44 = vpop.f32.mrb[60].mxu1 }
 0xb40   :  { %v3908_v41 = vadd.f32 %v3907_v44, %v3565_v33  ;;  %v3909_v42 = vpop.f32.mrb[61].mxu1 }
 0xb41   :  { %v3910_v43 = vadd.f32 %v3909_v42, %v3569_v39  ;;  %v3911_v24 = vpop.f32.mrb[62].mxu1 }
 0xb42   :  { %v3944_v45 = vrot.slane %v3908_v41, 5  ;;  %v3912_v47 = vpop.f32.mrb[63].mxu1  ;;  %v3980_v52 = vrot.slane %v3908_v41, 2 }
 0xb43   :  { %v3945_v11 = vrot.slane %v3910_v43, 5  ;;  %v3981_v31 = vrot.slane %v3910_v43, 2 }
 0xb44   :  { %v3998_v49 = vsel %vm3995_vm12, %v3993_v4, %v3944_v45 }
 0xb45   :  { %v4003_v40 = vsel %vm4000_vm13, %v3998_v49, %v3956_v6  ;;  %v3999_v25 = vsel %vm3995_vm12, %v3994_v1, %v3945_v11 }
 0xb46   :  { %v4008_v36 = vsel %vm4005_vm14, %v4003_v40, %v3964_v26  ;;  %v4004_v54 = vsel %vm4000_vm13, %v3999_v25, %v3957_v35 }
 0xb47   :  { %v4013_v60 = vsel %vm4010_vm15, %v4008_v36, %v3972_v14  ;;  %v4009_v56 = vsel %vm4005_vm14, %v4004_v54, %v3965_v8 }
 0xb48   :  { %v10540_v32 = vsel %vm4015_vm0, %v4013_v60, %v3980_v52  ;;  %v4014_v53 = vsel %vm4010_vm15, %v4009_v56, %v3973_v50 }
 0xb49   :  { %v10544_v57 = vsel %vm4015_vm0, %v4014_v53, %v3981_v31 }
 0xb4a   :  { %9783 = dma.done.wait [#allocation8 + $0x3], 36864 }
 0xb4b   :  { %9784 = vsyncadd [#allocation8 + $0x3], 4294930432  ;;  %v10546_v55 = vpack.c.bf16 %v4017_v38, %v4017_v38  ;;  %v4033_v63 = vld [vmem:[#allocation5 + $0x8] sm:$0xff]  ;;  %v4032_v0 = vld [vmem:[#allocation5] sm:$0xff]  ;;  %v10552_v24 = vpack.c.bf16 %v10518_v22, %v10518_v22  ;;  %v10556_v45 = vpack.c.bf16 %v10544_v57, %v10544_v57  ;;  %vm4732_vm1 = vcmask 588800  }
 0xb4c   :  { %v4042_v4 = vld [vmem:[#allocation5 + $0x50] sm:$0xff]  ;;  %4320 = vmatprep.subr.bf16.mxu1 %v4033_v63  ;;  %v4041_v1 = vld [vmem:[#allocation5 + $0x48] sm:$0xff]  ;;  %v4051_v7 = vld [vmem:[#allocation5 + $0x98] sm:$0xff] }
 0xb4d   :  { %4352 = vmatprep.mubr.bf16.mxu1 %v10546_v55  ;;  %4516 = vmatprep.mubr.bf16.mxu0 %v10546_v55  ;;  %v4050_v10 = vld [vmem:[#allocation5 + $0x90] sm:$0xff]  ;;  %v4060_v34 = vld [vmem:[#allocation5 + $0xe0] sm:$0xff]  ;;  %v4059_v2 = vld [vmem:[#allocation5 + $0xd8] sm:$0xff] }
 0xb4e   :  { %4321 = vmatpush1.bf16.msra.mxu1 %v4032_v0  ;;  %v4069_v12 = vld [vmem:[#allocation5 + $0x128] sm:$0xff]  ;;  %v4068_v29 = vld [vmem:[#allocation5 + $0x120] sm:$0xff]  ;;  %v4078_v48 = vld [vmem:[#allocation5 + $0x170] sm:$0xff] }
 0xb4f   :  { %4322 = vmatprep.subr.bf16.mxu1 %v4042_v4  ;;  %v4077_v18 = vld [vmem:[#allocation5 + $0x168] sm:$0xff]  ;;  %v4087_v62 = vld [vmem:[#allocation5 + $0x1b8] sm:$0xff]  ;;  %v4086_v20 = vld [vmem:[#allocation5 + $0x1b0] sm:$0xff] }
 0xb50   :  { %v4096_v21 = vld [vmem:[#allocation5 + $0x200] sm:$0xff]  ;;  %v4095_v3 = vld [vmem:[#allocation5 + $0x1f8] sm:$0xff]  ;;  %v4105_v9 = vld [vmem:[#allocation5 + $0x248] sm:$0xff] }
 0xb51   :  { %v4104_v58 = vld [vmem:[#allocation5 + $0x240] sm:$0xff]  ;;  %v4114_v46 = vld [vmem:[#allocation5 + $0x290] sm:$0xff]  ;;  %v4113_v51 = vld [vmem:[#allocation5 + $0x288] sm:$0xff] }
 0xb52   :  { %4323 = vmatpush1.bf16.msra.mxu1 %v4041_v1  ;;  %v4123_v27 = vld [vmem:[#allocation5 + $0x2d8] sm:$0xff]  ;;  %v4122_v28 = vld [vmem:[#allocation5 + $0x2d0] sm:$0xff]  ;;  %v4132_v30 = vld [vmem:[#allocation5 + $0x320] sm:$0xff] }
 0xb53   :  { %4324 = vmatprep.subr.bf16.mxu1 %v4051_v7  ;;  %v4131_v13 = vld [vmem:[#allocation5 + $0x318] sm:$0xff]  ;;  %v4141_v17 = vld [vmem:[#allocation5 + $0x368] sm:$0xff]  ;;  %v4140_v19 = vld [vmem:[#allocation5 + $0x360] sm:$0xff] }
 0xb54   :  { %v4150_v5 = vld [vmem:[#allocation5 + $0x3b0] sm:$0xff]  ;;  %v4149_v15 = vld [vmem:[#allocation5 + $0x3a8] sm:$0xff]  ;;  %v4159_v16 = vld [vmem:[#allocation5 + $0x3f8] sm:$0xff] }
 0xb55   :  { %v4037_v37 = vld [vmem:[#allocation5 + $0x28] sm:$0xff]  ;;  %v4158_v38 = vld [vmem:[#allocation5 + $0x3f0] sm:$0xff]  ;;  %v4036_v33 = vld [vmem:[#allocation5 + $0x20] sm:$0xff] }
 0xb56   :  { %4325 = vmatpush1.bf16.msra.mxu1 %v4050_v10  ;;  %4484 = vmatprep.subr.bf16.mxu0 %v4037_v37  ;;  %v4168_v39 = vld [vmem:[#allocation5 + $0x440] sm:$0xff]  ;;  %v4046_v44 = vld [vmem:[#allocation5 + $0x70] sm:$0xff]  ;;  %v4167_v41 = vld [vmem:[#allocation5 + $0x438] sm:$0xff] }
 0xb57   :  { %4326 = vmatprep.subr.bf16.mxu1 %v4060_v34  ;;  %4485 = vmatpush1.bf16.msra.mxu0 %v4036_v33  ;;  %v4045_v42 = vld [vmem:[#allocation5 + $0x68] sm:$0xff]  ;;  %v4055_v47 = vld [vmem:[#allocation5 + $0xb8] sm:$0xff]  ;;  %v4176_v6 = vld [vmem:[#allocation5 + $0x480] sm:$0xff] }
 0xb58   :  { %4486 = vmatprep.subr.bf16.mxu0 %v4046_v44  ;;  %v4177_v43 = vld [vmem:[#allocation5 + $0x488] sm:$0xff]  ;;  %v4054_v11 = vld [vmem:[#allocation5 + $0xb0] sm:$0xff]  ;;  %v4064_v26 = vld [vmem:[#allocation5 + $0x100] sm:$0xff] }
 0xb59   :  { %v4186_v35 = vld [vmem:[#allocation5 + $0x4d0] sm:$0xff]  ;;  %v4185_v22 = vld [vmem:[#allocation5 + $0x4c8] sm:$0xff]  ;;  %v4063_v49 = vld [vmem:[#allocation5 + $0xf8] sm:$0xff] }
 0xb5a   :  { %4327 = vmatpush1.bf16.msra.mxu1 %v4059_v2  ;;  %v4195_v8 = vld [vmem:[#allocation5 + $0x518] sm:$0xff]  ;;  %v4073_v14 = vld [vmem:[#allocation5 + $0x148] sm:$0xff]  ;;  %v4194_v40 = vld [vmem:[#allocation5 + $0x510] sm:$0xff] }
 0xb5b   :  { %4328 = vmatprep.subr.bf16.mxu1 %v4069_v12  ;;  %4487 = vmatpush1.bf16.msra.mxu0 %v4045_v42  ;;  %v4072_v25 = vld [vmem:[#allocation5 + $0x140] sm:$0xff]  ;;  %v4082_v52 = vld [vmem:[#allocation5 + $0x190] sm:$0xff]  ;;  %v4203_v36 = vld [vmem:[#allocation5 + $0x558] sm:$0xff] }
 0xb5c   :  { %4488 = vmatprep.subr.bf16.mxu0 %v4055_v47  ;;  %v4204_v50 = vld [vmem:[#allocation5 + $0x560] sm:$0xff]  ;;  %v4081_v54 = vld [vmem:[#allocation5 + $0x188] sm:$0xff]  ;;  %v4091_v31 = vld [vmem:[#allocation5 + $0x1d8] sm:$0xff] }
 0xb5d   :  { %v4213_v60 = vld [vmem:[#allocation5 + $0x5a8] sm:$0xff]  ;;  %v4212_v56 = vld [vmem:[#allocation5 + $0x5a0] sm:$0xff]  ;;  %v4090_v53 = vld [vmem:[#allocation5 + $0x1d0] sm:$0xff] }
 0xb5e   :  { %4329 = vmatpush1.bf16.msra.mxu1 %v4068_v29  ;;  %v4222_v57 = vld [vmem:[#allocation5 + $0x5f0] sm:$0xff]  ;;  %v4100_v63 = vld [vmem:[#allocation5 + $0x220] sm:$0xff]  ;;  %v4221_v0 = vld [vmem:[#allocation5 + $0x5e8] sm:$0xff] }
 0xb5f   :  { %4330 = vmatprep.subr.bf16.mxu1 %v4078_v48  ;;  %4489 = vmatpush1.bf16.msra.mxu0 %v4054_v11  ;;  %v4099_v4 = vld [vmem:[#allocation5 + $0x218] sm:$0xff]  ;;  %v4109_v7 = vld [vmem:[#allocation5 + $0x268] sm:$0xff]  ;;  %v4230_v10 = vld [vmem:[#allocation5 + $0x630] sm:$0xff] }
 0xb60   :  { %4490 = vmatprep.subr.bf16.mxu0 %v4064_v26  ;;  %v4231_v1 = vld [vmem:[#allocation5 + $0x638] sm:$0xff]  ;;  %v4108_v34 = vld [vmem:[#allocation5 + $0x260] sm:$0xff]  ;;  %v4118_v12 = vld [vmem:[#allocation5 + $0x2b0] sm:$0xff] }
 0xb61   :  { %v4240_v2 = vld [vmem:[#allocation5 + $0x680] sm:$0xff]  ;;  %v4239_v29 = vld [vmem:[#allocation5 + $0x678] sm:$0xff]  ;;  %v4117_v48 = vld [vmem:[#allocation5 + $0x2a8] sm:$0xff] }
 0xb62   :  { %4331 = vmatpush1.bf16.msra.mxu1 %v4077_v18  ;;  %v4249_v18 = vld [vmem:[#allocation5 + $0x6c8] sm:$0xff]  ;;  %v4284_v37 = vld [vmem:[#allocation5 + $0x7e0] sm:$0xff]  ;;  %v4294_v33 = vld [vmem:[#allocation5 + $0x830] sm:$0xff] }
 0xb63   :  { %4332 = vmatprep.subr.bf16.mxu1 %v4087_v62  ;;  %4491 = vmatpush1.bf16.msra.mxu0 %v4063_v49  ;;  %v4127_v62 = vld [vmem:[#allocation5 + $0x2f8] sm:$0xff]  ;;  %v4293_v44 = vld [vmem:[#allocation5 + $0x828] sm:$0xff]  ;;  %v4302_v47 = vld [vmem:[#allocation5 + $0x870] sm:$0xff] }
 0xb64   :  { %4492 = vmatprep.subr.bf16.mxu0 %v4073_v14  ;;  %v4303_v42 = vld [vmem:[#allocation5 + $0x878] sm:$0xff]  ;;  %v4312_v11 = vld [vmem:[#allocation5 + $0x8c0] sm:$0xff] }
 0xb65   :  { %v4311_v26 = vld [vmem:[#allocation5 + $0x8b8] sm:$0xff] }
 0xb66   :  { %4333 = vmatpush1.bf16.msra.mxu1 %v4086_v20  ;;  %v4248_v20 = vld [vmem:[#allocation5 + $0x6c0] sm:$0xff]  ;;  %v4035_v49 = vld [vmem:[#allocation5 + $0x18] sm:$0xff] }
 0xb67   :  { %4334 = vmatprep.subr.bf16.mxu1 %v4096_v21  ;;  %4493 = vmatpush1.bf16.msra.mxu0 %v4072_v25  ;;  %v4126_v21 = vld [vmem:[#allocation5 + $0x2f0] sm:$0xff]  ;;  %v4199_v14 = vld [vmem:[#allocation5 + $0x538] sm:$0xff]  ;;  %v4044_v25 = vld [vmem:[#allocation5 + $0x60] sm:$0xff] }
 0xb68   :  { %4494 = vmatprep.subr.bf16.mxu0 %v4082_v52  ;;  %v4208_v52 = vld [vmem:[#allocation5 + $0x580] sm:$0xff] }
 0xb6a   :  { %4335 = vmatpush1.bf16.msra.mxu1 %v4095_v3  ;;  %v4258_v3 = vld [vmem:[#allocation5 + $0x710] sm:$0xff] }
 0xb6b   :  { %4336 = vmatprep.subr.bf16.mxu1 %v4105_v9  ;;  %4495 = vmatpush1.bf16.msra.mxu0 %v4081_v54  ;;  %v4136_v9 = vld [vmem:[#allocation5 + $0x340] sm:$0xff]  ;;  %v4043_v54 = vld [vmem:[#allocation5 + $0x58] sm:$0xff] }
 0xb6c   :  { %4496 = vmatprep.subr.bf16.mxu0 %v4091_v31  ;;  %v4216_v31 = vld [vmem:[#allocation5 + $0x5c0] sm:$0xff] }
 0xb6e   :  { %4337 = vmatpush1.bf16.msra.mxu1 %v4104_v58  ;;  %v4257_v58 = vld [vmem:[#allocation5 + $0x708] sm:$0xff] }
 0xb6f   :  { %4338 = vmatprep.subr.bf16.mxu1 %v4114_v46  ;;  %4497 = vmatpush1.bf16.msra.mxu0 %v4090_v53  ;;  %v4135_v46 = vld [vmem:[#allocation5 + $0x338] sm:$0xff]  ;;  %v4062_v53 = vld [vmem:[#allocation5 + $0xf0] sm:$0xff] }
 0xb70   :  { %4498 = vmatprep.subr.bf16.mxu0 %v4100_v63  ;;  %v4225_v63 = vld [vmem:[#allocation5 + $0x608] sm:$0xff] }
 0xb72   :  { %4339 = vmatpush1.bf16.msra.mxu1 %v4113_v51  ;;  %v4267_v51 = vld [vmem:[#allocation5 + $0x758] sm:$0xff] }
 0xb73   :  { %4340 = vmatprep.subr.bf16.mxu1 %v4123_v27  ;;  %4499 = vmatpush1.bf16.msra.mxu0 %v4099_v4  ;;  %v4145_v27 = vld [vmem:[#allocation5 + $0x388] sm:$0xff]  ;;  %v4071_v4 = vld [vmem:[#allocation5 + $0x138] sm:$0xff] }
 0xb74   :  { %4500 = vmatprep.subr.bf16.mxu0 %v4109_v7  ;;  %v4234_v7 = vld [vmem:[#allocation5 + $0x650] sm:$0xff] }
 0xb76   :  { %4341 = vmatpush1.bf16.msra.mxu1 %v4122_v28  ;;  %v4266_v28 = vld [vmem:[#allocation5 + $0x750] sm:$0xff] }
 0xb77   :  { %4342 = vmatprep.subr.bf16.mxu1 %v4132_v30  ;;  %4501 = vmatpush1.bf16.msra.mxu0 %v4108_v34  ;;  %v4144_v30 = vld [vmem:[#allocation5 + $0x380] sm:$0xff] }
 0xb78   :  { %4502 = vmatprep.subr.bf16.mxu0 %v4118_v12  ;;  %v4080_v34 = vld [vmem:[#allocation5 + $0x180] sm:$0xff]  ;;  %v4243_v12 = vld [vmem:[#allocation5 + $0x698] sm:$0xff] }
 0xb7a   :  { %4343 = vmatpush1.bf16.msra.mxu1 %v4131_v13  ;;  %v4276_v13 = vld [vmem:[#allocation5 + $0x7a0] sm:$0xff] }
 0xb7b   :  { %4344 = vmatprep.subr.bf16.mxu1 %v4141_v17  ;;  %4503 = vmatpush1.bf16.msra.mxu0 %v4117_v48  ;;  %v4154_v17 = vld [vmem:[#allocation5 + $0x3d0] sm:$0xff]  ;;  %v4089_v48 = vld [vmem:[#allocation5 + $0x1c8] sm:$0xff] }
 0xb7c   :  { %4504 = vmatprep.subr.bf16.mxu0 %v4127_v62  ;;  %v4252_v62 = vld [vmem:[#allocation5 + $0x6e0] sm:$0xff] }
 0xb7e   :  { %4345 = vmatpush1.bf16.msra.mxu1 %v4140_v19  ;;  %v4275_v19 = vld [vmem:[#allocation5 + $0x798] sm:$0xff] }
 0xb7f   :  { %4346 = vmatprep.subr.bf16.mxu1 %v4150_v5  ;;  %4505 = vmatpush1.bf16.msra.mxu0 %v4126_v21  ;;  %v4153_v5 = vld [vmem:[#allocation5 + $0x3c8] sm:$0xff]  ;;  %v4098_v21 = vld [vmem:[#allocation5 + $0x210] sm:$0xff] }
 0xb80   :  { %4506 = vmatprep.subr.bf16.mxu0 %v4136_v9  ;;  %v4261_v9 = vld [vmem:[#allocation5 + $0x728] sm:$0xff] }
 0xb82   :  { %4347 = vmatpush1.bf16.msra.mxu1 %v4149_v15  ;;  %v4285_v15 = vld [vmem:[#allocation5 + $0x7e8] sm:$0xff] }
 0xb83   :  { %4348 = vmatprep.subr.bf16.mxu1 %v4159_v16  ;;  %4507 = vmatpush1.bf16.msra.mxu0 %v4135_v46  ;;  %v4163_v16 = vld [vmem:[#allocation5 + $0x418] sm:$0xff] }
 0xb84   :  { %4508 = vmatprep.subr.bf16.mxu0 %v4145_v27  ;;  %v4107_v46 = vld [vmem:[#allocation5 + $0x258] sm:$0xff]  ;;  %v4270_v27 = vld [vmem:[#allocation5 + $0x770] sm:$0xff] }
 0xb86   :  { %4349 = vmatpush1.bf16.msra.mxu1 %v4158_v38  ;;  %v4162_v38 = vld [vmem:[#allocation5 + $0x410] sm:$0xff] }
 0xb87   :  { %4350 = vmatprep.subr.bf16.mxu1 %v4168_v39  ;;  %4509 = vmatpush1.bf16.msra.mxu0 %v4144_v30  ;;  %v4172_v39 = vld [vmem:[#allocation5 + $0x460] sm:$0xff] }
 0xb88   :  { %4510 = vmatprep.subr.bf16.mxu0 %v4154_v17  ;;  %v4116_v30 = vld [vmem:[#allocation5 + $0x2a0] sm:$0xff]  ;;  %v4279_v17 = vld [vmem:[#allocation5 + $0x7b8] sm:$0xff] }
 0xb8a   :  { %4351 = vmatpush1.bf16.msra.mxu1 %v4167_v41  ;;  %v4171_v41 = vld [vmem:[#allocation5 + $0x458] sm:$0xff] }
 0xb8b   :  { %4361 = vmatprep.subr.bf16.mxu1 %v4177_v43  ;;  %4511 = vmatpush1.bf16.msra.mxu0 %v4153_v5  ;;  %v4181_v43 = vld [vmem:[#allocation5 + $0x4a8] sm:$0xff] }
 0xb8c   :  { %4512 = vmatprep.subr.bf16.mxu0 %v4163_v16  ;;  %v4125_v5 = vld [vmem:[#allocation5 + $0x2e8] sm:$0xff]  ;;  %v4288_v16 = vld [vmem:[#allocation5 + $0x800] sm:$0xff] }
 0xb8d   :  { %4353 = vmatmul.mubr.bf16.vlgmr.msra.gmra.mrb[64].mxu1 %v10552_v24 }
 0xb8e   :  { %4362 = vmatpush1.bf16.msra.mxu1 %v4176_v6  ;;  %4393 = vmatprep.mubr.bf16.mxu1 %v10556_v45  ;;  %v4180_v6 = vld [vmem:[#allocation5 + $0x4a0] sm:$0xff] }
 0xb8f   :  { %4363 = vmatprep.subr.bf16.mxu1 %v4186_v35  ;;  %4513 = vmatpush1.bf16.msra.mxu0 %v4162_v38  ;;  %v4190_v35 = vld [vmem:[#allocation5 + $0x4f0] sm:$0xff] }
 0xb90   :  { %4514 = vmatprep.subr.bf16.mxu0 %v4172_v39  ;;  %v4134_v38 = vld [vmem:[#allocation5 + $0x330] sm:$0xff]  ;;  %v4297_v39 = vld [vmem:[#allocation5 + $0x848] sm:$0xff] }
 0xb92   :  { %4364 = vmatpush1.bf16.msra.mxu1 %v4185_v22  ;;  %v4189_v22 = vld [vmem:[#allocation5 + $0x4e8] sm:$0xff] }
 0xb93   :  { %4365 = vmatprep.subr.bf16.mxu1 %v4195_v8  ;;  %4515 = vmatpush1.bf16.msra.mxu0 %v4171_v41  ;;  %v10564_v8 = vpack.c.bf16 %v10540_v32, %v10540_v32  ;;  %v4053_v32 = vld [vmem:[#allocation5 + $0xa8] sm:$0xff]  ;;  %v4143_v41 = vld [vmem:[#allocation5 + $0x378] sm:$0xff] }
 0xb94   :  { %4525 = vmatprep.subr.bf16.mxu0 %v4181_v43  ;;  %v4306_v43 = vld [vmem:[#allocation5 + $0x890] sm:$0xff] }
 0xb96   :  { %4366 = vmatpush1.bf16.msra.mxu1 %v4194_v40  ;;  %4517 = vmatmul.mubr.bf16.vlgmr.msra.gmra.mrb[72].mxu0 %v10552_v24  ;;  %v4034_v40 = vld [vmem:[#allocation5 + $0x10] sm:$0xff] }
 0xb97   :  { %4367 = vmatprep.subr.bf16.mxu1 %v4204_v50  ;;  %4526 = vmatpush1.bf16.msra.mxu0 %v4180_v6  ;;  %v4198_v50 = vld [vmem:[#allocation5 + $0x530] sm:$0xff]  ;;  %v4152_v6 = vld [vmem:[#allocation5 + $0x3c0] sm:$0xff] }
 0xb98   :  { %4557 = vmatprep.mubr.bf16.mxu0 %v10556_v45  ;;  %4527 = vmatprep.subr.bf16.mxu0 %v4190_v35  ;;  %v4315_v35 = vld [vmem:[#allocation5 + $0x8d8] sm:$0xff] }
 0xb9a   :  { %4368 = vmatpush1.bf16.msra.mxu1 %v4203_v36  ;;  %v4207_v36 = vld [vmem:[#allocation5 + $0x578] sm:$0xff] }
 0xb9b   :  { %4369 = vmatprep.subr.bf16.mxu1 %v4213_v60  ;;  %4528 = vmatpush1.bf16.msra.mxu0 %v4189_v22  ;;  %v4217_v60 = vld [vmem:[#allocation5 + $0x5c8] sm:$0xff] }
 0xb9c   :  { %4529 = vmatprep.subr.bf16.mxu0 %v4199_v14  ;;  %v4161_v22 = vld [vmem:[#allocation5 + $0x408] sm:$0xff]  ;;  %v4160_v14 = vld [vmem:[#allocation5 + $0x400] sm:$0xff] }
 0xb9e   :  { %4370 = vmatpush1.bf16.msra.mxu1 %v4212_v56  ;;  %v4052_v56 = vld [vmem:[#allocation5 + $0xa0] sm:$0xff] }
 0xb9f   :  { %4371 = vmatprep.subr.bf16.mxu1 %v4222_v57  ;;  %4530 = vmatpush1.bf16.msra.mxu0 %v4198_v50  ;;  %v4226_v57 = vld [vmem:[#allocation5 + $0x610] sm:$0xff]  ;;  %v4121_v50 = vld [vmem:[#allocation5 + $0x2c8] sm:$0xff] }
 0xba0   :  { %4531 = vmatprep.subr.bf16.mxu0 %v4208_v52  ;;  %v4169_v52 = vld [vmem:[#allocation5 + $0x448] sm:$0xff] }
 0xba2   :  { %4372 = vmatpush1.bf16.msra.mxu1 %v4221_v0  ;;  %v4061_v0 = vld [vmem:[#allocation5 + $0xe8] sm:$0xff] }
 0xba3   :  { %4373 = vmatprep.subr.bf16.mxu1 %v4231_v1  ;;  %4532 = vmatpush1.bf16.msra.mxu0 %v4207_v36  ;;  %v4235_v1 = vld [vmem:[#allocation5 + $0x658] sm:$0xff]  ;;  %v4049_v36 = vld [vmem:[#allocation5 + $0x88] sm:$0xff] }
 0xba4   :  { %4533 = vmatprep.subr.bf16.mxu0 %v4217_v60  ;;  %v4178_v60 = vld [vmem:[#allocation5 + $0x490] sm:$0xff] }
 0xba6   :  { %4374 = vmatpush1.bf16.msra.mxu1 %v4230_v10  ;;  %v4070_v10 = vld [vmem:[#allocation5 + $0x130] sm:$0xff] }
 0xba7   :  { %4375 = vmatprep.subr.bf16.mxu1 %v4240_v2  ;;  %4534 = vmatpush1.bf16.msra.mxu0 %v4216_v31  ;;  %v4244_v2 = vld [vmem:[#allocation5 + $0x6a0] sm:$0xff]  ;;  %v4058_v31 = vld [vmem:[#allocation5 + $0xd0] sm:$0xff] }
 0xba8   :  { %4535 = vmatprep.subr.bf16.mxu0 %v4226_v57  ;;  %v4187_v57 = vld [vmem:[#allocation5 + $0x4d8] sm:$0xff] }
 0xbaa   :  { %4376 = vmatpush1.bf16.msra.mxu1 %v4239_v29  ;;  %v4079_v29 = vld [vmem:[#allocation5 + $0x178] sm:$0xff] }
 0xbab   :  { %4377 = vmatprep.subr.bf16.mxu1 %v4249_v18  ;;  %4536 = vmatpush1.bf16.msra.mxu0 %v4225_v63  ;;  %v4253_v18 = vld [vmem:[#allocation5 + $0x6e8] sm:$0xff]  ;;  %v4067_v63 = vld [vmem:[#allocation5 + $0x118] sm:$0xff] }
 0xbac   :  { %4537 = vmatprep.subr.bf16.mxu0 %v4235_v1  ;;  %v4196_v1 = vld [vmem:[#allocation5 + $0x520] sm:$0xff] }
 0xbae   :  { %4378 = vmatpush1.bf16.msra.mxu1 %v4248_v20  ;;  %v4088_v20 = vld [vmem:[#allocation5 + $0x1c0] sm:$0xff] }
 0xbaf   :  { %4379 = vmatprep.subr.bf16.mxu1 %v4258_v3  ;;  %4538 = vmatpush1.bf16.msra.mxu0 %v4234_v7  ;;  %v4262_v3 = vld [vmem:[#allocation5 + $0x730] sm:$0xff]  ;;  %v4076_v7 = vld [vmem:[#allocation5 + $0x160] sm:$0xff] }
 0xbb0   :  { %4539 = vmatprep.subr.bf16.mxu0 %v4244_v2  ;;  %v4205_v2 = vld [vmem:[#allocation5 + $0x568] sm:$0xff] }
 0xbb2   :  { %4380 = vmatpush1.bf16.msra.mxu1 %v4257_v58  ;;  %v4097_v58 = vld [vmem:[#allocation5 + $0x208] sm:$0xff] }
 0xbb3   :  { %4381 = vmatprep.subr.bf16.mxu1 %v4267_v51  ;;  %4540 = vmatpush1.bf16.msra.mxu0 %v4243_v12  ;;  %v4271_v51 = vld [vmem:[#allocation5 + $0x778] sm:$0xff]  ;;  %v4085_v12 = vld [vmem:[#allocation5 + $0x1a8] sm:$0xff] }
 0xbb4   :  { %4541 = vmatprep.subr.bf16.mxu0 %v4253_v18  ;;  %v4214_v18 = vld [vmem:[#allocation5 + $0x5b0] sm:$0xff] }
 0xbb6   :  { %4382 = vmatpush1.bf16.msra.mxu1 %v4266_v28  ;;  %v4106_v28 = vld [vmem:[#allocation5 + $0x250] sm:$0xff] }
 0xbb7   :  { %4383 = vmatprep.subr.bf16.mxu1 %v4276_v13  ;;  %4542 = vmatpush1.bf16.msra.mxu0 %v4252_v62  ;;  %v4280_v13 = vld [vmem:[#allocation5 + $0x7c0] sm:$0xff]  ;;  %v4094_v62 = vld [vmem:[#allocation5 + $0x1f0] sm:$0xff] }
 0xbb8   :  { %4543 = vmatprep.subr.bf16.mxu0 %v4262_v3  ;;  %v4175_v3 = vld [vmem:[#allocation5 + $0x478] sm:$0xff] }
 0xbba   :  { %4384 = vmatpush1.bf16.msra.mxu1 %v4275_v19  ;;  %v4115_v19 = vld [vmem:[#allocation5 + $0x298] sm:$0xff] }
 0xbbb   :  { %4385 = vmatprep.subr.bf16.mxu1 %v4285_v15  ;;  %4544 = vmatpush1.bf16.msra.mxu0 %v4261_v9  ;;  %v4289_v15 = vld [vmem:[#allocation5 + $0x808] sm:$0xff] }
 0xbbc   :  { %4545 = vmatprep.subr.bf16.mxu0 %v4271_v51  ;;  %v4233_v9 = vld [vmem:[#allocation5 + $0x648] sm:$0xff]  ;;  %v4242_v51 = vld [vmem:[#allocation5 + $0x690] sm:$0xff] }
 0xbbe   :  { %4386 = vmatpush1.bf16.msra.mxu1 %v4284_v37  ;;  %v4124_v37 = vld [vmem:[#allocation5 + $0x2e0] sm:$0xff] }
 0xbbf   :  { %4387 = vmatprep.subr.bf16.mxu1 %v4294_v33  ;;  %4546 = vmatpush1.bf16.msra.mxu0 %v4270_v27  ;;  %v4298_v33 = vld [vmem:[#allocation5 + $0x850] sm:$0xff]  ;;  %v4241_v27 = vld [vmem:[#allocation5 + $0x688] sm:$0xff] }
 0xbc0   :  { %4547 = vmatprep.subr.bf16.mxu0 %v4280_v13  ;;  %v4260_v13 = vld [vmem:[#allocation5 + $0x720] sm:$0xff] }
 0xbc2   :  { %4388 = vmatpush1.bf16.msra.mxu1 %v4293_v44  ;;  %v4133_v44 = vld [vmem:[#allocation5 + $0x328] sm:$0xff] }
 0xbc3   :  { %4389 = vmatprep.subr.bf16.mxu1 %v4303_v42  ;;  %4548 = vmatpush1.bf16.msra.mxu0 %v4279_v17  ;;  %v4307_v42 = vld [vmem:[#allocation5 + $0x898] sm:$0xff] }
 0xbc4   :  { %4549 = vmatprep.subr.bf16.mxu0 %v4289_v15  ;;  %v4259_v17 = vld [vmem:[#allocation5 + $0x718] sm:$0xff]  ;;  %v4278_v15 = vld [vmem:[#allocation5 + $0x7b0] sm:$0xff] }
 0xbc6   :  { %4390 = vmatpush1.bf16.msra.mxu1 %v4302_v47  ;;  %v4142_v47 = vld [vmem:[#allocation5 + $0x370] sm:$0xff] }
 0xbc7   :  { %4391 = vmatprep.subr.bf16.mxu1 %v4312_v11  ;;  %4550 = vmatpush1.bf16.msra.mxu0 %v4288_v16  ;;  %v4316_v11 = vld [vmem:[#allocation5 + $0x8e0] sm:$0xff]  ;;  %v4277_v16 = vld [vmem:[#allocation5 + $0x7a8] sm:$0xff] }
 0xbc8   :  { %4551 = vmatprep.subr.bf16.mxu0 %v4298_v33  ;;  %v4296_v33 = vld [vmem:[#allocation5 + $0x840] sm:$0xff] }
 0xbca   :  { %4392 = vmatpush1.bf16.msra.mxu1 %v4311_v26  ;;  %v4151_v26 = vld [vmem:[#allocation5 + $0x3b8] sm:$0xff] }
 0xbcb   :  { %4402 = vmatprep.subr.bf16.mxu1 %v4035_v49  ;;  %4552 = vmatpush1.bf16.msra.mxu0 %v4297_v39  ;;  %v4112_v49 = vld [vmem:[#allocation5 + $0x280] sm:$0xff]  ;;  %v4295_v39 = vld [vmem:[#allocation5 + $0x838] sm:$0xff] }
 0xbcc   :  { %4553 = vmatprep.subr.bf16.mxu0 %v4307_v42  ;;  %v4314_v42 = vld [vmem:[#allocation5 + $0x8d0] sm:$0xff] }
 0xbcd   :  { %4394 = vmatmul.mubr.bf16.vlgmr.msra.gmra.mrb[64].mxu1 %v10564_v8 }
 0xbce   :  { %4403 = vmatpush1.bf16.msra.mxu1 %v4034_v40  ;;  %4434 = vmatprep.mubr.bf16.mxu1 %v10546_v55  ;;  %v4040_v40 = vld [vmem:[#allocation5 + $0x40] sm:$0xff] }
 0xbcf   :  { %4404 = vmatprep.subr.bf16.mxu1 %v4044_v25  ;;  %4554 = vmatpush1.bf16.msra.mxu0 %v4306_v43  ;;  %v4170_v25 = vld [vmem:[#allocation5 + $0x450] sm:$0xff]  ;;  %v4313_v43 = vld [vmem:[#allocation5 + $0x8c8] sm:$0xff] }
 0xbd0   :  { %4555 = vmatprep.subr.bf16.mxu0 %v4316_v11  ;;  %v4048_v11 = vld [vmem:[#allocation5 + $0x80] sm:$0xff] }
 0xbd2   :  { %4405 = vmatpush1.bf16.msra.mxu1 %v4043_v54  ;;  %v4179_v54 = vld [vmem:[#allocation5 + $0x498] sm:$0xff] }
 0xbd3   :  { %4406 = vmatprep.subr.bf16.mxu1 %v4053_v32  ;;  %4556 = vmatpush1.bf16.msra.mxu0 %v4315_v35  ;;  %v4130_v32 = vld [vmem:[#allocation5 + $0x310] sm:$0xff]  ;;  %v4047_v35 = vld [vmem:[#allocation5 + $0x78] sm:$0xff] }
 0xbd4   :  { %8157 = vmatprep.subr.bf16.mxu0 %v4112_v49  ;;  %v4066_v49 = vld [vmem:[#allocation5 + $0x110] sm:$0xff] }
 0xbd6   :  { %4407 = vmatpush1.bf16.msra.mxu1 %v4052_v56  ;;  %4558 = vmatmul.mubr.bf16.vlgmr.msra.gmra.mrb[72].mxu0 %v10564_v8  ;;  %v4188_v56 = vld [vmem:[#allocation5 + $0x4e0] sm:$0xff] }
 0xbd7   :  { %4408 = vmatprep.subr.bf16.mxu1 %v4062_v53  ;;  %8158 = vmatpush3.bf16.msra.mxu0 %v4040_v40  ;;  %v4139_v53 = vld [vmem:[#allocation5 + $0x358] sm:$0xff] }
 0xbd8   :  { %4680 = vmatprep.mubr.bf16.mxu0 %v10546_v55  ;;  %8159 = vmatprep.subr.bf16.mxu0 %v4121_v50  ;;  %v4075_v40 = vld [vmem:[#allocation5 + $0x158] sm:$0xff]  ;;  %v4084_v50 = vld [vmem:[#allocation5 + $0x1a0] sm:$0xff] }
 0xbda   :  { %4409 = vmatpush1.bf16.msra.mxu1 %v4061_v0  ;;  %v4197_v0 = vld [vmem:[#allocation5 + $0x528] sm:$0xff] }
 0xbdb   :  { %4410 = vmatprep.subr.bf16.mxu1 %v4071_v4  ;;  %8160 = vmatpush3.bf16.msra.mxu0 %v4049_v36  ;;  %v4148_v4 = vld [vmem:[#allocation5 + $0x3a0] sm:$0xff]  ;;  %v4093_v36 = vld [vmem:[#allocation5 + $0x1e8] sm:$0xff] }
 0xbdc   :  { %8161 = vmatprep.subr.bf16.mxu0 %v4130_v32  ;;  %v4101_v32 = vld [vmem:[#allocation5 + $0x228] sm:$0xff] }
 0xbde   :  { %4411 = vmatpush1.bf16.msra.mxu1 %v4070_v10  ;;  %v4206_v10 = vld [vmem:[#allocation5 + $0x570] sm:$0xff] }
 0xbdf   :  { %4412 = vmatprep.subr.bf16.mxu1 %v4080_v34  ;;  %8162 = vmatpush3.bf16.msra.mxu0 %v4058_v31  ;;  %v4157_v34 = vld [vmem:[#allocation5 + $0x3e8] sm:$0xff]  ;;  %v4110_v31 = vld [vmem:[#allocation5 + $0x270] sm:$0xff] }
 0xbe0   :  { %8163 = vmatprep.subr.bf16.mxu0 %v4139_v53  ;;  %v4119_v53 = vld [vmem:[#allocation5 + $0x2b8] sm:$0xff] }
 0xbe2   :  { %4413 = vmatpush1.bf16.msra.mxu1 %v4079_v29  ;;  %v4215_v29 = vld [vmem:[#allocation5 + $0x5b8] sm:$0xff] }
 0xbe3   :  { %4414 = vmatprep.subr.bf16.mxu1 %v4089_v48  ;;  %8164 = vmatpush3.bf16.msra.mxu0 %v4067_v63  ;;  %v4166_v48 = vld [vmem:[#allocation5 + $0x430] sm:$0xff]  ;;  %v4128_v63 = vld [vmem:[#allocation5 + $0x300] sm:$0xff] }
 0xbe4   :  { %8165 = vmatprep.subr.bf16.mxu0 %v4148_v4  ;;  %v4137_v4 = vld [vmem:[#allocation5 + $0x348] sm:$0xff] }
 0xbe6   :  { %4415 = vmatpush1.bf16.msra.mxu1 %v4088_v20  ;;  %v4224_v20 = vld [vmem:[#allocation5 + $0x600] sm:$0xff] }
 0xbe7   :  { %4416 = vmatprep.subr.bf16.mxu1 %v4098_v21  ;;  %8166 = vmatpush3.bf16.msra.mxu0 %v4076_v7  ;;  %v4223_v21 = vld [vmem:[#allocation5 + $0x5f8] sm:$0xff]  ;;  %v4146_v7 = vld [vmem:[#allocation5 + $0x390] sm:$0xff] }
 0xbe8   :  { %8167 = vmatprep.subr.bf16.mxu0 %v4157_v34  ;;  %v4155_v34 = vld [vmem:[#allocation5 + $0x3d8] sm:$0xff] }
 0xbea   :  { %4417 = vmatpush1.bf16.msra.mxu1 %v4097_v58  ;;  %v4103_v58 = vld [vmem:[#allocation5 + $0x238] sm:$0xff] }
 0xbeb   :  { %4418 = vmatprep.subr.bf16.mxu1 %v4107_v46  ;;  %8168 = vmatpush3.bf16.msra.mxu0 %v4085_v12  ;;  %v4232_v46 = vld [vmem:[#allocation5 + $0x640] sm:$0xff] }
 0xbec   :  { %8169 = vmatprep.subr.bf16.mxu0 %v4166_v48  ;;  %v4164_v12 = vld [vmem:[#allocation5 + $0x420] sm:$0xff]  ;;  %v4173_v48 = vld [vmem:[#allocation5 + $0x468] sm:$0xff] }
 0xbee   :  { %4419 = vmatpush1.bf16.msra.mxu1 %v4106_v28  ;;  %v4251_v28 = vld [vmem:[#allocation5 + $0x6d8] sm:$0xff] }
 0xbef   :  { %4420 = vmatprep.subr.bf16.mxu1 %v4116_v30  ;;  %8170 = vmatpush3.bf16.msra.mxu0 %v4094_v62  ;;  %v4250_v30 = vld [vmem:[#allocation5 + $0x6d0] sm:$0xff] }
 0xbf0   :  { %8171 = vmatprep.subr.bf16.mxu0 %v4175_v3  ;;  %v4182_v62 = vld [vmem:[#allocation5 + $0x4b0] sm:$0xff]  ;;  %v4201_v3 = vld [vmem:[#allocation5 + $0x548] sm:$0xff] }
 0xbf2   :  { %4421 = vmatpush1.bf16.msra.mxu1 %v4115_v19  ;;  %v4269_v19 = vld [vmem:[#allocation5 + $0x768] sm:$0xff] }
 0xbf3   :  { %4422 = vmatprep.subr.bf16.mxu1 %v4125_v5  ;;  %8172 = vmatpush3.bf16.msra.mxu0 %v4103_v58  ;;  %v4268_v5 = vld [vmem:[#allocation5 + $0x760] sm:$0xff]  ;;  %v4210_v58 = vld [vmem:[#allocation5 + $0x590] sm:$0xff] }
 0xbf6   :  { %4423 = vmatpush1.bf16.msra.mxu1 %v4124_v37  ;;  %4681 = vmatmul.mubr.bf16.vlgmr.msra.gmra.mrb[76].mxu0 %v10552_v24  ;;  %v4287_v37 = vld [vmem:[#allocation5 + $0x7f8] sm:$0xff] }
 0xbf7   :  { %4424 = vmatprep.subr.bf16.mxu1 %v4134_v38  ;;  %v4286_v38 = vld [vmem:[#allocation5 + $0x7f0] sm:$0xff] }
 0xbfa   :  { %4425 = vmatpush1.bf16.msra.mxu1 %v4133_v44  ;;  %v4305_v44 = vld [vmem:[#allocation5 + $0x888] sm:$0xff] }
 0xbfb   :  { %4426 = vmatprep.subr.bf16.mxu1 %v4143_v41  ;;  %v4304_v41 = vld [vmem:[#allocation5 + $0x880] sm:$0xff] }
 0xbfe   :  { %4427 = vmatpush1.bf16.msra.mxu1 %v4142_v47  ;;  %v4039_v47 = vld [vmem:[#allocation5 + $0x38] sm:$0xff] }
 0xbff   :  { %4428 = vmatprep.subr.bf16.mxu1 %v4152_v6  ;;  %v4038_v6 = vld [vmem:[#allocation5 + $0x30] sm:$0xff] }
 0xc02   :  { %4429 = vmatpush1.bf16.msra.mxu1 %v4151_v26  ;;  %v4057_v26 = vld [vmem:[#allocation5 + $0xc8] sm:$0xff] }
 0xc03   :  { %4430 = vmatprep.subr.bf16.mxu1 %v4161_v22  ;;  %v4056_v22 = vld [vmem:[#allocation5 + $0xc0] sm:$0xff] }
 0xc06   :  { %4431 = vmatpush1.bf16.msra.mxu1 %v4160_v14  ;;  %v4065_v14 = vld [vmem:[#allocation5 + $0x108] sm:$0xff] }
 0xc07   :  { %4432 = vmatprep.subr.bf16.mxu1 %v4170_v25  ;;  %v4074_v25 = vld [vmem:[#allocation5 + $0x150] sm:$0xff] }
 0xc0a   :  { %4433 = vmatpush1.bf16.msra.mxu1 %v4169_v52  ;;  %v4083_v52 = vld [vmem:[#allocation5 + $0x198] sm:$0xff] }
 0xc0b   :  { %4443 = vmatprep.subr.bf16.mxu1 %v4179_v54  ;;  %v4102_v54 = vld [vmem:[#allocation5 + $0x230] sm:$0xff] }
 0xc0d   :  { %4435 = vmatmul.mubr.bf16.vlgmr.msra.gmra.mrb[68].mxu1 %v10552_v24 }
 0xc0e   :  { %4444 = vmatpush1.bf16.msra.mxu1 %v4178_v60  ;;  %4475 = vmatprep.mubr.bf16.mxu1 %v10556_v45  ;;  %v4111_v60 = vld [vmem:[#allocation5 + $0x278] sm:$0xff] }
 0xc0f   :  { %4445 = vmatprep.subr.bf16.mxu1 %v4188_v56  ;;  %v4120_v56 = vld [vmem:[#allocation5 + $0x2c0] sm:$0xff] }
 0xc12   :  { %4446 = vmatpush1.bf16.msra.mxu1 %v4187_v57  ;;  %v4129_v57 = vld [vmem:[#allocation5 + $0x308] sm:$0xff] }
 0xc13   :  { %4447 = vmatprep.subr.bf16.mxu1 %v4197_v0  ;;  %v4138_v0 = vld [vmem:[#allocation5 + $0x350] sm:$0xff] }
 0xc16   :  { %4448 = vmatpush1.bf16.msra.mxu1 %v4196_v1  ;;  %v4147_v1 = vld [vmem:[#allocation5 + $0x398] sm:$0xff] }
 0xc17   :  { %4449 = vmatprep.subr.bf16.mxu1 %v4206_v10  ;;  %v4156_v10 = vld [vmem:[#allocation5 + $0x3e0] sm:$0xff] }
 0xc1a   :  { %4450 = vmatpush1.bf16.msra.mxu1 %v4205_v2  ;;  %v4165_v2 = vld [vmem:[#allocation5 + $0x428] sm:$0xff] }
 0xc1b   :  { %4451 = vmatprep.subr.bf16.mxu1 %v4215_v29  ;;  %v4174_v29 = vld [vmem:[#allocation5 + $0x470] sm:$0xff] }
 0xc1e   :  { %4452 = vmatpush1.bf16.msra.mxu1 %v4214_v18  ;;  %v4183_v18 = vld [vmem:[#allocation5 + $0x4b8] sm:$0xff] }
 0xc1f   :  { %4453 = vmatprep.subr.bf16.mxu1 %v4224_v20  ;;  %v4192_v20 = vld [vmem:[#allocation5 + $0x500] sm:$0xff] }
 0xc22   :  { %4454 = vmatpush1.bf16.msra.mxu1 %v4223_v21  ;;  %v4191_v21 = vld [vmem:[#allocation5 + $0x4f8] sm:$0xff] }
 0xc23   :  { %4455 = vmatprep.subr.bf16.mxu1 %v4233_v9  ;;  %v4200_v9 = vld [vmem:[#allocation5 + $0x540] sm:$0xff] }
 0xc26   :  { %4456 = vmatpush1.bf16.msra.mxu1 %v4232_v46  ;;  %v4209_v46 = vld [vmem:[#allocation5 + $0x588] sm:$0xff] }
 0xc27   :  { %4457 = vmatprep.subr.bf16.mxu1 %v4242_v51  ;;  %v4219_v51 = vld [vmem:[#allocation5 + $0x5d8] sm:$0xff] }
 0xc2a   :  { %4458 = vmatpush1.bf16.msra.mxu1 %v4241_v27  ;;  %v4218_v27 = vld [vmem:[#allocation5 + $0x5d0] sm:$0xff] }
 0xc2b   :  { %4459 = vmatprep.subr.bf16.mxu1 %v4251_v28  ;;  %v4228_v28 = vld [vmem:[#allocation5 + $0x620] sm:$0xff] }
 0xc2e   :  { %4460 = vmatpush1.bf16.msra.mxu1 %v4250_v30 }
 0xc2f   :  { %4461 = vmatprep.subr.bf16.mxu1 %v4260_v13  ;;  %v4237_v13 = vld [vmem:[#allocation5 + $0x668] sm:$0xff] }
 0xc32   :  { %4462 = vmatpush1.bf16.msra.mxu1 %v4259_v17 }
 0xc33   :  { %4463 = vmatprep.subr.bf16.mxu1 %v4269_v19 }
 0xc36   :  { %4464 = vmatpush1.bf16.msra.mxu1 %v4268_v5 }
 0xc37   :  { %4465 = vmatprep.subr.bf16.mxu1 %v4278_v15 }
 0xc3a   :  { %4466 = vmatpush1.bf16.msra.mxu1 %v4277_v16  ;;  %v4236_v16 = vld [vmem:[#allocation5 + $0x660] sm:$0xff] }
 0xc3b   :  { %4467 = vmatprep.subr.bf16.mxu1 %v4287_v37  ;;  %v4246_v37 = vld [vmem:[#allocation5 + $0x6b0] sm:$0xff] }
 0xc3e   :  { %4468 = vmatpush1.bf16.msra.mxu1 %v4286_v38  ;;  %v4245_v38 = vld [vmem:[#allocation5 + $0x6a8] sm:$0xff] }
 0xc3f   :  { %4469 = vmatprep.subr.bf16.mxu1 %v4296_v33  ;;  %v4255_v33 = vld [vmem:[#allocation5 + $0x6f8] sm:$0xff] }
 0xc42   :  { %4470 = vmatpush1.bf16.msra.mxu1 %v4295_v39  ;;  %v4254_v39 = vld [vmem:[#allocation5 + $0x6f0] sm:$0xff] }
 0xc43   :  { %4471 = vmatprep.subr.bf16.mxu1 %v4305_v44  ;;  %v4264_v44 = vld [vmem:[#allocation5 + $0x740] sm:$0xff] }
 0xc46   :  { %4472 = vmatpush1.bf16.msra.mxu1 %v4304_v41  ;;  %v4263_v41 = vld [vmem:[#allocation5 + $0x738] sm:$0xff] }
 0xc47   :  { %4473 = vmatprep.subr.bf16.mxu1 %v4314_v42  ;;  %v4273_v42 = vld [vmem:[#allocation5 + $0x788] sm:$0xff] }
 0xc4a   :  { %4474 = vmatpush1.bf16.msra.mxu1 %v4313_v43  ;;  %v4272_v43 = vld [vmem:[#allocation5 + $0x780] sm:$0xff] }
 0xc4b   :  { %4566 = vmatprep.subr.bf16.mxu1 %v4039_v47  ;;  %v4282_v47 = vld [vmem:[#allocation5 + $0x7d0] sm:$0xff] }
 0xc4d   :  { %4476 = vmatmul.mubr.bf16.vlgmr.msra.gmra.mrb[68].mxu1 %v10564_v8 }
 0xc4e   :  { %4567 = vmatpush1.bf16.msra.mxu1 %v4038_v6  ;;  %4598 = vmatprep.mubr.bf16.mxu1 %v10546_v55  ;;  %v4092_v55 = vld [vmem:[#allocation5 + $0x1e0] sm:$0xff]  ;;  %v4281_v6 = vld [vmem:[#allocation5 + $0x7c8] sm:$0xff] }
 0xc4f   :  { %4568 = vmatprep.subr.bf16.mxu1 %v4048_v11  ;;  %v4291_v11 = vld [vmem:[#allocation5 + $0x818] sm:$0xff] }
 0xc52   :  { %4569 = vmatpush1.bf16.msra.mxu1 %v4047_v35  ;;  %v4290_v35 = vld [vmem:[#allocation5 + $0x810] sm:$0xff] }
 0xc53   :  { %4570 = vmatprep.subr.bf16.mxu1 %v4057_v26  ;;  %v4300_v26 = vld [vmem:[#allocation5 + $0x860] sm:$0xff] }
 0xc56   :  { %4571 = vmatpush1.bf16.msra.mxu1 %v4056_v22  ;;  %v4299_v22 = vld [vmem:[#allocation5 + $0x858] sm:$0xff] }
 0xc57   :  { %4572 = vmatprep.subr.bf16.mxu1 %v4066_v49  ;;  %v4309_v49 = vld [vmem:[#allocation5 + $0x8a8] sm:$0xff] }
 0xc5a   :  { %4573 = vmatpush1.bf16.msra.mxu1 %v4065_v14  ;;  %v4308_v14 = vld [vmem:[#allocation5 + $0x8a0] sm:$0xff] }
 0xc5b   :  { %4574 = vmatprep.subr.bf16.mxu1 %v4075_v40  ;;  %v4318_v40 = vld [vmem:[#allocation5 + $0x8f0] sm:$0xff] }
 0xc5e   :  { %4575 = vmatpush1.bf16.msra.mxu1 %v4074_v25  ;;  %v4317_v25 = vld [vmem:[#allocation5 + $0x8e8] sm:$0xff] }
 0xc5f   :  { %4576 = vmatprep.subr.bf16.mxu1 %v4084_v50  ;;  %v4256_v50 = vld [vmem:[#allocation5 + $0x700] sm:$0xff] }
 0xc62   :  { %4577 = vmatpush1.bf16.msra.mxu1 %v4083_v52  ;;  %v4184_v52 = vld [vmem:[#allocation5 + $0x4c0] sm:$0xff] }
 0xc63   :  { %4578 = vmatprep.subr.bf16.mxu1 %v4093_v36  ;;  %v4265_v36 = vld [vmem:[#allocation5 + $0x748] sm:$0xff] }
 0xc66   :  { %4579 = vmatpush1.bf16.msra.mxu1 %v4092_v55  ;;  %v4193_v55 = vld [vmem:[#allocation5 + $0x508] sm:$0xff] }
 0xc67   :  { %4580 = vmatprep.subr.bf16.mxu1 %v4102_v54  ;;  %v4274_v54 = vld [vmem:[#allocation5 + $0x790] sm:$0xff] }
 0xc6a   :  { %4581 = vmatpush1.bf16.msra.mxu1 %v4101_v32  ;;  %v4202_v32 = vld [vmem:[#allocation5 + $0x550] sm:$0xff] }
 0xc6b   :  { %4582 = vmatprep.subr.bf16.mxu1 %v4111_v60  ;;  %v4283_v60 = vld [vmem:[#allocation5 + $0x7d8] sm:$0xff] }
 0xc6e   :  { %4583 = vmatpush1.bf16.msra.mxu1 %v4110_v31  ;;  %v4211_v31 = vld [vmem:[#allocation5 + $0x598] sm:$0xff] }
 0xc6f   :  { %4584 = vmatprep.subr.bf16.mxu1 %v4120_v56 }
 0xc72   :  { %4585 = vmatpush1.bf16.msra.mxu1 %v4119_v53  ;;  %v4292_v53 = vld [vmem:[#allocation5 + $0x820] sm:$0xff] }
 0xc73   :  { %4586 = vmatprep.subr.bf16.mxu1 %v4129_v57 }
 0xc76   :  { %4587 = vmatpush1.bf16.msra.mxu1 %v4128_v63 }
 0xc77   :  { %4588 = vmatprep.subr.bf16.mxu1 %v4138_v0 }
 0xc7a   :  { %4589 = vmatpush1.bf16.msra.mxu1 %v4137_v4 }
 0xc7b   :  { %4590 = vmatprep.subr.bf16.mxu1 %v4147_v1  ;;  %v4220_v1 = vld [vmem:[#allocation5 + $0x5e0] sm:$0xff] }
 0xc7e   :  { %4591 = vmatpush1.bf16.msra.mxu1 %v4146_v7  ;;  %v4229_v7 = vld [vmem:[#allocation5 + $0x628] sm:$0xff] }
 0xc7f   :  { %4592 = vmatprep.subr.bf16.mxu1 %v4156_v10  ;;  %v4310_v10 = vld [vmem:[#allocation5 + $0x8b0] sm:$0xff] }
 0xc82   :  { %4593 = vmatpush1.bf16.msra.mxu1 %v4155_v34  ;;  %v4238_v34 = vld [vmem:[#allocation5 + $0x670] sm:$0xff] }
 0xc83   :  { %4594 = vmatprep.subr.bf16.mxu1 %v4165_v2  ;;  %v4319_v2 = vld [vmem:[#allocation5 + $0x8f8] sm:$0xff] }
 0xc86   :  { %4595 = vmatpush1.bf16.msra.mxu1 %v4164_v12  ;;  %v4247_v12 = vld [vmem:[#allocation5 + $0x6b8] sm:$0xff] }
 0xc87   :  { %4596 = vmatprep.subr.bf16.mxu1 %v4174_v29 }
 0xc8a   :  { %4597 = vmatpush1.bf16.msra.mxu1 %v4173_v48 }
 0xc8b   :  { %4607 = vmatprep.subr.bf16.mxu1 %v4183_v18 }
 0xc8d   :  { %4599 = vmatmul.mubr.bf16.vlgmr.msra.gmra.mrb[72].mxu1 %v10552_v24  ;;  %v4227_v24 = vld [vmem:[#allocation5 + $0x618] sm:$0xff] }
 0xc8e   :  { %4608 = vmatpush1.bf16.msra.mxu1 %v4182_v62  ;;  %4639 = vmatprep.mubr.bf16.mxu1 %v10556_v45 }
 0xc8f   :  { %4609 = vmatprep.subr.bf16.mxu1 %v4192_v20 }
 0xc92   :  { %4610 = vmatpush1.bf16.msra.mxu1 %v4191_v21 }
 0xc93   :  { %4611 = vmatprep.subr.bf16.mxu1 %v4201_v3 }
 0xc96   :  { %4612 = vmatpush1.bf16.msra.mxu1 %v4200_v9 }
 0xc97   :  { %4613 = vmatprep.subr.bf16.mxu1 %v4210_v58 }
 0xc9a   :  { %4614 = vmatpush1.bf16.msra.mxu1 %v4209_v46 }
 0xc9b   :  { %4615 = vmatprep.subr.bf16.mxu1 %v4219_v51  ;;  %v7994_v51 = vld [vmem:[#allocation20] sm:$0xff]  }
 0xc9e   :  { %4616 = vmatpush1.bf16.msra.mxu1 %v4218_v27  ;;  %v7995_v27 = vunpack.c.l.bf16 %v7994_v51 }
 0xc9f   :  { %4617 = vmatprep.subr.bf16.mxu1 %v4228_v28 }
 0xca0   :  { %v4395_v30 = vpop.f32.mrb[64].mxu1  ;;  %8790 = vmatprep.mubr.msk.f32.mxu0 %vm4732_vm1, %v7995_v27 }
 0xca1   :  { %v4397_v17 = vpop.f32.mrb[65].mxu1 }
 0xca2   :  { %v9040_v19 = vpack.c.bf16 %v4397_v17, %v4395_v30  ;;  %v4399_v5 = vpop.f32.mrb[66].mxu1  ;;  %4618 = vmatpush1.bf16.msra.mxu1 %v4227_v24 }
 0xca3   :  { %v4400_v15 = vpop.f32.mrb[67].mxu1  ;;  %4619 = vmatprep.subr.bf16.mxu1 %v4237_v13 }
 0xca4   :  { %9041 = vmatprep.subr.bf16.mxu0 %v9040_v19 }
 0xca5   :  { %9043 = vmatpush3.bf16.msra.mxu0 %v9040_v19 }
 0xca6   :  { %4620 = vmatpush1.bf16.msra.mxu1 %v4236_v16  ;;  %v8001_v16 = vld [vmem:[#allocation20 + $0x8] sm:$0xff]  }
 0xca7   :  { %4621 = vmatprep.subr.bf16.mxu1 %v4246_v37 }
 0xca9   :  { %v4559_v56 = vpop.f32.mrb[72].mxu0 }
 0xcaa   :  { %4622 = vmatpush1.bf16.msra.mxu1 %v4245_v38  ;;  %v4561_v57 = vpop.f32.mrb[73].mxu0 }
 0xcab   :  { %4623 = vmatprep.subr.bf16.mxu1 %v4255_v33  ;;  %v9048_v63 = vpack.c.bf16 %v4561_v57, %v4559_v56  ;;  %v4563_v0 = vpop.f32.mrb[74].mxu0  ;;  %v7996_v33 = vunpack.c.h.bf16 %v7994_v51 }
 0xcac   :  { %v4564_v4 = vpop.f32.mrb[75].mxu0 }
 0xcae   :  { %4624 = vmatpush1.bf16.msra.mxu1 %v4254_v39  ;;  %v7999_v39 = vunpack.c.l.bf16 %v8001_v16 }
 0xcaf   :  { %4625 = vmatprep.subr.bf16.mxu1 %v4264_v44  ;;  %v8000_v44 = vunpack.c.h.bf16 %v8001_v16 }
 0xcb2   :  { %4626 = vmatpush1.bf16.msra.mxu1 %v4263_v41 }
 0xcb3   :  { %4627 = vmatprep.subr.bf16.mxu1 %v4273_v42 }
 0xcb6   :  { %4628 = vmatpush1.bf16.msra.mxu1 %v4272_v43 }
 0xcb7   :  { %4629 = vmatprep.subr.bf16.mxu1 %v4282_v47 }
 0xcba   :  { %4630 = vmatpush1.bf16.msra.mxu1 %v4281_v6 }
 0xcbb   :  { %4631 = vmatprep.subr.bf16.mxu1 %v4291_v11 }
 0xcbe   :  { %4632 = vmatpush1.bf16.msra.mxu1 %v4290_v35 }
 0xcbf   :  { %4633 = vmatprep.subr.bf16.mxu1 %v4300_v26 }
 0xcc2   :  { %4634 = vmatpush1.bf16.msra.mxu1 %v4299_v22 }
 0xcc3   :  { %4635 = vmatprep.subr.bf16.mxu1 %v4309_v49 }
 0xcc6   :  { %4636 = vmatpush1.bf16.msra.mxu1 %v4308_v14 }
 0xcc7   :  { %4637 = vmatprep.subr.bf16.mxu1 %v4318_v40 }
 0xcc9   :  { %v8173_v21 = vpop.f32.mrb[76].mxu0 }
 0xcca   :  { %4638 = vmatpush1.bf16.msra.mxu1 %v4317_v25  ;;  %v8174_v3 = vpop.f32.mrb[77].mxu0 }
 0xccb   :  { %8179 = vmatprep.subr.bf16.mxu1 %v4256_v50  ;;  %v8175_v9 = vadd.f32 %v8174_v3, %v8173_v21  ;;  %v8176_v58 = vpop.f32.mrb[78].mxu0 }
 0xccc   :  { %v8177_v46 = vpop.f32.mrb[79].mxu0 }
 0xccd   :  { %4640 = vmatmul.mubr.bf16.vlgmr.msra.gmra.mrb[72].mxu1 %v10564_v8 }
 0xcce   :  { %8180 = vmatpush3.bf16.msra.mxu1 %v4184_v52  ;;  %4720 = vmatprep.mubr.bf16.mxu1 %v10556_v45  ;;  %v4301_v45 = vld [vmem:[#allocation5 + $0x868] sm:$0xff] }
 0xccf   :  { %8181 = vmatprep.subr.bf16.mxu1 %v4265_v36 }
 0xcd2   :  { %8182 = vmatpush3.bf16.msra.mxu1 %v4193_v55 }
 0xcd3   :  { %8183 = vmatprep.subr.bf16.mxu1 %v4274_v54 }
 0xcd6   :  { %8184 = vmatpush3.bf16.msra.mxu1 %v4202_v32 }
 0xcd7   :  { %8185 = vmatprep.subr.bf16.mxu1 %v4283_v60 }
 0xcda   :  { %8186 = vmatpush3.bf16.msra.mxu1 %v4211_v31 }
 0xcdb   :  { %8187 = vmatprep.subr.bf16.mxu1 %v4292_v53 }
 0xcde   :  { %8188 = vmatpush3.bf16.msra.mxu1 %v4220_v1 }
 0xcdf   :  { %8189 = vmatprep.subr.bf16.mxu1 %v4301_v45 }
 0xce2   :  { %8190 = vmatpush3.bf16.msra.mxu1 %v4229_v7 }
 0xce3   :  { %8191 = vmatprep.subr.bf16.mxu1 %v4310_v10 }
 0xce6   :  { %8192 = vmatpush3.bf16.msra.mxu1 %v4238_v34 }
 0xce7   :  { %8193 = vmatprep.subr.bf16.mxu1 %v4319_v2 }
 0xcea   :  { %8194 = vmatpush3.bf16.msra.mxu1 %v4247_v12  ;;  %v4830_v12 = vld [vmem:[#allocation21] sm:$0x3] }
 0xced   :  { %4721 = vmatmul.mubr.bf16.vlgmr.msra.gmra.mrb[76].mxu1 %v10564_v8 }
 0xd20   :  { %v4477_v29 = vpop.f32.mrb[68].mxu1 }
 0xd21   :  { %v4479_v48 = vpop.f32.mrb[69].mxu1 }
 0xd22   :  { %v9044_v18 = vpack.c.bf16 %v4479_v48, %v4477_v29  ;;  %v4481_v62 = vpop.f32.mrb[70].mxu1  ;;  %v4868_v29 = vrot.slane %v4830_v12, %v10233_v59 }
 0xd23   :  { %v4482_v20 = vpop.f32.mrb[71].mxu1 }
 0xd24   :  { %9045 = vmatprep.subr.bf16.mxu0 %v9044_v18 }
 0xd25   :  { %9047 = vmatpush3.bf16.msra.mxu0 %v9044_v18  ;;  %v4876_v18 = vrot.slane %v4830_v12, %v10236_v61 }
 0xd26   :  { %9049 = vmatprep.subr.bf16.mxu0 %v9048_v63 }
 0xd29   :  { %9051 = vmatpush3.bf16.msra.mxu0 %v9048_v63 }
 0xda0   :  { %v4641_v8 = vpop.f32.mrb[72].mxu1 }
 0xda1   :  { %v4643_v28 = vpop.f32.mrb[73].mxu1 }
 0xda2   :  { %v9052_v24 = vpack.c.bf16 %v4643_v28, %v4641_v8  ;;  %v4645_v30 = vpop.f32.mrb[74].mxu1 }
 0xda3   :  { %v4646_v13 = vpop.f32.mrb[75].mxu1 }
 0xda4   :  { %9053 = vmatprep.subr.bf16.mxu0 %v9052_v24 }
 0xda5   :  { %9055 = vmatpush3.bf16.msra.mxu0 %v9052_v24 }
 0xdc0   :  { %v8195_v17 = vpop.f32.mrb[76].mxu1 }
 0xdc1   :  { %v8196_v19 = vpop.f32.mrb[77].mxu1 }
 0xdc2   :  { %v8197_v5 = vadd.f32 %v8196_v19, %v8195_v17  ;;  %v8198_v15 = vpop.f32.mrb[78].mxu1 }
 0xdc3   :  { %v8199_v37 = vpop.f32.mrb[79].mxu1 }
 0xdc4   :  { %v4723_v38 = vadd.f32 %v8197_v5, %v8175_v9 }
 0xdc6   :  { %8788 = vmatprep.subr.mxu0 %v4723_v38 }
 0xdc7   :  { %8789 = vmatpush3.msra.mxu0 %v4723_v38 }
 0xdc8   :  { %8791 = vmatmul.mubr.msk.f32.vlgmr.msra.gmra.mrb[80].mxu0 %vm4732_vm1, %v7996_v33 }
 0xdc9   :  { %8793 = vmatprep.mubr.msk.f32.mxu0 %vm4732_vm1, %v7999_v39 }
 0xdcc   :  { %8794 = vmatmul.mubr.msk.f32.gmra.mrb[82].mxu0 %vm4732_vm1, %v8000_v44 }
 0xe9b   :  { %v8792_v41 = vpop.f32.mrb[80].mxu0 }
 0xe9c   :  { %v4811_v42 = vpop.f32.mrb[81].mxu0 }
 0xe9d   :  { %v4831_v43 = vadd.f32 %v8792_v41, %v4811_v42 }
 0xe9f   :  { %v8795_v47 = vpop.f32.mrb[82].mxu0 }
 0xea0   :  { %v4821_v6 = vpop.f32.mrb[83].mxu0 }
 0xea1   :  { %v4832_v11 = vadd.f32 %v4831_v43, %v4821_v6 }
 0xea3   :  { %v4833_v35 = vadd.f32 %v8795_v47, %v4832_v11 }
 0xea5   :  { %v4834_v26 = vrot.slane %v4833_v35, 4 }
 0xea7   :  { %v4835_v22 = vadd.f32 %v4834_v26, %v4833_v35 }
 0xea9   :  { %v4836_v49 = vrot.slane %v4835_v22, 2 }
 0xeab   :  { %v4837_v14 = vadd.f32 %v4836_v49, %v4835_v22 }
 0xead   :  { %v4838_v40 = vrot.slane %v4837_v14, 1 }
 0xeaf   :  { %v4839_v25 = vadd.f32 %v4838_v40, %v4837_v14 }
 0xeb1   :  { %v4840_v50 = vmul.f32 0.03125, %v4839_v25 }
 0xeb3   :  { %v4841_v52 = vsub.f32 %v4811_v42, %v4840_v50  ;;  %v4842_v36 = vsub.f32 %v8792_v41, %v4840_v50  ;;  %v4843_v55 = vsub.f32 %v4821_v6, %v4840_v50  ;;  %v4844_v54 = vsub.f32 %v8795_v47, %v4840_v50 }
 0xeb5   :  { %v4845_v32 = vmul.f32 %v4841_v52, %v4841_v52  ;;  %v4846_v60 = vmul.f32 %v4842_v36, %v4842_v36  ;;  %v4847_v31 = vmul.f32 %v4843_v55, %v4843_v55  ;;  %v4848_v53 = vmul.f32 %v4844_v54, %v4844_v54 }
 0xeb7   :  { %v4849_v56 = vadd.f32 %v4846_v60, %v4845_v32 }
 0xeb9   :  { %v4850_v57 = vadd.f32 %v4849_v56, %v4847_v31 }
 0xebb   :  { %v4851_v63 = vadd.f32 %v4850_v57, %v4848_v53 }
 0xebd   :  { %v4852_v0 = vrot.slane %v4851_v63, 4 }
 0xebf   :  { %v4853_v4 = vadd.f32 %v4852_v0, %v4851_v63 }
 0xec1   :  { %v4854_v1 = vrot.slane %v4853_v4, 2 }
 0xec3   :  { %v4855_v45 = vadd.f32 %v4854_v1, %v4853_v4 }
 0xec5   :  { %v4856_v7 = vrot.slane %v4855_v45, 1 }
 0xec7   :  { %v4857_v10 = vadd.f32 %v4856_v7, %v4855_v45 }
 0xec9   :  { %v4858_v34 = vmul.f32 0.03125, %v4857_v10 }
 0xecb   :  { %v4859_v2 = vadd.f32 1e-05, %v4858_v34 }
 0xecd   :  { %9349 = vrsqrt.f32 %v4859_v2 }
 0xed7   :  { %v9350_v48 = vpop.eup %9349 }
 0xed8   :  { %v4861_v62 = vmul.f32 %v9350_v48, %v4841_v52  ;;  %v4862_v20 = vmul.f32 %v9350_v48, %v4842_v36  ;;  %v4863_v21 = vmul.f32 %v9350_v48, %v4843_v55  ;;  %v4864_v3 = vmul.f32 %v9350_v48, %v4844_v54 }
 0xeda   :  { %v4869_v9 = vmul.f32 %v4868_v29, %v4861_v62  ;;  %v4870_v58 = vmul.f32 %v4868_v29, %v4862_v20  ;;  %v4871_v46 = vmul.f32 %v4868_v29, %v4863_v21  ;;  %v4872_v51 = vmul.f32 %v4868_v29, %v4864_v3 }
 0xedc   :  { %v4877_v27 = vadd.f32 %v4876_v18, %v4869_v9  ;;  %v4878_v8 = vadd.f32 %v4876_v18, %v4870_v58  ;;  %v4879_v28 = vadd.f32 %v4876_v18, %v4871_v46  ;;  %v4880_v24 = vadd.f32 %v4876_v18, %v4872_v51 }
 0xede   :  { %vm4881_vm2 = vcmp.ge.f32.partialorder %v4877_v27, 0.0  ;;  %vm4882_vm3 = vcmp.ge.f32.partialorder %v4878_v8, 0.0  ;;  %vm4883_vm4 = vcmp.ge.f32.partialorder %v4879_v28, 0.0  ;;  %vm4884_vm6 = vcmp.ge.f32.partialorder %v4880_v24, 0.0 }
 0xedf   :  { %v4885_v30 = vmul.f32 0.01, %v4877_v27  ;;  %v4886_v13 = vmul.f32 0.01, %v4878_v8  ;;  %v4887_v17 = vmul.f32 0.01, %v4879_v28 }
 0xee0   :  { %v4888_v19 = vmul.f32 0.01, %v4880_v24 }
 0xee1   :  { %v10586_v5 = vsel %vm4881_vm2, %v4877_v27, %v4885_v30  ;;  %v10588_v15 = vsel %vm4882_vm3, %v4878_v8, %v4886_v13  ;;  %v10590_v16 = vsel %vm4883_vm4, %v4879_v28, %v4887_v17 }
 0xee2   :  { %v10592_v37 = vsel %vm4884_vm6, %v4880_v24, %v4888_v19 }
 0xee3   :  { %9785 = dma.done.wait [#allocation8 + $0x4], 9216 }
 0xee4   :  { %9786 = vsyncadd [#allocation8 + $0x4], 4294958080  ;;  %5034 = vmatprep.mubr.bf16.mxu1 %v9834_v23  ;;  %5087 = vmatprep.mubr.bf16.mxu0 %v9834_v23  ;;  %v4931_v38 = vld [vmem:[#allocation6 + $0x8] sm:$0xff]  ;;  %v4930_v33 = vld [vmem:[#allocation6] sm:$0xff]  ;;  %v10598_v45 = vpack.c.bf16 %v10588_v15, %v10586_v5  ;;  %v10606_v20 = vpack.c.bf16 %v10592_v37, %v10590_v16 }
 0xee5   :  { %v4940_v39 = vld [vmem:[#allocation6 + $0x50] sm:$0xff]  ;;  %5002 = vmatprep.subr.bf16.mxu1 %v4931_v38  ;;  %v4933_v44 = vld [vmem:[#allocation6 + $0x18] sm:$0xff]  ;;  %v4939_v41 = vld [vmem:[#allocation6 + $0x48] sm:$0xff] }
 0xee6   :  { %5003 = vmatpush1.bf16.msra.mxu1 %v4930_v33  ;;  %5055 = vmatprep.subr.bf16.mxu0 %v4933_v44  ;;  %v4932_v42 = vld [vmem:[#allocation6 + $0x10] sm:$0xff]  ;;  %v4949_v43 = vld [vmem:[#allocation6 + $0x98] sm:$0xff]  ;;  %v4942_v47 = vld [vmem:[#allocation6 + $0x60] sm:$0xff] }
 0xee7   :  { %5004 = vmatprep.subr.bf16.mxu1 %v4940_v39  ;;  %5056 = vmatpush1.bf16.msra.mxu0 %v4932_v42  ;;  %v4941_v6 = vld [vmem:[#allocation6 + $0x58] sm:$0xff]  ;;  %v4951_v11 = vld [vmem:[#allocation6 + $0xa8] sm:$0xff]  ;;  %v4948_v35 = vld [vmem:[#allocation6 + $0x90] sm:$0xff] }
 0xee8   :  { %5057 = vmatprep.subr.bf16.mxu0 %v4942_v47  ;;  %v4958_v26 = vld [vmem:[#allocation6 + $0xe0] sm:$0xff]  ;;  %v4960_v49 = vld [vmem:[#allocation6 + $0xf0] sm:$0xff]  ;;  %v4957_v14 = vld [vmem:[#allocation6 + $0xd8] sm:$0xff] }
 0xee9   :  { %v4950_v22 = vld [vmem:[#allocation6 + $0xa0] sm:$0xff]  ;;  %v4967_v40 = vld [vmem:[#allocation6 + $0x128] sm:$0xff]  ;;  %v4969_v50 = vld [vmem:[#allocation6 + $0x138] sm:$0xff] }
 0xeea   :  { %5005 = vmatpush1.bf16.msra.mxu1 %v4939_v41  ;;  %v4959_v25 = vld [vmem:[#allocation6 + $0xe8] sm:$0xff]  ;;  %v4966_v52 = vld [vmem:[#allocation6 + $0x120] sm:$0xff]  ;;  %v4976_v36 = vld [vmem:[#allocation6 + $0x170] sm:$0xff] }
 0xeeb   :  { %5006 = vmatprep.subr.bf16.mxu1 %v4949_v43  ;;  %5058 = vmatpush1.bf16.msra.mxu0 %v4941_v6  ;;  %v4968_v55 = vld [vmem:[#allocation6 + $0x130] sm:$0xff]  ;;  %v4978_v54 = vld [vmem:[#allocation6 + $0x180] sm:$0xff]  ;;  %v4975_v32 = vld [vmem:[#allocation6 + $0x168] sm:$0xff] }
 0xeec   :  { %5059 = vmatprep.subr.bf16.mxu0 %v4951_v11  ;;  %v4985_v60 = vld [vmem:[#allocation6 + $0x1b8] sm:$0xff]  ;;  %v4987_v56 = vld [vmem:[#allocation6 + $0x1c8] sm:$0xff]  ;;  %v4984_v53 = vld [vmem:[#allocation6 + $0x1b0] sm:$0xff] }
 0xeed   :  { %v4977_v31 = vld [vmem:[#allocation6 + $0x178] sm:$0xff]  ;;  %v4994_v57 = vld [vmem:[#allocation6 + $0x200] sm:$0xff]  ;;  %v4996_v0 = vld [vmem:[#allocation6 + $0x210] sm:$0xff] }
 0xeee   :  { %5007 = vmatpush1.bf16.msra.mxu1 %v4948_v35  ;;  %v4986_v63 = vld [vmem:[#allocation6 + $0x1c0] sm:$0xff]  ;;  %v4993_v4 = vld [vmem:[#allocation6 + $0x1f8] sm:$0xff]  ;;  %v4935_v1 = vld [vmem:[#allocation6 + $0x28] sm:$0xff] }
 0xeef   :  { %5008 = vmatprep.subr.bf16.mxu1 %v4958_v26  ;;  %5060 = vmatpush1.bf16.msra.mxu0 %v4950_v22  ;;  %v4995_v7 = vld [vmem:[#allocation6 + $0x208] sm:$0xff]  ;;  %v4937_v10 = vld [vmem:[#allocation6 + $0x38] sm:$0xff]  ;;  %v4934_v34 = vld [vmem:[#allocation6 + $0x20] sm:$0xff] }
 0xef0   :  { %5061 = vmatprep.subr.bf16.mxu0 %v4960_v49  ;;  %v4944_v2 = vld [vmem:[#allocation6 + $0x70] sm:$0xff]  ;;  %v4946_v29 = vld [vmem:[#allocation6 + $0x80] sm:$0xff]  ;;  %v4943_v48 = vld [vmem:[#allocation6 + $0x68] sm:$0xff] }
 0xef1   :  { %v4936_v12 = vld [vmem:[#allocation6 + $0x30] sm:$0xff]  ;;  %v4953_v18 = vld [vmem:[#allocation6 + $0xb8] sm:$0xff]  ;;  %v4955_v21 = vld [vmem:[#allocation6 + $0xc8] sm:$0xff] }
 0xef2   :  { %5009 = vmatpush1.bf16.msra.mxu1 %v4957_v14  ;;  %v4945_v62 = vld [vmem:[#allocation6 + $0x78] sm:$0xff]  ;;  %v4952_v3 = vld [vmem:[#allocation6 + $0xb0] sm:$0xff]  ;;  %v4962_v9 = vld [vmem:[#allocation6 + $0x100] sm:$0xff] }
 0xef3   :  { %5010 = vmatprep.subr.bf16.mxu1 %v4967_v40  ;;  %5062 = vmatpush1.bf16.msra.mxu0 %v4959_v25  ;;  %v4954_v58 = vld [vmem:[#allocation6 + $0xc0] sm:$0xff]  ;;  %v4964_v46 = vld [vmem:[#allocation6 + $0x110] sm:$0xff]  ;;  %v4961_v51 = vld [vmem:[#allocation6 + $0xf8] sm:$0xff] }
 0xef4   :  { %5063 = vmatprep.subr.bf16.mxu0 %v4969_v50  ;;  %v4971_v27 = vld [vmem:[#allocation6 + $0x148] sm:$0xff]  ;;  %v4973_v28 = vld [vmem:[#allocation6 + $0x158] sm:$0xff]  ;;  %v4970_v24 = vld [vmem:[#allocation6 + $0x140] sm:$0xff] }
 0xef5   :  { %v4963_v8 = vld [vmem:[#allocation6 + $0x108] sm:$0xff]  ;;  %v4980_v30 = vld [vmem:[#allocation6 + $0x190] sm:$0xff]  ;;  %v4982_v17 = vld [vmem:[#allocation6 + $0x1a0] sm:$0xff] }
 0xef6   :  { %5011 = vmatpush1.bf16.msra.mxu1 %v4966_v52  ;;  %v4972_v13 = vld [vmem:[#allocation6 + $0x150] sm:$0xff]  ;;  %v4979_v19 = vld [vmem:[#allocation6 + $0x188] sm:$0xff]  ;;  %v4989_v5 = vld [vmem:[#allocation6 + $0x1d8] sm:$0xff] }
 0xef7   :  { %5012 = vmatprep.subr.bf16.mxu1 %v4976_v36  ;;  %5064 = vmatpush1.bf16.msra.mxu0 %v4968_v55  ;;  %v4981_v15 = vld [vmem:[#allocation6 + $0x198] sm:$0xff]  ;;  %v4991_v16 = vld [vmem:[#allocation6 + $0x1e8] sm:$0xff]  ;;  %v4988_v37 = vld [vmem:[#allocation6 + $0x1d0] sm:$0xff] }
 0xef8   :  { %5065 = vmatprep.subr.bf16.mxu0 %v4978_v54  ;;  %v4998_v38 = vld [vmem:[#allocation6 + $0x220] sm:$0xff]  ;;  %v5000_v39 = vld [vmem:[#allocation6 + $0x230] sm:$0xff]  ;;  %v4997_v44 = vld [vmem:[#allocation6 + $0x218] sm:$0xff] }
 0xef9   :  { %v4990_v33 = vld [vmem:[#allocation6 + $0x1e0] sm:$0xff]  ;;  %v4999_v42 = vld [vmem:[#allocation6 + $0x228] sm:$0xff]  ;;  %v4956_v47 = vld [vmem:[#allocation6 + $0xd0] sm:$0xff] }
 0xefa   :  { %5013 = vmatpush1.bf16.msra.mxu1 %v4975_v32  ;;  %v4938_v41 = vld [vmem:[#allocation6 + $0x40] sm:$0xff]  ;;  %v4947_v43 = vld [vmem:[#allocation6 + $0x88] sm:$0xff]  ;;  %v4965_v6 = vld [vmem:[#allocation6 + $0x118] sm:$0xff] }
 0xefb   :  { %5014 = vmatprep.subr.bf16.mxu1 %v4985_v60  ;;  %5066 = vmatpush1.bf16.msra.mxu0 %v4977_v31  ;;  %v4974_v11 = vld [vmem:[#allocation6 + $0x160] sm:$0xff]  ;;  %v4983_v35 = vld [vmem:[#allocation6 + $0x1a8] sm:$0xff]  ;;  %v4992_v26 = vld [vmem:[#allocation6 + $0x1f0] sm:$0xff] }
 0xefc   :  { %5067 = vmatprep.subr.bf16.mxu0 %v4987_v56  ;;  %v10623_v22 = vld [vmem:[%s11302_s11] sm:$0xff]  ;;  %v10629_v14 = vld [vmem:[%s11302_s11 + $0x8] ss:$12 sps:$4 sm:$0xff]  }
 0xefd   :  { %v5264_v49 = vunpack.c.h.bf16 %v10623_v22  ;;  %v5265_v40 = vunpack.c.l.bf16 %v10629_v14 }
 0xefe   :  { %5015 = vmatpush1.bf16.msra.mxu1 %v4984_v53 }
 0xeff   :  { %5016 = vmatprep.subr.bf16.mxu1 %v4994_v57  ;;  %5068 = vmatpush1.bf16.msra.mxu0 %v4986_v63 }
 0xf00   :  { %5069 = vmatprep.subr.bf16.mxu0 %v4996_v0 }
 0xf02   :  { %5017 = vmatpush1.bf16.msra.mxu1 %v4993_v4 }
 0xf03   :  { %5108 = vmatprep.subr.bf16.mxu1 %v4935_v1  ;;  %5070 = vmatpush1.bf16.msra.mxu0 %v4995_v7 }
 0xf04   :  { %5161 = vmatprep.subr.bf16.mxu0 %v4937_v10 }
 0xf05   :  { %5035 = vmatmul.mubr.bf16.vlgmr.msra.gmra.mrb[80].mxu1 %v10598_v45 }
 0xf06   :  { %5109 = vmatpush1.bf16.msra.mxu1 %v4934_v34  ;;  %5044 = vmatprep.mubr.bf16.mxu1 %v9834_v23 }
 0xf07   :  { %5110 = vmatprep.subr.bf16.mxu1 %v4944_v2  ;;  %5088 = vmatmul.mubr.bf16.vlgmr.msra.gmra.mrb[84].mxu0 %v10598_v45 }
 0xf08   :  { %5162 = vmatpush1.bf16.msra.mxu0 %v4936_v12  ;;  %5097 = vmatprep.mubr.bf16.mxu0 %v9834_v23 }
 0xf09   :  { %5163 = vmatprep.subr.bf16.mxu0 %v4946_v29 }
 0xf0a   :  { %5111 = vmatpush1.bf16.msra.mxu1 %v4943_v48 }
 0xf0b   :  { %5112 = vmatprep.subr.bf16.mxu1 %v4953_v18 }
 0xf0c   :  { %5164 = vmatpush1.bf16.msra.mxu0 %v4945_v62 }
 0xf0d   :  { %5045 = vmatmul.mubr.bf16.gmra.mrb[84].mxu1 %v10606_v20  ;;  %5165 = vmatprep.subr.bf16.mxu0 %v4955_v21 }
 0xf0e   :  { %5113 = vmatpush1.bf16.msra.mxu1 %v4952_v3  ;;  %5140 = vmatprep.mubr.bf16.mxu1 %v9834_v23 }
 0xf0f   :  { %5114 = vmatprep.subr.bf16.mxu1 %v4962_v9  ;;  %5098 = vmatmul.mubr.bf16.gmra.mrb[88].mxu0 %v10606_v20 }
 0xf10   :  { %5166 = vmatpush1.bf16.msra.mxu0 %v4954_v58  ;;  %5193 = vmatprep.mubr.bf16.mxu0 %v9834_v23 }
 0xf11   :  { %5167 = vmatprep.subr.bf16.mxu0 %v4964_v46 }
 0xf12   :  { %5115 = vmatpush1.bf16.msra.mxu1 %v4961_v51 }
 0xf13   :  { %5116 = vmatprep.subr.bf16.mxu1 %v4971_v27 }
 0xf14   :  { %5168 = vmatpush1.bf16.msra.mxu0 %v4963_v8 }
 0xf15   :  { %5169 = vmatprep.subr.bf16.mxu0 %v4973_v28 }
 0xf16   :  { %5117 = vmatpush1.bf16.msra.mxu1 %v4970_v24 }
 0xf17   :  { %5118 = vmatprep.subr.bf16.mxu1 %v4980_v30 }
 0xf18   :  { %5170 = vmatpush1.bf16.msra.mxu0 %v4972_v13 }
 0xf19   :  { %5171 = vmatprep.subr.bf16.mxu0 %v4982_v17 }
 0xf1a   :  { %5119 = vmatpush1.bf16.msra.mxu1 %v4979_v19 }
 0xf1b   :  { %5120 = vmatprep.subr.bf16.mxu1 %v4989_v5 }
 0xf1c   :  { %5172 = vmatpush1.bf16.msra.mxu0 %v4981_v15 }
 0xf1d   :  { %5173 = vmatprep.subr.bf16.mxu0 %v4991_v16 }
 0xf1e   :  { %5121 = vmatpush1.bf16.msra.mxu1 %v4988_v37 }
 0xf1f   :  { %5122 = vmatprep.subr.bf16.mxu1 %v4998_v38 }
 0xf20   :  { %5174 = vmatpush1.bf16.msra.mxu0 %v4990_v33 }
 0xf21   :  { %5175 = vmatprep.subr.bf16.mxu0 %v5000_v39 }
 0xf22   :  { %5123 = vmatpush1.bf16.msra.mxu1 %v4997_v44 }
 0xf23   :  { %8796 = vmatprep.subr.bf16.mxu1 %v4938_v41 }
 0xf24   :  { %5176 = vmatpush1.bf16.msra.mxu0 %v4999_v42 }
 0xf25   :  { %5141 = vmatmul.mubr.bf16.vlgmr.msra.gmra.mrb[88].mxu1 %v10598_v45 }
 0xf26   :  { %8797 = vmatpush3.bf16.msra.mxu1 %v4938_v41  ;;  %5150 = vmatprep.mubr.bf16.mxu1 %v9834_v23 }
 0xf27   :  { %8798 = vmatprep.subr.bf16.mxu1 %v4947_v43  ;;  %5194 = vmatmul.mubr.bf16.vlgmr.msra.gmra.mrb[92].mxu0 %v10598_v45 }
 0xf28   :  { %5203 = vmatprep.mubr.bf16.mxu0 %v9834_v23  ;;  %v5001_v23 = vld [vmem:[#allocation6 + $0x238] sm:$0xff] }
 0xf2a   :  { %8799 = vmatpush3.bf16.msra.mxu1 %v4947_v43 }
 0xf2b   :  { %8800 = vmatprep.subr.bf16.mxu1 %v4956_v47 }
 0xf2d   :  { %5151 = vmatmul.mubr.bf16.gmra.mrb[92].mxu1 %v10606_v20 }
 0xf2e   :  { %8801 = vmatpush3.bf16.msra.mxu1 %v4956_v47  ;;  %8812 = vmatprep.mubr.bf16.mxu1 %v10598_v45 }
 0xf2f   :  { %8802 = vmatprep.subr.bf16.mxu1 %v4965_v6  ;;  %5204 = vmatmul.mubr.bf16.gmra.mrb[96].mxu0 %v10606_v20 }
 0xf30   :  { %5423 = vmatprep.mubr.f32.mxu0 %v5264_v49  ;;  %v4903_v49 = vld [vmem:[%s11302_s11 + $0x20] ss:$12 sps:$4 sm:$0xff]  }
 0xf32   :  { %8803 = vmatpush3.bf16.msra.mxu1 %v4965_v6  ;;  %v4900_v6 = vld [vmem:[%s11302_s11 + $0xc] sm:$0xff] }
 0xf33   :  { %8804 = vmatprep.subr.bf16.mxu1 %v4974_v11 }
 0xf36   :  { %8805 = vmatpush3.bf16.msra.mxu1 %v4974_v11 }
 0xf37   :  { %8806 = vmatprep.subr.bf16.mxu1 %v4983_v35 }
 0xf3a   :  { %8807 = vmatpush3.bf16.msra.mxu1 %v4983_v35  ;;  %v5263_v35 = vunpack.c.l.bf16 %v10623_v22  ;;  %v5271_v22 = vunpack.c.l.bf16 %v4903_v49 }
 0xf3b   :  { %8808 = vmatprep.subr.bf16.mxu1 %v4992_v26 }
 0xf3e   :  { %8809 = vmatpush3.bf16.msra.mxu1 %v4992_v26  ;;  %v5267_v26 = vunpack.c.h.bf16 %v4900_v6 }
 0xf3f   :  { %8810 = vmatprep.subr.bf16.mxu1 %v5001_v23 }
 0xf42   :  { %8811 = vmatpush3.bf16.msra.mxu1 %v5001_v23  ;;  %v4902_v23 = vld [vmem:[%s11302_s11 + $0x18] sm:$0xff] }
 0xf45   :  { %8813 = vmatmul.mubr.bf16.vlgmr.msra.gmra.mrb[96].mxu1 %v10606_v20 }
 0xf46   :  { %8824 = vmatprep.mubr.msk.f32.mxu1 %vm1998_vm5, %v5265_v40  ;;  %v5266_v40 = vunpack.c.l.bf16 %v4900_v6  ;;  %v4926_v6 = vld [vmem:[%s11302_s11 + $0xa8] sm:$0xff] }
 0xfd8   :  { %v5036_v25 = vpop.f32.mrb[80].mxu1 }
 0xfd9   :  { %v5038_v50 = vpop.f32.mrb[81].mxu1 }
 0xfda   :  { %v5040_v52 = vpop.f32.mrb[82].mxu1  ;;  %v5089_v36 = vpop.f32.mrb[84].mxu0 }
 0xfdb   :  { %v9058_v55 = vpack.c.bf16 %v5040_v52, %v5036_v25  ;;  %v5042_v54 = vpop.f32.mrb[83].mxu1  ;;  %v5091_v32 = vpop.f32.mrb[85].mxu0  ;;  %v5268_v25 = vunpack.c.h.bf16 %v10629_v14  ;;  %v4904_v52 = vld [vmem:[%s11302_s11 + $0x24] sm:$0xff]  ;;  %v4906_v14 = vld [vmem:[%s11302_s11 + $0x30] sm:$0xff] }
 0xfdc   :  { %v9066_v60 = vpack.c.bf16 %v5042_v54, %v5038_v50  ;;  %v5093_v31 = vpop.f32.mrb[86].mxu0  ;;  %v5270_v50 = vunpack.c.h.bf16 %v4902_v23  ;;  %v5274_v54 = vunpack.c.h.bf16 %v4903_v49 }
 0xfdd   :  { %v9074_v56 = vpack.c.bf16 %v5093_v31, %v5089_v36  ;;  %v5095_v53 = vpop.f32.mrb[87].mxu0  ;;  %v4907_v36 = vld [vmem:[%s11302_s11 + $0x38] ss:$12 sps:$4 sm:$0xff]   ;;  %v4911_v31 = vld [vmem:[%s11302_s11 + $0x50] ss:$12 sps:$4 sm:$0xff]  }
 0xfde   :  { %v9082_v57 = vpack.c.bf16 %v5095_v53, %v5091_v32  ;;  %v5273_v32 = vunpack.c.h.bf16 %v4904_v52  ;;  %v5276_v53 = vunpack.c.h.bf16 %v4906_v14 }
 0xfe0   :  { %v5046_v63 = vpop.f32.mrb[84].mxu1 }
 0xfe1   :  { %v5048_v0 = vpop.f32.mrb[85].mxu1 }
 0xfe2   :  { %v5050_v4 = vpop.f32.mrb[86].mxu1  ;;  %v5099_v1 = vpop.f32.mrb[88].mxu0 }
 0xfe3   :  { %v9062_v45 = vpack.c.bf16 %v5050_v4, %v5046_v63  ;;  %v5052_v7 = vpop.f32.mrb[87].mxu1  ;;  %v5101_v10 = vpop.f32.mrb[89].mxu0  ;;  %v4908_v63 = vld [vmem:[%s11302_s11 + $0x3c] sm:$0xff]  ;;  %v4915_v4 = vld [vmem:[%s11302_s11 + $0x68] ss:$12 sps:$4 sm:$0xff]  }
 0xfe4   :  { %v9070_v34 = vpack.c.bf16 %v5052_v7, %v5048_v0  ;;  %v5103_v2 = vpop.f32.mrb[90].mxu0  ;;  %v5283_v0 = vunpack.c.l.bf16 %v4911_v31  ;;  %v5286_v7 = vunpack.c.h.bf16 %v4911_v31 }
 0xfe5   :  { %v9078_v12 = vpack.c.bf16 %v5103_v2, %v5099_v1  ;;  %v5105_v29 = vpop.f32.mrb[91].mxu0  ;;  %v5275_v1 = vunpack.c.l.bf16 %v4906_v14  ;;  %v4919_v2 = vld [vmem:[%s11302_s11 + $0x80] ss:$12 sps:$4 sm:$0xff]  }
 0xfe6   :  { %v9086_v48 = vpack.c.bf16 %v5105_v29, %v5101_v10  ;;  %v4910_v10 = vld [vmem:[%s11302_s11 + $0x48] sm:$0xff] }
 0xfe7   :  { %v5282_v29 = vunpack.c.h.bf16 %v4910_v10 }
 0xff8   :  { %v5142_v18 = vpop.f32.mrb[88].mxu1 }
 0xff9   :  { %v5144_v62 = vpop.f32.mrb[89].mxu1 }
 0xffa   :  { %v5146_v20 = vpop.f32.mrb[90].mxu1  ;;  %v5195_v21 = vpop.f32.mrb[92].mxu0 }
 0xffb   :  { %v9056_v3 = vpack.c.bf16 %v5146_v20, %v5142_v18  ;;  %v5148_v9 = vpop.f32.mrb[91].mxu1  ;;  %v5197_v58 = vpop.f32.mrb[93].mxu0  ;;  %v4912_v18 = vld [vmem:[%s11302_s11 + $0x54] sm:$0xff] }
 0xffc   :  { %v9064_v46 = vpack.c.bf16 %v5148_v9, %v5144_v62  ;;  %v5199_v51 = vpop.f32.mrb[94].mxu0  ;;  %v5295_v62 = vunpack.c.l.bf16 %v4919_v2  ;;  %v4923_v20 = vld [vmem:[%s11302_s11 + $0x98] ss:$12 sps:$4 sm:$0xff]   ;;  %v5298_v9 = vunpack.c.h.bf16 %v4919_v2 }
 0xffd   :  { %9057 = vmatprep.subr.bf16.mxu0 %v9056_v3  ;;  %v9072_v27 = vpack.c.bf16 %v5199_v51, %v5195_v21  ;;  %v5201_v8 = vpop.f32.mrb[95].mxu0  ;;  %v5281_v21 = vunpack.c.l.bf16 %v4910_v10  ;;  %v5285_v3 = vunpack.c.h.bf16 %v4912_v18  ;;  %v4927_v51 = vld [vmem:[%s11302_s11 + $0xb0] ss:$12 sps:$4 sm:$0xff]  }
 0xffe   :  { %9059 = vmatpush3.bf16.msra.mxu0 %v9058_v55  ;;  %v9080_v28 = vpack.c.bf16 %v5201_v8, %v5197_v58  ;;  %v5269_v55 = vunpack.c.l.bf16 %v4902_v23  ;;  %v4914_v58 = vld [vmem:[%s11302_s11 + $0x60] sm:$0xff]  ;;  %v5305_v23 = vunpack.c.l.bf16 %v4926_v6 }
 0xfff   :  { %v5288_v8 = vunpack.c.h.bf16 %v4914_v58 }
0x1000   :  { %v5152_v24 = vpop.f32.mrb[92].mxu1 }
0x1001   :  { %v5154_v30 = vpop.f32.mrb[93].mxu1 }
0x1002   :  { %v5156_v13 = vpop.f32.mrb[94].mxu1  ;;  %v5205_v17 = vpop.f32.mrb[96].mxu0 }
0x1003   :  { %v9060_v19 = vpack.c.bf16 %v5156_v13, %v5152_v24  ;;  %v5158_v5 = vpop.f32.mrb[95].mxu1  ;;  %v5207_v15 = vpop.f32.mrb[97].mxu0  ;;  %v4916_v24 = vld [vmem:[%s11302_s11 + $0x6c] sm:$0xff]  ;;  %v5287_v13 = vunpack.c.l.bf16 %v4914_v58 }
0x1004   :  { %v9068_v16 = vpack.c.bf16 %v5158_v5, %v5154_v30  ;;  %v5209_v37 = vpop.f32.mrb[98].mxu0  ;;  %v5307_v30 = vunpack.c.l.bf16 %v4927_v51  ;;  %v4918_v5 = vld [vmem:[%s11302_s11 + $0x78] sm:$0xff] }
0x1005   :  { %9061 = vmatprep.subr.bf16.mxu0 %v9060_v19  ;;  %v9076_v38 = vpack.c.bf16 %v5209_v37, %v5205_v17  ;;  %v5211_v33 = vpop.f32.mrb[99].mxu0  ;;  %v5291_v17 = vunpack.c.h.bf16 %v4916_v24  ;;  %v5310_v19 = vunpack.c.h.bf16 %v4927_v51  ;;  %v4920_v37 = vld [vmem:[%s11302_s11 + $0x84] sm:$0xff] }
0x1006   :  { %9063 = vmatpush3.bf16.msra.mxu0 %v9062_v45  ;;  %v9084_v39 = vpack.c.bf16 %v5211_v33, %v5207_v15  ;;  %v5279_v45 = vunpack.c.h.bf16 %v4908_v63  ;;  %v5290_v15 = vunpack.c.l.bf16 %v4916_v24  ;;  %v5297_v33 = vunpack.c.h.bf16 %v4920_v37 }
0x1007   :  { %9065 = vmatprep.subr.bf16.mxu0 %v9064_v46  ;;  %v5301_v46 = vunpack.c.l.bf16 %v4923_v20 }
0x100a   :  { %9067 = vmatpush3.bf16.msra.mxu0 %v9066_v60  ;;  %v5277_v60 = vunpack.c.l.bf16 %v4907_v36 }
0x100b   :  { %9069 = vmatprep.subr.bf16.mxu0 %v9068_v16  ;;  %v5294_v16 = vunpack.c.h.bf16 %v4918_v5 }
0x100e   :  { %9071 = vmatpush3.bf16.msra.mxu0 %v9070_v34  ;;  %v5289_v34 = vunpack.c.l.bf16 %v4915_v4 }
0x100f   :  { %9073 = vmatprep.subr.bf16.mxu0 %v9072_v27  ;;  %v5284_v27 = vunpack.c.l.bf16 %v4912_v18 }
0x1012   :  { %9075 = vmatpush3.bf16.msra.mxu0 %v9074_v56  ;;  %v5272_v56 = vunpack.c.l.bf16 %v4904_v52 }
0x1013   :  { %9077 = vmatprep.subr.bf16.mxu0 %v9076_v38  ;;  %v5293_v38 = vunpack.c.l.bf16 %v4918_v5 }
0x1016   :  { %9079 = vmatpush3.bf16.msra.mxu0 %v9078_v12  ;;  %v5278_v12 = vunpack.c.l.bf16 %v4908_v63 }
0x1017   :  { %9081 = vmatprep.subr.bf16.mxu0 %v9080_v28  ;;  %v5304_v28 = vunpack.c.h.bf16 %v4923_v20 }
0x1018   :  { %v8814_v44 = vpop.f32.mrb[96].mxu1 }
0x1019   :  { %v5248_v41 = vpop.f32.mrb[97].mxu1 }
0x101a   :  { %v8815_v42 = vpop.f32.mrb[98].mxu1  ;;  %9083 = vmatpush3.bf16.msra.mxu0 %v9082_v57  ;;  %v5280_v57 = vunpack.c.h.bf16 %v4907_v36 }
0x101b   :  { %v9092_v43 = vpack.c.bf16 %v8815_v42, %v8814_v44  ;;  %v5251_v47 = vpop.f32.mrb[99].mxu1  ;;  %9085 = vmatprep.subr.bf16.mxu0 %v9084_v39  ;;  %v4922_v39 = vld [vmem:[%s11302_s11 + $0x90] sm:$0xff]  ;;  %v5296_v44 = vunpack.c.l.bf16 %v4920_v37  ;;  %v4924_v42 = vld [vmem:[%s11302_s11 + $0x9c] sm:$0xff] }
0x101c   :  { %v9088_v11 = vpack.c.bf16 %v5251_v47, %v5248_v41  ;;  %v5300_v41 = vunpack.c.h.bf16 %v4922_v39  ;;  %v5303_v47 = vunpack.c.h.bf16 %v4924_v42 }
0x101e   :  { %9087 = vmatpush3.bf16.msra.mxu0 %v9086_v48  ;;  %9089 = vmatprep.subr.bf16.mxu1 %v9088_v11  ;;  %v5292_v48 = vunpack.c.h.bf16 %v4915_v4 }
0x101f   :  { %9091 = vmatpush3.bf16.msra.mxu1 %v9088_v11  ;;  %v5302_v11 = vunpack.c.l.bf16 %v4924_v42 }
0x1020   :  { %9093 = vmatprep.subr.bf16.mxu1 %v9092_v43 }
0x1021   :  { %5424 = vmatmul.mubr.f32.vlgmr.msra.gmra.mrb[100].mxu0 %v5263_v35  ;;  %v5306_v35 = vunpack.c.h.bf16 %v4926_v6 }
0x1022   :  { %5428 = vmatprep.mubr.f32.mxu0 %v5267_v26  ;;  %v4928_v26 = vld [vmem:[%s11302_s11 + $0xb4] sm:$0xff] }
0x1023   :  { %9095 = vmatpush3.bf16.msra.mxu1 %v9092_v43  ;;  %v5299_v43 = vunpack.c.l.bf16 %v4922_v39  ;;  %v5309_v49 = vunpack.c.h.bf16 %v4928_v26 }
0x1025   :  { %5429 = vmatmul.mubr.f32.gmra.mrb[102].mxu0 %v5266_v40  ;;  %v5308_v40 = vunpack.c.l.bf16 %v4928_v26 }
0x1026   :  { %8825 = vmatmul.mubr.msk.f32.vlgmr.msra.gmra.mrb[100].mxu1 %vm1998_vm5, %v5268_v25  ;;  %5433 = vmatprep.mubr.f32.mxu0 %v5270_v50 }
0x1027   :  { %8827 = vmatprep.mubr.msk.f32.mxu1 %vm1998_vm5, %v5271_v22 }
0x1029   :  { %5434 = vmatmul.mubr.f32.gmra.mrb[104].mxu0 %v5269_v55 }
0x102a   :  { %8828 = vmatmul.mubr.msk.f32.gmra.mrb[102].mxu1 %vm1998_vm5, %v5274_v54  ;;  %5438 = vmatprep.mubr.f32.mxu0 %v5273_v32 }
0x102b   :  { %8830 = vmatprep.mubr.msk.f32.mxu1 %vm1998_vm5, %v5277_v60 }
0x102d   :  { %5439 = vmatmul.mubr.f32.gmra.mrb[106].mxu0 %v5272_v56 }
0x102e   :  { %5443 = vmatprep.mubr.f32.mxu0 %v5276_v53  ;;  %8831 = vmatmul.mubr.msk.f32.gmra.mrb[104].mxu1 %vm1998_vm5, %v5280_v57 }
0x102f   :  { %8833 = vmatprep.mubr.msk.f32.mxu1 %vm1998_vm5, %v5283_v0 }
0x1031   :  { %5444 = vmatmul.mubr.f32.gmra.mrb[108].mxu0 %v5275_v1 }
0x1032   :  { %5448 = vmatprep.mubr.f32.mxu0 %v5279_v45  ;;  %8834 = vmatmul.mubr.msk.f32.gmra.mrb[106].mxu1 %vm1998_vm5, %v5286_v7 }
0x1033   :  { %8836 = vmatprep.mubr.msk.f32.mxu1 %vm1998_vm5, %v5289_v34 }
0x1035   :  { %5449 = vmatmul.mubr.f32.gmra.mrb[110].mxu0 %v5278_v12 }
0x1036   :  { %5453 = vmatprep.mubr.f32.mxu0 %v5282_v29  ;;  %8837 = vmatmul.mubr.msk.f32.gmra.mrb[108].mxu1 %vm1998_vm5, %v5292_v48 }
0x1037   :  { %8839 = vmatprep.mubr.msk.f32.mxu1 %vm1998_vm5, %v5295_v62 }
0x1039   :  { %5454 = vmatmul.mubr.f32.gmra.mrb[112].mxu0 %v5281_v21 }
0x103a   :  { %5458 = vmatprep.mubr.f32.mxu0 %v5285_v3  ;;  %8840 = vmatmul.mubr.msk.f32.gmra.mrb[110].mxu1 %vm1998_vm5, %v5298_v9 }
0x103b   :  { %8842 = vmatprep.mubr.msk.f32.mxu1 %vm1998_vm5, %v5301_v46 }
0x103d   :  { %5459 = vmatmul.mubr.f32.gmra.mrb[114].mxu0 %v5284_v27 }
0x103e   :  { %5463 = vmatprep.mubr.f32.mxu0 %v5288_v8  ;;  %8843 = vmatmul.mubr.msk.f32.gmra.mrb[112].mxu1 %vm1998_vm5, %v5304_v28 }
0x103f   :  { %8845 = vmatprep.mubr.msk.f32.mxu1 %vm1998_vm5, %v5307_v30 }
0x1041   :  { %5464 = vmatmul.mubr.f32.gmra.mrb[116].mxu0 %v5287_v13 }
0x1042   :  { %5468 = vmatprep.mubr.f32.mxu0 %v5291_v17  ;;  %8846 = vmatmul.mubr.msk.f32.gmra.mrb[114].mxu1 %vm1998_vm5, %v5310_v19 }
0x1045   :  { %5469 = vmatmul.mubr.f32.gmra.mrb[118].mxu0 %v5290_v15 }
0x1046   :  { %5473 = vmatprep.mubr.f32.mxu0 %v5294_v16 }
0x1049   :  { %5474 = vmatmul.mubr.f32.gmra.mrb[120].mxu0 %v5293_v38 }
0x104a   :  { %5478 = vmatprep.mubr.f32.mxu0 %v5297_v33 }
0x104d   :  { %5479 = vmatmul.mubr.f32.gmra.mrb[122].mxu0 %v5296_v44 }
0x104e   :  { %5483 = vmatprep.mubr.f32.mxu0 %v5300_v41 }
0x1051   :  { %5484 = vmatmul.mubr.f32.gmra.mrb[124].mxu0 %v5299_v43 }
0x1052   :  { %5488 = vmatprep.mubr.f32.mxu0 %v5303_v47 }
0x1055   :  { %5489 = vmatmul.mubr.f32.gmra.mrb[126].mxu0 %v5302_v11 }
0x1056   :  { %5493 = vmatprep.mubr.f32.mxu0 %v5306_v35 }
0x1059   :  { %5494 = vmatmul.mubr.f32.gmra.mrb[128].mxu0 %v5305_v23 }
0x105a   :  { %5498 = vmatprep.mubr.f32.mxu0 %v5309_v49 }
0x105d   :  { %5499 = vmatmul.mubr.f32.gmra.mrb[130].mxu0 %v5308_v40 }
0x10f4   :  { %v8256_v25 = vpop.f32.mrb[100].mxu0 }
0x10f5   :  { %v8257_v50 = vpop.f32.mrb[101].mxu0 }
0x10f6   :  { %v8258_v22 = vadd.f32 %v8257_v50, %v8256_v25 }
0x10f8   :  { %v8259_v52 = vpop.f32.mrb[102].mxu0 }
0x10f9   :  { %v8260_v36 = vpop.f32.mrb[103].mxu0  ;;  %v8826_v55 = vpop.f32.mrb[100].mxu1 }
0x10fa   :  { %v8261_v54 = vadd.f32 %v8260_v36, %v8259_v52  ;;  %v5570_v32 = vpop.f32.mrb[101].mxu1 }
0x10fb   :  { %v10716_v14 = vadd.f32 %v8258_v22, %v5570_v32 }
0x10fc   :  { %v10718_v60 = vadd.f32 %v8826_v55, %v8261_v54  ;;  %v8262_v31 = vpop.f32.mrb[104].mxu0 }
0x10fd   :  { %v8263_v56 = vpop.f32.mrb[105].mxu0  ;;  %v8829_v53 = vpop.f32.mrb[102].mxu1 }
0x10fe   :  { %v5650_v57 = vadd.f32 %v10718_v60, %v10716_v14  ;;  %v8264_v63 = vadd.f32 %v8263_v56, %v8262_v31  ;;  %v5580_v0 = vpop.f32.mrb[103].mxu1 }
0x1100   :  { %v10722_v4 = vadd.f32 %v8264_v63, %v5580_v0  ;;  %v8265_v1 = vpop.f32.mrb[106].mxu0 }
0x1101   :  { %v8266_v45 = vpop.f32.mrb[107].mxu0  ;;  %v8832_v7 = vpop.f32.mrb[104].mxu1 }
0x1102   :  { %v5651_v10 = vadd.f32 %v5650_v57, %v10722_v4  ;;  %v8267_v34 = vadd.f32 %v8266_v45, %v8265_v1  ;;  %v5590_v2 = vpop.f32.mrb[105].mxu1 }
0x1104   :  { %v10725_v12 = vadd.f32 %v8829_v53, %v8267_v34  ;;  %v8268_v29 = vpop.f32.mrb[108].mxu0 }
0x1105   :  { %v8269_v48 = vpop.f32.mrb[109].mxu0  ;;  %v8835_v18 = vpop.f32.mrb[106].mxu1 }
0x1106   :  { %v8270_v62 = vadd.f32 %v8269_v48, %v8268_v29  ;;  %v5652_v20 = vadd.f32 %v5651_v10, %v10725_v12  ;;  %v5600_v21 = vpop.f32.mrb[107].mxu1 }
0x1108   :  { %v10728_v3 = vadd.f32 %v8270_v62, %v5590_v2  ;;  %v8271_v9 = vpop.f32.mrb[110].mxu0 }
0x1109   :  { %v8272_v58 = vpop.f32.mrb[111].mxu0  ;;  %v8838_v46 = vpop.f32.mrb[108].mxu1 }
0x110a   :  { %v5653_v51 = vadd.f32 %v5652_v20, %v10728_v3  ;;  %v8273_v27 = vadd.f32 %v8272_v58, %v8271_v9  ;;  %v5610_v8 = vpop.f32.mrb[109].mxu1 }
0x110c   :  { %v10731_v28 = vadd.f32 %v8832_v7, %v8273_v27  ;;  %v8274_v24 = vpop.f32.mrb[112].mxu0 }
0x110d   :  { %v8275_v30 = vpop.f32.mrb[113].mxu0  ;;  %v8841_v13 = vpop.f32.mrb[110].mxu1 }
0x110e   :  { %v8276_v17 = vadd.f32 %v8275_v30, %v8274_v24  ;;  %v5654_v19 = vadd.f32 %v5653_v51, %v10731_v28  ;;  %v5620_v5 = vpop.f32.mrb[111].mxu1 }
0x1110   :  { %v10734_v15 = vadd.f32 %v8276_v17, %v5600_v21  ;;  %v8277_v16 = vpop.f32.mrb[114].mxu0 }
0x1111   :  { %v8278_v37 = vpop.f32.mrb[115].mxu0  ;;  %v8844_v38 = vpop.f32.mrb[112].mxu1 }
0x1112   :  { %v5655_v33 = vadd.f32 %v5654_v19, %v10734_v15  ;;  %v8279_v39 = vadd.f32 %v8278_v37, %v8277_v16  ;;  %v5630_v44 = vpop.f32.mrb[113].mxu1 }
0x1114   :  { %v5606_v41 = vadd.f32 %v8835_v18, %v8279_v39  ;;  %v8280_v42 = vpop.f32.mrb[116].mxu0 }
0x1115   :  { %v8281_v43 = vpop.f32.mrb[117].mxu0  ;;  %v8847_v47 = vpop.f32.mrb[114].mxu1 }
0x1116   :  { %v8282_v6 = vadd.f32 %v8281_v43, %v8280_v42  ;;  %v5656_v11 = vadd.f32 %v5655_v33, %v5606_v41  ;;  %v5640_v35 = vpop.f32.mrb[115].mxu1 }
0x1118   :  { %v5611_v26 = vadd.f32 %v8282_v6, %v5610_v8  ;;  %v8283_v23 = vpop.f32.mrb[118].mxu0 }
0x1119   :  { %v8284_v49 = vpop.f32.mrb[119].mxu0 }
0x111a   :  { %v5657_v40 = vadd.f32 %v5656_v11, %v5611_v26  ;;  %v8285_v25 = vadd.f32 %v8284_v49, %v8283_v23 }
0x111c   :  { %v5616_v50 = vadd.f32 %v8838_v46, %v8285_v25  ;;  %v8286_v22 = vpop.f32.mrb[120].mxu0 }
0x111d   :  { %v8287_v52 = vpop.f32.mrb[121].mxu0 }
0x111e   :  { %v8288_v36 = vadd.f32 %v8287_v52, %v8286_v22  ;;  %v5658_v55 = vadd.f32 %v5657_v40, %v5616_v50 }
0x1120   :  { %v5621_v54 = vadd.f32 %v8288_v36, %v5620_v5  ;;  %v8289_v32 = vpop.f32.mrb[122].mxu0 }
0x1121   :  { %v8290_v31 = vpop.f32.mrb[123].mxu0 }
0x1122   :  { %v5659_v56 = vadd.f32 %v5658_v55, %v5621_v54  ;;  %v8291_v53 = vadd.f32 %v8290_v31, %v8289_v32 }
0x1124   :  { %v5626_v57 = vadd.f32 %v8841_v13, %v8291_v53  ;;  %v8292_v63 = vpop.f32.mrb[124].mxu0 }
0x1125   :  { %v8293_v0 = vpop.f32.mrb[125].mxu0 }
0x1126   :  { %v8294_v1 = vadd.f32 %v8293_v0, %v8292_v63  ;;  %v5660_v45 = vadd.f32 %v5659_v56, %v5626_v57 }
0x1128   :  { %v5631_v7 = vadd.f32 %v8294_v1, %v5630_v44  ;;  %v8295_v10 = vpop.f32.mrb[126].mxu0 }
0x1129   :  { %v8296_v34 = vpop.f32.mrb[127].mxu0 }
0x112a   :  { %v5661_v2 = vadd.f32 %v5660_v45, %v5631_v7  ;;  %v8297_v29 = vadd.f32 %v8296_v34, %v8295_v10 }
0x112c   :  { %v5636_v48 = vadd.f32 %v8844_v38, %v8297_v29  ;;  %v8298_v18 = vpop.f32.mrb[128].mxu0 }
0x112d   :  { %v8299_v62 = vpop.f32.mrb[129].mxu0 }
0x112e   :  { %v8300_v20 = vadd.f32 %v8299_v62, %v8298_v18  ;;  %v5662_v21 = vadd.f32 %v5661_v2, %v5636_v48 }
0x1130   :  { %v5641_v9 = vadd.f32 %v8300_v20, %v5640_v35  ;;  %v8301_v58 = vpop.f32.mrb[130].mxu0 }
0x1131   :  { %v8302_v46 = vpop.f32.mrb[131].mxu0 }
0x1132   :  { %v5663_v51 = vadd.f32 %v5662_v21, %v5641_v9  ;;  %v8303_v27 = vadd.f32 %v8302_v46, %v8301_v58 }
0x1134   :  { %v5646_v8 = vadd.f32 %v8847_v47, %v8303_v27 }
0x1136   :  { %v5664_v24 = vadd.f32 %v5663_v51, %v5646_v8 }
0x1138   :  { %v5665_v30 = vrot.slane %v5664_v24, 4 }
0x113a   :  { %v5666_v13 = vadd.f32 %v5665_v30, %v5664_v24  ;;  %v5649_v30 = vld [vmem:[#allocation23] sm:$0x3] }
0x113c   :  { %v5667_v17 = vrot.slane %v5666_v13, 2 }
0x113e   :  { %v5668_v19 = vadd.f32 %v5667_v17, %v5666_v13  ;;  %v5748_v17 = vrot.slane %v5649_v30, %v10233_v59 }
0x1140   :  { %v5669_v5 = vrot.slane %v5668_v19, 1 }
0x1142   :  { %v5670_v16 = vadd.f32 %v5669_v5, %v5668_v19  ;;  %v5768_v19 = vrot.slane %v5649_v30, %v10236_v61 }
0x1144   :  { %v5672_v37 = vmul.f32 0.0078125, %v5670_v16 }
0x1146   :  { %v5673_v38 = vsub.f32 %v10716_v14, %v5672_v37  ;;  %v5674_v33 = vsub.f32 %v10718_v60, %v5672_v37  ;;  %v5675_v39 = vsub.f32 %v10722_v4, %v5672_v37  ;;  %v5676_v44 = vsub.f32 %v10725_v12, %v5672_v37 }
0x1147   :  { %v5677_v42 = vsub.f32 %v10728_v3, %v5672_v37  ;;  %v5678_v43 = vsub.f32 %v10731_v28, %v5672_v37  ;;  %v5679_v47 = vsub.f32 %v10734_v15, %v5672_v37  ;;  %v5680_v6 = vsub.f32 %v5606_v41, %v5672_v37 }
0x1148   :  { %v5681_v11 = vsub.f32 %v5611_v26, %v5672_v37  ;;  %v5682_v35 = vsub.f32 %v5616_v50, %v5672_v37  ;;  %v5683_v23 = vsub.f32 %v5621_v54, %v5672_v37  ;;  %v5684_v49 = vsub.f32 %v5626_v57, %v5672_v37 }
0x1149   :  { %v5685_v40 = vsub.f32 %v5631_v7, %v5672_v37  ;;  %v5686_v25 = vsub.f32 %v5636_v48, %v5672_v37  ;;  %v5687_v14 = vsub.f32 %v5641_v9, %v5672_v37  ;;  %v5688_v22 = vsub.f32 %v5646_v8, %v5672_v37 }
0x114a   :  { %v5689_v60 = vmul.f32 %v5673_v38, %v5673_v38  ;;  %v5690_v52 = vmul.f32 %v5674_v33, %v5674_v33  ;;  %v5691_v4 = vmul.f32 %v5675_v39, %v5675_v39  ;;  %v5692_v12 = vmul.f32 %v5676_v44, %v5676_v44 }
0x114b   :  { %v5693_v3 = vmul.f32 %v5677_v42, %v5677_v42  ;;  %v5694_v28 = vmul.f32 %v5678_v43, %v5678_v43  ;;  %v5695_v15 = vmul.f32 %v5679_v47, %v5679_v47  ;;  %v5696_v26 = vmul.f32 %v5680_v6, %v5680_v6 }
0x114c   :  { %v5705_v36 = vadd.f32 %v5690_v52, %v5689_v60  ;;  %v5697_v54 = vmul.f32 %v5681_v11, %v5681_v11  ;;  %v5698_v53 = vmul.f32 %v5682_v35, %v5682_v35  ;;  %v5699_v63 = vmul.f32 %v5683_v23, %v5683_v23 }
0x114d   :  { %v5700_v1 = vmul.f32 %v5684_v49, %v5684_v49  ;;  %v5701_v7 = vmul.f32 %v5685_v40, %v5685_v40  ;;  %v5702_v34 = vmul.f32 %v5686_v25, %v5686_v25  ;;  %v5703_v29 = vmul.f32 %v5687_v14, %v5687_v14 }
0x114e   :  { %v5706_v55 = vadd.f32 %v5705_v36, %v5691_v4  ;;  %v5704_v18 = vmul.f32 %v5688_v22, %v5688_v22 }
0x1150   :  { %v5707_v32 = vadd.f32 %v5706_v55, %v5692_v12 }
0x1152   :  { %v5708_v31 = vadd.f32 %v5707_v32, %v5693_v3 }
0x1154   :  { %v5709_v41 = vadd.f32 %v5708_v31, %v5694_v28 }
0x1156   :  { %v5710_v50 = vadd.f32 %v5709_v41, %v5695_v15 }
0x1158   :  { %v5711_v56 = vadd.f32 %v5710_v50, %v5696_v26 }
0x115a   :  { %v5712_v57 = vadd.f32 %v5711_v56, %v5697_v54 }
0x115c   :  { %v5713_v0 = vadd.f32 %v5712_v57, %v5698_v53 }
0x115e   :  { %v5714_v45 = vadd.f32 %v5713_v0, %v5699_v63 }
0x1160   :  { %v5715_v10 = vadd.f32 %v5714_v45, %v5700_v1 }
0x1162   :  { %v5716_v2 = vadd.f32 %v5715_v10, %v5701_v7 }
0x1164   :  { %v5717_v48 = vadd.f32 %v5716_v2, %v5702_v34 }
0x1166   :  { %v5718_v62 = vadd.f32 %v5717_v48, %v5703_v29 }
0x1168   :  { %v5719_v20 = vadd.f32 %v5718_v62, %v5704_v18 }
0x116a   :  { %v5720_v21 = vrot.slane %v5719_v20, 4 }
0x116c   :  { %v5721_v9 = vadd.f32 %v5720_v21, %v5719_v20 }
0x116e   :  { %v5722_v58 = vrot.slane %v5721_v9, 2 }
0x1170   :  { %v5723_v46 = vadd.f32 %v5722_v58, %v5721_v9 }
0x1172   :  { %v5724_v51 = vrot.slane %v5723_v46, 1 }
0x1174   :  { %v5725_v27 = vadd.f32 %v5724_v51, %v5723_v46 }
0x1176   :  { %v5726_v8 = vmul.f32 0.0078125, %v5725_v27 }
0x1178   :  { %v5727_v24 = vadd.f32 1e-05, %v5726_v8 }
0x117a   :  { %9351 = vrsqrt.f32 %v5727_v24 }
0x1184   :  { %v9352_v13 = vpop.eup %9351 }
0x1185   :  { %v5729_v5 = vmul.f32 %v9352_v13, %v5673_v38  ;;  %v5730_v16 = vmul.f32 %v9352_v13, %v5674_v33  ;;  %v5731_v37 = vmul.f32 %v9352_v13, %v5675_v39  ;;  %v5732_v60 = vmul.f32 %v9352_v13, %v5676_v44 }
0x1186   :  { %v5733_v52 = vmul.f32 %v9352_v13, %v5677_v42  ;;  %v5734_v4 = vmul.f32 %v9352_v13, %v5678_v43  ;;  %v5735_v36 = vmul.f32 %v9352_v13, %v5679_v47  ;;  %v5736_v12 = vmul.f32 %v9352_v13, %v5680_v6 }
0x1187   :  { %v5737_v55 = vmul.f32 %v9352_v13, %v5681_v11  ;;  %v5738_v3 = vmul.f32 %v9352_v13, %v5682_v35  ;;  %v5739_v32 = vmul.f32 %v9352_v13, %v5683_v23  ;;  %v5740_v28 = vmul.f32 %v9352_v13, %v5684_v49 }
0x1188   :  { %v5741_v31 = vmul.f32 %v9352_v13, %v5685_v40  ;;  %v5742_v15 = vmul.f32 %v9352_v13, %v5686_v25  ;;  %v5743_v41 = vmul.f32 %v9352_v13, %v5687_v14  ;;  %v5744_v26 = vmul.f32 %v9352_v13, %v5688_v22 }
0x1189   :  { %v5749_v50 = vmul.f32 %v5748_v17, %v5729_v5  ;;  %v5750_v59 = vmul.f32 %v5748_v17, %v5730_v16  ;;  %v5751_v54 = vmul.f32 %v5748_v17, %v5731_v37  ;;  %v5752_v61 = vmul.f32 %v5748_v17, %v5732_v60 }
0x118a   :  { %v5753_v38 = vmul.f32 %v5748_v17, %v5733_v52  ;;  %v5754_v33 = vmul.f32 %v5748_v17, %v5734_v4  ;;  %v5755_v39 = vmul.f32 %v5748_v17, %v5735_v36  ;;  %v5756_v44 = vmul.f32 %v5748_v17, %v5736_v12 }
0x118b   :  { %v5757_v42 = vmul.f32 %v5748_v17, %v5737_v55  ;;  %v5758_v43 = vmul.f32 %v5748_v17, %v5738_v3  ;;  %v5759_v47 = vmul.f32 %v5748_v17, %v5739_v32  ;;  %v5760_v6 = vmul.f32 %v5748_v17, %v5740_v28 }
0x118c   :  { %v5761_v11 = vmul.f32 %v5748_v17, %v5741_v31  ;;  %v5762_v35 = vmul.f32 %v5748_v17, %v5742_v15  ;;  %v5763_v23 = vmul.f32 %v5748_v17, %v5743_v41  ;;  %v5764_v49 = vmul.f32 %v5748_v17, %v5744_v26 }
0x118d   :  { %v5769_v40 = vadd.f32 %v5768_v19, %v5749_v50  ;;  %v5770_v25 = vadd.f32 %v5768_v19, %v5750_v59  ;;  %v5771_v14 = vadd.f32 %v5768_v19, %v5751_v54  ;;  %v5772_v22 = vadd.f32 %v5768_v19, %v5752_v61 }
0x118e   :  { %v5773_v56 = vadd.f32 %v5768_v19, %v5753_v38  ;;  %v5774_v53 = vadd.f32 %v5768_v19, %v5754_v33  ;;  %v5775_v57 = vadd.f32 %v5768_v19, %v5755_v39  ;;  %v5776_v63 = vadd.f32 %v5768_v19, %v5756_v44 }
0x118f   :  { %v5777_v0 = vadd.f32 %v5768_v19, %v5757_v42  ;;  %v5778_v1 = vadd.f32 %v5768_v19, %v5758_v43  ;;  %v5779_v45 = vadd.f32 %v5768_v19, %v5759_v47  ;;  %v5780_v7 = vadd.f32 %v5768_v19, %v5760_v6 }
0x1190   :  { %v5781_v10 = vadd.f32 %v5768_v19, %v5761_v11  ;;  %v5782_v34 = vadd.f32 %v5768_v19, %v5762_v35  ;;  %v5783_v2 = vadd.f32 %v5768_v19, %v5763_v23  ;;  %v5784_v29 = vadd.f32 %v5768_v19, %v5764_v49 }
0x1191   :  { %vm5785_vm5 = vcmp.ge.f32.partialorder %v5769_v40, 0.0  ;;  %vm5786_vm7 = vcmp.ge.f32.partialorder %v5770_v25, 0.0  ;;  %vm5787_vm8 = vcmp.ge.f32.partialorder %v5771_v14, 0.0  ;;  %vm5788_vm9 = vcmp.ge.f32.partialorder %v5772_v22, 0.0 }
0x1192   :  { %vm5789_vm10 = vcmp.ge.f32.partialorder %v5773_v56, 0.0  ;;  %vm5790_vm11 = vcmp.ge.f32.partialorder %v5774_v53, 0.0  ;;  %vm5791_vm12 = vcmp.ge.f32.partialorder %v5775_v57, 0.0  ;;  %vm5792_vm13 = vcmp.ge.f32.partialorder %v5776_v63, 0.0 }
0x1193   :  { %vm5793_vm14 = vcmp.ge.f32.partialorder %v5777_v0, 0.0  ;;  %vm5794_vm15 = vcmp.ge.f32.partialorder %v5778_v1, 0.0  ;;  %vm5795_vm0 = vcmp.ge.f32.partialorder %v5779_v45, 0.0  ;;  %vm5796_vm1 = vcmp.ge.f32.partialorder %v5780_v7, 0.0 }
0x1194   :  { %vm5797_vm2 = vcmp.ge.f32.partialorder %v5781_v10, 0.0  ;;  %vm5798_vm3 = vcmp.ge.f32.partialorder %v5782_v34, 0.0  ;;  %vm5799_vm4 = vcmp.ge.f32.partialorder %v5783_v2, 0.0  ;;  %vm5800_vm6 = vcmp.ge.f32.partialorder %v5784_v29, 0.0 }
0x1195   :  { %v5801_v48 = vmul.f32 0.01, %v5769_v40  ;;  %v5802_v18 = vmul.f32 0.01, %v5770_v25  ;;  %v5803_v62 = vmul.f32 0.01, %v5771_v14 }
0x1196   :  { %v5804_v20 = vmul.f32 0.01, %v5772_v22  ;;  %v5805_v21 = vmul.f32 0.01, %v5773_v56  ;;  %v5806_v9 = vmul.f32 0.01, %v5774_v53 }
0x1197   :  { %v5807_v58 = vmul.f32 0.01, %v5775_v57  ;;  %v5808_v46 = vmul.f32 0.01, %v5776_v63  ;;  %v5809_v51 = vmul.f32 0.01, %v5777_v0  ;;  %v5817_v27 = vsel %vm5785_vm5, %v5769_v40, %v5801_v48 }
0x1198   :  { %v5810_v8 = vmul.f32 0.01, %v5778_v1  ;;  %v5811_v24 = vmul.f32 0.01, %v5779_v45  ;;  %v5812_v30 = vmul.f32 0.01, %v5780_v7  ;;  %v5818_v13 = vsel %vm5786_vm7, %v5770_v25, %v5802_v18 }
0x1199   :  { %v5813_v17 = vmul.f32 0.01, %v5781_v10  ;;  %v5814_v19 = vmul.f32 0.01, %v5782_v34  ;;  %v5815_v5 = vmul.f32 0.01, %v5783_v2  ;;  %v5819_v16 = vsel %vm5787_vm8, %v5771_v14, %v5803_v62 }
0x119a   :  { %v5816_v37 = vmul.f32 0.01, %v5784_v29  ;;  %v5820_v60 = vsel %vm5788_vm9, %v5772_v22, %v5804_v20  ;;  %v5821_v52 = vsel %vm5789_vm10, %v5773_v56, %v5805_v21  ;;  %v5822_v4 = vsel %vm5790_vm11, %v5774_v53, %v5806_v9 }
0x119b   :  { %v5823_v36 = vsel %vm5791_vm12, %v5775_v57, %v5807_v58  ;;  %v5824_v12 = vsel %vm5792_vm13, %v5776_v63, %v5808_v46  ;;  %v5825_v55 = vsel %vm5793_vm14, %v5777_v0, %v5809_v51  ;;  %v5826_v3 = vsel %vm5794_vm15, %v5778_v1, %v5810_v8 }
0x119c   :  { %v5827_v32 = vsel %vm5795_vm0, %v5779_v45, %v5811_v24  ;;  %v5828_v28 = vsel %vm5796_vm1, %v5780_v7, %v5812_v30  ;;  %v5829_v31 = vsel %vm5797_vm2, %v5781_v10, %v5813_v17  ;;  %v5830_v15 = vsel %vm5798_vm3, %v5782_v34, %v5814_v19 }
0x119d   :  { %v5831_v41 = vsel %vm5799_vm4, %v5783_v2, %v5815_v5  ;;  %v5832_v26 = vsel %vm5800_vm6, %v5784_v29, %v5816_v37  ;;  %v5836_v50 = vpack.c.bf16 %v5818_v13, %v5817_v27  ;;  %v5837_v59 = vpack.c.bf16 %v5820_v60, %v5819_v16 }
0x119e   :  { %9787 = dma.done.wait [#allocation8 + $0x5], 9216 }
0x119f   :  { %9788 = vsyncadd [#allocation8 + $0x5], 4294958080  ;;  %8848 = vmatprep.subr.bf16.mxu1 %v5836_v50  ;;  %v5838_v54 = vpack.c.bf16 %v5822_v4, %v5821_v52  ;;  %v9353_v61 = vld [vmem:[#allocation24] sm:$0xff]   ;;  %v5839_v38 = vpack.c.bf16 %v5824_v12, %v5823_v36  ;;  %v5840_v33 = vpack.c.bf16 %v5826_v3, %v5825_v55  ;;  %v5841_v39 = vpack.c.bf16 %v5828_v28, %v5827_v32  ;;  %v9354_v43 = vld [vmem:[#allocation24 + $0x8] sm:$0xff]   ;;  %s9835_s11 = smov [#allocation27]   ;;  %s9836_s5 = smov [#allocation28]  }
0x11a0   :  { %8849 = vmatpush3.bf16.msra.mxu1 %v5836_v50  ;;  %8864 = vmatprep.mubr.bf16.mxu1 %v9353_v61  ;;  %v5842_v44 = vpack.c.bf16 %v5830_v15, %v5829_v31  ;;  %v5843_v42 = vpack.c.bf16 %v5832_v26, %v5831_v41  ;;  %v9355_v47 = vld [vmem:[#allocation24 + $0x10] sm:$0xff]   ;;  %v9356_v6 = vld [vmem:[#allocation24 + $0x18] sm:$0xff]   ;;  %v9357_v11 = vld [vmem:[#allocation24 + $0x20] sm:$0xff]   ;;  %s7705_s0 = sshll.u32 %s9835_s11, 4  ;;  %s7715_s19 = sshll.u32 %s9836_s5, 4  ;;  %s7706_s0 = int_to_ptr.vmem [resolvable:$true] %s7705_s0  ;;  %s11148_s19 = int_to_ptr.vmem [resolvable:$true] %s7715_s19 }
0x11a1   :  { %8850 = vmatprep.subr.bf16.mxu1 %v5837_v59  ;;  %v9358_v35 = vld [vmem:[#allocation24 + $0x28] sm:$0xff]   ;;  %v9359_v23 = vld [vmem:[#allocation24 + $0x30] sm:$0xff]   ;;  %v9360_v49 = vld [vmem:[#allocation24 + $0x38] sm:$0xff]   ;;  %s9721_s10 = scalar_lea.vmem %s7706_s0, 32  ;;  %p9726_p13 = scmp.lt.s32.totalorder %s7706_s0, %s7706_s0 }
0x11a2   :  { %v9361_v40 = vld [vmem:[#allocation24 + $0x40] sm:$0xff]   ;;  %v9362_v25 = vld [vmem:[#allocation24 + $0x48] sm:$0xff]   ;;  %v9363_v14 = vld [vmem:[#allocation24 + $0x50] sm:$0xff]   ;;  %p9722_p12 = scmp.ne.s32.totalorder %s7706_s0, %s9721_s10  ;;  %p9727_p0 = scmp.lt.s32.totalorder %s9721_s10, %s9721_s10 }
0x11a3   :  { %v9364_v22 = vld [vmem:[#allocation24 + $0x58] sm:$0xff]   ;;  %v9365_v56 = vld [vmem:[#allocation24 + $0x60] sm:$0xff]   ;;  %v9366_v53 = vld [vmem:[#allocation24 + $0x68] sm:$0xff]  }
0x11a4   :  { %8851 = vmatpush3.bf16.msra.mxu1 %v5837_v59  ;;  %v9367_v57 = vld [vmem:[#allocation24 + $0x70] sm:$0xff]   ;;  %v9368_v63 = vld [vmem:[#allocation24 + $0x78] sm:$0xff]   ;;  %v9369_v0 = vld [vmem:[#allocation24 + $0x80] sm:$0xff]   ;;  %p9728_p1 = por %p9727_p0, %p9726_p13 }
0x11a5   :  { %8852 = vmatprep.subr.bf16.mxu1 %v5838_v54  ;;  %v9370_v1 = vld [vmem:[#allocation24 + $0x88] sm:$0xff]   ;;  %v9371_v45 = vld [vmem:[#allocation24 + $0x90] sm:$0xff]   ;;  %v9372_v7 = vld [vmem:[#allocation24 + $0x98] sm:$0xff]  }
0x11a6   :  { %v9373_v10 = vld [vmem:[#allocation24 + $0xa0] sm:$0xff]   ;;  %v9374_v2 = vld [vmem:[#allocation24 + $0xa8] sm:$0xff]   ;;  %v9375_v29 = vld [vmem:[#allocation24 + $0xb0] sm:$0xff]   ;;  %p9729_p2 = pnand %p9728_p1, %p9722_p12 }
0x11a7   :  { %v10762_v34 = vld [vmem:[#allocation7 + $0x200] sm:$0xff]  ;;  %v9376_v48 = vld [vmem:[#allocation24 + $0xb8] sm:$0xff]   ;;  %v9378_v21 = vld [vmem:[#allocation24 + $0xc8] sm:$0xff]  }
0x11a8   :  { %8853 = vmatpush3.bf16.msra.mxu1 %v5838_v54  ;;  %v9377_v18 = vld [vmem:[#allocation24 + $0xc0] sm:$0xff]   ;;  %v9379_v9 = vld [vmem:[#allocation24 + $0xd0] sm:$0xff]   ;;  %v5997_v58 = vld [vmem:[#allocation7 + $0x48] sm:$0xff] }
0x11a9   :  { %8854 = vmatprep.subr.bf16.mxu1 %v5839_v38  ;;  %v5996_v62 = vld [vmem:[#allocation7 + $0x40] sm:$0xff]  ;;  %v5989_v46 = vld [vmem:[#allocation7 + $0x8] sm:$0xff]  ;;  %v5998_v51 = vld [vmem:[#allocation7 + $0x50] sm:$0xff] }
0x11aa   :  { %v5988_v20 = vld [vmem:[#allocation7] sm:$0xff]  ;;  %8404 = vmatprep.subr.bf16.mxu0 %v5996_v62  ;;  %v5990_v27 = vld [vmem:[#allocation7 + $0x10] sm:$0xff]  ;;  %v9380_v8 = vld [vmem:[#allocation24 + $0xd8] sm:$0xff]  }
0x11ab   :  { %8405 = vmatpush3.bf16.msra.mxu0 %v5988_v20  ;;  %v9381_v24 = vld [vmem:[#allocation24 + $0xe0] sm:$0xff]   ;;  %v5999_v30 = vld [vmem:[#allocation7 + $0x58] sm:$0xff]  ;;  %v9382_v5 = vld [vmem:[#allocation24 + $0xe8] sm:$0xff]  }
0x11ac   :  { %8855 = vmatpush3.bf16.msra.mxu1 %v5839_v38  ;;  %8406 = vmatprep.subr.bf16.mxu0 %v5997_v58  ;;  %v5991_v13 = vld [vmem:[#allocation7 + $0x18] sm:$0xff]  ;;  %v6000_v17 = vld [vmem:[#allocation7 + $0x60] sm:$0xff]  ;;  %v9383_v16 = vld [vmem:[#allocation24 + $0xf0] sm:$0xff]  }
0x11ad   :  { %8856 = vmatprep.subr.bf16.mxu1 %v5840_v33  ;;  %v5992_v19 = vld [vmem:[#allocation7 + $0x20] sm:$0xff]  ;;  %v6001_v37 = vld [vmem:[#allocation7 + $0x68] sm:$0xff]  ;;  %v6002_v4 = vld [vmem:[#allocation7 + $0x70] sm:$0xff] }
0x11ae   :  { %v10766_v60 = vld [vmem:[#allocation7 + $0x208] sm:$0xff]  ;;  %v5994_v36 = vld [vmem:[#allocation7 + $0x30] sm:$0xff]  ;;  %v9384_v12 = vld [vmem:[#allocation24 + $0xf8] sm:$0xff]  }
0x11af   :  { %8407 = vmatpush3.bf16.msra.mxu0 %v5989_v46  ;;  %v5993_v52 = vld [vmem:[#allocation7 + $0x28] sm:$0xff]  ;;  %v9385_v55 = vld [vmem:[#allocation24 + $0x100] sm:$0xff]   ;;  %v6003_v3 = vld [vmem:[#allocation7 + $0x78] sm:$0xff] }
0x11b0   :  { %8857 = vmatpush3.bf16.msra.mxu1 %v5840_v33  ;;  %8408 = vmatprep.subr.bf16.mxu0 %v5998_v51  ;;  %v5995_v32 = vld [vmem:[#allocation7 + $0x38] sm:$0xff]  ;;  %v6012_v28 = vld [vmem:[#allocation7 + $0xc0] sm:$0xff]  ;;  %v9386_v31 = vld [vmem:[#allocation24 + $0x108] sm:$0xff]  }
0x11b1   :  { %8858 = vmatprep.subr.bf16.mxu1 %v5841_v39  ;;  %v9387_v15 = vld [vmem:[#allocation24 + $0x110] sm:$0xff]   ;;  %v9388_v41 = vld [vmem:[#allocation24 + $0x118] sm:$0xff]   ;;  %v9389_v26 = vld [vmem:[#allocation24 + $0x120] sm:$0xff]  }
0x11b2   :  { %v9390_v50 = vld [vmem:[#allocation24 + $0x128] sm:$0xff]   ;;  %v9391_v59 = vld [vmem:[#allocation24 + $0x130] sm:$0xff]   ;;  %v9392_v61 = vld [vmem:[#allocation24 + $0x138] sm:$0xff]  }
0x11b3   :  { %8409 = vmatpush3.bf16.msra.mxu0 %v5990_v27  ;;  %v10770_v54 = vld [vmem:[#allocation7 + $0x210] sm:$0xff]  ;;  %v9393_v38 = vld [vmem:[#allocation24 + $0x140] sm:$0xff]   ;;  %v9394_v33 = vld [vmem:[#allocation24 + $0x148] sm:$0xff]  }
0x11b4   :  { %8859 = vmatpush3.bf16.msra.mxu1 %v5841_v39  ;;  %8410 = vmatprep.subr.bf16.mxu0 %v5999_v30  ;;  %v9395_v39 = vld [vmem:[#allocation24 + $0x150] sm:$0xff]   ;;  %v9412_v51 = vld [vmem:[#allocation24 + $0x1d8] sm:$0xff]  }
0x11b5   :  { %8860 = vmatprep.subr.bf16.mxu1 %v5842_v44  ;;  %v9411_v62 = vld [vmem:[#allocation24 + $0x1d0] sm:$0xff]  }
0x11b7   :  { %8411 = vmatpush3.bf16.msra.mxu0 %v5991_v13 }
0x11b8   :  { %8861 = vmatpush3.bf16.msra.mxu1 %v5842_v44  ;;  %8412 = vmatprep.subr.bf16.mxu0 %v6000_v17  ;;  %v9396_v44 = vld [vmem:[#allocation24 + $0x158] sm:$0xff]  }
0x11b9   :  { %8862 = vmatprep.subr.bf16.mxu1 %v5843_v42 }
0x11bb   :  { %8413 = vmatpush3.bf16.msra.mxu0 %v5992_v19 }
0x11bc   :  { %8863 = vmatpush3.bf16.msra.mxu1 %v5843_v42  ;;  %8414 = vmatprep.subr.bf16.mxu0 %v6001_v37  ;;  %v9397_v42 = vld [vmem:[#allocation24 + $0x160] sm:$0xff]   ;;  %v9415_v37 = vld [vmem:[#allocation24 + $0x1f0] sm:$0xff]  }
0x11bd   :  { %9096 = vmatprep.subr.bf16.mxu1 %v10762_v34 }
0x11bf   :  { %8865 = vmatmul.mubr.bf16.vlgmr.msra.gmra.mrb[116].mxu1 %v9354_v43  ;;  %8415 = vmatpush3.bf16.msra.mxu0 %v5993_v52  ;;  %v9398_v43 = vld [vmem:[#allocation24 + $0x168] sm:$0xff]  }
0x11c0   :  { %8868 = vmatprep.mubr.bf16.mxu1 %v9355_v47  ;;  %9104 = vmatpush3.bf16.msra.mxu1 %v10762_v34  ;;  %v9399_v47 = vld [vmem:[#allocation24 + $0x170] sm:$0xff]  }
0x11c1   :  { %9097 = vmatprep.subr.bf16.mxu1 %v10766_v60  ;;  %8416 = vmatprep.subr.bf16.mxu0 %v6002_v4 }
0x11c3   :  { %8417 = vmatpush3.bf16.msra.mxu0 %v5994_v36 }
0x11c4   :  { %9105 = vmatpush3.bf16.msra.mxu1 %v10766_v60  ;;  %8418 = vmatprep.subr.bf16.mxu0 %v6003_v3  ;;  %v9416_v3 = vld [vmem:[#allocation24 + $0x1f8] sm:$0xff]  }
0x11c5   :  { %9098 = vmatprep.subr.bf16.mxu1 %v10770_v54 }
0x11c7   :  { %8869 = vmatmul.mubr.bf16.gmra.mrb[120].mxu1 %v9356_v6  ;;  %8419 = vmatpush3.bf16.msra.mxu0 %v5995_v32  ;;  %v9400_v6 = vld [vmem:[#allocation24 + $0x178] sm:$0xff]  }
0x11c8   :  { %8872 = vmatprep.mubr.bf16.mxu1 %v9357_v11  ;;  %8468 = vmatprep.subr.bf16.mxu0 %v6012_v28  ;;  %v9401_v11 = vld [vmem:[#allocation24 + $0x180] sm:$0xff]  }
0x11c9   :  { %9106 = vmatpush3.bf16.msra.mxu1 %v10770_v54  ;;  %v9417_v28 = vld [vmem:[#allocation24 + $0x200] sm:$0xff]  }
0x11cf   :  { %8873 = vmatmul.mubr.bf16.gmra.mrb[124].mxu1 %v9358_v35  ;;  %v10774_v35 = vld [vmem:[#allocation7 + $0x218] sm:$0xff] }
0x11d0   :  { %8876 = vmatprep.mubr.bf16.mxu1 %v9359_v23  ;;  %9099 = vmatprep.subr.bf16.mxu1 %v10774_v35  ;;  %v9402_v23 = vld [vmem:[#allocation24 + $0x188] sm:$0xff]  }
0x11d1   :  { %9107 = vmatpush3.bf16.msra.mxu1 %v10774_v35 }
0x11d7   :  { %8877 = vmatmul.mubr.bf16.gmra.mrb[128].mxu1 %v9360_v49  ;;  %v9403_v49 = vld [vmem:[#allocation24 + $0x190] sm:$0xff]  }
0x11d8   :  { %8880 = vmatprep.mubr.bf16.mxu1 %v9361_v40  ;;  %v9404_v40 = vld [vmem:[#allocation24 + $0x198] sm:$0xff]  }
0x11df   :  { %8881 = vmatmul.mubr.bf16.gmra.mrb[132].mxu1 %v9362_v25  ;;  %v9405_v25 = vld [vmem:[#allocation24 + $0x1a0] sm:$0xff]  }
0x11e0   :  { %8884 = vmatprep.mubr.bf16.mxu1 %v9363_v14  ;;  %v9406_v14 = vld [vmem:[#allocation24 + $0x1a8] sm:$0xff]  }
0x11e7   :  { %8885 = vmatmul.mubr.bf16.gmra.mrb[136].mxu1 %v9364_v22  ;;  %v9407_v22 = vld [vmem:[#allocation24 + $0x1b0] sm:$0xff]  }
0x11e8   :  { %8888 = vmatprep.mubr.bf16.mxu1 %v9365_v56 }
0x11ef   :  { %8889 = vmatmul.mubr.bf16.gmra.mrb[140].mxu1 %v9366_v53 }
0x11f0   :  { %8892 = vmatprep.mubr.bf16.mxu1 %v9367_v57  ;;  %v9408_v57 = vld [vmem:[#allocation24 + $0x1b8] sm:$0xff]  }
0x11f7   :  { %8893 = vmatmul.mubr.bf16.gmra.mrb[144].mxu1 %v9368_v63 }
0x11f8   :  { %8896 = vmatprep.mubr.bf16.mxu1 %v9369_v0  ;;  %v9409_v0 = vld [vmem:[#allocation24 + $0x1c0] sm:$0xff]  }
0x11ff   :  { %8897 = vmatmul.mubr.bf16.gmra.mrb[148].mxu1 %v9370_v1 }
0x1200   :  { %8900 = vmatprep.mubr.bf16.mxu1 %v9371_v45 }
0x1207   :  { %8901 = vmatmul.mubr.bf16.gmra.mrb[152].mxu1 %v9372_v7 }
0x1208   :  { %8904 = vmatprep.mubr.bf16.mxu1 %v9373_v10  ;;  %v10784_v10 = vld [vmem:[#allocation7 + $0x220] sm:$0xff] }
0x1209   :  { %9100 = vmatprep.subr.bf16.mxu1 %v10784_v10 }
0x120a   :  { %9108 = vmatpush3.bf16.msra.mxu1 %v10784_v10 }
0x120f   :  { %8905 = vmatmul.mubr.bf16.gmra.mrb[156].mxu1 %v9374_v2 }
0x1210   :  { %8908 = vmatprep.mubr.bf16.mxu1 %v9375_v29 }
0x1217   :  { %8909 = vmatmul.mubr.bf16.gmra.mrb[160].mxu1 %v9376_v48  ;;  %v9410_v48 = vld [vmem:[#allocation24 + $0x1c8] sm:$0xff]  }
0x1218   :  { %8912 = vmatprep.mubr.bf16.mxu1 %v9377_v18 }
0x121f   :  { %8913 = vmatmul.mubr.bf16.gmra.mrb[164].mxu1 %v9378_v21 }
0x1220   :  { %8916 = vmatprep.mubr.bf16.mxu1 %v9379_v9 }
0x1227   :  { %8917 = vmatmul.mubr.bf16.gmra.mrb[168].mxu1 %v9380_v8  ;;  %v9413_v8 = vld [vmem:[#allocation24 + $0x1e0] sm:$0xff]  }
0x1228   :  { %8920 = vmatprep.mubr.bf16.mxu1 %v9381_v24 }
0x122f   :  { %8921 = vmatmul.mubr.bf16.gmra.mrb[172].mxu1 %v9382_v5  ;;  %v9414_v5 = vld [vmem:[#allocation24 + $0x1e8] sm:$0xff]  }
0x1230   :  { %8924 = vmatprep.mubr.bf16.mxu1 %v9383_v16 }
0x1237   :  { %8925 = vmatmul.mubr.bf16.gmra.mrb[176].mxu1 %v9384_v12 }
0x1238   :  { %8928 = vmatprep.mubr.bf16.mxu1 %v9385_v55 }
0x123f   :  { %8929 = vmatmul.mubr.bf16.gmra.mrb[180].mxu1 %v9386_v31 }
0x1240   :  { %8932 = vmatprep.mubr.bf16.mxu1 %v9387_v15 }
0x1247   :  { %8933 = vmatmul.mubr.bf16.gmra.mrb[184].mxu1 %v9388_v41 }
0x1248   :  { %8936 = vmatprep.mubr.bf16.mxu1 %v9389_v26  ;;  %v6004_v26 = vld [vmem:[#allocation7 + $0x80] sm:$0xff] }
0x124f   :  { %8937 = vmatmul.mubr.bf16.gmra.mrb[188].mxu1 %v9390_v50  ;;  %v6013_v50 = vld [vmem:[#allocation7 + $0xc8] sm:$0xff] }
0x1250   :  { %8940 = vmatprep.mubr.bf16.mxu1 %v9391_v59 }
0x1257   :  { %8941 = vmatmul.mubr.bf16.gmra.mrb[192].mxu1 %v9392_v61 }
0x1258   :  { %8944 = vmatprep.mubr.bf16.mxu1 %v9393_v38  ;;  %v9418_v38 = vld [vmem:[#allocation24 + $0x208] sm:$0xff]  }
0x125f   :  { %8945 = vmatmul.mubr.bf16.gmra.mrb[196].mxu1 %v9394_v33  ;;  %v6005_v33 = vld [vmem:[#allocation7 + $0x88] sm:$0xff] }
0x1260   :  { %8948 = vmatprep.mubr.bf16.mxu1 %v9395_v39 }
0x1267   :  { %8949 = vmatmul.mubr.bf16.gmra.mrb[200].mxu1 %v9396_v44  ;;  %v9419_v44 = vld [vmem:[#allocation24 + $0x210] sm:$0xff]  }
0x1268   :  { %8952 = vmatprep.mubr.bf16.mxu1 %v9397_v42  ;;  %v6014_v42 = vld [vmem:[#allocation7 + $0xd0] sm:$0xff] }
0x126f   :  { %8953 = vmatmul.mubr.bf16.gmra.mrb[204].mxu1 %v9398_v43 }
0x1270   :  { %8956 = vmatprep.mubr.bf16.mxu1 %v9399_v47 }
0x1277   :  { %8957 = vmatmul.mubr.bf16.gmra.mrb[208].mxu1 %v9400_v6  ;;  %v10824_v6 = vld [vmem:[#allocation7 + $0x228] sm:$0xff] }
0x1278   :  { %8960 = vmatprep.mubr.bf16.mxu1 %v9401_v11  ;;  %9101 = vmatprep.subr.bf16.mxu1 %v10824_v6 }
0x1279   :  { %9109 = vmatpush3.bf16.msra.mxu1 %v10824_v6 }
0x127f   :  { %8961 = vmatmul.mubr.bf16.gmra.mrb[212].mxu1 %v9402_v23  ;;  %v6006_v23 = vld [vmem:[#allocation7 + $0x90] sm:$0xff] }
0x1280   :  { %8964 = vmatprep.mubr.bf16.mxu1 %v9403_v49  ;;  %v6015_v49 = vld [vmem:[#allocation7 + $0xd8] sm:$0xff] }
0x1287   :  { %8965 = vmatmul.mubr.bf16.gmra.mrb[216].mxu1 %v9404_v40 }
0x1288   :  { %8968 = vmatprep.mubr.bf16.mxu1 %v9405_v25 }
0x128f   :  { %8969 = vmatmul.mubr.bf16.gmra.mrb[220].mxu1 %v9406_v14  ;;  %v9420_v14 = vld [vmem:[#allocation24 + $0x218] sm:$0xff]  }
0x1290   :  { %8972 = vmatprep.mubr.bf16.mxu1 %v9407_v22  ;;  %v6007_v22 = vld [vmem:[#allocation7 + $0x98] sm:$0xff] }
0x1292   :  { %v10778_v56 = vpop.f32.mrb[116].mxu1 }
0x1293   :  { %v6526_v53 = vpop.f32.mrb[117].mxu1 }
0x1294   :  { %v10780_v63 = vpop.f32.mrb[118].mxu1 }
0x1295   :  { %v7110_v1 = vpack.c.bf16 %v10780_v63, %v10778_v56  ;;  %v6529_v45 = vpop.f32.mrb[119].mxu1  ;;  %v6017_v56 = vld [vmem:[#allocation7 + $0xe8] sm:$0xff] }
0x1296   :  { %v7101_v7 = vpack.c.bf16 %v6529_v45, %v6526_v53 }
0x1297   :  { %8973 = vmatmul.mubr.bf16.gmra.mrb[224].mxu1 %v9408_v57  ;;  %v9421_v57 = vld [vmem:[#allocation24 + $0x220] sm:$0xff]  }
0x1298   :  { %8976 = vmatprep.mubr.bf16.mxu1 %v9409_v0  ;;  %v6016_v0 = vld [vmem:[#allocation7 + $0xe0] sm:$0xff] }
0x129a   :  { %v10788_v2 = vpop.f32.mrb[120].mxu1 }
0x129b   :  { %v10790_v29 = vpop.f32.mrb[121].mxu1 }
0x129c   :  { %v10792_v18 = vpop.f32.mrb[122].mxu1 }
0x129d   :  { %v7128_v20 = vpack.c.bf16 %v10792_v18, %v10788_v2  ;;  %v10796_v21 = vpop.f32.mrb[123].mxu1 }
0x129e   :  { %v7119_v9 = vpack.c.bf16 %v10796_v21, %v10790_v29  ;;  %v6019_v29 = vld [vmem:[#allocation7 + $0xf8] sm:$0xff] }
0x129f   :  { %8977 = vmatmul.mubr.bf16.gmra.mrb[228].mxu1 %v9410_v48 }
0x12a0   :  { %8980 = vmatprep.mubr.bf16.mxu1 %v9411_v62  ;;  %v6008_v62 = vld [vmem:[#allocation7 + $0xa0] sm:$0xff] }
0x12a2   :  { %v10800_v58 = vpop.f32.mrb[124].mxu1 }
0x12a3   :  { %v10802_v46 = vpop.f32.mrb[125].mxu1 }
0x12a4   :  { %v10804_v27 = vpop.f32.mrb[126].mxu1 }
0x12a5   :  { %v7146_v24 = vpack.c.bf16 %v10804_v27, %v10800_v58  ;;  %v10808_v30 = vpop.f32.mrb[127].mxu1 }
0x12a6   :  { %v7137_v13 = vpack.c.bf16 %v10808_v30, %v10802_v46 }
0x12a7   :  { %8981 = vmatmul.mubr.bf16.gmra.mrb[232].mxu1 %v9412_v51  ;;  %v9422_v51 = vld [vmem:[#allocation24 + $0x228] sm:$0xff]  }
0x12a8   :  { %8984 = vmatprep.mubr.bf16.mxu1 %v9413_v8  ;;  %v6009_v8 = vld [vmem:[#allocation7 + $0xa8] sm:$0xff] }
0x12aa   :  { %v10812_v17 = vpop.f32.mrb[128].mxu1 }
0x12ab   :  { %v10814_v19 = vpop.f32.mrb[129].mxu1 }
0x12ac   :  { %v10816_v16 = vpop.f32.mrb[130].mxu1 }
0x12ad   :  { %v7164_v52 = vpack.c.bf16 %v10816_v16, %v10812_v17  ;;  %v10820_v4 = vpop.f32.mrb[131].mxu1 }
0x12ae   :  { %v7155_v36 = vpack.c.bf16 %v10820_v4, %v10814_v19 }
0x12af   :  { %8985 = vmatmul.mubr.bf16.gmra.mrb[236].mxu1 %v9414_v5 }
0x12b0   :  { %8988 = vmatprep.mubr.bf16.mxu1 %v9415_v37  ;;  %v9423_v37 = vld [vmem:[#allocation24 + $0x230] sm:$0xff]  }
0x12b2   :  { %v8882_v12 = vpop.f32.mrb[132].mxu1 }
0x12b3   :  { %v6590_v55 = vpop.f32.mrb[133].mxu1 }
0x12b4   :  { %v8883_v32 = vpop.f32.mrb[134].mxu1 }
0x12b5   :  { %v7111_v31 = vpack.c.bf16 %v8883_v32, %v8882_v12  ;;  %v6593_v15 = vpop.f32.mrb[135].mxu1  ;;  %v6018_v12 = vld [vmem:[#allocation7 + $0xf0] sm:$0xff] }
0x12b6   :  { %v7102_v41 = vpack.c.bf16 %v6593_v15, %v6590_v55  ;;  %v6011_v15 = vld [vmem:[#allocation7 + $0xb8] sm:$0xff] }
0x12b7   :  { %8989 = vmatmul.mubr.bf16.gmra.mrb[240].mxu1 %v9416_v3 }
0x12b8   :  { %7212 = vmatprep.mubr.bf16.mxu0 %v7102_v41  ;;  %8992 = vmatprep.mubr.bf16.mxu1 %v9417_v28  ;;  %v6010_v28 = vld [vmem:[#allocation7 + $0xb0] sm:$0xff] }
0x12b9   :  { %7213 = vmatmul.mubr.bf16.vlgmr.msra.gmra.mrb[132].mxu0 %v7101_v7 }
0x12ba   :  { %8469 = vmatpush3.bf16.msra.mxu0 %v6004_v26  ;;  %v8886_v59 = vpop.f32.mrb[136].mxu1  ;;  %7220 = vmatprep.mubr.bf16.mxu0 %v7111_v31  ;;  %v9424_v31 = vld [vmem:[#allocation24 + $0x238] sm:$0xff]   ;;  %v6028_v26 = vld [vmem:[#allocation7 + $0x140] sm:$0xff] }
0x12bb   :  { %v6606_v61 = vpop.f32.mrb[137].mxu1  ;;  %8470 = vmatprep.subr.bf16.mxu0 %v6013_v50 }
0x12bc   :  { %v8887_v39 = vpop.f32.mrb[138].mxu1 }
0x12bd   :  { %v7129_v43 = vpack.c.bf16 %v8887_v39, %v8886_v59  ;;  %v6609_v47 = vpop.f32.mrb[139].mxu1 }
0x12be   :  { %v7120_v11 = vpack.c.bf16 %v6609_v47, %v6606_v61  ;;  %8471 = vmatpush3.bf16.msra.mxu0 %v6005_v33 }
0x12bf   :  { %8993 = vmatmul.mubr.bf16.gmra.mrb[244].mxu1 %v9418_v38  ;;  %8472 = vmatprep.subr.bf16.mxu0 %v6014_v42 }
0x12c0   :  { %8996 = vmatprep.mubr.bf16.mxu1 %v9419_v44  ;;  %v10855_v44 = vld [vmem:[#allocation7 + $0x230] sm:$0xff] }
0x12c1   :  { %7221 = vmatmul.mubr.bf16.gmra.mrb[136].mxu0 %v7110_v1  ;;  %9102 = vmatprep.subr.bf16.mxu1 %v10855_v44 }
0x12c2   :  { %v8890_v40 = vpop.f32.mrb[140].mxu1  ;;  %7228 = vmatprep.mubr.bf16.mxu0 %v7120_v11  ;;  %8473 = vmatpush3.bf16.msra.mxu0 %v6006_v23 }
0x12c3   :  { %v6622_v25 = vpop.f32.mrb[141].mxu1  ;;  %8474 = vmatprep.subr.bf16.mxu0 %v6015_v49  ;;  %9110 = vmatpush3.bf16.msra.mxu1 %v10855_v44 }
0x12c4   :  { %v8891_v53 = vpop.f32.mrb[142].mxu1 }
0x12c5   :  { %v7147_v45 = vpack.c.bf16 %v8891_v53, %v8890_v40  ;;  %v6625_v7 = vpop.f32.mrb[143].mxu1  ;;  %v6029_v53 = vld [vmem:[#allocation7 + $0x148] sm:$0xff] }
0x12c6   :  { %v7138_v48 = vpack.c.bf16 %v6625_v7, %v6622_v25  ;;  %8475 = vmatpush3.bf16.msra.mxu0 %v6007_v22  ;;  %v6020_v22 = vld [vmem:[#allocation7 + $0x100] sm:$0xff] }
0x12c7   :  { %8997 = vmatmul.mubr.bf16.gmra.mrb[248].mxu1 %v9420_v14  ;;  %8476 = vmatprep.subr.bf16.mxu0 %v6016_v0 }
0x12c8   :  { %9000 = vmatprep.mubr.bf16.mxu1 %v9421_v57 }
0x12c9   :  { %7229 = vmatmul.mubr.bf16.gmra.mrb[140].mxu0 %v7119_v9 }
0x12ca   :  { %v8894_v63 = vpop.f32.mrb[144].mxu1  ;;  %7236 = vmatprep.mubr.bf16.mxu0 %v7129_v43  ;;  %8477 = vmatpush3.bf16.msra.mxu0 %v6008_v62  ;;  %v6022_v62 = vld [vmem:[#allocation7 + $0x110] sm:$0xff] }
0x12cb   :  { %v6638_v1 = vpop.f32.mrb[145].mxu1  ;;  %8478 = vmatprep.subr.bf16.mxu0 %v6017_v56  ;;  %v6031_v56 = vld [vmem:[#allocation7 + $0x158] sm:$0xff] }
0x12cc   :  { %v8895_v5 = vpop.f32.mrb[146].mxu1 }
0x12cd   :  { %v7165_v55 = vpack.c.bf16 %v8895_v5, %v8894_v63  ;;  %v6641_v3 = vpop.f32.mrb[147].mxu1  ;;  %v10892_v63 = vld [vmem:[#allocation7 + $0x238] sm:$0xff] }
0x12ce   :  { %v7156_v32 = vpack.c.bf16 %v6641_v3, %v6638_v1  ;;  %8479 = vmatpush3.bf16.msra.mxu0 %v6009_v8  ;;  %v6023_v8 = vld [vmem:[#allocation7 + $0x118] sm:$0xff]  ;;  %9103 = vmatprep.subr.bf16.mxu1 %v10892_v63 }
0x12cf   :  { %9001 = vmatmul.mubr.bf16.gmra.mrb[252].mxu1 %v9422_v51  ;;  %8480 = vmatprep.subr.bf16.mxu0 %v6018_v12 }
0x12d0   :  { %9004 = vmatprep.mubr.bf16.mxu1 %v9423_v37  ;;  %v6032_v37 = vld [vmem:[#allocation7 + $0x160] sm:$0xff]  ;;  %9111 = vmatpush3.bf16.msra.mxu1 %v10892_v63 }
0x12d1   :  { %7237 = vmatmul.mubr.bf16.gmra.mrb[144].mxu0 %v7128_v20 }
0x12d2   :  { %v10837_v21 = vpop.f32.mrb[148].mxu1  ;;  %7244 = vmatprep.mubr.bf16.mxu0 %v7138_v48  ;;  %8481 = vmatpush3.bf16.msra.mxu0 %v6010_v28  ;;  %v6030_v48 = vld [vmem:[#allocation7 + $0x150] sm:$0xff]  ;;  %v6033_v28 = vld [vmem:[#allocation7 + $0x168] sm:$0xff] }
0x12d3   :  { %v6654_v9 = vpop.f32.mrb[149].mxu1  ;;  %8482 = vmatprep.subr.bf16.mxu0 %v6019_v29 }
0x12d4   :  { %v8899_v41 = vpop.f32.mrb[150].mxu1 }
0x12d5   :  { %v7112_v50 = vpack.c.bf16 %v8899_v41, %v10837_v21  ;;  %v6657_v59 = vpop.f32.mrb[151].mxu1 }
0x12d6   :  { %v7103_v61 = vpack.c.bf16 %v6657_v59, %v6654_v9  ;;  %8483 = vmatpush3.bf16.msra.mxu0 %v6011_v15  ;;  %v6025_v9 = vld [vmem:[#allocation7 + $0x128] sm:$0xff]  ;;  %v6034_v15 = vld [vmem:[#allocation7 + $0x170] sm:$0xff] }
0x12d7   :  { %9005 = vmatmul.mubr.bf16.gmra.mrb[0].mxu1 %v9424_v31  ;;  %8532 = vmatprep.subr.bf16.mxu0 %v6028_v26  ;;  %v6026_v59 = vld [vmem:[#allocation7 + $0x130] sm:$0xff] }
0x12d9   :  { %7245 = vmatmul.mubr.bf16.gmra.mrb[148].mxu0 %v7137_v13 }
0x12da   :  { %v10843_v2 = vpop.f32.mrb[152].mxu1  ;;  %7252 = vmatprep.mubr.bf16.mxu0 %v7147_v45  ;;  %v6021_v45 = vld [vmem:[#allocation7 + $0x108] sm:$0xff] }
0x12db   :  { %v10845_v18 = vpop.f32.mrb[153].mxu1 }
0x12dc   :  { %v10847_v20 = vpop.f32.mrb[154].mxu1 }
0x12dd   :  { %v7130_v38 = vpack.c.bf16 %v10847_v20, %v10843_v2  ;;  %v10851_v33 = vpop.f32.mrb[155].mxu1 }
0x12de   :  { %v7121_v39 = vpack.c.bf16 %v10851_v33, %v10845_v18 }
0x12e1   :  { %7253 = vmatmul.mubr.bf16.gmra.mrb[152].mxu0 %v7146_v24 }
0x12e2   :  { %v10862_v46 = vpop.f32.mrb[156].mxu1  ;;  %7260 = vmatprep.mubr.bf16.mxu0 %v7156_v32  ;;  %v6024_v32 = vld [vmem:[#allocation7 + $0x120] sm:$0xff] }
0x12e3   :  { %v10864_v30 = vpop.f32.mrb[157].mxu1 }
0x12e4   :  { %v10866_v13 = vpop.f32.mrb[158].mxu1 }
0x12e5   :  { %v7148_v42 = vpack.c.bf16 %v10866_v13, %v10862_v46  ;;  %v10870_v43 = vpop.f32.mrb[159].mxu1 }
0x12e6   :  { %v7139_v47 = vpack.c.bf16 %v10870_v43, %v10864_v30 }
0x12e9   :  { %7261 = vmatmul.mubr.bf16.gmra.mrb[156].mxu0 %v7155_v36 }
0x12ea   :  { %v10877_v58 = vpop.f32.mrb[160].mxu1  ;;  %7268 = vmatprep.mubr.bf16.mxu0 %v7165_v55 }
0x12eb   :  { %v10879_v27 = vpop.f32.mrb[161].mxu1 }
0x12ec   :  { %v10881_v24 = vpop.f32.mrb[162].mxu1 }
0x12ed   :  { %v7166_v11 = vpack.c.bf16 %v10881_v24, %v10877_v58  ;;  %v10885_v23 = vpop.f32.mrb[163].mxu1 }
0x12ee   :  { %v7157_v49 = vpack.c.bf16 %v10885_v23, %v10879_v27 }
0x12f1   :  { %7269 = vmatmul.mubr.bf16.gmra.mrb[160].mxu0 %v7164_v52 }
0x12f2   :  { %v8914_v19 = vpop.f32.mrb[164].mxu1 }
0x12f3   :  { %v6718_v4 = vpop.f32.mrb[165].mxu1 }
0x12f4   :  { %v8915_v36 = vpop.f32.mrb[166].mxu1 }
0x12f5   :  { %v7113_v40 = vpack.c.bf16 %v8915_v36, %v8914_v19  ;;  %v6721_v25 = vpop.f32.mrb[167].mxu1 }
0x12f6   :  { %v7104_v14 = vpack.c.bf16 %v6721_v25, %v6718_v4  ;;  %v6044_v4 = vld [vmem:[#allocation7 + $0x1c0] sm:$0xff] }
0x12f8   :  { %7309 = vmatprep.mubr.bf16.mxu0 %v7104_v14 }
0x12f9   :  { %7310 = vmatmul.mubr.bf16.vlgmr.msra.gmra.mrb[164].mxu0 %v7103_v61  ;;  %v6035_v61 = vld [vmem:[#allocation7 + $0x178] sm:$0xff] }
0x12fa   :  { %8533 = vmatpush3.bf16.msra.mxu0 %v6020_v22  ;;  %v8918_v57 = vpop.f32.mrb[168].mxu1  ;;  %7317 = vmatprep.mubr.bf16.mxu0 %v7113_v40 }
0x12fb   :  { %v6734_v0 = vpop.f32.mrb[169].mxu1  ;;  %8534 = vmatprep.subr.bf16.mxu0 %v6029_v53 }
0x12fc   :  { %v8919_v7 = vpop.f32.mrb[170].mxu1 }
0x12fd   :  { %v7131_v17 = vpack.c.bf16 %v8919_v7, %v8918_v57  ;;  %v6737_v16 = vpop.f32.mrb[171].mxu1 }
0x12fe   :  { %v7122_v52 = vpack.c.bf16 %v6737_v16, %v6734_v0  ;;  %8535 = vmatpush3.bf16.msra.mxu0 %v6021_v45 }
0x12ff   :  { %8536 = vmatprep.subr.bf16.mxu0 %v6030_v48 }
0x1301   :  { %7318 = vmatmul.mubr.bf16.gmra.mrb[168].mxu0 %v7112_v50 }
0x1302   :  { %v8922_v1 = vpop.f32.mrb[172].mxu1  ;;  %7325 = vmatprep.mubr.bf16.mxu0 %v7122_v52  ;;  %8537 = vmatpush3.bf16.msra.mxu0 %v6022_v62 }
0x1303   :  { %v6750_v51 = vpop.f32.mrb[173].mxu1  ;;  %8538 = vmatprep.subr.bf16.mxu0 %v6031_v56  ;;  %v6036_v56 = vld [vmem:[#allocation7 + $0x180] sm:$0xff] }
0x1304   :  { %v8923_v5 = vpop.f32.mrb[174].mxu1 }
0x1305   :  { %v7149_v12 = vpack.c.bf16 %v8923_v5, %v8922_v1  ;;  %v6753_v55 = vpop.f32.mrb[175].mxu1  ;;  %v6045_v1 = vld [vmem:[#allocation7 + $0x1c8] sm:$0xff] }
0x1306   :  { %v7140_v3 = vpack.c.bf16 %v6753_v55, %v6750_v51  ;;  %8539 = vmatpush3.bf16.msra.mxu0 %v6023_v8  ;;  %v6037_v5 = vld [vmem:[#allocation7 + $0x188] sm:$0xff]  ;;  %v6038_v55 = vld [vmem:[#allocation7 + $0x190] sm:$0xff] }
0x1307   :  { %8540 = vmatprep.subr.bf16.mxu0 %v6032_v37 }
0x1309   :  { %7326 = vmatmul.mubr.bf16.gmra.mrb[172].mxu0 %v7121_v39  ;;  %v6027_v39 = vld [vmem:[#allocation7 + $0x138] sm:$0xff] }
0x130a   :  { %v8926_v29 = vpop.f32.mrb[176].mxu1  ;;  %7333 = vmatprep.mubr.bf16.mxu0 %v7131_v17  ;;  %8541 = vmatpush3.bf16.msra.mxu0 %v6024_v32 }
0x130b   :  { %v6766_v21 = vpop.f32.mrb[177].mxu1  ;;  %8542 = vmatprep.subr.bf16.mxu0 %v6033_v28 }
0x130c   :  { %v8927_v31 = vpop.f32.mrb[178].mxu1 }
0x130d   :  { %v7167_v41 = vpack.c.bf16 %v8927_v31, %v8926_v29  ;;  %v6769_v26 = vpop.f32.mrb[179].mxu1  ;;  %v6039_v29 = vld [vmem:[#allocation7 + $0x198] sm:$0xff] }
0x130e   :  { %v7158_v50 = vpack.c.bf16 %v6769_v26, %v6766_v21  ;;  %8543 = vmatpush3.bf16.msra.mxu0 %v6025_v9  ;;  %v6048_v9 = vld [vmem:[#allocation7 + $0x1e0] sm:$0xff] }
0x130f   :  { %8544 = vmatprep.subr.bf16.mxu0 %v6034_v15  ;;  %v6040_v26 = vld [vmem:[#allocation7 + $0x1a0] sm:$0xff] }
0x1311   :  { %7334 = vmatmul.mubr.bf16.gmra.mrb[176].mxu0 %v7130_v38 }
0x1312   :  { %v10902_v18 = vpop.f32.mrb[180].mxu1  ;;  %7341 = vmatprep.mubr.bf16.mxu0 %v7140_v3  ;;  %8545 = vmatpush3.bf16.msra.mxu0 %v6026_v59  ;;  %v6047_v3 = vld [vmem:[#allocation7 + $0x1d8] sm:$0xff] }
0x1313   :  { %v6782_v33 = vpop.f32.mrb[181].mxu1  ;;  %8546 = vmatprep.subr.bf16.mxu0 %v6035_v61 }
0x1314   :  { %v8931_v19 = vpop.f32.mrb[182].mxu1 }
0x1315   :  { %v7114_v36 = vpack.c.bf16 %v8931_v19, %v10902_v18  ;;  %v6785_v40 = vpop.f32.mrb[183].mxu1  ;;  %v6041_v18 = vld [vmem:[#allocation7 + $0x1a8] sm:$0xff] }
0x1316   :  { %v7105_v25 = vpack.c.bf16 %v6785_v40, %v6782_v33  ;;  %8547 = vmatpush3.bf16.msra.mxu0 %v6027_v39  ;;  %v6050_v39 = vld [vmem:[#allocation7 + $0x1f0] sm:$0xff] }
0x1317   :  { %8596 = vmatprep.subr.bf16.mxu0 %v6044_v4  ;;  %v6042_v40 = vld [vmem:[#allocation7 + $0x1b0] sm:$0xff] }
0x1319   :  { %7342 = vmatmul.mubr.bf16.gmra.mrb[180].mxu0 %v7139_v47 }
0x131a   :  { %v10908_v2 = vpop.f32.mrb[184].mxu1  ;;  %7349 = vmatprep.mubr.bf16.mxu0 %v7149_v12  ;;  %v6046_v12 = vld [vmem:[#allocation7 + $0x1d0] sm:$0xff] }
0x131b   :  { %v10910_v20 = vpop.f32.mrb[185].mxu1 }
0x131c   :  { %v10912_v38 = vpop.f32.mrb[186].mxu1 }
0x131d   :  { %v7132_v14 = vpack.c.bf16 %v10912_v38, %v10908_v2  ;;  %v6801_v22 = vpop.f32.mrb[187].mxu1 }
0x131e   :  { %v7123_v53 = vpack.c.bf16 %v6801_v22, %v10910_v20 }
0x1321   :  { %7350 = vmatmul.mubr.bf16.gmra.mrb[184].mxu0 %v7148_v42 }
0x1322   :  { %v10920_v57 = vpop.f32.mrb[188].mxu1  ;;  %7357 = vmatprep.mubr.bf16.mxu0 %v7158_v50  ;;  %v6049_v50 = vld [vmem:[#allocation7 + $0x1e8] sm:$0xff] }
0x1323   :  { %v10922_v30 = vpop.f32.mrb[189].mxu1 }
0x1324   :  { %v10924_v43 = vpop.f32.mrb[190].mxu1 }
0x1325   :  { %v7150_v47 = vpack.c.bf16 %v10924_v43, %v10920_v57  ;;  %v10928_v0 = vpop.f32.mrb[191].mxu1 }
0x1326   :  { %v7141_v45 = vpack.c.bf16 %v10928_v0, %v10922_v30 }
0x1329   :  { %7358 = vmatmul.mubr.bf16.gmra.mrb[188].mxu0 %v7157_v49 }
0x132a   :  { %v10935_v46 = vpop.f32.mrb[192].mxu1  ;;  %7365 = vmatprep.mubr.bf16.mxu0 %v7167_v41 }
0x132b   :  { %v10937_v13 = vpop.f32.mrb[193].mxu1 }
0x132c   :  { %v10939_v42 = vpop.f32.mrb[194].mxu1 }
0x132d   :  { %v7168_v7 = vpack.c.bf16 %v10939_v42, %v10935_v46  ;;  %v10943_v48 = vpop.f32.mrb[195].mxu1 }
0x132e   :  { %v7159_v17 = vpack.c.bf16 %v10943_v48, %v10937_v13 }
0x1331   :  { %7366 = vmatmul.mubr.bf16.gmra.mrb[192].mxu0 %v7166_v11 }
0x1332   :  { %v8946_v27 = vpop.f32.mrb[196].mxu1 }
0x1333   :  { %v6846_v23 = vpop.f32.mrb[197].mxu1 }
0x1334   :  { %v8947_v49 = vpop.f32.mrb[198].mxu1 }
0x1335   :  { %v7115_v16 = vpack.c.bf16 %v8947_v49, %v8946_v27  ;;  %v6849_v52 = vpop.f32.mrb[199].mxu1 }
0x1336   :  { %v7106_v62 = vpack.c.bf16 %v6849_v52, %v6846_v23 }
0x1338   :  { %7406 = vmatprep.mubr.bf16.mxu0 %v7106_v62 }
0x1339   :  { %7407 = vmatmul.mubr.bf16.vlgmr.msra.gmra.mrb[196].mxu0 %v7105_v25  ;;  %v6051_v25 = vld [vmem:[#allocation7 + $0x1f8] sm:$0xff] }
0x133a   :  { %8597 = vmatpush3.bf16.msra.mxu0 %v6036_v56  ;;  %v8950_v51 = vpop.f32.mrb[200].mxu1  ;;  %7414 = vmatprep.mubr.bf16.mxu0 %v7115_v16 }
0x133b   :  { %v6862_v8 = vpop.f32.mrb[201].mxu1  ;;  %8598 = vmatprep.subr.bf16.mxu0 %v6045_v1 }
0x133c   :  { %v8951_v37 = vpop.f32.mrb[202].mxu1 }
0x133d   :  { %v7133_v58 = vpack.c.bf16 %v8951_v37, %v8950_v51  ;;  %v6865_v24 = vpop.f32.mrb[203].mxu1 }
0x133e   :  { %v7124_v11 = vpack.c.bf16 %v6865_v24, %v6862_v8  ;;  %8599 = vmatpush3.bf16.msra.mxu0 %v6037_v5 }
0x133f   :  { %8600 = vmatprep.subr.bf16.mxu0 %v6046_v12 }
0x1341   :  { %7415 = vmatmul.mubr.bf16.gmra.mrb[200].mxu0 %v7114_v36 }
0x1342   :  { %v8954_v32 = vpop.f32.mrb[204].mxu1  ;;  %7422 = vmatprep.mubr.bf16.mxu0 %v7124_v11  ;;  %8601 = vmatpush3.bf16.msra.mxu0 %v6038_v55 }
0x1343   :  { %v6878_v28 = vpop.f32.mrb[205].mxu1  ;;  %8602 = vmatprep.subr.bf16.mxu0 %v6047_v3 }
0x1344   :  { %v8955_v21 = vpop.f32.mrb[206].mxu1 }
0x1345   :  { %v7151_v31 = vpack.c.bf16 %v8955_v21, %v8954_v32  ;;  %v6881_v15 = vpop.f32.mrb[207].mxu1 }
0x1346   :  { %v7142_v41 = vpack.c.bf16 %v6881_v15, %v6878_v28  ;;  %8603 = vmatpush3.bf16.msra.mxu0 %v6039_v29 }
0x1347   :  { %8604 = vmatprep.subr.bf16.mxu0 %v6048_v9 }
0x1349   :  { %7423 = vmatmul.mubr.bf16.gmra.mrb[204].mxu0 %v7123_v53  ;;  %v6043_v53 = vld [vmem:[#allocation7 + $0x1b8] sm:$0xff] }
0x134a   :  { %v8958_v59 = vpop.f32.mrb[208].mxu1  ;;  %7430 = vmatprep.mubr.bf16.mxu0 %v7133_v58  ;;  %8605 = vmatpush3.bf16.msra.mxu0 %v6040_v26 }
0x134b   :  { %v6894_v61 = vpop.f32.mrb[209].mxu1  ;;  %8606 = vmatprep.subr.bf16.mxu0 %v6049_v50 }
0x134c   :  { %v8959_v33 = vpop.f32.mrb[210].mxu1 }
0x134d   :  { %v7169_v19 = vpack.c.bf16 %v8959_v33, %v8958_v59  ;;  %v6897_v4 = vpop.f32.mrb[211].mxu1 }
0x134e   :  { %v7160_v36 = vpack.c.bf16 %v6897_v4, %v6894_v61  ;;  %8607 = vmatpush3.bf16.msra.mxu0 %v6041_v18 }
0x134f   :  { %8608 = vmatprep.subr.bf16.mxu0 %v6050_v39 }
0x1351   :  { %7431 = vmatmul.mubr.bf16.gmra.mrb[208].mxu0 %v7132_v14 }
0x1352   :  { %v8962_v20 = vpop.f32.mrb[212].mxu1  ;;  %7438 = vmatprep.mubr.bf16.mxu0 %v7142_v41  ;;  %8609 = vmatpush3.bf16.msra.mxu0 %v6042_v40 }
0x1353   :  { %v6910_v22 = vpop.f32.mrb[213].mxu1  ;;  %8610 = vmatprep.subr.bf16.mxu0 %v6051_v25 }
0x1354   :  { %v8963_v27 = vpop.f32.mrb[214].mxu1 }
0x1355   :  { %v7116_v23 = vpack.c.bf16 %v8963_v27, %v8962_v20  ;;  %v6913_v49 = vpop.f32.mrb[215].mxu1 }
0x1356   :  { %v7107_v16 = vpack.c.bf16 %v6913_v49, %v6910_v22  ;;  %8611 = vmatpush3.bf16.msra.mxu0 %v6043_v53 }
0x1357   :  { %9008 = vmatprep.subr.bf16.mxu0 %v10762_v34 }
0x1359   :  { %7439 = vmatmul.mubr.bf16.gmra.mrb[212].mxu0 %v7141_v45 }
0x135a   :  { %v10957_v52 = vpop.f32.mrb[216].mxu1  ;;  %7446 = vmatprep.mubr.bf16.mxu0 %v7151_v31 }
0x135b   :  { %v6926_v2 = vpop.f32.mrb[217].mxu1 }
0x135c   :  { %v10959_v38 = vpop.f32.mrb[218].mxu1 }
0x135d   :  { %v7134_v14 = vpack.c.bf16 %v10959_v38, %v10957_v52  ;;  %v6929_v62 = vpop.f32.mrb[219].mxu1 }
0x135e   :  { %v7125_v56 = vpack.c.bf16 %v6929_v62, %v6926_v2 }
0x1361   :  { %7447 = vmatmul.mubr.bf16.gmra.mrb[216].mxu0 %v7150_v47 }
0x1362   :  { %v10966_v1 = vpop.f32.mrb[220].mxu1  ;;  %7454 = vmatprep.mubr.bf16.mxu0 %v7160_v36 }
0x1363   :  { %v10968_v30 = vpop.f32.mrb[221].mxu1 }
0x1364   :  { %v10970_v0 = vpop.f32.mrb[222].mxu1 }
0x1365   :  { %v7152_v45 = vpack.c.bf16 %v10970_v0, %v10966_v1  ;;  %v10974_v51 = vpop.f32.mrb[223].mxu1 }
0x1366   :  { %v7143_v8 = vpack.c.bf16 %v10974_v51, %v10968_v30 }
0x1369   :  { %7455 = vmatmul.mubr.bf16.gmra.mrb[220].mxu0 %v7159_v17 }
0x136a   :  { %v10981_v57 = vpop.f32.mrb[224].mxu1  ;;  %7462 = vmatprep.mubr.bf16.mxu0 %v7169_v19 }
0x136b   :  { %v10983_v43 = vpop.f32.mrb[225].mxu1 }
0x136c   :  { %v10985_v47 = vpop.f32.mrb[226].mxu1 }
0x136d   :  { %v7170_v5 = vpack.c.bf16 %v10985_v47, %v10981_v57  ;;  %v10989_v37 = vpop.f32.mrb[227].mxu1 }
0x136e   :  { %v7161_v12 = vpack.c.bf16 %v10989_v37, %v10983_v43 }
0x1371   :  { %7463 = vmatmul.mubr.bf16.gmra.mrb[224].mxu0 %v7168_v7 }
0x1372   :  { %v8978_v13 = vpop.f32.mrb[228].mxu1 }
0x1373   :  { %v6974_v48 = vpop.f32.mrb[229].mxu1 }
0x1374   :  { %v8979_v17 = vpop.f32.mrb[230].mxu1 }
0x1375   :  { %v7117_v58 = vpack.c.bf16 %v8979_v17, %v8978_v13  ;;  %v6977_v24 = vpop.f32.mrb[231].mxu1 }
0x1376   :  { %v7108_v11 = vpack.c.bf16 %v6977_v24, %v6974_v48 }
0x1378   :  { %7503 = vmatprep.mubr.bf16.mxu0 %v7108_v11 }
0x1379   :  { %7504 = vmatmul.mubr.bf16.vlgmr.msra.gmra.mrb[228].mxu0 %v7107_v16 }
0x137a   :  { %9009 = vmatpush3.bf16.msra.mxu0 %v10762_v34  ;;  %7511 = vmatprep.mubr.bf16.mxu0 %v7117_v58  ;;  %v8982_v55 = vpop.f32.mrb[232].mxu1 }
0x137b   :  { %v6990_v3 = vpop.f32.mrb[233].mxu1  ;;  %9010 = vmatprep.subr.bf16.mxu0 %v10766_v60 }
0x137c   :  { %v8983_v32 = vpop.f32.mrb[234].mxu1 }
0x137d   :  { %v7135_v28 = vpack.c.bf16 %v8983_v32, %v8982_v55  ;;  %v6993_v29 = vpop.f32.mrb[235].mxu1 }
0x137e   :  { %9011 = vmatpush3.bf16.msra.mxu0 %v10766_v60  ;;  %v7126_v46 = vpack.c.bf16 %v6993_v29, %v6990_v3 }
0x137f   :  { %9012 = vmatprep.subr.bf16.mxu0 %v10770_v54 }
0x1381   :  { %7512 = vmatmul.mubr.bf16.gmra.mrb[232].mxu0 %v7116_v23 }
0x1382   :  { %7519 = vmatprep.mubr.bf16.mxu0 %v7126_v46  ;;  %v8986_v42 = vpop.f32.mrb[236].mxu1  ;;  %9013 = vmatpush3.bf16.msra.mxu0 %v10770_v54 }
0x1383   :  { %v7006_v7 = vpop.f32.mrb[237].mxu1  ;;  %9014 = vmatprep.subr.bf16.mxu0 %v10774_v35 }
0x1384   :  { %v8987_v34 = vpop.f32.mrb[238].mxu1 }
0x1385   :  { %v7153_v21 = vpack.c.bf16 %v8987_v34, %v8986_v42  ;;  %v7009_v9 = vpop.f32.mrb[239].mxu1 }
0x1386   :  { %v7144_v31 = vpack.c.bf16 %v7009_v9, %v7006_v7  ;;  %9015 = vmatpush3.bf16.msra.mxu0 %v10774_v35 }
0x1387   :  { %9016 = vmatprep.subr.bf16.mxu0 %v10784_v10 }
0x1389   :  { %7520 = vmatmul.mubr.bf16.gmra.mrb[236].mxu0 %v7125_v56 }
0x138a   :  { %7527 = vmatprep.mubr.bf16.mxu0 %v7135_v28  ;;  %v11004_v60 = vpop.f32.mrb[240].mxu1  ;;  %9017 = vmatpush3.bf16.msra.mxu0 %v10784_v10 }
0x138b   :  { %v7022_v15 = vpop.f32.mrb[241].mxu1  ;;  %9018 = vmatprep.subr.bf16.mxu0 %v10824_v6 }
0x138c   :  { %v8420_v54 = vpop.f32.mrb[132].mxu0  ;;  %v8991_v41 = vpop.f32.mrb[242].mxu1 }
0x138d   :  { %v8421_v26 = vpop.f32.mrb[133].mxu0  ;;  %v7171_v50 = vpack.c.bf16 %v8991_v41, %v11004_v60  ;;  %v7025_v59 = vpop.f32.mrb[243].mxu1 }
0x138e   :  { %v11009_v61 = vadd.f32 %v8421_v26, %v8420_v54  ;;  %v8423_v35 = vpop.f32.mrb[134].mxu0  ;;  %v7162_v18 = vpack.c.bf16 %v7025_v59, %v7022_v15  ;;  %9019 = vmatpush3.bf16.msra.mxu0 %v10824_v6 }
0x138f   :  { %v8424_v33 = vpop.f32.mrb[135].mxu0  ;;  %9020 = vmatprep.subr.bf16.mxu0 %v10855_v44 }
0x1390   :  { %v11013_v39 = vadd.f32 %v8424_v33, %v8423_v35 }
0x1391   :  { %7528 = vmatmul.mubr.bf16.gmra.mrb[240].mxu0 %v7134_v14 }
0x1392   :  { %7535 = vmatprep.mubr.bf16.mxu0 %v7144_v31  ;;  %v11018_v10 = vpop.f32.mrb[244].mxu1  ;;  %9021 = vmatpush3.bf16.msra.mxu0 %v10855_v44 }
0x1393   :  { %v7038_v19 = vpop.f32.mrb[245].mxu1  ;;  %9022 = vmatprep.subr.bf16.mxu0 %v10892_v63 }
0x1394   :  { %v8426_v4 = vpop.f32.mrb[136].mxu0  ;;  %v11022_v36 = vpop.f32.mrb[246].mxu1 }
0x1395   :  { %v8427_v6 = vpop.f32.mrb[137].mxu0  ;;  %v7118_v40 = vpack.c.bf16 %v11022_v36, %v11018_v10  ;;  %v7041_v25 = vpop.f32.mrb[247].mxu1 }
0x1396   :  { %v11026_v20 = vadd.f32 %v8427_v6, %v8426_v4  ;;  %v8429_v22 = vpop.f32.mrb[138].mxu0  ;;  %v7109_v53 = vpack.c.bf16 %v7041_v25, %v7038_v19  ;;  %9023 = vmatpush3.bf16.msra.mxu0 %v10892_v63 }
0x1397   :  { %v8430_v27 = vpop.f32.mrb[139].mxu0 }
0x1398   :  { %v11029_v23 = vadd.f32 %v8430_v27, %v8429_v22  ;;  %v11070_v22 = vld [vmem:[#allocation26] ss:$0 sm:$0xff] }
0x1399   :  { %7536 = vmatmul.mubr.bf16.gmra.mrb[244].mxu0 %v7143_v8 }
0x139a   :  { %v8998_v44 = vpop.f32.mrb[248].mxu1  ;;  %7543 = vmatprep.mubr.bf16.mxu0 %v7153_v21 }
0x139b   :  { %v7054_v49 = vpop.f32.mrb[249].mxu1 }
0x139c   :  { %v8999_v16 = vpop.f32.mrb[250].mxu1  ;;  %v8432_v52 = vpop.f32.mrb[140].mxu0 }
0x139d   :  { %v7136_v2 = vpack.c.bf16 %v8999_v16, %v8998_v44  ;;  %v7057_v38 = vpop.f32.mrb[251].mxu1  ;;  %v8433_v14 = vpop.f32.mrb[141].mxu0 }
0x139e   :  { %v7127_v62 = vpack.c.bf16 %v7057_v38, %v7054_v49  ;;  %v11034_v56 = vadd.f32 %v8433_v14, %v8432_v52  ;;  %v8435_v13 = vpop.f32.mrb[142].mxu0  ;;  %v7218_v49 = vadd.f32 %v11013_v39, %v11070_v22 }
0x139f   :  { %v8436_v63 = vpop.f32.mrb[143].mxu0 }
0x13a0   :  { %v11036_v48 = vadd.f32 %v8436_v63, %v8435_v13  ;;  %9028 = vmatprep.mubr.bf16.mxu1 %v7127_v62  ;;  %v7223_v62 = vadd.f32 %v11026_v20, %v11070_v22 }
0x13a1   :  { %7544 = vmatmul.mubr.bf16.gmra.mrb[248].mxu0 %v7152_v45  ;;  %9029 = vmatmul.mubr.bf16.vlgmr.msra.gmra.mrb[4].mxu1 %v7136_v2 }
0x13a2   :  { %v9002_v30 = vpop.f32.mrb[252].mxu1  ;;  %7551 = vmatprep.mubr.bf16.mxu0 %v7162_v18  ;;  %v7234_v20 = vadd.f32 %v11036_v48, %v11070_v22 }
0x13a3   :  { %v7070_v51 = vpop.f32.mrb[253].mxu1 }
0x13a4   :  { %v9003_v8 = vpop.f32.mrb[254].mxu1  ;;  %v8438_v17 = vpop.f32.mrb[144].mxu0 }
0x13a5   :  { %v7154_v58 = vpack.c.bf16 %v9003_v8, %v9002_v30  ;;  %v7073_v24 = vpop.f32.mrb[255].mxu1  ;;  %v8439_v11 = vpop.f32.mrb[145].mxu0 }
0x13a6   :  { %v7145_v55 = vpack.c.bf16 %v7073_v24, %v7070_v51  ;;  %v11041_v3 = vadd.f32 %v8439_v11, %v8438_v17  ;;  %v8441_v32 = vpop.f32.mrb[146].mxu0  ;;  %v7231_v24 = vadd.f32 %v11034_v56, %v11070_v22 }
0x13a7   :  { %v8442_v28 = vpop.f32.mrb[147].mxu0 }
0x13a8   :  { %v11043_v29 = vadd.f32 %v8442_v28, %v8441_v32  ;;  %9032 = vmatprep.mubr.bf16.mxu1 %v7145_v55 }
0x13a9   :  { %7552 = vmatmul.mubr.bf16.gmra.mrb[252].mxu0 %v7161_v12  ;;  %9033 = vmatmul.mubr.bf16.gmra.mrb[8].mxu1 %v7154_v58 }
0x13aa   :  { %v9006_v1 = vpop.f32.mrb[0].mxu1  ;;  %7559 = vmatprep.mubr.bf16.mxu0 %v7171_v50  ;;  %v7242_v56 = vadd.f32 %v11043_v29, %v11070_v22 }
0x13ab   :  { %v7086_v0 = vpop.f32.mrb[1].mxu1 }
0x13ac   :  { %v9007_v45 = vpop.f32.mrb[2].mxu1  ;;  %v8444_v46 = vpop.f32.mrb[148].mxu0 }
0x13ad   :  { %v7172_v42 = vpack.c.bf16 %v9007_v45, %v9006_v1  ;;  %v7089_v7 = vpop.f32.mrb[3].mxu1  ;;  %v8445_v34 = vpop.f32.mrb[149].mxu0 }
0x13ae   :  { %v7163_v21 = vpack.c.bf16 %v7089_v7, %v7086_v0  ;;  %v11048_v9 = vadd.f32 %v8445_v34, %v8444_v46  ;;  %v8447_v31 = vpop.f32.mrb[150].mxu0  ;;  %v7239_v46 = vadd.f32 %v11041_v3, %v11070_v22 }
0x13af   :  { %v8448_v60 = vpop.f32.mrb[151].mxu0 }
0x13b0   :  { %v11050_v15 = vadd.f32 %v8448_v60, %v8447_v31  ;;  %9036 = vmatprep.mubr.bf16.mxu1 %v7163_v21 }
0x13b1   :  { %7560 = vmatmul.mubr.bf16.gmra.mrb[0].mxu0 %v7170_v5  ;;  %9037 = vmatmul.mubr.bf16.gmra.mrb[12].mxu1 %v7172_v42 }
0x13b2   :  { %9024 = vmatprep.mubr.bf16.mxu0 %v7109_v53  ;;  %v7250_v3 = vadd.f32 %v11050_v15, %v11070_v22 }
0x13b4   :  { %v8450_v43 = vpop.f32.mrb[152].mxu0 }
0x13b5   :  { %v8451_v37 = vpop.f32.mrb[153].mxu0 }
0x13b6   :  { %v11055_v12 = vadd.f32 %v8451_v37, %v8450_v43  ;;  %v8453_v54 = vpop.f32.mrb[154].mxu0  ;;  %v7247_v37 = vadd.f32 %v11048_v9, %v11070_v22 }
0x13b7   :  { %v8454_v41 = vpop.f32.mrb[155].mxu0 }
0x13b8   :  { %v11057_v26 = vadd.f32 %v8454_v41, %v8453_v54 }
0x13b9   :  { %9025 = vmatmul.mubr.bf16.vlgmr.msra.gmra.mrb[4].mxu0 %v7118_v40  ;;  %v7215_v40 = vadd.f32 %v11009_v61, %v11070_v22  ;;  %v7226_v61 = vadd.f32 %v11029_v23, %v11070_v22 }
0x13ba   :  { %v7258_v9 = vadd.f32 %v11057_v26, %v11070_v22 }
0x13bc   :  { %v8456_v50 = vpop.f32.mrb[156].mxu0 }
0x13bd   :  { %v8457_v59 = vpop.f32.mrb[157].mxu0 }
0x13be   :  { %v11062_v35 = vadd.f32 %v8457_v59, %v8456_v50  ;;  %v8459_v57 = vpop.f32.mrb[158].mxu0 }
0x13bf   :  { %v8460_v47 = vpop.f32.mrb[159].mxu0 }
0x13c0   :  { %v11064_v5 = vadd.f32 %v8460_v47, %v8459_v57 }
0x13c4   :  { %v8462_v18 = vpop.f32.mrb[160].mxu0 }
0x13c5   :  { %v8463_v33 = vpop.f32.mrb[161].mxu0 }
0x13c6   :  { %v11066_v19 = vadd.f32 %v8463_v33, %v8462_v18  ;;  %v8465_v4 = vpop.f32.mrb[162].mxu0  ;;  %v7255_v33 = vadd.f32 %v11055_v12, %v11070_v22  ;;  %v7266_v12 = vadd.f32 %v11064_v5, %v11070_v22 }
0x13c7   :  { %v8466_v6 = vpop.f32.mrb[163].mxu0 }
0x13c8   :  { %v11068_v25 = vadd.f32 %v8466_v6, %v8465_v4 }
0x13cc   :  { %v8484_v10 = vpop.f32.mrb[164].mxu0 }
0x13cd   :  { %v8485_v36 = vpop.f32.mrb[165].mxu0 }
0x13ce   :  { %v8486_v53 = vadd.f32 %v8485_v36, %v8484_v10  ;;  %v8487_v27 = vpop.f32.mrb[166].mxu0 }
0x13cf   :  { %v8488_v44 = vpop.f32.mrb[167].mxu0 }
0x13d0   :  { %v11076_v16 = vadd.f32 %v8486_v53, %v7215_v40  ;;  %v8489_v52 = vadd.f32 %v8488_v44, %v8487_v27  ;;  %v7263_v44 = vadd.f32 %v11062_v35, %v11070_v22  ;;  %v7274_v35 = vadd.f32 %v11068_v25, %v11070_v22 }
0x13d2   :  { %v11078_v2 = vadd.f32 %v8489_v52, %v7218_v49 }
0x13d4   :  { %v8490_v38 = vpop.f32.mrb[168].mxu0 }
0x13d5   :  { %v8491_v14 = vpop.f32.mrb[169].mxu0 }
0x13d6   :  { %v8492_v13 = vadd.f32 %v8491_v14, %v8490_v38  ;;  %v8493_v63 = vpop.f32.mrb[170].mxu0 }
0x13d7   :  { %v8494_v30 = vpop.f32.mrb[171].mxu0 }
0x13d8   :  { %v11084_v51 = vadd.f32 %v8492_v13, %v7223_v62  ;;  %v8495_v8 = vadd.f32 %v8494_v30, %v8493_v63  ;;  %v7271_v30 = vadd.f32 %v11066_v19, %v11070_v22 }
0x13da   :  { %v11086_v39 = vadd.f32 %v8495_v8, %v7226_v61 }
0x13dc   :  { %v8496_v17 = vpop.f32.mrb[172].mxu0 }
0x13dd   :  { %v8497_v58 = vpop.f32.mrb[173].mxu0 }
0x13de   :  { %v8498_v11 = vadd.f32 %v8497_v58, %v8496_v17  ;;  %v8499_v55 = vpop.f32.mrb[174].mxu0 }
0x13df   :  { %v8500_v32 = vpop.f32.mrb[175].mxu0 }
0x13e0   :  { %v11092_v28 = vadd.f32 %v8498_v11, %v7231_v24  ;;  %v8501_v1 = vadd.f32 %v8500_v32, %v8499_v55 }
0x13e2   :  { %v11094_v23 = vadd.f32 %v8501_v1, %v7234_v20 }
0x13e4   :  { %v8502_v0 = vpop.f32.mrb[176].mxu0 }
0x13e5   :  { %v8503_v45 = vpop.f32.mrb[177].mxu0 }
0x13e6   :  { %v8504_v42 = vadd.f32 %v8503_v45, %v8502_v0  ;;  %v8505_v7 = vpop.f32.mrb[178].mxu0 }
0x13e7   :  { %v8506_v34 = vpop.f32.mrb[179].mxu0 }
0x13e8   :  { %v11100_v21 = vadd.f32 %v8504_v42, %v7239_v46  ;;  %v8507_v31 = vadd.f32 %v8506_v34, %v8505_v7 }
0x13ea   :  { %v11102_v48 = vadd.f32 %v8507_v31, %v7242_v56 }
0x13ec   :  { %v8508_v60 = vpop.f32.mrb[180].mxu0 }
0x13ed   :  { %v8509_v43 = vpop.f32.mrb[181].mxu0 }
0x13ee   :  { %v8510_v54 = vadd.f32 %v8509_v43, %v8508_v60  ;;  %v8511_v41 = vpop.f32.mrb[182].mxu0 }
0x13ef   :  { %v8512_v50 = vpop.f32.mrb[183].mxu0 }
0x13f0   :  { %v11108_v59 = vadd.f32 %v8510_v54, %v7247_v37  ;;  %v8513_v57 = vadd.f32 %v8512_v50, %v8511_v41 }
0x13f2   :  { %v11110_v29 = vadd.f32 %v8513_v57, %v7250_v3 }
0x13f4   :  { %v8514_v47 = vpop.f32.mrb[184].mxu0 }
0x13f5   :  { %v8515_v18 = vpop.f32.mrb[185].mxu0 }
0x13f6   :  { %v8516_v4 = vadd.f32 %v8515_v18, %v8514_v47  ;;  %v8517_v6 = vpop.f32.mrb[186].mxu0 }
0x13f7   :  { %v8518_v10 = vpop.f32.mrb[187].mxu0 }
0x13f8   :  { %v11116_v36 = vadd.f32 %v8516_v4, %v7255_v33  ;;  %v8519_v40 = vadd.f32 %v8518_v10, %v8517_v6 }
0x13fa   :  { %v11118_v15 = vadd.f32 %v8519_v40, %v7258_v9 }
0x13fc   :  { %v8520_v53 = vpop.f32.mrb[188].mxu0 }
0x13fd   :  { %v8521_v27 = vpop.f32.mrb[189].mxu0 }
0x13fe   :  { %v8522_v49 = vadd.f32 %v8521_v27, %v8520_v53  ;;  %v8523_v52 = vpop.f32.mrb[190].mxu0 }
0x13ff   :  { %v8524_v38 = vpop.f32.mrb[191].mxu0 }
0x1400   :  { %v11124_v14 = vadd.f32 %v8522_v49, %v7263_v44  ;;  %v8525_v62 = vadd.f32 %v8524_v38, %v8523_v52 }
0x1402   :  { %v11126_v26 = vadd.f32 %v8525_v62, %v7266_v12 }
0x1404   :  { %v8526_v13 = vpop.f32.mrb[192].mxu0 }
0x1405   :  { %v8527_v63 = vpop.f32.mrb[193].mxu0 }
0x1406   :  { %v8528_v61 = vadd.f32 %v8527_v63, %v8526_v13  ;;  %v8529_v8 = vpop.f32.mrb[194].mxu0 }
0x1407   :  { %v8530_v17 = vpop.f32.mrb[195].mxu0 }
0x1408   :  { %v11132_v58 = vadd.f32 %v8528_v61, %v7271_v30  ;;  %v8531_v24 = vadd.f32 %v8530_v17, %v8529_v8 }
0x140a   :  { %v11134_v5 = vadd.f32 %v8531_v24, %v7274_v35 }
0x140c   :  { %v8548_v11 = vpop.f32.mrb[196].mxu0 }
0x140d   :  { %v8549_v55 = vpop.f32.mrb[197].mxu0 }
0x140e   :  { %v8550_v32 = vadd.f32 %v8549_v55, %v8548_v11  ;;  %v8551_v20 = vpop.f32.mrb[198].mxu0 }
0x140f   :  { %v8552_v1 = vpop.f32.mrb[199].mxu0 }
0x1410   :  { %v11137_v0 = vadd.f32 %v8550_v32, %v11076_v16  ;;  %v8553_v19 = vadd.f32 %v8552_v1, %v8551_v20 }
0x1412   :  { %v11140_v45 = vadd.f32 %v8553_v19, %v11078_v2 }
0x1414   :  { %v8554_v46 = vpop.f32.mrb[200].mxu0 }
0x1415   :  { %v8555_v42 = vpop.f32.mrb[201].mxu0 }
0x1416   :  { %v8556_v25 = vadd.f32 %v8555_v42, %v8554_v46  ;;  %v8557_v22 = vpop.f32.mrb[202].mxu0 }
0x1417   :  { %v8558_v7 = vpop.f32.mrb[203].mxu0 }
0x1418   :  { %v11143_v34 = vadd.f32 %v8556_v25, %v11084_v51  ;;  %v8559_v56 = vadd.f32 %v8558_v7, %v8557_v22 }
0x141a   :  { %v11146_v31 = vadd.f32 %v8559_v56, %v11086_v39 }
0x141c   :  { %v8560_v16 = vpop.f32.mrb[204].mxu0 }
0x141d   :  { %v8561_v2 = vpop.f32.mrb[205].mxu0 }
0x141e   :  { %9732 = shalt.err (!%p9729_p2)
}
0x141f   :  { %s9733_s25 = scalar_lea.hbm %s11313_s22, 32 }
0x1420   :  { %p9734_p3 = scmp.ne.s32.totalorder %s11313_s22, %s9733_s25  ;;  %p9737_p4 = scmp.lt.u32.totalorder %s9733_s25, %s11313_s22 }
0x1422   :  { %p9739_p5 = pnand %p9737_p4, %p9734_p3 }
0x1424   :  { %9742 = shalt.err (!%p9739_p5)
}
0x1425   :  { %7708 = dma.vmem_to_hbm [thread:$0]  %s7706_s0, 32, %s11313_s22, [#allocation11]   ;;  %v8562_v51 = vadd.f32 %v8561_v2, %v8560_v16  ;;  %v8563_v39 = vpop.f32.mrb[206].mxu0 }
0x1426   :  { %s9743_s27 = scalar_lea.vmem %s11148_s19, 32  ;;  %p9748_p7 = scmp.lt.s32.totalorder %s11148_s19, %s11148_s19 }
0x1427   :  { %p9744_p6 = scmp.ne.s32.totalorder %s11148_s19, %s9743_s27  ;;  %p9749_p8 = scmp.lt.s32.totalorder %s9743_s27, %s9743_s27 }
0x1429   :  { %p9750_p9 = por %p9749_p8, %p9748_p7 }
0x142b   :  { %p9751_p10 = pnand %p9750_p9, %p9744_p6 }
0x142d   :  { %9754 = shalt.err (!%p9751_p10)
}
0x142e   :  { %s9755_s29 = scalar_lea.hbm %s11314_s23, 32 }
0x142f   :  { %p9756_p11 = scmp.ne.s32.totalorder %s11314_s23, %s9755_s29  ;;  %p9759_p12 = scmp.lt.u32.totalorder %s9755_s29, %s11314_s23 }
0x1431   :  { %p9761_p13 = pnand %p9759_p12, %p9756_p11 }
0x1433   :  { %9764 = shalt.err (!%p9761_p13)
}
0x1434   :  { %7718 = dma.vmem_to_hbm [thread:$0]  %s11148_s19, 32, %s11314_s23, [#allocation29]   ;;  %v8564_v60 = vpop.f32.mrb[207].mxu0  ;;  %v11180_v43 = vadd.f32 %v8562_v51, %v11092_v28 }
0x1435   :  { %v8565_v37 = vadd.f32 %v8564_v60, %v8563_v39  ;;  %v8566_v41 = vpop.f32.mrb[208].mxu0  ;;  %s11343_s16 = sld [smem:[#allocation66_spill]] }
0x1436   :  { %v8567_v50 = vpop.f32.mrb[209].mxu0 }
0x1437   :  { %v11183_v54 = vadd.f32 %v8565_v37, %v11094_v23  ;;  %v8568_v3 = vadd.f32 %v8567_v50, %v8566_v41  ;;  %v8569_v57 = vpop.f32.mrb[210].mxu0 }
0x1438   :  { %v8570_v47 = vpop.f32.mrb[211].mxu0 }
0x1439   :  { %v11186_v18 = vadd.f32 %v8568_v3, %v11100_v21  ;;  %v8571_v33 = vadd.f32 %v8570_v47, %v8569_v57  ;;  %v8572_v6 = vpop.f32.mrb[212].mxu0 }
0x143a   :  { %v8573_v10 = vpop.f32.mrb[213].mxu0 }
0x143b   :  { %v11189_v4 = vadd.f32 %v8571_v33, %v11102_v48  ;;  %v8574_v28 = vadd.f32 %v8573_v10, %v8572_v6  ;;  %v8575_v9 = vpop.f32.mrb[214].mxu0 }
0x143c   :  { %v8576_v40 = vpop.f32.mrb[215].mxu0 }
0x143d   :  { %v11192_v23 = vadd.f32 %v8574_v28, %v11108_v59  ;;  %v8577_v53 = vadd.f32 %v8576_v40, %v8575_v9  ;;  %v8578_v44 = vpop.f32.mrb[216].mxu0 }
0x143e   :  { %v8579_v49 = vpop.f32.mrb[217].mxu0 }
0x143f   :  { %v11195_v27 = vadd.f32 %v8577_v53, %v11110_v29  ;;  %v8580_v21 = vadd.f32 %v8579_v49, %v8578_v44  ;;  %v8581_v52 = vpop.f32.mrb[218].mxu0 }
0x1440   :  { %v8582_v38 = vpop.f32.mrb[219].mxu0 }
0x1441   :  { %v11198_v48 = vadd.f32 %v8580_v21, %v11116_v36  ;;  %v8583_v12 = vadd.f32 %v8582_v38, %v8581_v52  ;;  %v8584_v13 = vpop.f32.mrb[220].mxu0 }
0x1442   :  { %v8585_v63 = vpop.f32.mrb[221].mxu0 }
0x1443   :  { %v11201_v62 = vadd.f32 %v8583_v12, %v11118_v15  ;;  %v8586_v59 = vadd.f32 %v8585_v63, %v8584_v13  ;;  %v8587_v30 = vpop.f32.mrb[222].mxu0 }
0x1444   :  { %v8588_v61 = vpop.f32.mrb[223].mxu0 }
0x1445   :  { %v11204_v29 = vadd.f32 %v8586_v59, %v11124_v14  ;;  %v8589_v8 = vadd.f32 %v8588_v61, %v8587_v30  ;;  %v8590_v35 = vpop.f32.mrb[224].mxu0 }
0x1446   :  { %v8591_v24 = vpop.f32.mrb[225].mxu0 }
0x1447   :  { %v11207_v17 = vadd.f32 %v8589_v8, %v11126_v26  ;;  %v8592_v36 = vadd.f32 %v8591_v24, %v8590_v35  ;;  %v8593_v11 = vpop.f32.mrb[226].mxu0 }
0x1448   :  { %v8594_v55 = vpop.f32.mrb[227].mxu0 }
0x1449   :  { %v11210_v15 = vadd.f32 %v8592_v36, %v11132_v58  ;;  %v8595_v32 = vadd.f32 %v8594_v55, %v8593_v11 }
0x144b   :  { %v11213_v20 = vadd.f32 %v8595_v32, %v11134_v5 }
0x144c   :  { %v8612_v1 = vpop.f32.mrb[228].mxu0 }
0x144d   :  { %v8613_v19 = vpop.f32.mrb[229].mxu0 }
0x144e   :  { %v8614_v14 = vadd.f32 %v8613_v19, %v8612_v1  ;;  %v8615_v46 = vpop.f32.mrb[230].mxu0 }
0x144f   :  { %v8616_v42 = vpop.f32.mrb[231].mxu0 }
0x1450   :  { %v8617_v25 = vadd.f32 %v8616_v42, %v8615_v46  ;;  %v11216_v26 = vadd.f32 %v8614_v14, %v11137_v0 }
0x1452   :  { %v11219_v22 = vadd.f32 %v8617_v25, %v11140_v45 }
0x1454   :  { %v8618_v7 = vpop.f32.mrb[232].mxu0 }
0x1455   :  { %v8619_v56 = vpop.f32.mrb[233].mxu0 }
0x1456   :  { %v8620_v58 = vadd.f32 %v8619_v56, %v8618_v7  ;;  %v8621_v16 = vpop.f32.mrb[234].mxu0 }
0x1457   :  { %v8622_v2 = vpop.f32.mrb[235].mxu0 }
0x1458   :  { %v8623_v51 = vadd.f32 %v8622_v2, %v8621_v16  ;;  %v11222_v5 = vadd.f32 %v8620_v58, %v11143_v34 }
0x145a   :  { %v11225_v39 = vadd.f32 %v8623_v51, %v11146_v31 }
0x145c   :  { %v8624_v60 = vpop.f32.mrb[236].mxu0 }
0x145d   :  { %v8625_v37 = vpop.f32.mrb[237].mxu0 }
0x145e   :  { %v8626_v41 = vadd.f32 %v8625_v37, %v8624_v60  ;;  %v8627_v0 = vpop.f32.mrb[238].mxu0 }
0x145f   :  { %v8628_v50 = vpop.f32.mrb[239].mxu0 }
0x1460   :  { %v8629_v3 = vadd.f32 %v8628_v50, %v8627_v0  ;;  %v7522_v45 = vadd.f32 %v8626_v41, %v11180_v43 }
0x1462   :  { %v7525_v57 = vadd.f32 %v8629_v3, %v11183_v54 }
0x1464   :  { %v8630_v47 = vpop.f32.mrb[240].mxu0 }
0x1465   :  { %v8631_v33 = vpop.f32.mrb[241].mxu0 }
0x1466   :  { %v8632_v6 = vadd.f32 %v8631_v33, %v8630_v47  ;;  %v8633_v10 = vpop.f32.mrb[242].mxu0 }
0x1467   :  { %v8634_v28 = vpop.f32.mrb[243].mxu0 }
0x1468   :  { %v8635_v34 = vadd.f32 %v8634_v28, %v8633_v10  ;;  %v7530_v9 = vadd.f32 %v8632_v6, %v11186_v18 }
0x146a   :  { %v7533_v31 = vadd.f32 %v8635_v34, %v11189_v4 }
0x146c   :  { %v8636_v40 = vpop.f32.mrb[244].mxu0 }
0x146d   :  { %v8637_v53 = vpop.f32.mrb[245].mxu0 }
0x146e   :  { %v8638_v44 = vadd.f32 %v8637_v53, %v8636_v40  ;;  %v8639_v49 = vpop.f32.mrb[246].mxu0 }
0x146f   :  { %v8640_v21 = vpop.f32.mrb[247].mxu0 }
0x1470   :  { %v8641_v52 = vadd.f32 %v8640_v21, %v8639_v49  ;;  %v7538_v43 = vadd.f32 %v8638_v44, %v11192_v23 }
0x1472   :  { %v7541_v54 = vadd.f32 %v8641_v52, %v11195_v27 }
0x1474   :  { %v8642_v38 = vpop.f32.mrb[248].mxu0  ;;  %v9030_v12 = vpop.f32.mrb[4].mxu1 }
0x1475   :  { %v7627_v13 = vadd.f32 %v9030_v12, %v7530_v9  ;;  %v8643_v63 = vpop.f32.mrb[249].mxu0  ;;  %v7618_v59 = vpop.f32.mrb[5].mxu1 }
0x1476   :  { %v8644_v30 = vadd.f32 %v8643_v63, %v8642_v38  ;;  %v7619_v61 = vadd.f32 %v7618_v59, %v7522_v45  ;;  %v8645_v18 = vpop.f32.mrb[250].mxu0  ;;  %v9031_v8 = vpop.f32.mrb[6].mxu1 }
0x1477   :  { %9425 = vtanh.f32 %v7627_v13  ;;  %v7630_v4 = vadd.f32 %v9031_v8, %v7533_v31  ;;  %v8646_v35 = vpop.f32.mrb[251].mxu0  ;;  %v7621_v24 = vpop.f32.mrb[7].mxu1 }
0x1478   :  { %9427 = vtanh.f32 %v7619_v61  ;;  %v8647_v36 = vadd.f32 %v8646_v35, %v8645_v18  ;;  %v7622_v11 = vadd.f32 %v7621_v24, %v7525_v57  ;;  %v7546_v23 = vadd.f32 %v8644_v30, %v11198_v48 }
0x1479   :  { %9429 = vtanh.f32 %v7630_v4 }
0x147a   :  { %9431 = vtanh.f32 %v7622_v11  ;;  %v7549_v27 = vadd.f32 %v8647_v36, %v11201_v62 }
0x147c   :  { %v8648_v55 = vpop.f32.mrb[252].mxu0  ;;  %v9034_v32 = vpop.f32.mrb[8].mxu1 }
0x147d   :  { %v7643_v1 = vadd.f32 %v9034_v32, %v7546_v23  ;;  %v8649_v19 = vpop.f32.mrb[253].mxu0  ;;  %v7634_v14 = vpop.f32.mrb[9].mxu1 }
0x147e   :  { %v8650_v46 = vadd.f32 %v8649_v19, %v8648_v55  ;;  %v7635_v42 = vadd.f32 %v7634_v14, %v7538_v43  ;;  %v8651_v25 = vpop.f32.mrb[254].mxu0  ;;  %v9035_v7 = vpop.f32.mrb[10].mxu1 }
0x147f   :  { %9433 = vtanh.f32 %v7643_v1  ;;  %v7646_v56 = vadd.f32 %v9035_v7, %v7549_v27  ;;  %v8652_v58 = vpop.f32.mrb[255].mxu0  ;;  %v7637_v16 = vpop.f32.mrb[11].mxu1 }
0x1480   :  { %9435 = vtanh.f32 %v7635_v42  ;;  %v8653_v2 = vadd.f32 %v8652_v58, %v8651_v25  ;;  %v7638_v48 = vadd.f32 %v7637_v16, %v7541_v54  ;;  %v7554_v51 = vadd.f32 %v8650_v46, %v11204_v29 }
0x1481   :  { %v9426_v60 = vpop.eup %9425  ;;  %9437 = vtanh.f32 %v7646_v56 }
0x1482   :  { %v9428_v62 = vpop.eup %9427  ;;  %7687 = vst [vmem:[%s11343_s16 + $0x30] sm:$0xff] %v9426_v60  ;;  %9439 = vtanh.f32 %v7638_v48  ;;  %v7557_v37 = vadd.f32 %v8653_v2, %v11207_v17 }
0x1483   :  { %v9430_v41 = vpop.eup %9429  ;;  %7685 = vst [vmem:[%s11343_s16 + $0x20] sm:$0xff] %v9428_v62 }
0x1484   :  { %v9432_v0 = vpop.eup %9431  ;;  %7688 = vst [vmem:[%s11343_s16 + $0x38] sm:$0xff] %v9430_v41  ;;  %v8654_v29 = vpop.f32.mrb[0].mxu0 }
0x1485   :  { %v9038_v50 = vpop.f32.mrb[12].mxu1  ;;  %7686 = vst [vmem:[%s11343_s16 + $0x28] sm:$0xff] %v9432_v0  ;;  %v8655_v3 = vpop.f32.mrb[1].mxu0 }
0x1486   :  { %v7650_v45 = vpop.f32.mrb[13].mxu1  ;;  %v8656_v57 = vadd.f32 %v8655_v3, %v8654_v29  ;;  %v8657_v47 = vpop.f32.mrb[2].mxu0 }
0x1487   :  { %v7651_v17 = vadd.f32 %v7650_v45, %v7554_v51  ;;  %v9039_v33 = vpop.f32.mrb[14].mxu1  ;;  %v8658_v6 = vpop.f32.mrb[3].mxu0 }
0x1488   :  { %v7653_v10 = vpop.f32.mrb[15].mxu1  ;;  %v7562_v28 = vadd.f32 %v8656_v57, %v11210_v15  ;;  %v8659_v34 = vadd.f32 %v8658_v6, %v8657_v47 }
0x1489   :  { %9441 = vtanh.f32 %v7651_v17  ;;  %v7654_v9 = vadd.f32 %v7653_v10, %v7557_v37  ;;  %v9434_v31 = vpop.eup %9433 }
0x148a   :  { %v9436_v40 = vpop.eup %9435  ;;  %7691 = vst [vmem:[%s11343_s16 + $0x50] sm:$0xff] %v9434_v31  ;;  %v7659_v53 = vadd.f32 %v9038_v50, %v7562_v28  ;;  %v7565_v44 = vadd.f32 %v8659_v34, %v11213_v20 }
0x148b   :  { %9443 = vtanh.f32 %v7654_v9  ;;  %v9438_v49 = vpop.eup %9437  ;;  %7689 = vst [vmem:[%s11343_s16 + $0x40] sm:$0xff] %v9436_v40 }
0x148c   :  { %v9440_v21 = vpop.eup %9439  ;;  %7692 = vst [vmem:[%s11343_s16 + $0x58] sm:$0xff] %v9438_v49  ;;  %9445 = vtanh.f32 %v7659_v53  ;;  %v7662_v15 = vadd.f32 %v9039_v33, %v7565_v44  ;;  %v9026_v52 = vpop.f32.mrb[4].mxu0 }
0x148d   :  { %7690 = vst [vmem:[%s11343_s16 + $0x48] sm:$0xff] %v9440_v21  ;;  %v7611_v20 = vadd.f32 %v9026_v52, %v11222_v5  ;;  %v7602_v43 = vpop.f32.mrb[5].mxu0 }
0x148e   :  { %9447 = vtanh.f32 %v7662_v15  ;;  %v7603_v54 = vadd.f32 %v7602_v43, %v11216_v26  ;;  %v9027_v38 = vpop.f32.mrb[6].mxu0 }
0x148f   :  { %9449 = vtanh.f32 %v7611_v20  ;;  %v7614_v12 = vadd.f32 %v9027_v38, %v11225_v39  ;;  %v7605_v13 = vpop.f32.mrb[7].mxu0 }
0x1490   :  { %9451 = vtanh.f32 %v7603_v54  ;;  %v7606_v63 = vadd.f32 %v7605_v13, %v11219_v22 }
0x1491   :  { %9453 = vtanh.f32 %v7614_v12 }
0x1492   :  { %9455 = vtanh.f32 %v7606_v63 }
0x1493   :  { %v9442_v59 = vpop.eup %9441 }
0x1494   :  { %7693 = vst [vmem:[%s11343_s16 + $0x60] sm:$0xff] %v9442_v59 }
0x1495   :  { %v9444_v5 = vpop.eup %9443 }
0x1496   :  { %7694 = vst [vmem:[%s11343_s16 + $0x68] sm:$0xff] %v9444_v5  ;;  %v9446_v26 = vpop.eup %9445 }
0x1497   :  { %7695 = vst [vmem:[%s11343_s16 + $0x70] sm:$0xff] %v9446_v26 }
0x1498   :  { %v9448_v39 = vpop.eup %9447 }
0x1499   :  { %v9450_v30 = vpop.eup %9449  ;;  %7696 = vst [vmem:[%s11343_s16 + $0x78] sm:$0xff] %v9448_v39 }
0x149a   :  { %v9452_v22 = vpop.eup %9451  ;;  %7683 = vst [vmem:[%s11343_s16 + $0x10] sm:$0xff] %v9450_v30 }
0x149b   :  { %v9454_v61 = vpop.eup %9453  ;;  %7681 = vst [vmem:[%s11343_s16] sm:$0xff] %v9452_v22 }
0x149c   :  { %v9456_v18 = vpop.eup %9455  ;;  %7684 = vst [vmem:[%s11343_s16 + $0x18] sm:$0xff] %v9454_v61 }
0x149d   :  { %7682 = vst [vmem:[%s11343_s16 + $0x8] sm:$0xff] %v9456_v18 }
0x149e   :  { %9789 = dma.done.wait [#allocation11], 32  }
0x149f   :  { %9790 = vsyncadd [#allocation11], 4294967264 }
0x14a0   :  { %9791 = dma.done.wait [#allocation29], 32  }
0x14a1   :  { %9792 = vsyncadd [#allocation29], 4294967264 }
0x14a2   :  { %7727 = vsyncpa [#allocation10], 1 }
0x14a3   :  { %7728 = vsyncpa [#allocation13], 1 }
0x14a4   :  { %7729 = vsyncpa [#allocation16], 1 }
0x14a5   :  { %7730 = vsyncpa [#allocation19], 1 }
0x14a6   :  { %7731 = vsyncpa [#allocation22], 1 }
0x14a7   :  { %7732 = vsyncpa [#allocation25], 1 }
0x14a8   :  { %7733 = vsyncpa [#allocation11], 1 }
0x14a9   :  { %7734 = vsyncpa [#allocation29], 1 }
0x14aa   :  { %7735 = vsyncmov [#allocation8] }
0x14ad   :  { %s7736_s13 = vpop.sfrf %7735 }
0x14ae   :  { %p7987_p0 = scmp.ne.s32.totalorder %s7736_s13, 0 }
0x14b0   :  { %7740 = shalt.err (%p7987_p0)  }
0x14b1   :  { %7742 = vsyncmov [#allocation8 + $0x1] }
0x14b4   :  { %s7743_s21 = vpop.sfrf %7742 }
0x14b5   :  { %p7988_p1 = scmp.ne.s32.totalorder %s7743_s21, 0 }
0x14b7   :  { %7747 = shalt.err (%p7988_p1)  }
0x14b8   :  { %7749 = vsyncmov [#allocation8 + $0x2] }
0x14bb   :  { %s7750_s16 = vpop.sfrf %7749 }
0x14bc   :  { %p7989_p2 = scmp.ne.s32.totalorder %s7750_s16, 0 }
0x14be   :  { %7754 = shalt.err (%p7989_p2)  }
0x14bf   :  { %7756 = vsyncmov [#allocation8 + $0x3] }
0x14c2   :  { %s7757_s1 = vpop.sfrf %7756 }
0x14c3   :  { %p7990_p3 = scmp.ne.s32.totalorder %s7757_s1, 0 }
0x14c5   :  { %7761 = shalt.err (%p7990_p3)  }
0x14c6   :  { %7763 = vsyncmov [#allocation8 + $0x4] }
0x14c9   :  { %s7764_s9 = vpop.sfrf %7763 }
0x14ca   :  { %p7991_p4 = scmp.ne.s32.totalorder %s7764_s9, 0 }
0x14cc   :  { %7768 = shalt.err (%p7991_p4)  }
0x14cd   :  { %7770 = vsyncmov [#allocation8 + $0x5] }
0x14d0   :  { %s7771_s11 = vpop.sfrf %7770 }
0x14d1   :  { %p7992_p5 = scmp.ne.s32.totalorder %s7771_s11, 0 }
0x14d3   :  { %7775 = shalt.err (%p7992_p5)  }

</bundles_post_ra>
